<compile_context>
chip_gen: v7x
topology: tpu7x:2x2x1
jax: 0.10.0
libtpu: 0.0.40
codegen_flags: <defaults>
</compile_context>

<pallas_src>
import jax
import jax.numpy as jnp
import numpy as np
from jax.experimental import pallas as pl
from jax.experimental.pallas import tpu as pltpu

LN_EPS = 1e-6


def _erf_approx(z):
    # Abramowitz & Stegun 7.1.26, |error| <= 1.5e-7. Uses only exp/mul/add/where.
    a1, a2, a3, a4, a5 = 0.254829592, -0.284496736, 1.421413741, -1.453152027, 1.061405429
    p = 0.3275911
    az = jnp.abs(z)
    t = 1.0 / (1.0 + p * az)
    poly = ((((a5 * t + a4) * t + a3) * t + a2) * t + a1) * t
    y = 1.0 - poly * jnp.exp(-az * az)
    return jnp.where(z >= 0, y, -y)


def _gelu_exact(x):
    return 0.5 * x * (1.0 + _erf_approx(x * 0.7071067811865476))


def _layer_norm(x, gamma, beta):
    mu = jnp.mean(x, axis=-1, keepdims=True)
    var = jnp.mean((x - mu) ** 2, axis=-1, keepdims=True)
    return (x - mu) * jax.lax.rsqrt(var + LN_EPS) * gamma + beta


def _block_kernel(x_ref,
                  g1_ref, be1_ref,            # norm1 gamma/beta           (1, D)  f32
                  wp_ref, bp_ref,             # attention.proj  W^T (D,D) bf16, b (1,D) f32
                  g2_ref, be2_ref,            # norm2 gamma/beta           (1, D)  f32
                  w1_ref, b1_ref,             # mlp.fc1 W^T (D,H) bf16, b (1,H) f32
                  w2_ref, b2_ref,             # mlp.fc2 W^T (H,D) bf16, b (1,D) f32
                  out_ref):
    x = x_ref[...].astype(jnp.float32)                               # (TM, D)

    # ---- x = x + Attention(norm1(x)) ; reference Attention(y) == Dropout(proj(y)) ----
    h1 = _layer_norm(x, g1_ref[...], be1_ref[...])
    attn_out = jnp.dot(h1.astype(jnp.bfloat16), wp_ref[...],
                       preferred_element_type=jnp.float32) + bp_ref[...]
    x1 = x + attn_out

    # ---- x = x + MLP(norm2(x)) ----
    h2 = _layer_norm(x1, g2_ref[...], be2_ref[...])
    h = jnp.dot(h2.astype(jnp.bfloat16), w1_ref[...],
                preferred_element_type=jnp.float32) + b1_ref[...]
    h = _gelu_exact(h)
    m = jnp.dot(h.astype(jnp.bfloat16), w2_ref[...],
                preferred_element_type=jnp.float32) + b2_ref[...]

    out_ref[...] = (x1 + m).astype(out_ref.dtype)


def vit_block_forward(x, params, *, row_tile=256):
    """x: (B, N, D) float32.  params: dict of pre-transposed f32 weights.

    D and the MLP hidden dim should ideally be multiples of 128 (lane-dense stores).
    Rows (B*N) need not be a multiple of row_tile: they are zero-padded.
    """
    B, N, D = x.shape
    H = params["w1"].shape[1]
    rows = B * N
    assert row_tile % 8 == 0

    padded_rows = pl.cdiv(rows, row_tile) * row_tile
    xf = x.reshape(rows, D).astype(jnp.float32)
    if padded_rows != rows:
        xf = jnp.pad(xf, ((0, padded_rows - rows), (0, 0)))

    bf16 = jnp.bfloat16
    # Matmul weights in bf16 (native MXU); biases & LN params stay f32 (post-acc adds).
    weights = [params["g1"], params["be1"],
               params["wp"].astype(bf16), params["bp"],
               params["g2"], params["be2"],
               params["w1"].astype(bf16), params["b1"],
               params["w2"].astype(bf16), params["b2"]]

    flops = 2 * padded_rows * (D * D + 2 * D * H)
    bytes_accessed = int(2 * padded_rows * D * 4
                         + sum(int(w.size) * w.dtype.itemsize for w in weights))
    cost = pl.CostEstimate(flops=flops,
                           transcendentals=padded_rows * H,
                           bytes_accessed=bytes_accessed)

    def build(single_buffer_weights):
        in_specs = [pl.BlockSpec((row_tile, D), lambda i: (i, 0))]
        for w in weights:
            if single_buffer_weights:
                # Grid-invariant operand: no need to double-buffer it.
                in_specs.append(pl.BlockSpec(w.shape, lambda i: (0, 0),
                                             pipeline_mode=pl.Buffered(1)))
            else:
                in_specs.append(pl.BlockSpec(w.shape, lambda i: (0, 0)))
        return pl.pallas_call(
            _block_kernel,
            out_shape=jax.ShapeDtypeStruct((padded_rows, D), x.dtype),
            grid=(padded_rows // row_tile,),
            in_specs=in_specs,
            out_specs=pl.BlockSpec((row_tile, D), lambda i: (i, 0)),
            compiler_params=pltpu.CompilerParams(
                dimension_semantics=("parallel",),
                vmem_limit_bytes=48 * 1024 * 1024),
            cost_estimate=cost,
        )

    try:
        out = build(True)(xf, *weights)
    except Exception:
        # Fallback: default double-buffering if single-buffering is rejected.
        out = build(False)(xf, *weights)

    return out[:rows].reshape(B, N, D)


def init_params(key, dim, n_heads, mlp_ratio=4.0):
    hidden = int(mlp_ratio * dim)
    ks = jax.random.split(key, 6)
    g1 = jnp.ones((1, dim), jnp.float32)
    be1 = jnp.zeros((1, dim), jnp.float32)
    g2 = jnp.ones((1, dim), jnp.float32)
    be2 = jnp.zeros((1, dim), jnp.float32)
    # Linear params (stored pre-transposed so kernel computes x @ W):
    wp = jax.random.normal(ks[0], (dim, dim), jnp.float32) * 0.05
    bp = jax.random.normal(ks[1], (1, dim), jnp.float32) * 0.02
    w1 = jax.random.normal(ks[2], (dim, hidden), jnp.float32) * 0.05
    b1 = jax.random.normal(ks[3], (1, hidden), jnp.float32) * 0.02
    w2 = jax.random.normal(ks[4], (hidden, dim), jnp.float32) * 0.05
    b2 = jax.random.normal(ks[5], (1, dim), jnp.float32) * 0.02
    # NOTE: attention.qkv weights are not created — their output is unused in the
    # reference forward pass (dead code).
    return dict(g1=g1, be1=be1, wp=wp, bp=bp, g2=g2, be2=be2,
                w1=w1, b1=b1, w2=w2, b2=b2)


def _ln_ref(v, g, b):
    mu = v.mean(-1, keepdims=True)
    var = ((v - mu) ** 2).mean(-1, keepdims=True)
    return (v - mu) * jax.lax.rsqrt(var + LN_EPS) * g + b


def reference_forward_f32(x, p):
    """Pure-f32 JAX mirror of the PyTorch Block.forward (eval mode)."""
    h1 = _ln_ref(x, p["g1"], p["be1"])
    x1 = x + (h1 @ p["wp"] + p["bp"])                       # proj applied to attention *input*
    h2 = _ln_ref(x1, p["g2"], p["be2"])
    m = jax.nn.gelu(h2 @ p["w1"] + p["b1"], approximate=False) @ p["w2"] + p["b2"]
    return x1 + m


def reference_forward_mixed(x, p):
    """Mirror of the kernel numerics: bf16 matmul operands, f32 accumulation/elementwise."""
    B, N, D = x.shape
    bf = jnp.bfloat16
    xf = x.reshape(-1, D).astype(jnp.float32)
    h1 = _ln_ref(xf, p["g1"], p["be1"])
    attn = jnp.dot(h1.astype(bf), p["wp"].astype(bf),
                   preferred_element_type=jnp.float32) + p["bp"]
    x1 = xf + attn
    h2 = _ln_ref(x1, p["g2"], p["be2"])
    h = jnp.dot(h2.astype(bf), p["w1"].astype(bf),
                preferred_element_type=jnp.float32) + p["b1"]
    h = jax.nn.gelu(h, approximate=False)
    m = jnp.dot(h.astype(bf), p["w2"].astype(bf),
                preferred_element_type=jnp.float32) + p["b2"]
    return (x1 + m).reshape(B, N, D)


if __name__ == "__main__":
    key = jax.random.PRNGKey(0)
    k_x, k_p = jax.random.split(key)

    # Small but MXU/lane-friendly shapes: D multiple of 128, B*N NOT a multiple of the
    # row tile (exercises the padding path), and a >=2-step grid for megacore sharding.
    B, N, D, n_heads = 2, 100, 128, 4        # (n_samples, n_patches+1, dim)
    x = jax.random.normal(k_x, (B, N, D), jnp.float32)
    params = init_params(k_p, D, n_heads, mlp_ratio=4.0)

    out = vit_block_forward(x, params, row_tile=128)
    out = jax.block_until_ready(out)

    # Tight check against a reference with identical mixed-precision numerics.
    ref_mixed = reference_forward_mixed(x, params)
    np.testing.assert_allclose(np.asarray(out), np.asarray(ref_mixed), rtol=1e-3, atol=1e-3)

    # Looser check against the pure-f32 module semantics (bf16 matmul quantization error).
    ref_f32 = reference_forward_f32(x, params)
    np.testing.assert_allclose(np.asarray(out), np.asarray(ref_f32), rtol=5e-2, atol=5e-2)

    print("KERNEL_OK")
</pallas_src>

<mosaic_0001>
module attributes {stable_mosaic.version = 11 : i64} {
  func.func @_block_kernel(%arg0: i32, %arg1: memref<128x128xf32, #tpu.memory_space<vmem>>, %arg2: memref<1x128xf32, #tpu.memory_space<vmem>>, %arg3: memref<1x128xf32, #tpu.memory_space<vmem>>, %arg4: memref<128x128xbf16, #tpu.memory_space<vmem>>, %arg5: memref<1x128xf32, #tpu.memory_space<vmem>>, %arg6: memref<1x128xf32, #tpu.memory_space<vmem>>, %arg7: memref<1x128xf32, #tpu.memory_space<vmem>>, %arg8: memref<128x512xbf16, #tpu.memory_space<vmem>>, %arg9: memref<1x512xf32, #tpu.memory_space<vmem>>, %arg10: memref<512x128xbf16, #tpu.memory_space<vmem>>, %arg11: memref<1x128xf32, #tpu.memory_space<vmem>>, %arg12: memref<128x128xf32, #tpu.memory_space<vmem>>) attributes {dimension_semantics = [#tpu.dimension_semantics<parallel>], iteration_bounds = array<i64: 2>, scalar_prefetch = 0 : i64, scratch_operands = 0 : i64, tpu.core_type = #tpu.core_type<tc>, window_params = [{transform_indices = @transform_0, window_bounds = array<i64: 128, 128>}, {pipeline_mode = #tpu.pipeline_mode<synchronous>, transform_indices = @transform_1, window_bounds = array<i64: 1, 128>}, {pipeline_mode = #tpu.pipeline_mode<synchronous>, transform_indices = @transform_2, window_bounds = array<i64: 1, 128>}, {pipeline_mode = #tpu.pipeline_mode<synchronous>, transform_indices = @transform_3, window_bounds = array<i64: 128, 128>}, {pipeline_mode = #tpu.pipeline_mode<synchronous>, transform_indices = @transform_4, window_bounds = array<i64: 1, 128>}, {pipeline_mode = #tpu.pipeline_mode<synchronous>, transform_indices = @transform_5, window_bounds = array<i64: 1, 128>}, {pipeline_mode = #tpu.pipeline_mode<synchronous>, transform_indices = @transform_6, window_bounds = array<i64: 1, 128>}, {pipeline_mode = #tpu.pipeline_mode<synchronous>, transform_indices = @transform_7, window_bounds = array<i64: 128, 512>}, {pipeline_mode = #tpu.pipeline_mode<synchronous>, transform_indices = @transform_8, window_bounds = array<i64: 1, 512>}, {pipeline_mode = #tpu.pipeline_mode<synchronous>, transform_indices = @transform_9, window_bounds = array<i64: 512, 128>}, {pipeline_mode = #tpu.pipeline_mode<synchronous>, transform_indices = @transform_10, window_bounds = array<i64: 1, 128>}, {transform_indices = @transform_11, window_bounds = array<i64: 128, 128>}]} {
    %c0 = arith.constant 0 : index
    %c0_0 = arith.constant 0 : index
    %0 = vector.load %arg1[%c0, %c0_0] : memref<128x128xf32, #tpu.memory_space<vmem>>, vector<128x128xf32>
    %c0_1 = arith.constant 0 : index
    %c0_2 = arith.constant 0 : index
    %1 = vector.load %arg2[%c0_1, %c0_2] : memref<1x128xf32, #tpu.memory_space<vmem>>, vector<1x128xf32>
    %c0_3 = arith.constant 0 : index
    %c0_4 = arith.constant 0 : index
    %2 = vector.load %arg3[%c0_3, %c0_4] : memref<1x128xf32, #tpu.memory_space<vmem>>, vector<1x128xf32>
    %cst = arith.constant dense<0.000000e+00> : vector<128xf32>
    %3 = vector.multi_reduction <add>, %0, %cst [1] : vector<128x128xf32> to vector<128xf32>
    %4 = vector.shape_cast %3 : vector<128xf32> to vector<128x1xf32>
    %cst_5 = arith.constant 1.280000e+02 : f32
    %5 = vector.broadcast %cst_5 : f32 to vector<128x1xf32>
    %6 = arith.divf %4, %5 : vector<128x1xf32>
    %7 = vector.broadcast %6 : vector<128x1xf32> to vector<128x128xf32>
    %8 = arith.subf %0, %7 : vector<128x128xf32>
    %9 = arith.mulf %8, %8 : vector<128x128xf32>
    %cst_6 = arith.constant dense<0.000000e+00> : vector<128xf32>
    %10 = vector.multi_reduction <add>, %9, %cst_6 [1] : vector<128x128xf32> to vector<128xf32>
    %11 = vector.shape_cast %10 : vector<128xf32> to vector<128x1xf32>
    %cst_7 = arith.constant 1.280000e+02 : f32
    %12 = vector.broadcast %cst_7 : f32 to vector<128x1xf32>
    %13 = arith.divf %11, %12 : vector<128x1xf32>
    %14 = vector.broadcast %6 : vector<128x1xf32> to vector<128x128xf32>
    %15 = arith.subf %0, %14 : vector<128x128xf32>
    %cst_8 = arith.constant 9.99999997E-7 : f32
    %16 = vector.broadcast %cst_8 : f32 to vector<128x1xf32>
    %17 = arith.addf %13, %16 : vector<128x1xf32>
    %18 = math.rsqrt %17 : vector<128x1xf32>
    %19 = vector.broadcast %18 : vector<128x1xf32> to vector<128x128xf32>
    %20 = arith.mulf %15, %19 : vector<128x128xf32>
    %21 = vector.broadcast %1 : vector<1x128xf32> to vector<128x128xf32>
    %22 = arith.mulf %20, %21 : vector<128x128xf32>
    %23 = vector.broadcast %2 : vector<1x128xf32> to vector<128x128xf32>
    %24 = arith.addf %22, %23 : vector<128x128xf32>
    %25 = arith.truncf %24 : vector<128x128xf32> to vector<128x128xbf16>
    %c0_9 = arith.constant 0 : index
    %c0_10 = arith.constant 0 : index
    %26 = vector.load %arg4[%c0_9, %c0_10] : memref<128x128xbf16, #tpu.memory_space<vmem>>, vector<128x128xbf16>
    %cst_11 = arith.constant dense<0.000000e+00> : vector<128x128xf32>
    %27 = tpu.matmul %25, %26, %cst_11 {dimension_numbers = #tpu.dot_dimension_numbers<[1], [0], [0], [1], [0, 0, 1, 1], [], []>} : vector<128x128xbf16>, vector<128x128xbf16>, vector<128x128xf32> -> vector<128x128xf32>
    %c0_12 = arith.constant 0 : index
    %c0_13 = arith.constant 0 : index
    %28 = vector.load %arg5[%c0_12, %c0_13] : memref<1x128xf32, #tpu.memory_space<vmem>>, vector<1x128xf32>
    %29 = vector.broadcast %28 : vector<1x128xf32> to vector<128x128xf32>
    %30 = arith.addf %27, %29 : vector<128x128xf32>
    %31 = arith.addf %0, %30 : vector<128x128xf32>
    %c0_14 = arith.constant 0 : index
    %c0_15 = arith.constant 0 : index
    %32 = vector.load %arg6[%c0_14, %c0_15] : memref<1x128xf32, #tpu.memory_space<vmem>>, vector<1x128xf32>
    %c0_16 = arith.constant 0 : index
    %c0_17 = arith.constant 0 : index
    %33 = vector.load %arg7[%c0_16, %c0_17] : memref<1x128xf32, #tpu.memory_space<vmem>>, vector<1x128xf32>
    %cst_18 = arith.constant dense<0.000000e+00> : vector<128xf32>
    %34 = vector.multi_reduction <add>, %31, %cst_18 [1] : vector<128x128xf32> to vector<128xf32>
    %35 = vector.shape_cast %34 : vector<128xf32> to vector<128x1xf32>
    %cst_19 = arith.constant 1.280000e+02 : f32
    %36 = vector.broadcast %cst_19 : f32 to vector<128x1xf32>
    %37 = arith.divf %35, %36 : vector<128x1xf32>
    %38 = vector.broadcast %37 : vector<128x1xf32> to vector<128x128xf32>
    %39 = arith.subf %31, %38 : vector<128x128xf32>
    %40 = arith.mulf %39, %39 : vector<128x128xf32>
    %cst_20 = arith.constant dense<0.000000e+00> : vector<128xf32>
    %41 = vector.multi_reduction <add>, %40, %cst_20 [1] : vector<128x128xf32> to vector<128xf32>
    %42 = vector.shape_cast %41 : vector<128xf32> to vector<128x1xf32>
    %cst_21 = arith.constant 1.280000e+02 : f32
    %43 = vector.broadcast %cst_21 : f32 to vector<128x1xf32>
    %44 = arith.divf %42, %43 : vector<128x1xf32>
    %45 = vector.broadcast %37 : vector<128x1xf32> to vector<128x128xf32>
    %46 = arith.subf %31, %45 : vector<128x128xf32>
    %cst_22 = arith.constant 9.99999997E-7 : f32
    %47 = vector.broadcast %cst_22 : f32 to vector<128x1xf32>
    %48 = arith.addf %44, %47 : vector<128x1xf32>
    %49 = math.rsqrt %48 : vector<128x1xf32>
    %50 = vector.broadcast %49 : vector<128x1xf32> to vector<128x128xf32>
    %51 = arith.mulf %46, %50 : vector<128x128xf32>
    %52 = vector.broadcast %32 : vector<1x128xf32> to vector<128x128xf32>
    %53 = arith.mulf %51, %52 : vector<128x128xf32>
    %54 = vector.broadcast %33 : vector<1x128xf32> to vector<128x128xf32>
    %55 = arith.addf %53, %54 : vector<128x128xf32>
    %56 = arith.truncf %55 : vector<128x128xf32> to vector<128x128xbf16>
    %c0_23 = arith.constant 0 : index
    %c0_24 = arith.constant 0 : index
    %57 = vector.load %arg8[%c0_23, %c0_24] : memref<128x512xbf16, #tpu.memory_space<vmem>>, vector<128x512xbf16>
    %cst_25 = arith.constant dense<0.000000e+00> : vector<128x512xf32>
    %58 = tpu.matmul %56, %57, %cst_25 {dimension_numbers = #tpu.dot_dimension_numbers<[1], [0], [0], [1], [0, 0, 1, 1], [], []>} : vector<128x128xbf16>, vector<128x512xbf16>, vector<128x512xf32> -> vector<128x512xf32>
    %c0_26 = arith.constant 0 : index
    %c0_27 = arith.constant 0 : index
    %59 = vector.load %arg9[%c0_26, %c0_27] : memref<1x512xf32, #tpu.memory_space<vmem>>, vector<1x512xf32>
    %60 = vector.broadcast %59 : vector<1x512xf32> to vector<128x512xf32>
    %61 = arith.addf %58, %60 : vector<128x512xf32>
    %cst_28 = arith.constant 5.000000e-01 : f32
    %62 = vector.broadcast %cst_28 : f32 to vector<128x512xf32>
    %63 = arith.mulf %62, %61 : vector<128x512xf32>
    %cst_29 = arith.constant 0.707106769 : f32
    %64 = vector.broadcast %cst_29 : f32 to vector<128x512xf32>
    %65 = arith.mulf %61, %64 : vector<128x512xf32>
    %66 = math.absf %65 : vector<128x512xf32>
    %cst_30 = arith.constant 0.327591091 : f32
    %67 = vector.broadcast %cst_30 : f32 to vector<128x512xf32>
    %68 = arith.mulf %67, %66 : vector<128x512xf32>
    %cst_31 = arith.constant 1.000000e+00 : f32
    %69 = vector.broadcast %cst_31 : f32 to vector<128x512xf32>
    %70 = arith.addf %69, %68 : vector<128x512xf32>
    %cst_32 = arith.constant 1.000000e+00 : f32
    %71 = vector.broadcast %cst_32 : f32 to vector<128x512xf32>
    %72 = arith.divf %71, %70 : vector<128x512xf32>
    %cst_33 = arith.constant 1.06140542 : f32
    %73 = vector.broadcast %cst_33 : f32 to vector<128x512xf32>
    %74 = arith.mulf %73, %72 : vector<128x512xf32>
    %cst_34 = arith.constant -1.45315206 : f32
    %75 = vector.broadcast %cst_34 : f32 to vector<128x512xf32>
    %76 = arith.addf %74, %75 : vector<128x512xf32>
    %77 = arith.mulf %76, %72 : vector<128x512xf32>
    %cst_35 = arith.constant 1.42141378 : f32
    %78 = vector.broadcast %cst_35 : f32 to vector<128x512xf32>
    %79 = arith.addf %77, %78 : vector<128x512xf32>
    %80 = arith.mulf %79, %72 : vector<128x512xf32>
    %cst_36 = arith.constant -0.284496725 : f32
    %81 = vector.broadcast %cst_36 : f32 to vector<128x512xf32>
    %82 = arith.addf %80, %81 : vector<128x512xf32>
    %83 = arith.mulf %82, %72 : vector<128x512xf32>
    %cst_37 = arith.constant 0.254829586 : f32
    %84 = vector.broadcast %cst_37 : f32 to vector<128x512xf32>
    %85 = arith.addf %83, %84 : vector<128x512xf32>
    %86 = arith.mulf %85, %72 : vector<128x512xf32>
    %cst_38 = arith.constant 0.000000e+00 : f32
    %87 = vector.broadcast %cst_38 : f32 to vector<128x512xf32>
    %88 = arith.subf %87, %66 : vector<128x512xf32>
    %89 = arith.mulf %88, %66 : vector<128x512xf32>
    %90 = math.exp %89 : vector<128x512xf32>
    %91 = arith.mulf %86, %90 : vector<128x512xf32>
    %cst_39 = arith.constant 1.000000e+00 : f32
    %92 = vector.broadcast %cst_39 : f32 to vector<128x512xf32>
    %93 = arith.subf %92, %91 : vector<128x512xf32>
    %cst_40 = arith.constant 0.000000e+00 : f32
    %94 = vector.broadcast %cst_40 : f32 to vector<128x512xf32>
    %95 = arith.cmpf oge, %65, %94 : vector<128x512xf32>
    %cst_41 = arith.constant 0.000000e+00 : f32
    %96 = vector.broadcast %cst_41 : f32 to vector<128x512xf32>
    %97 = arith.subf %96, %93 : vector<128x512xf32>
    %98 = arith.select %95, %93, %97 : vector<128x512xi1>, vector<128x512xf32>
    %cst_42 = arith.constant 1.000000e+00 : f32
    %99 = vector.broadcast %cst_42 : f32 to vector<128x512xf32>
    %100 = arith.addf %99, %98 : vector<128x512xf32>
    %101 = arith.mulf %63, %100 : vector<128x512xf32>
    %102 = arith.truncf %101 : vector<128x512xf32> to vector<128x512xbf16>
    %c0_43 = arith.constant 0 : index
    %c0_44 = arith.constant 0 : index
    %103 = vector.load %arg10[%c0_43, %c0_44] : memref<512x128xbf16, #tpu.memory_space<vmem>>, vector<512x128xbf16>
    %cst_45 = arith.constant dense<0.000000e+00> : vector<128x128xf32>
    %104 = tpu.matmul %102, %103, %cst_45 {dimension_numbers = #tpu.dot_dimension_numbers<[1], [0], [0], [1], [0, 0, 1, 1], [], []>} : vector<128x512xbf16>, vector<512x128xbf16>, vector<128x128xf32> -> vector<128x128xf32>
    %c0_46 = arith.constant 0 : index
    %c0_47 = arith.constant 0 : index
    %105 = vector.load %arg11[%c0_46, %c0_47] : memref<1x128xf32, #tpu.memory_space<vmem>>, vector<1x128xf32>
    %106 = vector.broadcast %105 : vector<1x128xf32> to vector<128x128xf32>
    %107 = arith.addf %104, %106 : vector<128x128xf32>
    %108 = arith.addf %31, %107 : vector<128x128xf32>
    %c0_48 = arith.constant 0 : index
    %c0_49 = arith.constant 0 : index
    %109 = vector.load %arg12[%c0_48, %c0_49] : memref<128x128xf32, #tpu.memory_space<vmem>>, vector<128x128xf32>
    tpu.vector_store %arg12[%c0_48, %c0_49], %108 {strides = array<i32>} : memref<128x128xf32, #tpu.memory_space<vmem>>, vector<128x128xf32>,
    return
  }
  func.func @transform_0(%arg0: i32) -> (i32, i32) {
    %c0_i32 = arith.constant 0 : i32
    %c0_i32_0 = arith.constant 0 : i32
    return %arg0, %c0_i32 : i32, i32
  }
  func.func @transform_1(%arg0: i32) -> (i32, i32) {
    %c0_i32 = arith.constant 0 : i32
    %c0_i32_0 = arith.constant 0 : i32
    %c0_i32_1 = arith.constant 0 : i32
    return %c0_i32, %c0_i32_0 : i32, i32
  }
  func.func @transform_2(%arg0: i32) -> (i32, i32) {
    %c0_i32 = arith.constant 0 : i32
    %c0_i32_0 = arith.constant 0 : i32
    %c0_i32_1 = arith.constant 0 : i32
    return %c0_i32, %c0_i32_0 : i32, i32
  }
  func.func @transform_3(%arg0: i32) -> (i32, i32) {
    %c0_i32 = arith.constant 0 : i32
    %c0_i32_0 = arith.constant 0 : i32
    %c0_i32_1 = arith.constant 0 : i32
    return %c0_i32, %c0_i32_0 : i32, i32
  }
  func.func @transform_4(%arg0: i32) -> (i32, i32) {
    %c0_i32 = arith.constant 0 : i32
    %c0_i32_0 = arith.constant 0 : i32
    %c0_i32_1 = arith.constant 0 : i32
    return %c0_i32, %c0_i32_0 : i32, i32
  }
  func.func @transform_5(%arg0: i32) -> (i32, i32) {
    %c0_i32 = arith.constant 0 : i32
    %c0_i32_0 = arith.constant 0 : i32
    %c0_i32_1 = arith.constant 0 : i32
    return %c0_i32, %c0_i32_0 : i32, i32
  }
  func.func @transform_6(%arg0: i32) -> (i32, i32) {
    %c0_i32 = arith.constant 0 : i32
    %c0_i32_0 = arith.constant 0 : i32
    %c0_i32_1 = arith.constant 0 : i32
    return %c0_i32, %c0_i32_0 : i32, i32
  }
  func.func @transform_7(%arg0: i32) -> (i32, i32) {
    %c0_i32 = arith.constant 0 : i32
    %c0_i32_0 = arith.constant 0 : i32
    %c0_i32_1 = arith.constant 0 : i32
    return %c0_i32, %c0_i32_0 : i32, i32
  }
  func.func @transform_8(%arg0: i32) -> (i32, i32) {
    %c0_i32 = arith.constant 0 : i32
    %c0_i32_0 = arith.constant 0 : i32
    %c0_i32_1 = arith.constant 0 : i32
    return %c0_i32, %c0_i32_0 : i32, i32
  }
  func.func @transform_9(%arg0: i32) -> (i32, i32) {
    %c0_i32 = arith.constant 0 : i32
    %c0_i32_0 = arith.constant 0 : i32
    %c0_i32_1 = arith.constant 0 : i32
    return %c0_i32, %c0_i32_0 : i32, i32
  }
  func.func @transform_10(%arg0: i32) -> (i32, i32) {
    %c0_i32 = arith.constant 0 : i32
    %c0_i32_0 = arith.constant 0 : i32
    %c0_i32_1 = arith.constant 0 : i32
    return %c0_i32, %c0_i32_0 : i32, i32
  }
  func.func @transform_11(%arg0: i32) -> (i32, i32) {
    %c0_i32 = arith.constant 0 : i32
    %c0_i32_0 = arith.constant 0 : i32
    return %arg0, %c0_i32 : i32, i32
  }
}

module attributes {stable_mosaic.version = 11 : i64} {
  func.func @_block_kernel(%arg0: i32, %arg1: memref<128x128xf32, #tpu.memory_space<vmem>>, %arg2: memref<1x128xf32, #tpu.memory_space<vmem>>, %arg3: memref<1x128xf32, #tpu.memory_space<vmem>>, %arg4: memref<128x128xbf16, #tpu.memory_space<vmem>>, %arg5: memref<1x128xf32, #tpu.memory_space<vmem>>, %arg6: memref<1x128xf32, #tpu.memory_space<vmem>>, %arg7: memref<1x128xf32, #tpu.memory_space<vmem>>, %arg8: memref<128x512xbf16, #tpu.memory_space<vmem>>, %arg9: memref<1x512xf32, #tpu.memory_space<vmem>>, %arg10: memref<512x128xbf16, #tpu.memory_space<vmem>>, %arg11: memref<1x128xf32, #tpu.memory_space<vmem>>, %arg12: memref<128x128xf32, #tpu.memory_space<vmem>>) attributes {dimension_semantics = [#tpu.dimension_semantics<parallel>], iteration_bounds = array<i64: 2>, scalar_prefetch = 0 : i64, scratch_operands = 0 : i64, tpu.core_type = #tpu.core_type<tc>, window_params = [{transform_indices = @transform_0, window_bounds = array<i64: 128, 128>}, {pipeline_mode = #tpu.pipeline_mode<synchronous>, transform_indices = @transform_1, window_bounds = array<i64: 1, 128>}, {pipeline_mode = #tpu.pipeline_mode<synchronous>, transform_indices = @transform_2, window_bounds = array<i64: 1, 128>}, {pipeline_mode = #tpu.pipeline_mode<synchronous>, transform_indices = @transform_3, window_bounds = array<i64: 128, 128>}, {pipeline_mode = #tpu.pipeline_mode<synchronous>, transform_indices = @transform_4, window_bounds = array<i64: 1, 128>}, {pipeline_mode = #tpu.pipeline_mode<synchronous>, transform_indices = @transform_5, window_bounds = array<i64: 1, 128>}, {pipeline_mode = #tpu.pipeline_mode<synchronous>, transform_indices = @transform_6, window_bounds = array<i64: 1, 128>}, {pipeline_mode = #tpu.pipeline_mode<synchronous>, transform_indices = @transform_7, window_bounds = array<i64: 128, 512>}, {pipeline_mode = #tpu.pipeline_mode<synchronous>, transform_indices = @transform_8, window_bounds = array<i64: 1, 512>}, {pipeline_mode = #tpu.pipeline_mode<synchronous>, transform_indices = @transform_9, window_bounds = array<i64: 512, 128>}, {pipeline_mode = #tpu.pipeline_mode<synchronous>, transform_indices = @transform_10, window_bounds = array<i64: 1, 128>}, {transform_indices = @transform_11, window_bounds = array<i64: 128, 128>}]} {
    %c0 = arith.constant 0 : index
    %c0_0 = arith.constant 0 : index
    %0 = vector.load %arg1[%c0, %c0_0] : memref<128x128xf32, #tpu.memory_space<vmem>>, vector<128x128xf32>
    %c0_1 = arith.constant 0 : index
    %c0_2 = arith.constant 0 : index
    %1 = vector.load %arg2[%c0_1, %c0_2] : memref<1x128xf32, #tpu.memory_space<vmem>>, vector<1x128xf32>
    %c0_3 = arith.constant 0 : index
    %c0_4 = arith.constant 0 : index
    %2 = vector.load %arg3[%c0_3, %c0_4] : memref<1x128xf32, #tpu.memory_space<vmem>>, vector<1x128xf32>
    %cst = arith.constant dense<0.000000e+00> : vector<128xf32>
    %3 = vector.multi_reduction <add>, %0, %cst [1] : vector<128x128xf32> to vector<128xf32>
    %4 = vector.shape_cast %3 : vector<128xf32> to vector<128x1xf32>
    %cst_5 = arith.constant 1.280000e+02 : f32
    %5 = vector.broadcast %cst_5 : f32 to vector<128x1xf32>
    %6 = arith.divf %4, %5 : vector<128x1xf32>
    %7 = vector.broadcast %6 : vector<128x1xf32> to vector<128x128xf32>
    %8 = arith.subf %0, %7 : vector<128x128xf32>
    %9 = arith.mulf %8, %8 : vector<128x128xf32>
    %cst_6 = arith.constant dense<0.000000e+00> : vector<128xf32>
    %10 = vector.multi_reduction <add>, %9, %cst_6 [1] : vector<128x128xf32> to vector<128xf32>
    %11 = vector.shape_cast %10 : vector<128xf32> to vector<128x1xf32>
    %cst_7 = arith.constant 1.280000e+02 : f32
    %12 = vector.broadcast %cst_7 : f32 to vector<128x1xf32>
    %13 = arith.divf %11, %12 : vector<128x1xf32>
    %14 = vector.broadcast %6 : vector<128x1xf32> to vector<128x128xf32>
    %15 = arith.subf %0, %14 : vector<128x128xf32>
    %cst_8 = arith.constant 9.99999997E-7 : f32
    %16 = vector.broadcast %cst_8 : f32 to vector<128x1xf32>
    %17 = arith.addf %13, %16 : vector<128x1xf32>
    %18 = math.rsqrt %17 : vector<128x1xf32>
    %19 = vector.broadcast %18 : vector<128x1xf32> to vector<128x128xf32>
    %20 = arith.mulf %15, %19 : vector<128x128xf32>
    %21 = vector.broadcast %1 : vector<1x128xf32> to vector<128x128xf32>
    %22 = arith.mulf %20, %21 : vector<128x128xf32>
    %23 = vector.broadcast %2 : vector<1x128xf32> to vector<128x128xf32>
    %24 = arith.addf %22, %23 : vector<128x128xf32>
    %25 = arith.truncf %24 : vector<128x128xf32> to vector<128x128xbf16>
    %c0_9 = arith.constant 0 : index
    %c0_10 = arith.constant 0 : index
    %26 = vector.load %arg4[%c0_9, %c0_10] : memref<128x128xbf16, #tpu.memory_space<vmem>>, vector<128x128xbf16>
    %cst_11 = arith.constant dense<0.000000e+00> : vector<128x128xf32>
    %27 = tpu.matmul %25, %26, %cst_11 {dimension_numbers = #tpu.dot_dimension_numbers<[1], [0], [0], [1], [0, 0, 1, 1], [], []>} : vector<128x128xbf16>, vector<128x128xbf16>, vector<128x128xf32> -> vector<128x128xf32>
    %c0_12 = arith.constant 0 : index
    %c0_13 = arith.constant 0 : index
    %28 = vector.load %arg5[%c0_12, %c0_13] : memref<1x128xf32, #tpu.memory_space<vmem>>, vector<1x128xf32>
    %29 = vector.broadcast %28 : vector<1x128xf32> to vector<128x128xf32>
    %30 = arith.addf %27, %29 : vector<128x128xf32>
    %31 = arith.addf %0, %30 : vector<128x128xf32>
    %c0_14 = arith.constant 0 : index
    %c0_15 = arith.constant 0 : index
    %32 = vector.load %arg6[%c0_14, %c0_15] : memref<1x128xf32, #tpu.memory_space<vmem>>, vector<1x128xf32>
    %c0_16 = arith.constant 0 : index
    %c0_17 = arith.constant 0 : index
    %33 = vector.load %arg7[%c0_16, %c0_17] : memref<1x128xf32, #tpu.memory_space<vmem>>, vector<1x128xf32>
    %cst_18 = arith.constant dense<0.000000e+00> : vector<128xf32>
    %34 = vector.multi_reduction <add>, %31, %cst_18 [1] : vector<128x128xf32> to vector<128xf32>
    %35 = vector.shape_cast %34 : vector<128xf32> to vector<128x1xf32>
    %cst_19 = arith.constant 1.280000e+02 : f32
    %36 = vector.broadcast %cst_19 : f32 to vector<128x1xf32>
    %37 = arith.divf %35, %36 : vector<128x1xf32>
    %38 = vector.broadcast %37 : vector<128x1xf32> to vector<128x128xf32>
    %39 = arith.subf %31, %38 : vector<128x128xf32>
    %40 = arith.mulf %39, %39 : vector<128x128xf32>
    %cst_20 = arith.constant dense<0.000000e+00> : vector<128xf32>
    %41 = vector.multi_reduction <add>, %40, %cst_20 [1] : vector<128x128xf32> to vector<128xf32>
    %42 = vector.shape_cast %41 : vector<128xf32> to vector<128x1xf32>
    %cst_21 = arith.constant 1.280000e+02 : f32
    %43 = vector.broadcast %cst_21 : f32 to vector<128x1xf32>
    %44 = arith.divf %42, %43 : vector<128x1xf32>
    %45 = vector.broadcast %37 : vector<128x1xf32> to vector<128x128xf32>
    %46 = arith.subf %31, %45 : vector<128x128xf32>
    %cst_22 = arith.constant 9.99999997E-7 : f32
    %47 = vector.broadcast %cst_22 : f32 to vector<128x1xf32>
    %48 = arith.addf %44, %47 : vector<128x1xf32>
    %49 = math.rsqrt %48 : vector<128x1xf32>
    %50 = vector.broadcast %49 : vector<128x1xf32> to vector<128x128xf32>
    %51 = arith.mulf %46, %50 : vector<128x128xf32>
    %52 = vector.broadcast %32 : vector<1x128xf32> to vector<128x128xf32>
    %53 = arith.mulf %51, %52 : vector<128x128xf32>
    %54 = vector.broadcast %33 : vector<1x128xf32> to vector<128x128xf32>
    %55 = arith.addf %53, %54 : vector<128x128xf32>
    %56 = arith.truncf %55 : vector<128x128xf32> to vector<128x128xbf16>
    %c0_23 = arith.constant 0 : index
    %c0_24 = arith.constant 0 : index
    %57 = vector.load %arg8[%c0_23, %c0_24] : memref<128x512xbf16, #tpu.memory_space<vmem>>, vector<128x512xbf16>
    %cst_25 = arith.constant dense<0.000000e+00> : vector<128x512xf32>
    %58 = tpu.matmul %56, %57, %cst_25 {dimension_numbers = #tpu.dot_dimension_numbers<[1], [0], [0], [1], [0, 0, 1, 1], [], []>} : vector<128x128xbf16>, vector<128x512xbf16>, vector<128x512xf32> -> vector<128x512xf32>
    %c0_26 = arith.constant 0 : index
    %c0_27 = arith.constant 0 : index
    %59 = vector.load %arg9[%c0_26, %c0_27] : memref<1x512xf32, #tpu.memory_space<vmem>>, vector<1x512xf32>
    %60 = vector.broadcast %59 : vector<1x512xf32> to vector<128x512xf32>
    %61 = arith.addf %58, %60 : vector<128x512xf32>
    %cst_28 = arith.constant 5.000000e-01 : f32
    %62 = vector.broadcast %cst_28 : f32 to vector<128x512xf32>
    %63 = arith.mulf %62, %61 : vector<128x512xf32>
    %cst_29 = arith.constant 0.707106769 : f32
    %64 = vector.broadcast %cst_29 : f32 to vector<128x512xf32>
    %65 = arith.mulf %61, %64 : vector<128x512xf32>
    %66 = math.absf %65 : vector<128x512xf32>
    %cst_30 = arith.constant 0.327591091 : f32
    %67 = vector.broadcast %cst_30 : f32 to vector<128x512xf32>
    %68 = arith.mulf %67, %66 : vector<128x512xf32>
    %cst_31 = arith.constant 1.000000e+00 : f32
    %69 = vector.broadcast %cst_31 : f32 to vector<128x512xf32>
    %70 = arith.addf %69, %68 : vector<128x512xf32>
    %cst_32 = arith.constant 1.000000e+00 : f32
    %71 = vector.broadcast %cst_32 : f32 to vector<128x512xf32>
    %72 = arith.divf %71, %70 : vector<128x512xf32>
    %cst_33 = arith.constant 1.06140542 : f32
    %73 = vector.broadcast %cst_33 : f32 to vector<128x512xf32>
    %74 = arith.mulf %73, %72 : vector<128x512xf32>
    %cst_34 = arith.constant -1.45315206 : f32
    %75 = vector.broadcast %cst_34 : f32 to vector<128x512xf32>
    %76 = arith.addf %74, %75 : vector<128x512xf32>
    %77 = arith.mulf %76, %72 : vector<128x512xf32>
    %cst_35 = arith.constant 1.42141378 : f32
    %78 = vector.broadcast %cst_35 : f32 to vector<128x512xf32>
    %79 = arith.addf %77, %78 : vector<128x512xf32>
    %80 = arith.mulf %79, %72 : vector<128x512xf32>
    %cst_36 = arith.constant -0.284496725 : f32
    %81 = vector.broadcast %cst_36 : f32 to vector<128x512xf32>
    %82 = arith.addf %80, %81 : vector<128x512xf32>
    %83 = arith.mulf %82, %72 : vector<128x512xf32>
    %cst_37 = arith.constant 0.254829586 : f32
    %84 = vector.broadcast %cst_37 : f32 to vector<128x512xf32>
    %85 = arith.addf %83, %84 : vector<128x512xf32>
    %86 = arith.mulf %85, %72 : vector<128x512xf32>
    %cst_38 = arith.constant 0.000000e+00 : f32
    %87 = vector.broadcast %cst_38 : f32 to vector<128x512xf32>
    %88 = arith.subf %87, %66 : vector<128x512xf32>
    %89 = arith.mulf %88, %66 : vector<128x512xf32>
    %90 = math.exp %89 : vector<128x512xf32>
    %91 = arith.mulf %86, %90 : vector<128x512xf32>
    %cst_39 = arith.constant 1.000000e+00 : f32
    %92 = vector.broadcast %cst_39 : f32 to vector<128x512xf32>
    %93 = arith.subf %92, %91 : vector<128x512xf32>
    %cst_40 = arith.constant 0.000000e+00 : f32
    %94 = vector.broadcast %cst_40 : f32 to vector<128x512xf32>
    %95 = arith.cmpf oge, %65, %94 : vector<128x512xf32>
    %cst_41 = arith.constant 0.000000e+00 : f32
    %96 = vector.broadcast %cst_41 : f32 to vector<128x512xf32>
    %97 = arith.subf %96, %93 : vector<128x512xf32>
    %98 = arith.select %95, %93, %97 : vector<128x512xi1>, vector<128x512xf32>
    %cst_42 = arith.constant 1.000000e+00 : f32
    %99 = vector.broadcast %cst_42 : f32 to vector<128x512xf32>
    %100 = arith.addf %99, %98 : vector<128x512xf32>
    %101 = arith.mulf %63, %100 : vector<128x512xf32>
    %102 = arith.truncf %101 : vector<128x512xf32> to vector<128x512xbf16>
    %c0_43 = arith.constant 0 : index
    %c0_44 = arith.constant 0 : index
    %103 = vector.load %arg10[%c0_43, %c0_44] : memref<512x128xbf16, #tpu.memory_space<vmem>>, vector<512x128xbf16>
    %cst_45 = arith.constant dense<0.000000e+00> : vector<128x128xf32>
    %104 = tpu.matmul %102, %103, %cst_45 {dimension_numbers = #tpu.dot_dimension_numbers<[1], [0], [0], [1], [0, 0, 1, 1], [], []>} : vector<128x512xbf16>, vector<512x128xbf16>, vector<128x128xf32> -> vector<128x128xf32>
    %c0_46 = arith.constant 0 : index
    %c0_47 = arith.constant 0 : index
    %105 = vector.load %arg11[%c0_46, %c0_47] : memref<1x128xf32, #tpu.memory_space<vmem>>, vector<1x128xf32>
    %106 = vector.broadcast %105 : vector<1x128xf32> to vector<128x128xf32>
    %107 = arith.addf %104, %106 : vector<128x128xf32>
    %108 = arith.addf %31, %107 : vector<128x128xf32>
    %c0_48 = arith.constant 0 : index
    %c0_49 = arith.constant 0 : index
    %109 = vector.load %arg12[%c0_48, %c0_49] : memref<128x128xf32, #tpu.memory_space<vmem>>, vector<128x128xf32>
    tpu.vector_store %arg12[%c0_48, %c0_49], %108 {strides = array<i32>} : memref<128x128xf32, #tpu.memory_space<vmem>>, vector<128x128xf32>,
    return
  }
  func.func @transform_0(%arg0: i32) -> (i32, i32) {
    %c0_i32 = arith.constant 0 : i32
    %c0_i32_0 = arith.constant 0 : i32
    return %arg0, %c0_i32 : i32, i32
  }
  func.func @transform_1(%arg0: i32) -> (i32, i32) {
    %c0_i32 = arith.constant 0 : i32
    %c0_i32_0 = arith.constant 0 : i32
    %c0_i32_1 = arith.constant 0 : i32
    return %c0_i32, %c0_i32_0 : i32, i32
  }
  func.func @transform_2(%arg0: i32) -> (i32, i32) {
    %c0_i32 = arith.constant 0 : i32
    %c0_i32_0 = arith.constant 0 : i32
    %c0_i32_1 = arith.constant 0 : i32
    return %c0_i32, %c0_i32_0 : i32, i32
  }
  func.func @transform_3(%arg0: i32) -> (i32, i32) {
    %c0_i32 = arith.constant 0 : i32
    %c0_i32_0 = arith.constant 0 : i32
    %c0_i32_1 = arith.constant 0 : i32
    return %c0_i32, %c0_i32_0 : i32, i32
  }
  func.func @transform_4(%arg0: i32) -> (i32, i32) {
    %c0_i32 = arith.constant 0 : i32
    %c0_i32_0 = arith.constant 0 : i32
    %c0_i32_1 = arith.constant 0 : i32
    return %c0_i32, %c0_i32_0 : i32, i32
  }
  func.func @transform_5(%arg0: i32) -> (i32, i32) {
    %c0_i32 = arith.constant 0 : i32
    %c0_i32_0 = arith.constant 0 : i32
    %c0_i32_1 = arith.constant 0 : i32
    return %c0_i32, %c0_i32_0 : i32, i32
  }
  func.func @transform_6(%arg0: i32) -> (i32, i32) {
    %c0_i32 = arith.constant 0 : i32
    %c0_i32_0 = arith.constant 0 : i32
    %c0_i32_1 = arith.constant 0 : i32
    return %c0_i32, %c0_i32_0 : i32, i32
  }
  func.func @transform_7(%arg0: i32) -> (i32, i32) {
    %c0_i32 = arith.constant 0 : i32
    %c0_i32_0 = arith.constant 0 : i32
    %c0_i32_1 = arith.constant 0 : i32
    return %c0_i32, %c0_i32_0 : i32, i32
  }
  func.func @transform_8(%arg0: i32) -> (i32, i32) {
    %c0_i32 = arith.constant 0 : i32
    %c0_i32_0 = arith.constant 0 : i32
    %c0_i32_1 = arith.constant 0 : i32
    return %c0_i32, %c0_i32_0 : i32, i32
  }
  func.func @transform_9(%arg0: i32) -> (i32, i32) {
    %c0_i32 = arith.constant 0 : i32
    %c0_i32_0 = arith.constant 0 : i32
    %c0_i32_1 = arith.constant 0 : i32
    return %c0_i32, %c0_i32_0 : i32, i32
  }
  func.func @transform_10(%arg0: i32) -> (i32, i32) {
    %c0_i32 = arith.constant 0 : i32
    %c0_i32_0 = arith.constant 0 : i32
    %c0_i32_1 = arith.constant 0 : i32
    return %c0_i32, %c0_i32_0 : i32, i32
  }
  func.func @transform_11(%arg0: i32) -> (i32, i32) {
    %c0_i32 = arith.constant 0 : i32
    %c0_i32_0 = arith.constant 0 : i32
    return %arg0, %c0_i32 : i32, i32
  }
}

</mosaic_0001>

<bundles_post_ra>
// kernel: tpu_custom_call.1
= control target key start
LH: loop header
LB: loop body
LE: loop exit
PB: predicated region body
PF: predicated region fallthrough
CT: control target
= control target key end

     0   :  { %s7775_s0 = inlined_call_operand.hbm [shape: f32[256,128], index: 0, kind: input, shape index: {}]   ;;  %s7776_s1 = inlined_call_operand.vmem [shape: f32[1,128], index: 1, kind: input, shape index: {}]   ;;  %s7777_s2 = inlined_call_operand.vmem [shape: f32[1,128], index: 2, kind: input, shape index: {}]   ;;  %s7778_s3 = inlined_call_operand.hbm [shape: bf16[128,128], index: 3, kind: input, shape index: {}]   ;;  %s7779_s4 = inlined_call_operand.vmem [shape: f32[1,128], index: 4, kind: input, shape index: {}]   ;;  %s7780_s5 = inlined_call_operand.vmem [shape: f32[1,128], index: 5, kind: input, shape index: {}]   ;;  %s7781_s6 = inlined_call_operand.vmem [shape: f32[1,128], index: 6, kind: input, shape index: {}]   ;;  %s7782_s7 = inlined_call_operand.hbm [shape: bf16[128,512], index: 7, kind: input, shape index: {}]   ;;  %s7783_s8 = inlined_call_operand.vmem [shape: f32[1,512], index: 8, kind: input, shape index: {}]   ;;  %s7784_s9 = inlined_call_operand.hbm [shape: bf16[512,128], index: 9, kind: input, shape index: {}]   ;;  %s7785_s10 = inlined_call_operand.vmem [shape: f32[1,128], index: 10, kind: input, shape index: {}]   ;;  %s7786_s11 = inlined_call_operand.hbm [shape: f32[256,128], index: 11, kind: output, shape index: {}]  }
   0x1   :  { %7848 = sst [smem:[#allocation85_spill]] %s7778_s3 }
   0x2   :  { %7849 = sst [smem:[#allocation86_spill]] %s7783_s8 }
   0x3   :  { %7850 = sst [smem:[#allocation87_spill]] %s7785_s10 }
   0x4   :  { %7851 = sst [smem:[#allocation88_spill]] %s7786_s11 }
   0x5   :  { %16 = vsyncpa [#allocation3], 0 }
   0x6   :  { %18 = vsyncpa [#allocation3 + $0x1], 0 }
   0x7   :  { %19 = vsyncpa [#allocation6], 0 }
   0x8   :  { %20 = vsyncpa [#allocation9], 0 }
   0x9   :  { %21 = vsyncpa [#allocation4], 0 }
   0xa   :  { %23 = vsyncpa [#allocation4 + $0x1], 0  ;;  %s4984_s17 = smov 0   ;;  %s4986_s18 = smov 0  }
   0xb   :  { %s4988_s19 = smov 0   ;;  %s4990_s20 = smov 0  }
   0xc LB: > { %7852 = sst [smem:[#allocation15_spill]] %s4896_s17  ;;  %s5005_s21 = sadd.s32 4294967295, %s4908_s20   ;;  %s4908_s20 = sphi %s4990_s20, %s8127_s20   ;;  %s4904_s19 = sphi %s4988_s19, %s8126_s19   ;;  %s4900_s18 = sphi %s4986_s18, %s8125_s18   ;;  %s4896_s17 = sphi %s4984_s17, %s8124_s17  }
   0xd   : > { %s3918_s22 = sadd.s32 4294967294, %s4908_s20   ;;  %p49_p0 = scmp.ne.s32.totalorder %s4900_s18, %s4896_s17 }
   0xe   : > { %p7787_p1 = scmp.eq.s32.totalorder %s5005_s21, 0  ;;  %p289_p3 = scmp.eq.s32.totalorder %s3918_s22, 1 }
   0xf   : > { %p3919_p5 = scmp.ge.s32.totalorder %s4908_s20, 1  ;;  %p296_p7 = scmp.lt.s32.totalorder %s4908_s20, 3 }
  0x10   : > { %p5014_p4 = por %p7787_p1, %p49_p0  ;;  %p5019_p6 = por %p289_p3, %p49_p0 }
  0x11   : > { %p5024_p8 = pnand %p3919_p5, %p296_p7  ;;  %s4910_s26 = smov [#allocation5]  }
  0x12   : > { %s7853_s23 = scalar_select %p5014_p4, 1, 0 }
  0x13   : > { %s7854_s24 = scalar_select %p5019_p6, 1, 0 }
  0x14   : > { %s7856_s25 = scalar_select %p5024_p8, 1, 0 }
  0x15   : > { %7855 = sst [smem:[#allocation16_spill]] %s7854_s24  ;;  %s314_s27 = sshll.u32 %s4910_s26, 4  ;;  %s5028_s27 = int_to_ptr.vmem [resolvable:$true] %s314_s27 }
  0x16   : > { %p4226_p9 = pneg %p5024_p8  ;;  %s4911_s29 = smov [#allocation7]  }
  0x17   : > { %s336_s30 = sshll.u32 %s4911_s29, 4  ;;  %s7858_s3 = sld [smem:[#allocation85_spill]]  ;;  %s5039_s30 = int_to_ptr.vmem [resolvable:$true] %s336_s30 }
  0x18   : > { %p5035_p11 = pnand %p4226_p9, %p7787_p1 }
  0x1a   : > { %p5049_p13 = pneg %p5035_p11 }
  0x1d   : > { %s4720_s14 = scalar_lea.hbm %s7858_s3, 1024 }
  0x1e   : > { %p4721_p12 = scmp.ne.s32.totalorder %s7858_s3, %s4720_s14  ;;  %p4727_p5 = scmp.lt.u32.totalorder %s4720_s14, %s7858_s3 }
  0x20   : > { %p4723_p0 = pnand %p5049_p13, %p4721_p12 }
  0x22   : > { %p4724_p3 = pneg %p4723_p0 }
  0x24   : > { %p4729_p7 = pnand %p4727_p5, %p4724_p3 }
  0x26   : > { %4732 = shalt.err (!%p4729_p7)
}
  0x27   : > { %s4733_s12 = scalar_lea.vmem %s5028_s27, 1024  ;;  %p4741_p2 = scmp.lt.s32.totalorder %s5028_s27, %s5028_s27 }
  0x28   : > { %p4734_p9 = scmp.ne.s32.totalorder %s5028_s27, %s4733_s12  ;;  %p4742_p6 = scmp.lt.s32.totalorder %s4733_s12, %s4733_s12 }
  0x2a   : > { %p4736_p10 = pnand %p4734_p9, %p5049_p13  ;;  %p4743_p12 = por %p4742_p6, %p4741_p2 }
  0x2c   : > { %p4737_p1 = pneg %p4736_p10 }
  0x2e   : > { %p4744_p0 = pnand %p4743_p12, %p4737_p1 }
  0x30   : > { %4747 = shalt.err (!%p4744_p0)
}
  0x31   : > { %s7791_s13 = smov 64   ;;  %s7792_s14 = smov 4  }
  0x32   : > { %4229 = dma.hbm_to_vmem [thread:$0]  (!%p5035_p11), %s7858_s3, 1024, %s5028_s27, [#allocation6], %s7791_s13, %s7791_s13, %s7792_s14  }
  0x33   : > { %s4748_s12 = scalar_lea.hbm %s7782_s7, 4096 }
  0x34   : > { %p4749_p1 = scmp.ne.s32.totalorder %s7782_s7, %s4748_s12  ;;  %p4755_p10 = scmp.lt.u32.totalorder %s4748_s12, %s7782_s7 }
  0x36   : > { %p4751_p2 = pnand %p4749_p1, %p5049_p13 }
  0x38   : > { %p4752_p6 = pneg %p4751_p2 }
  0x3a   : > { %p4757_p3 = pnand %p4755_p10, %p4752_p6 }
  0x3c   : > { %4760 = shalt.err (!%p4757_p3)
}
  0x3d   : > { %s4761_s27 = scalar_lea.vmem %s5039_s30, 4096  ;;  %p4769_p12 = scmp.lt.s32.totalorder %s5039_s30, %s5039_s30 }
  0x3e   : > { %p4762_p5 = scmp.ne.s32.totalorder %s5039_s30, %s4761_s27  ;;  %p4770_p0 = scmp.lt.s32.totalorder %s4761_s27, %s4761_s27 }
  0x40   : > { %p4764_p7 = pnand %p4762_p5, %p5049_p13  ;;  %p4771_p1 = por %p4770_p0, %p4769_p12 }
  0x42   : > { %p4765_p9 = pneg %p4764_p7 }
  0x44   : > { %p4772_p2 = pnand %p4771_p1, %p4765_p9 }
  0x46   : > { %4775 = shalt.err (!%p4772_p2)
}
  0x47   : > { %s4914_s17 = smov 256   ;;  %s4915_s10 = smov 16  }
  0x48   : > { %4232 = dma.hbm_to_vmem [thread:$0]  (!%p5035_p11), %s7782_s7, 4096, %s5039_s30, [#allocation6], %s4914_s17, %s4914_s17, %s4915_s10  }
  0x49   : > { %s4916_s15 = smov [#allocation8]   ;;  %s5097_s26 = sadd.s32 1, %s4908_s20  }
  0x4a   : > { %s352_s16 = sshll.u32 %s4916_s15, 4  ;;  %s4776_s27 = scalar_lea.hbm %s7784_s9, 4096  ;;  %s353_s16 = int_to_ptr.vmem [resolvable:$true] %s352_s16 }
  0x4b   : > { %p4777_p6 = scmp.ne.s32.totalorder %s7784_s9, %s4776_s27  ;;  %p4783_p5 = scmp.lt.u32.totalorder %s4776_s27, %s7784_s9 }
  0x4d   : > { %p4779_p10 = pnand %p4777_p6, %p5049_p13 }
  0x4f   : > { %p4780_p3 = pneg %p4779_p10 }
  0x51   : > { %p4785_p7 = pnand %p4783_p5, %p4780_p3 }
  0x53   : > { %4788 = shalt.err (!%p4785_p7)
}
  0x54   : > { %s4789_s30 = scalar_lea.vmem %s353_s16, 4096  ;;  %p4797_p1 = scmp.lt.s32.totalorder %s353_s16, %s353_s16 }
  0x55   : > { %p4790_p9 = scmp.ne.s32.totalorder %s353_s16, %s4789_s30  ;;  %p4798_p2 = scmp.lt.s32.totalorder %s4789_s30, %s4789_s30 }
  0x57   : > { %p4792_p12 = pnand %p4790_p9, %p5049_p13  ;;  %p4799_p4 = por %p4798_p2, %p4797_p1 }
  0x59   : > { %p4793_p0 = pneg %p4792_p12 }
  0x5b   : > { %p4800_p8 = pnand %p4799_p4, %p4793_p0 }
  0x5d   : > { %4803 = shalt.err (!%p4800_p8)
}
  0x5e   : > { %s7860_s13 = smov 4   ;;  %s7861_s14 = smov 64  }
  0x5f   : > { %4235 = dma.hbm_to_vmem [thread:$0]  (!%p5035_p11), %s7784_s9, 4096, %s353_s16, [#allocation9], %s7861_s14, %s7861_s14, %s7860_s13  }
  0x60   : > { %s33_s22 = ssub.s32 %s4908_s20, %s5097_s26  ;;  %s36_s28 = sadd.s32 1, %s4904_s19 }
  0x61   : > { %p34_p4 = scmp.eq.s32.totalorder %s33_s22, 0  ;;  %p43_p8 = scmp.ne.s32.totalorder %s4904_s19, %s4900_s18 }
  0x62   : > { %p44_p13 = scmp.eq.s32.totalorder %s4908_s20, 0  ;;  %p4247_p6 = scmp.lt.s32.totalorder %s4908_s20, 2 }
  0x63   : > { %s5128_s17 = scalar_select %p34_p4, %s4904_s19, %s36_s28  }
  0x64   : > { %p45_p10 = por %p44_p13, %p43_p8  ;;  %p7862_p3 = scmp.eq.s32.totalorder %s5005_s21, 1 }
  0x65   : > { %s369_s11 = sand.u32 1, %s4904_s19   ;;  %s4016_s24 = sshll.u32 %s4908_s20, 11 }
  0x66   : > { %p5132_p5 = por %p7862_p3, %p43_p8  ;;  %s3924_s15 = sshll.u32 %s369_s11, 7 }
  0x67   : > { %s5141_s16 = scalar_lea.hbm %s7775_s0, %s4016_s24  ;;  %s373_s27 = scalar_lea.vmem [#allocation2], %s3924_s15 }
  0x68   : > { %s380_s30 = sshll.u32 %s373_s27, 4  ;;  %p5143_p11 = pnand %p4247_p6, %p45_p10  ;;  %s5147_s30 = int_to_ptr.vmem [resolvable:$true] %s380_s30 }
  0x69   : > { %s5149_s14 = scalar_lea.sflag [#allocation3], %s369_s11  ;;  %s4804_s3 = scalar_lea.hbm %s5141_s16, 2048 }
  0x6a   : > { %p4805_p7 = scmp.ne.s32.totalorder %s5141_s16, %s4804_s3  ;;  %p4806_p9 = pneg %p5143_p11 }
  0x6b   : > { %s4809_s28 = scalar_lea.hbm %s7775_s0, 4096  ;;  %p4810_p1 = scmp.lt.u32.totalorder %s5141_s16, %s7775_s0 }
  0x6c   : > { %p4807_p12 = pnand %p4806_p9, %p4805_p7  ;;  %p4811_p2 = scmp.lt.u32.totalorder %s4809_s28, %s4804_s3 }
  0x6d   : > { %p4813_p8 = scmp.lt.u32.totalorder %s4804_s3, %s5141_s16 }
  0x6e   : > { %p4808_p0 = pneg %p4807_p12  ;;  %p4812_p4 = por %p4811_p2, %p4810_p1 }
  0x70   : > { %p4814_p13 = por %p4813_p8, %p4812_p4 }
  0x72   : > { %p4815_p6 = pnand %p4814_p13, %p4808_p0 }
  0x74   : > { %4818 = shalt.err (!%p4815_p6)
}
  0x75   : > { %s4819_s11 = scalar_lea.vmem %s5147_s30, 2048  ;;  %s4917_s29 = smov [#allocation2]  }
  0x76   : > { %p4820_p10 = scmp.ne.s32.totalorder %s5147_s30, %s4819_s11  ;;  %s4824_s12 = sshll.u32 %s4917_s29, 4  ;;  %s4825_s12 = int_to_ptr.vmem [resolvable:$false] %s4824_s12 }
  0x77   : > { %s4826_s27 = scalar_lea.vmem %s4825_s12, 4096  ;;  %p4827_p12 = scmp.lt.s32.totalorder %s5147_s30, %s4825_s12 }
  0x78   : > { %p4822_p3 = pnand %p4820_p10, %p4806_p9  ;;  %p4828_p1 = scmp.lt.s32.totalorder %s4826_s27, %s4819_s11 }
  0x7a   : > { %p4823_p7 = pneg %p4822_p3  ;;  %p4829_p2 = por %p4828_p1, %p4827_p12 }
  0x7c   : > { %p4830_p4 = pnand %p4829_p2, %p4823_p7 }
  0x7e   : > { %4833 = shalt.err (!%p4830_p4)
}
  0x7f   : > { %s4918_s3 = smov 128   ;;  %s4919_s8 = smov 8  }
  0x80   : > { %4239 = dma.hbm_to_vmem [thread:$0]  (!%p5143_p11), %s5141_s16, 2048, %s5147_s30, %s5149_s14, %s4918_s3, %s4918_s3, %s4919_s8  }
  0x81   : > { %p7865_p9 = scmp.ne.s32.totalorder %s7856_s25, 0 }
  0x83   : > { %392 = sbr.rel (%p7865_p9) target bundleno = 1934 (0x78e), region = 64 }
  0x8a   : > { %s5180_s22 = sand.u32 1, %s4900_s18   ;;  %p7866_p0 = scmp.ne.s32.totalorder %s7853_s23, 0 }
  0x8b   : > { %s3928_s28 = sshll.u32 %s5180_s22, 7  ;;  %s395_s24 = scalar_lea.sflag [#allocation3], %s5180_s22 }
  0x8c   : > { %s5186_s15 = scalar_lea.vmem [#allocation2], %s3928_s28 }
  0x8d   : > { %4879 = dma.done.wait (%p7866_p0), %s395_s24, 2048  }
  0x8e   : > { %4881 = vsyncadd (%p7866_p0), %s395_s24, 4294965248  ;;  %p7867_p11 = scmp.eq.s32.totalorder %s5005_s21, 0 }
  0x90   : > { %4883 = dma.done.wait (%p7867_p11), [#allocation6], 5120   ;;  %p7868_p8 = pmov %p7867_p11 }
  0x92   : > { %4885 = vsyncadd (%p7868_p8), [#allocation6], 4294962176  ;;  %p7869_p13 = pmov %p7868_p8 }
  0x93   : > { %p7870_p6 = pmov %p7868_p8 }
  0x94   : > { %4887 = dma.done.wait (%p7869_p13), [#allocation9], 4096  }
  0x95   : > { %4889 = vsyncadd (%p7870_p6), [#allocation9], 4294963200  ;;  %v5201_v0 = vld [vmem:[%s5186_s15] sm:$0xff]  ;;  %v5204_v1 = vld [vmem:[%s5186_s15 + $0x10] sm:$0xff]  ;;  %s7887_s24 = sld [smem:[#allocation86_spill]]  ;;  %s8101_s25 = sld [smem:[#allocation87_spill]] }
  0x96   : > { %470 = vadd.xlane.f32.xlu0 %v5201_v0  ;;  %474 = vadd.xlane.f32.xlu1 %v5204_v1  ;;  %v5209_v2 = vld [vmem:[%s5186_s15 + $0x8] sm:$0xff]  ;;  %v5212_v3 = vld [vmem:[%s5186_s15 + $0x18] sm:$0xff]  ;;  %v5215_v4 = vld [vmem:[%s5186_s15 + $0x20] sm:$0xff]  ;;  %s7677_s16 = scalar_lea.vmem [#allocation10], %s3928_s28  ;;  %s4017_s28 = sshll.u32 %s5005_s21, 11 }
  0x97   : > { %v5220_v5 = vld [vmem:[%s5186_s15 + $0x28] sm:$0xff]  ;;  %v5223_v6 = vld [vmem:[%s5186_s15 + $0x30] sm:$0xff]  ;;  %v5226_v7 = vld [vmem:[%s5186_s15 + $0x38] sm:$0xff]  ;;  %s3816_s30 = sshll.u32 %s7677_s16, 4  ;;  %s8117_s11 = sld [smem:[#allocation88_spill]]  ;;  %s7728_s30 = int_to_ptr.vmem [resolvable:$true] %s3816_s30 }
  0x98   : > { %v5231_v8 = vld [vmem:[%s5186_s15 + $0x40] sm:$0xff]  ;;  %v5234_v9 = vld [vmem:[%s5186_s15 + $0x48] sm:$0xff]  ;;  %v5239_v10 = vld [vmem:[%s5186_s15 + $0x50] sm:$0xff]  ;;  %s3803_s12 = scalar_lea.sflag [#allocation4], %s5180_s22  ;;  %s4834_s21 = scalar_lea.vmem %s7728_s30, 2048 }
  0x99   : > { %v5242_v11 = vld [vmem:[%s5186_s15 + $0x58] sm:$0xff]  ;;  %v5247_v12 = vld [vmem:[%s5186_s15 + $0x60] sm:$0xff]  ;;  %v5250_v13 = vld [vmem:[%s5186_s15 + $0x68] sm:$0xff]  ;;  %p4835_p10 = scmp.ne.s32.totalorder %s7728_s30, %s4834_s21  ;;  %s4921_s27 = smov [#allocation10]  }
  0x9a   : > { %472 = vadd.xlane.f32.xlu0 %v5209_v2  ;;  %476 = vadd.xlane.f32.xlu1 %v5212_v3  ;;  %v5255_v14 = vld [vmem:[%s5186_s15 + $0x70] sm:$0xff]  ;;  %v5258_v15 = vld [vmem:[%s5186_s15 + $0x78] sm:$0xff]  ;;  %v4296_v16 = vld [vmem:[#allocation5] sm:$0xff]   ;;  %s4838_s3 = sshll.u32 %s4921_s27, 4  ;;  %s4839_s3 = int_to_ptr.vmem [resolvable:$false] %s4838_s3 }
  0x9b   : > { %4162 = vmatprep.subr.bf16.mxu0 %v4296_v16  ;;  %v4297_v60 = vld [vmem:[#allocation5 + $0x8] sm:$0xff]   ;;  %p4836_p3 = pnand %p4835_p10, %p5132_p5  ;;  %s4840_s8 = scalar_lea.vmem %s4839_s3, 4096 }
  0x9c   : > { %4163 = vmatpush3.bf16.msra.mxu0 %v4296_v16  ;;  %p4841_p12 = scmp.lt.s32.totalorder %s7728_s30, %s4839_s3  ;;  %p4842_p1 = scmp.lt.s32.totalorder %s4840_s8, %s4834_s21 }
  0x9d   : > { %4164 = vmatprep.subr.bf16.mxu0 %v4297_v60  ;;  %s7726_s29 = scalar_lea.hbm %s8117_s11, %s4017_s28  ;;  %p4837_p7 = pneg %p4836_p3 }
  0x9e   : > { %478 = vadd.xlane.f32.xlu0 %v5215_v4  ;;  %480 = vadd.xlane.f32.xlu1 %v5220_v5  ;;  %p4843_p2 = por %p4842_p1, %p4841_p12 }
  0xa0   : > { %4165 = vmatpush3.bf16.msra.mxu0 %v4297_v60  ;;  %p4844_p4 = pnand %p4843_p2, %p4837_p7 }
  0xa2   : > { %482 = vadd.xlane.f32.xlu0 %v5223_v6  ;;  %484 = vadd.xlane.f32.xlu1 %v5226_v7 }
  0xa6   : > { %486 = vadd.xlane.f32.xlu0 %v5231_v8  ;;  %488 = vadd.xlane.f32.xlu1 %v5234_v9 }
  0xaa   : > { %490 = vadd.xlane.f32.xlu0 %v5239_v10  ;;  %492 = vadd.xlane.f32.xlu1 %v5242_v11 }
  0xae   : > { %494 = vadd.xlane.f32.xlu0 %v5247_v12  ;;  %496 = vadd.xlane.f32.xlu1 %v5250_v13 }
  0xb2   : > { %498 = vadd.xlane.f32.xlu0 %v5255_v14  ;;  %500 = vadd.xlane.f32.xlu1 %v5258_v15 }
 0x123   : > { %v471_v17 = vpop.xlane.xlu0 %470  ;;  %v475_v18 = vpop.xlane.xlu1 %474 }
 0x124   : > { %v503_v19 = vmul.f32 0.0078125, %v471_v17  ;;  %v505_v20 = vmul.f32 0.0078125, %v475_v18 }
 0x126   : > { %v5265_v21 = vsub.f32 %v5201_v0, %v503_v19  ;;  %v5268_v22 = vsub.f32 %v5204_v1, %v505_v20 }
 0x127   : > { %v473_v23 = vpop.xlane.xlu0 %472  ;;  %v477_v24 = vpop.xlane.xlu1 %476 }
 0x128   : > { %v504_v25 = vmul.f32 0.0078125, %v473_v23  ;;  %v535_v26 = vmul.f32 %v5265_v21, %v5265_v21  ;;  %v506_v27 = vmul.f32 0.0078125, %v477_v24  ;;  %v537_v30 = vmul.f32 %v5268_v22, %v5268_v22 }
 0x12a   : > { %v5273_v28 = vsub.f32 %v5209_v2, %v504_v25  ;;  %551 = vadd.xlane.f32.xlu0 %v535_v26  ;;  %v5276_v29 = vsub.f32 %v5212_v3, %v506_v27  ;;  %v4298_v26 = vld [vmem:[#allocation5 + $0x10] sm:$0xff]  }
 0x12b   : > { %v479_v31 = vpop.xlane.xlu0 %478  ;;  %v481_v32 = vpop.xlane.xlu1 %480  ;;  %4166 = vmatprep.subr.bf16.mxu0 %v4298_v26 }
 0x12c   : > { %v507_v33 = vmul.f32 0.0078125, %v479_v31  ;;  %v536_v34 = vmul.f32 %v5273_v28, %v5273_v28  ;;  %v508_v35 = vmul.f32 0.0078125, %v481_v32  ;;  %v538_v38 = vmul.f32 %v5276_v29, %v5276_v29  ;;  %4167 = vmatpush3.bf16.msra.mxu0 %v4298_v26 }
 0x12e   : > { %v5283_v36 = vsub.f32 %v5215_v4, %v507_v33  ;;  %555 = vadd.xlane.f32.xlu0 %v537_v30  ;;  %553 = vadd.xlane.f32.xlu1 %v536_v34  ;;  %v5286_v37 = vsub.f32 %v5220_v5, %v508_v35 }
 0x12f   : > { %v483_v39 = vpop.xlane.xlu0 %482  ;;  %v485_v40 = vpop.xlane.xlu1 %484 }
 0x130   : > { %v509_v41 = vmul.f32 0.0078125, %v483_v39  ;;  %v539_v42 = vmul.f32 %v5283_v36, %v5283_v36  ;;  %v510_v43 = vmul.f32 0.0078125, %v485_v40  ;;  %v540_v46 = vmul.f32 %v5286_v37, %v5286_v37  ;;  %v4299_v39 = vld [vmem:[#allocation5 + $0x18] sm:$0xff]  }
 0x131   : > { %4168 = vmatprep.subr.bf16.mxu0 %v4299_v39 }
 0x132   : > { %v5293_v44 = vsub.f32 %v5223_v6, %v509_v41  ;;  %557 = vadd.xlane.f32.xlu1 %v538_v38  ;;  %559 = vadd.xlane.f32.xlu0 %v539_v42  ;;  %v5296_v45 = vsub.f32 %v5226_v7, %v510_v43  ;;  %v4300_v42 = vld [vmem:[#allocation5 + $0x20] sm:$0xff]   ;;  %v4301_v43 = vld [vmem:[#allocation5 + $0x28] sm:$0xff]  }
 0x133   : > { %v487_v47 = vpop.xlane.xlu0 %486  ;;  %v489_v48 = vpop.xlane.xlu1 %488  ;;  %4169 = vmatpush3.bf16.msra.mxu0 %v4299_v39 }
 0x134   : > { %v511_v49 = vmul.f32 0.0078125, %v487_v47  ;;  %v541_v50 = vmul.f32 %v5293_v44, %v5293_v44  ;;  %v512_v51 = vmul.f32 0.0078125, %v489_v48  ;;  %v542_v54 = vmul.f32 %v5296_v45, %v5296_v45  ;;  %4170 = vmatprep.subr.bf16.mxu0 %v4300_v42  ;;  %v4303_v47 = vld [vmem:[#allocation5 + $0x38] sm:$0xff]  }
 0x136   : > { %v5303_v52 = vsub.f32 %v5231_v8, %v511_v49  ;;  %561 = vadd.xlane.f32.xlu1 %v540_v46  ;;  %563 = vadd.xlane.f32.xlu0 %v541_v50  ;;  %v5306_v53 = vsub.f32 %v5234_v9, %v512_v51  ;;  %v4302_v46 = vld [vmem:[#allocation5 + $0x30] sm:$0xff]  }
 0x137   : > { %v491_v55 = vpop.xlane.xlu0 %490  ;;  %v493_v56 = vpop.xlane.xlu1 %492  ;;  %4171 = vmatpush3.bf16.msra.mxu0 %v4300_v42 }
 0x138   : > { %v513_v57 = vmul.f32 0.0078125, %v491_v55  ;;  %v543_v58 = vmul.f32 %v5303_v52, %v5303_v52  ;;  %v514_v59 = vmul.f32 0.0078125, %v493_v56  ;;  %v544_v63 = vmul.f32 %v5306_v53, %v5306_v53  ;;  %4172 = vmatprep.subr.bf16.mxu0 %v4301_v43 }
 0x13a   : > { %v5313_v61 = vsub.f32 %v5239_v10, %v513_v57  ;;  %565 = vadd.xlane.f32.xlu1 %v542_v54  ;;  %567 = vadd.xlane.f32.xlu0 %v543_v58  ;;  %v5316_v62 = vsub.f32 %v5242_v11, %v514_v59 }
 0x13b   : > { %v495_v16 = vpop.xlane.xlu0 %494  ;;  %v497_v17 = vpop.xlane.xlu1 %496  ;;  %4173 = vmatpush3.bf16.msra.mxu0 %v4301_v43 }
 0x13c   : > { %v515_v18 = vmul.f32 0.0078125, %v495_v16  ;;  %v545_v19 = vmul.f32 %v5313_v61, %v5313_v61  ;;  %v516_v20 = vmul.f32 0.0078125, %v497_v17  ;;  %v546_v25 = vmul.f32 %v5316_v62, %v5316_v62  ;;  %4174 = vmatprep.subr.bf16.mxu0 %v4302_v46 }
 0x13e   : > { %v5323_v23 = vsub.f32 %v5247_v12, %v515_v18  ;;  %569 = vadd.xlane.f32.xlu1 %v544_v63  ;;  %571 = vadd.xlane.f32.xlu0 %v545_v19  ;;  %v5326_v24 = vsub.f32 %v5250_v13, %v516_v20 }
 0x13f   : > { %v499_v27 = vpop.xlane.xlu0 %498  ;;  %v501_v30 = vpop.xlane.xlu1 %500  ;;  %4175 = vmatpush3.bf16.msra.mxu0 %v4302_v46 }
 0x140   : > { %v517_v31 = vmul.f32 0.0078125, %v499_v27  ;;  %v547_v32 = vmul.f32 %v5323_v23, %v5323_v23  ;;  %v518_v33 = vmul.f32 0.0078125, %v501_v30  ;;  %v548_v38 = vmul.f32 %v5326_v24, %v5326_v24  ;;  %4176 = vmatprep.subr.bf16.mxu0 %v4303_v47 }
 0x142   : > { %v5333_v34 = vsub.f32 %v5255_v14, %v517_v31  ;;  %573 = vadd.xlane.f32.xlu1 %v546_v25  ;;  %575 = vadd.xlane.f32.xlu0 %v547_v32  ;;  %v5336_v35 = vsub.f32 %v5258_v15, %v518_v33 }
 0x143   : > { %4177 = vmatpush3.bf16.msra.mxu0 %v4303_v47 }
 0x144   : > { %v549_v40 = vmul.f32 %v5333_v34, %v5333_v34  ;;  %v550_v41 = vmul.f32 %v5336_v35, %v5336_v35 }
 0x146   : > { %577 = vadd.xlane.f32.xlu1 %v548_v38  ;;  %579 = vadd.xlane.f32.xlu0 %v549_v40 }
 0x14a   : > { %581 = vadd.xlane.f32.xlu1 %v550_v41  ;;  %v5348_v41 = vld [vmem:[%s7776_s1] ss:$0 sm:$0xff] }
 0x1b7   : > { %v552_v48 = vpop.xlane.xlu0 %551 }
 0x1b8   : > { %v583_v49 = vmul.f32 0.0078125, %v552_v48 }
 0x1ba   : > { %v599_v50 = vadd.f32 1e-06, %v583_v49 }
 0x1bb   : > { %v554_v51 = vpop.xlane.xlu1 %553  ;;  %v556_v54 = vpop.xlane.xlu0 %555 }
 0x1bc   : > { %4384 = vrsqrt.f32 %v599_v50  ;;  %v584_v55 = vmul.f32 0.0078125, %v554_v51  ;;  %v585_v56 = vmul.f32 0.0078125, %v556_v54 }
 0x1be   : > { %v600_v57 = vadd.f32 1e-06, %v584_v55  ;;  %v601_v58 = vadd.f32 1e-06, %v585_v56  ;;  %v5355_v55 = vld [vmem:[%s7777_s2] ss:$0 sm:$0xff] }
 0x1bf   : > { %v558_v59 = vpop.xlane.xlu1 %557  ;;  %v560_v60 = vpop.xlane.xlu0 %559 }
 0x1c0   : > { %4386 = vrsqrt.f32 %v600_v57  ;;  %v586_v63 = vmul.f32 0.0078125, %v558_v59  ;;  %v587_v16 = vmul.f32 0.0078125, %v560_v60 }
 0x1c1   : > { %4388 = vrsqrt.f32 %v601_v58 }
 0x1c2   : > { %v602_v17 = vadd.f32 1e-06, %v586_v63  ;;  %v603_v18 = vadd.f32 1e-06, %v587_v16 }
 0x1c3   : > { %v562_v19 = vpop.xlane.xlu1 %561  ;;  %v564_v20 = vpop.xlane.xlu0 %563 }
 0x1c4   : > { %4390 = vrsqrt.f32 %v602_v17  ;;  %v588_v25 = vmul.f32 0.0078125, %v562_v19  ;;  %v589_v26 = vmul.f32 0.0078125, %v564_v20 }
 0x1c5   : > { %4392 = vrsqrt.f32 %v603_v18 }
 0x1c6   : > { %v4385_v27 = vpop.eup %4384  ;;  %v604_v30 = vadd.f32 1e-06, %v588_v25  ;;  %v605_v31 = vadd.f32 1e-06, %v589_v26 }
 0x1c7   : > { %v566_v32 = vpop.xlane.xlu1 %565  ;;  %v568_v33 = vpop.xlane.xlu0 %567  ;;  %v631_v38 = vmul.f32 %v4385_v27, %v5265_v21 }
 0x1c8   : > { %4394 = vrsqrt.f32 %v604_v30  ;;  %v590_v39 = vmul.f32 0.0078125, %v566_v32  ;;  %v591_v40 = vmul.f32 0.0078125, %v568_v33 }
 0x1c9   : > { %4396 = vrsqrt.f32 %v605_v31  ;;  %v653_v51 = vmul.f32 %v5348_v41, %v631_v38 }
 0x1ca   : > { %v4387_v42 = vpop.eup %4386  ;;  %v606_v43 = vadd.f32 1e-06, %v590_v39  ;;  %v607_v46 = vadd.f32 1e-06, %v591_v40 }
 0x1cb   : > { %v4389_v47 = vpop.eup %4388  ;;  %v570_v48 = vpop.xlane.xlu1 %569  ;;  %v632_v50 = vmul.f32 %v4387_v42, %v5273_v28  ;;  %v675_v17 = vadd.f32 %v5355_v55, %v653_v51 }
 0x1cc   : > { %v572_v49 = vpop.xlane.xlu0 %571  ;;  %4398 = vrsqrt.f32 %v606_v43  ;;  %v592_v21 = vmul.f32 0.0078125, %v570_v48  ;;  %v633_v56 = vmul.f32 %v4389_v47, %v5268_v22 }
 0x1cd   : > { %v593_v54 = vmul.f32 0.0078125, %v572_v49  ;;  %4400 = vrsqrt.f32 %v607_v46  ;;  %v654_v57 = vmul.f32 %v5348_v41, %v632_v50 }
 0x1ce   : > { %v4391_v58 = vpop.eup %4390  ;;  %v608_v59 = vadd.f32 1e-06, %v592_v21  ;;  %v655_v20 = vmul.f32 %v5348_v41, %v633_v56 }
 0x1cf   : > { %v609_v60 = vadd.f32 1e-06, %v593_v54  ;;  %v4393_v63 = vpop.eup %4392  ;;  %v574_v28 = vpop.xlane.xlu1 %573  ;;  %v676_v18 = vadd.f32 %v5355_v55, %v654_v57  ;;  %v634_v19 = vmul.f32 %v4391_v58, %v5276_v29 }
 0x1d0   : > { %v576_v16 = vpop.xlane.xlu0 %575  ;;  %4402 = vrsqrt.f32 %v608_v59  ;;  %v594_v25 = vmul.f32 0.0078125, %v574_v28  ;;  %v635_v30 = vmul.f32 %v4393_v63, %v5283_v36  ;;  %v677_v29 = vadd.f32 %v5355_v55, %v655_v20 }
 0x1d1   : > { %v595_v22 = vmul.f32 0.0078125, %v576_v16  ;;  %4404 = vrsqrt.f32 %v609_v60  ;;  %v691_v26 = vpack.c.bf16 %v676_v18, %v675_v17  ;;  %v656_v27 = vmul.f32 %v5348_v41, %v634_v19 }
 0x1d2   : > { %v4395_v31 = vpop.eup %4394  ;;  %v610_v32 = vadd.f32 1e-06, %v594_v25  ;;  %v657_v46 = vmul.f32 %v5348_v41, %v635_v30 }
 0x1d3   : > { %v611_v33 = vadd.f32 1e-06, %v595_v22  ;;  %v4397_v38 = vpop.eup %4396  ;;  %v578_v39 = vpop.xlane.xlu1 %577  ;;  %4178 = vmatprep.mubr.bf16.mxu0 %v691_v26  ;;  %v678_v42 = vadd.f32 %v5355_v55, %v656_v27  ;;  %v636_v43 = vmul.f32 %v4395_v31, %v5286_v37 }
 0x1d4   : > { %v580_v40 = vpop.xlane.xlu0 %579  ;;  %4406 = vrsqrt.f32 %v610_v32  ;;  %v596_v47 = vmul.f32 0.0078125, %v578_v39  ;;  %v637_v36 = vmul.f32 %v4397_v38, %v5293_v44  ;;  %v679_v58 = vadd.f32 %v5355_v55, %v657_v46 }
 0x1d5   : > { %v597_v48 = vmul.f32 0.0078125, %v580_v40  ;;  %4408 = vrsqrt.f32 %v611_v33  ;;  %v692_v49 = vpack.c.bf16 %v678_v42, %v677_v29  ;;  %v658_v50 = vmul.f32 %v5348_v41, %v636_v43 }
 0x1d6   : > { %v4399_v51 = vpop.eup %4398  ;;  %v612_v21 = vadd.f32 1e-06, %v596_v47  ;;  %v659_v60 = vmul.f32 %v5348_v41, %v637_v36 }
 0x1d7   : > { %v613_v54 = vadd.f32 1e-06, %v597_v48  ;;  %v4401_v56 = vpop.eup %4400  ;;  %v582_v57 = vpop.xlane.xlu1 %581  ;;  %4179 = vmatmul.mubr.bf16.vlgmr.msra.gmra.mrb[0].mxu0 %v692_v49  ;;  %v680_v37 = vadd.f32 %v5355_v55, %v658_v50  ;;  %v638_v59 = vmul.f32 %v4399_v51, %v5296_v45 }
 0x1d8   : > { %4410 = vrsqrt.f32 %v612_v21  ;;  %v598_v44 = vmul.f32 0.0078125, %v582_v57  ;;  %v639_v63 = vmul.f32 %v4401_v56, %v5303_v52  ;;  %v681_v20 = vadd.f32 %v5355_v55, %v659_v60 }
 0x1d9   : > { %4412 = vrsqrt.f32 %v613_v54  ;;  %v693_v28 = vpack.c.bf16 %v680_v37, %v679_v58  ;;  %v660_v16 = vmul.f32 %v5348_v41, %v638_v59  ;;  %v3935_v37 = vld [vmem:[%s7779_s4] ss:$0 sm:$0xff] }
 0x1da   : > { %v4403_v17 = vpop.eup %4402  ;;  %v614_v18 = vadd.f32 1e-06, %v598_v44  ;;  %v661_v22 = vmul.f32 %v5348_v41, %v639_v63 }
 0x1db   : > { %v4405_v19 = vpop.eup %4404  ;;  %4182 = vmatprep.mubr.bf16.mxu0 %v693_v28  ;;  %v682_v25 = vadd.f32 %v5355_v55, %v660_v16  ;;  %v640_v45 = vmul.f32 %v4403_v17, %v5306_v53 }
 0x1dc   : > { %4414 = vrsqrt.f32 %v614_v18  ;;  %v641_v26 = vmul.f32 %v4405_v19, %v5313_v61  ;;  %v683_v32 = vadd.f32 %v5355_v55, %v661_v22 }
 0x1dd   : > { %v694_v52 = vpack.c.bf16 %v682_v25, %v681_v20  ;;  %v662_v27 = vmul.f32 %v5348_v41, %v640_v45 }
 0x1de   : > { %v4407_v30 = vpop.eup %4406  ;;  %v663_v39 = vmul.f32 %v5348_v41, %v641_v26 }
 0x1df   : > { %v4409_v31 = vpop.eup %4408  ;;  %4183 = vmatmul.mubr.bf16.gmra.mrb[4].mxu0 %v694_v52  ;;  %v684_v33 = vadd.f32 %v5355_v55, %v662_v27  ;;  %v642_v38 = vmul.f32 %v4407_v30, %v5316_v62 }
 0x1e0   : > { %v643_v53 = vmul.f32 %v4409_v31, %v5323_v23  ;;  %v685_v43 = vadd.f32 %v5355_v55, %v663_v39 }
 0x1e1   : > { %v695_v40 = vpack.c.bf16 %v684_v33, %v683_v32  ;;  %v664_v29 = vmul.f32 %v5348_v41, %v642_v38 }
 0x1e2   : > { %v4411_v61 = vpop.eup %4410  ;;  %v665_v48 = vmul.f32 %v5348_v41, %v643_v53 }
 0x1e3   : > { %v4413_v42 = vpop.eup %4412  ;;  %4186 = vmatprep.mubr.bf16.mxu0 %v695_v40  ;;  %v686_v46 = vadd.f32 %v5355_v55, %v664_v29  ;;  %v644_v47 = vmul.f32 %v4411_v61, %v5326_v24 }
 0x1e4   : > { %v645_v62 = vmul.f32 %v4413_v42, %v5333_v34  ;;  %v687_v50 = vadd.f32 %v5355_v55, %v665_v48 }
 0x1e5   : > { %v696_v36 = vpack.c.bf16 %v686_v46, %v685_v43  ;;  %v666_v49 = vmul.f32 %v5348_v41, %v644_v47 }
 0x1e6   : > { %v4415_v23 = vpop.eup %4414  ;;  %v667_v54 = vmul.f32 %v5348_v41, %v645_v62 }
 0x1e7   : > { %4187 = vmatmul.mubr.bf16.gmra.mrb[8].mxu0 %v696_v36  ;;  %v688_v51 = vadd.f32 %v5355_v55, %v666_v49  ;;  %v646_v21 = vmul.f32 %v4415_v23, %v5336_v35  ;;  %v4306_v49 = vld [vmem:[#allocation7 + $0x8] ss:$16 sps:$4 sm:$0xff]   ;;  %v4308_v23 = vld [vmem:[#allocation7 + $0xc] ss:$16 sps:$4 sm:$0xff]  }
 0x1e8   : > { %v689_v57 = vadd.f32 %v5355_v55, %v667_v54  ;;  %1440 = vmatprep.subr.bf16.mxu0 %v4308_v23  ;;  %v4316_v23 = vld [vmem:[#allocation7 + $0x44] ss:$16 sps:$4 sm:$0xff]  }
 0x1e9   : > { %v697_v56 = vpack.c.bf16 %v688_v51, %v687_v50  ;;  %v668_v24 = vmul.f32 %v5348_v41, %v646_v21  ;;  %v4309_v50 = vld [vmem:[#allocation7] ss:$16 sps:$4 sm:$0xff]   ;;  %v4314_v51 = vld [vmem:[#allocation7 + $0x2c] ss:$16 sps:$4 sm:$0xff]   ;;  %1441 = vmatpush1.bf16.msra.mxu0 %v4306_v49 }
 0x1ea   : > { %v4315_v21 = vld [vmem:[#allocation7 + $0x20] ss:$16 sps:$4 sm:$0xff]   ;;  %1442 = vmatprep.subr.bf16.mxu0 %v4314_v51 }
 0x1eb   : > { %4190 = vmatprep.mubr.bf16.mxu0 %v697_v56  ;;  %v690_v34 = vadd.f32 %v5355_v55, %v668_v24 }
 0x1ed   : > { %v698_v58 = vpack.c.bf16 %v690_v34, %v689_v57 }
 0x1ef   : > { %4191 = vmatmul.mubr.bf16.gmra.mrb[12].mxu0 %v698_v58 }
 0x2aa   : > { %v4180_v59 = vpop.f32.mrb[0].mxu0 }
 0x2ab   : > { %v804_v60 = vpop.f32.mrb[1].mxu0  ;;  %v813_v28 = vadd.f32 %v4180_v59, %v3935_v37 }
 0x2ac   : > { %v805_v44 = vadd.f32 %v3935_v37, %v804_v60  ;;  %v4181_v35 = vpop.f32.mrb[2].mxu0 }
 0x2ad   : > { %v807_v63 = vpop.f32.mrb[3].mxu0  ;;  %v816_v17 = vadd.f32 %v4181_v35, %v3935_v37  ;;  %v5413_v55 = vadd.f32 %v813_v28, %v5204_v1 }
 0x2ae   : > { %v5406_v16 = vadd.f32 %v805_v44, %v5201_v0  ;;  %v808_v41 = vadd.f32 %v3935_v37, %v807_v63 }
 0x2af   : > { %7873 = vst [vmem:[#allocation19_spill] sm:$0xff] %v5413_v55  ;;  %v5417_v25 = vadd.f32 %v816_v17, %v5212_v3 }
 0x2b0   : > { %7871 = vst [vmem:[#allocation17_spill] sm:$0xff] %v5406_v16  ;;  %v5409_v18 = vadd.f32 %v808_v41, %v5209_v2  ;;  %885 = vadd.xlane.f32.xlu0 %v5406_v16 }
 0x2b1   : > { %7874 = vst [vmem:[#allocation20_spill] sm:$0xff] %v5417_v25 }
 0x2b2   : > { %7872 = vst [vmem:[#allocation18_spill] sm:$0xff] %v5409_v18  ;;  %887 = vadd.xlane.f32.xlu1 %v5409_v18  ;;  %v4184_v19 = vpop.f32.mrb[4].mxu0 }
 0x2b3   : > { %v820_v20 = vpop.f32.mrb[5].mxu0  ;;  %v829_v26 = vadd.f32 %v4184_v19, %v3935_v37 }
 0x2b4   : > { %v821_v45 = vadd.f32 %v3935_v37, %v820_v20  ;;  %889 = vadd.xlane.f32.xlu0 %v5413_v55  ;;  %v4185_v0 = vpop.f32.mrb[6].mxu0 }
 0x2b5   : > { %v823_v22 = vpop.f32.mrb[7].mxu0  ;;  %v832_v1 = vadd.f32 %v4185_v0, %v3935_v37  ;;  %v5429_v3 = vadd.f32 %v829_v26, %v5223_v6 }
 0x2b6   : > { %v5421_v2 = vadd.f32 %v821_v45, %v5215_v4  ;;  %v824_v52 = vadd.f32 %v3935_v37, %v823_v22  ;;  %891 = vadd.xlane.f32.xlu1 %v5417_v25 }
 0x2b7   : > { %7877 = vst [vmem:[#allocation23_spill] sm:$0xff] %v5429_v3  ;;  %v5433_v32 = vadd.f32 %v832_v1, %v5226_v7 }
 0x2b8   : > { %7875 = vst [vmem:[#allocation21_spill] sm:$0xff] %v5421_v2  ;;  %v5425_v27 = vadd.f32 %v824_v52, %v5220_v5  ;;  %893 = vadd.xlane.f32.xlu0 %v5421_v2 }
 0x2b9   : > { %7878 = vst [vmem:[#allocation24_spill] sm:$0xff] %v5433_v32 }
 0x2ba   : > { %7876 = vst [vmem:[#allocation22_spill] sm:$0xff] %v5425_v27  ;;  %895 = vadd.xlane.f32.xlu1 %v5425_v27  ;;  %v4188_v30 = vpop.f32.mrb[8].mxu0 }
 0x2bb   : > { %v836_v31 = vpop.f32.mrb[9].mxu0  ;;  %v845_v39 = vadd.f32 %v4188_v30, %v3935_v37 }
 0x2bc   : > { %v837_v4 = vadd.f32 %v3935_v37, %v836_v31  ;;  %897 = vadd.xlane.f32.xlu0 %v5429_v3  ;;  %v4189_v33 = vpop.f32.mrb[10].mxu0 }
 0x2bd   : > { %v839_v38 = vpop.f32.mrb[11].mxu0  ;;  %v848_v6 = vadd.f32 %v4189_v33, %v3935_v37  ;;  %v5445_v7 = vadd.f32 %v845_v39, %v5239_v10 }
 0x2be   : > { %v5437_v5 = vadd.f32 %v837_v4, %v5231_v8  ;;  %v840_v53 = vadd.f32 %v3935_v37, %v839_v38  ;;  %899 = vadd.xlane.f32.xlu1 %v5433_v32 }
 0x2bf   : > { %7881 = vst [vmem:[#allocation27_spill] sm:$0xff] %v5445_v7  ;;  %v5449_v42 = vadd.f32 %v848_v6, %v5242_v11 }
 0x2c0   : > { %7879 = vst [vmem:[#allocation25_spill] sm:$0xff] %v5437_v5  ;;  %v5441_v40 = vadd.f32 %v840_v53, %v5234_v9  ;;  %901 = vadd.xlane.f32.xlu0 %v5437_v5 }
 0x2c1   : > { %7882 = vst [vmem:[#allocation28_spill] sm:$0xff] %v5449_v42 }
 0x2c2   : > { %7880 = vst [vmem:[#allocation26_spill] sm:$0xff] %v5441_v40  ;;  %903 = vadd.xlane.f32.xlu1 %v5441_v40  ;;  %v4192_v29 = vpop.f32.mrb[12].mxu0 }
 0x2c3   : > { %v852_v61 = vpop.f32.mrb[13].mxu0  ;;  %v861_v47 = vadd.f32 %v4192_v29, %v3935_v37 }
 0x2c4   : > { %v853_v8 = vadd.f32 %v3935_v37, %v852_v61  ;;  %905 = vadd.xlane.f32.xlu0 %v5445_v7  ;;  %v4193_v43 = vpop.f32.mrb[14].mxu0 }
 0x2c5   : > { %v855_v46 = vpop.f32.mrb[15].mxu0  ;;  %v864_v10 = vadd.f32 %v4193_v43, %v3935_v37  ;;  %v5461_v11 = vadd.f32 %v861_v47, %v5255_v14  ;;  %v4312_v14 = vld [vmem:[#allocation7 + $0x28] ss:$16 sps:$4 sm:$0xff]  }
 0x2c6   : > { %v5453_v9 = vadd.f32 %v853_v8, %v5247_v12  ;;  %v856_v48 = vadd.f32 %v3935_v37, %v855_v46  ;;  %907 = vadd.xlane.f32.xlu1 %v5449_v42  ;;  %v4304_v12 = vld [vmem:[#allocation7 + $0x4] ss:$16 sps:$4 sm:$0xff]   ;;  %1443 = vmatpush1.bf16.msra.mxu0 %v4312_v14 }
 0x2c7   : > { %7885 = vst [vmem:[#allocation31_spill] sm:$0xff] %v5461_v11  ;;  %v5465_v36 = vadd.f32 %v864_v10, %v5258_v15  ;;  %1327 = vmatprep.subr.bf16.mxu1 %v4304_v12 }
 0x2c8   : > { %7883 = vst [vmem:[#allocation29_spill] sm:$0xff] %v5453_v9  ;;  %v5457_v62 = vadd.f32 %v856_v48, %v5250_v13  ;;  %909 = vadd.xlane.f32.xlu0 %v5453_v9  ;;  %v4310_v13 = vld [vmem:[#allocation7 + $0x24] ss:$16 sps:$4 sm:$0xff]   ;;  %1328 = vmatpush1.bf16.msra.mxu1 %v4309_v50  ;;  %v4320_v50 = vld [vmem:[#allocation7 + $0x4c] ss:$16 sps:$4 sm:$0xff]  }
 0x2c9   : > { %7886 = vst [vmem:[#allocation32_spill] sm:$0xff] %v5465_v36  ;;  %1329 = vmatprep.subr.bf16.mxu1 %v4310_v13  ;;  %1444 = vmatprep.subr.bf16.mxu0 %v4320_v50  ;;  %v4344_v50 = vld [vmem:[#allocation7 + $0xcc] ss:$16 sps:$4 sm:$0xff]  }
 0x2ca   : > { %7884 = vst [vmem:[#allocation30_spill] sm:$0xff] %v5457_v62  ;;  %911 = vadd.xlane.f32.xlu1 %v5457_v62 }
 0x2cc   : > { %913 = vadd.xlane.f32.xlu0 %v5461_v11  ;;  %1330 = vmatpush1.bf16.msra.mxu1 %v4315_v21  ;;  %v4318_v21 = vld [vmem:[#allocation7 + $0x48] ss:$16 sps:$4 sm:$0xff]  }
 0x2cd   : > { %1331 = vmatprep.subr.bf16.mxu1 %v4316_v23  ;;  %1445 = vmatpush1.bf16.msra.mxu0 %v4318_v21  ;;  %v4340_v23 = vld [vmem:[#allocation7 + $0xc4] ss:$16 sps:$4 sm:$0xff]  }
 0x2ce   : > { %915 = vadd.xlane.f32.xlu1 %v5465_v36  ;;  %v4346_v21 = vld [vmem:[#allocation7 + $0xe4] ss:$16 sps:$4 sm:$0xff]  }
 0x33d   : > { %v886_v15 = vpop.xlane.xlu0 %885 }
 0x33e   : > { %v917_v54 = vmul.f32 0.0078125, %v886_v15  ;;  %v4321_v15 = vld [vmem:[#allocation7 + $0x40] ss:$16 sps:$4 sm:$0xff]  }
 0x33f   : > { %v888_v56 = vpop.xlane.xlu1 %887  ;;  %1332 = vmatpush1.bf16.msra.mxu1 %v4321_v15  ;;  %v4350_v15 = vld [vmem:[#allocation7 + $0xec] ss:$16 sps:$4 sm:$0xff]  }
 0x340   : > { %v5470_v24 = vsub.f32 %v5406_v16, %v917_v54  ;;  %v918_v57 = vmul.f32 0.0078125, %v888_v56 }
 0x341   : > { %v890_v34 = vpop.xlane.xlu0 %889 }
 0x342   : > { %v5473_v58 = vsub.f32 %v5409_v18, %v918_v57  ;;  %v919_v37 = vmul.f32 0.0078125, %v890_v34  ;;  %v949_v59 = vmul.f32 %v5470_v24, %v5470_v24 }
 0x343   : > { %v892_v60 = vpop.xlane.xlu1 %891 }
 0x344   : > { %v5478_v44 = vsub.f32 %v5413_v55, %v919_v37  ;;  %v920_v35 = vmul.f32 0.0078125, %v892_v60  ;;  %965 = vadd.xlane.f32.xlu0 %v949_v59  ;;  %v950_v63 = vmul.f32 %v5473_v58, %v5473_v58  ;;  %v4322_v59 = vld [vmem:[#allocation7 + $0x64] ss:$16 sps:$4 sm:$0xff]   ;;  %v4326_v60 = vld [vmem:[#allocation7 + $0x6c] ss:$16 sps:$4 sm:$0xff]  }
 0x345   : > { %v894_v28 = vpop.xlane.xlu0 %893  ;;  %1333 = vmatprep.subr.bf16.mxu1 %v4322_v59  ;;  %1446 = vmatprep.subr.bf16.mxu0 %v4326_v60 }
 0x346   : > { %v5483_v41 = vsub.f32 %v5417_v25, %v920_v35  ;;  %v921_v17 = vmul.f32 0.0078125, %v894_v28  ;;  %967 = vadd.xlane.f32.xlu1 %v950_v63  ;;  %v951_v19 = vmul.f32 %v5478_v44, %v5478_v44 }
 0x347   : > { %v896_v20 = vpop.xlane.xlu1 %895 }
 0x348   : > { %v5488_v45 = vsub.f32 %v5421_v2, %v921_v17  ;;  %v922_v0 = vmul.f32 0.0078125, %v896_v20  ;;  %969 = vadd.xlane.f32.xlu0 %v951_v19  ;;  %v952_v22 = vmul.f32 %v5483_v41, %v5483_v41  ;;  %v4324_v17 = vld [vmem:[#allocation7 + $0x68] ss:$16 sps:$4 sm:$0xff]   ;;  %v4327_v19 = vld [vmem:[#allocation7 + $0x60] ss:$16 sps:$4 sm:$0xff]  }
 0x349   : > { %v898_v26 = vpop.xlane.xlu0 %897  ;;  %1334 = vmatpush1.bf16.msra.mxu1 %v4327_v19  ;;  %1447 = vmatpush1.bf16.msra.mxu0 %v4324_v17 }
 0x34a   : > { %v5493_v52 = vsub.f32 %v5425_v27, %v922_v0  ;;  %v923_v1 = vmul.f32 0.0078125, %v898_v26  ;;  %971 = vadd.xlane.f32.xlu1 %v952_v22  ;;  %v953_v30 = vmul.f32 %v5488_v45, %v5488_v45 }
 0x34b   : > { %v900_v31 = vpop.xlane.xlu1 %899 }
 0x34c   : > { %v5498_v4 = vsub.f32 %v5429_v3, %v923_v1  ;;  %v924_v33 = vmul.f32 0.0078125, %v900_v31  ;;  %973 = vadd.xlane.f32.xlu0 %v953_v30  ;;  %v954_v38 = vmul.f32 %v5493_v52, %v5493_v52  ;;  %v4328_v30 = vld [vmem:[#allocation7 + $0x84] ss:$16 sps:$4 sm:$0xff]   ;;  %v4332_v31 = vld [vmem:[#allocation7 + $0x8c] ss:$16 sps:$4 sm:$0xff]  }
 0x34d   : > { %v902_v39 = vpop.xlane.xlu0 %901  ;;  %1335 = vmatprep.subr.bf16.mxu1 %v4328_v30  ;;  %1448 = vmatprep.subr.bf16.mxu0 %v4332_v31 }
 0x34e   : > { %v5503_v53 = vsub.f32 %v5433_v32, %v924_v33  ;;  %v925_v6 = vmul.f32 0.0078125, %v902_v39  ;;  %975 = vadd.xlane.f32.xlu1 %v954_v38  ;;  %v955_v29 = vmul.f32 %v5498_v4, %v5498_v4 }
 0x34f   : > { %v904_v61 = vpop.xlane.xlu1 %903 }
 0x350   : > { %v5508_v8 = vsub.f32 %v5437_v5, %v925_v6  ;;  %v926_v43 = vmul.f32 0.0078125, %v904_v61  ;;  %977 = vadd.xlane.f32.xlu0 %v955_v29  ;;  %v956_v46 = vmul.f32 %v5503_v53, %v5503_v53  ;;  %v4330_v6 = vld [vmem:[#allocation7 + $0x88] ss:$16 sps:$4 sm:$0xff]   ;;  %v4333_v29 = vld [vmem:[#allocation7 + $0x80] ss:$16 sps:$4 sm:$0xff]  }
 0x351   : > { %v906_v47 = vpop.xlane.xlu0 %905  ;;  %1336 = vmatpush1.bf16.msra.mxu1 %v4333_v29  ;;  %1449 = vmatpush1.bf16.msra.mxu0 %v4330_v6 }
 0x352   : > { %v5513_v48 = vsub.f32 %v5441_v40, %v926_v43  ;;  %v927_v10 = vmul.f32 0.0078125, %v906_v47  ;;  %979 = vadd.xlane.f32.xlu1 %v956_v46  ;;  %v957_v12 = vmul.f32 %v5508_v8, %v5508_v8  ;;  %v4334_v46 = vld [vmem:[#allocation7 + $0xa4] ss:$16 sps:$4 sm:$0xff]   ;;  %v4338_v47 = vld [vmem:[#allocation7 + $0xac] ss:$16 sps:$4 sm:$0xff]  }
 0x353   : > { %v908_v49 = vpop.xlane.xlu1 %907  ;;  %1337 = vmatprep.subr.bf16.mxu1 %v4334_v46  ;;  %1450 = vmatprep.subr.bf16.mxu0 %v4338_v47 }
 0x354   : > { %v5518_v13 = vsub.f32 %v5445_v7, %v927_v10  ;;  %v928_v51 = vmul.f32 0.0078125, %v908_v49  ;;  %981 = vadd.xlane.f32.xlu0 %v957_v12  ;;  %v958_v14 = vmul.f32 %v5513_v48, %v5513_v48  ;;  %v4336_v12 = vld [vmem:[#allocation7 + $0xa8] ss:$16 sps:$4 sm:$0xff]   ;;  %v4339_v49 = vld [vmem:[#allocation7 + $0xa0] ss:$16 sps:$4 sm:$0xff]  }
 0x355   : > { %v910_v54 = vpop.xlane.xlu0 %909  ;;  %1338 = vmatpush1.bf16.msra.mxu1 %v4339_v49  ;;  %1451 = vmatpush1.bf16.msra.mxu0 %v4336_v12 }
 0x356   : > { %v5523_v56 = vsub.f32 %v5449_v42, %v928_v51  ;;  %v929_v57 = vmul.f32 0.0078125, %v910_v54  ;;  %983 = vadd.xlane.f32.xlu1 %v958_v14  ;;  %v959_v34 = vmul.f32 %v5518_v13, %v5518_v13  ;;  %v4342_v51 = vld [vmem:[#allocation7 + $0xc8] ss:$16 sps:$4 sm:$0xff]   ;;  %v4345_v14 = vld [vmem:[#allocation7 + $0xc0] ss:$16 sps:$4 sm:$0xff]   ;;  %1339 = vmatprep.subr.bf16.mxu1 %v4340_v23 }
 0x357   : > { %v912_v37 = vpop.xlane.xlu1 %911  ;;  %1452 = vmatprep.subr.bf16.mxu0 %v4344_v50  ;;  %v4348_v54 = vld [vmem:[#allocation7 + $0xe8] ss:$16 sps:$4 sm:$0xff]   ;;  %v5554_v23 = vld [vmem:[%s7780_s5] ss:$0 sm:$0xff] }
 0x358   : > { %v5528_v35 = vsub.f32 %v5453_v9, %v929_v57  ;;  %v930_v63 = vmul.f32 0.0078125, %v912_v37  ;;  %985 = vadd.xlane.f32.xlu0 %v959_v34  ;;  %v960_v28 = vmul.f32 %v5523_v56, %v5523_v56  ;;  %v4351_v57 = vld [vmem:[#allocation7 + $0xe0] ss:$16 sps:$4 sm:$0xff]   ;;  %v4920_v34 = vmov 0  }
 0x359   : > { %v914_v20 = vpop.xlane.xlu0 %913  ;;  %1340 = vmatpush1.bf16.msra.mxu1 %v4345_v14  ;;  %1453 = vmatpush1.bf16.msra.mxu0 %v4342_v51  ;;  %v4352_v37 = vld [vmem:[#allocation8 + $0x40] sm:$0xff]  }
 0x35a   : > { %v5533_v0 = vsub.f32 %v5457_v62, %v930_v63  ;;  %v931_v22 = vmul.f32 0.0078125, %v914_v20  ;;  %987 = vadd.xlane.f32.xlu1 %v960_v28  ;;  %v961_v26 = vmul.f32 %v5528_v35, %v5528_v35  ;;  %1341 = vmatprep.subr.bf16.mxu1 %v4346_v21  ;;  %v4361_v9 = vld [vmem:[#allocation8 + $0xc0] sm:$0xff]  }
 0x35b   : > { %v916_v1 = vpop.xlane.xlu1 %915  ;;  %1454 = vmatprep.subr.bf16.mxu0 %v4350_v15  ;;  %1359 = vmatprep.mubr.bf16.mxu1 %v4920_v34 }
 0x35c   : > { %v5538_v33 = vsub.f32 %v5461_v11, %v931_v22  ;;  %v932_v38 = vmul.f32 0.0078125, %v916_v1  ;;  %989 = vadd.xlane.f32.xlu0 %v961_v26  ;;  %v962_v39 = vmul.f32 %v5533_v0, %v5533_v0  ;;  %1472 = vmatprep.mubr.bf16.mxu0 %v4920_v34 }
 0x35d   : > { %1342 = vmatpush1.bf16.msra.mxu1 %v4351_v57  ;;  %1455 = vmatpush1.bf16.msra.mxu0 %v4348_v54 }
 0x35e   : > { %v5543_v61 = vsub.f32 %v5465_v36, %v932_v38  ;;  %991 = vadd.xlane.f32.xlu1 %v962_v39  ;;  %v963_v43 = vmul.f32 %v5538_v33, %v5538_v33  ;;  %4034 = vmatprep.subr.bf16.mxu1 %v4352_v37  ;;  %v5562_v37 = vld [vmem:[%s7781_s6] ss:$0 sm:$0xff] }
 0x35f   : > { %4098 = vmatprep.subr.bf16.mxu0 %v4361_v9 }
 0x360   : > { %993 = vadd.xlane.f32.xlu0 %v963_v43  ;;  %v964_v10 = vmul.f32 %v5543_v61, %v5543_v61 }
 0x362   : > { %995 = vadd.xlane.f32.xlu1 %v964_v10 }
 0x3d1   : > { %v966_v59 = vpop.xlane.xlu0 %965 }
 0x3d2   : > { %v997_v60 = vmul.f32 0.0078125, %v966_v59 }
 0x3d3   : > { %v968_v63 = vpop.xlane.xlu1 %967 }
 0x3d4   : > { %v1013_v28 = vadd.f32 1e-06, %v997_v60  ;;  %v998_v17 = vmul.f32 0.0078125, %v968_v63 }
 0x3d5   : > { %v970_v19 = vpop.xlane.xlu0 %969 }
 0x3d6   : > { %4416 = vrsqrt.f32 %v1013_v28  ;;  %v1014_v20 = vadd.f32 1e-06, %v998_v17  ;;  %v999_v22 = vmul.f32 0.0078125, %v970_v19 }
 0x3d7   : > { %v972_v26 = vpop.xlane.xlu1 %971 }
 0x3d8   : > { %4418 = vrsqrt.f32 %v1014_v20  ;;  %v1015_v1 = vadd.f32 1e-06, %v999_v22  ;;  %v1000_v30 = vmul.f32 0.0078125, %v972_v26 }
 0x3d9   : > { %v974_v31 = vpop.xlane.xlu0 %973 }
 0x3da   : > { %4420 = vrsqrt.f32 %v1015_v1  ;;  %v1016_v38 = vadd.f32 1e-06, %v1000_v30  ;;  %v1001_v39 = vmul.f32 0.0078125, %v974_v31  ;;  %v4353_v30 = vld [vmem:[#allocation8] sm:$0xff]  }
 0x3db   : > { %v976_v6 = vpop.xlane.xlu1 %975 }
 0x3dc   : > { %4422 = vrsqrt.f32 %v1016_v38  ;;  %v1002_v29 = vmul.f32 0.0078125, %v976_v6  ;;  %v1017_v43 = vadd.f32 1e-06, %v1001_v39 }
 0x3dd   : > { %v978_v47 = vpop.xlane.xlu0 %977 }
 0x3de   : > { %v1018_v46 = vadd.f32 1e-06, %v1002_v29  ;;  %v1003_v14 = vmul.f32 0.0078125, %v978_v47 }
 0x3df   : > { %v980_v10 = vpop.xlane.xlu1 %979 }
 0x3e0   : > { %v4417_v12 = vpop.eup %4416  ;;  %4424 = vrsqrt.f32 %v1018_v46  ;;  %v1004_v49 = vmul.f32 0.0078125, %v980_v10  ;;  %v1019_v28 = vadd.f32 1e-06, %v1003_v14 }
 0x3e1   : > { %v1045_v50 = vmul.f32 %v4417_v12, %v5470_v24  ;;  %4426 = vrsqrt.f32 %v1017_v43  ;;  %v982_v24 = vpop.xlane.xlu0 %981 }
 0x3e2   : > { %v4419_v51 = vpop.eup %4418  ;;  %v1020_v57 = vadd.f32 1e-06, %v1004_v49  ;;  %v1005_v38 = vmul.f32 0.0078125, %v982_v24 }
 0x3e3   : > { %v1046_v21 = vmul.f32 %v4419_v51, %v5473_v58  ;;  %v1067_v15 = vmul.f32 %v5554_v23, %v1045_v50  ;;  %v984_v59 = vpop.xlane.xlu1 %983 }
 0x3e4   : > { %v4421_v54 = vpop.eup %4420  ;;  %4428 = vrsqrt.f32 %v1020_v57  ;;  %v1006_v22 = vmul.f32 0.0078125, %v984_v59  ;;  %v1021_v46 = vadd.f32 1e-06, %v1005_v38 }
 0x3e5   : > { %v1068_v60 = vmul.f32 %v5554_v23, %v1046_v21  ;;  %v1089_v17 = vadd.f32 %v5562_v37, %v1067_v15  ;;  %v1047_v58 = vmul.f32 %v4421_v54, %v5478_v44  ;;  %4430 = vrsqrt.f32 %v1019_v28  ;;  %v986_v47 = vpop.xlane.xlu0 %985 }
 0x3e6   : > { %v4423_v63 = vpop.eup %4422  ;;  %v1022_v29 = vadd.f32 1e-06, %v1006_v22  ;;  %v1007_v21 = vmul.f32 0.0078125, %v986_v47 }
 0x3e7   : > { %v1090_v19 = vadd.f32 %v5562_v37, %v1068_v60  ;;  %v1048_v20 = vmul.f32 %v4423_v63, %v5483_v41  ;;  %v1069_v39 = vmul.f32 %v5554_v23, %v1047_v58  ;;  %v988_v44 = vpop.xlane.xlu1 %987 }
 0x3e8   : > { %4432 = vrsqrt.f32 %v1022_v29  ;;  %v1008_v49 = vmul.f32 0.0078125, %v988_v44  ;;  %v1023_v60 = vadd.f32 1e-06, %v1007_v21 }
 0x3e9   : > { %v1105_v26 = vpack.c.bf16 %v1090_v19, %v1089_v17  ;;  %v1070_v1 = vmul.f32 %v5554_v23, %v1048_v20  ;;  %v1091_v10 = vadd.f32 %v5562_v37, %v1069_v39  ;;  %4434 = vrsqrt.f32 %v1021_v46  ;;  %v990_v63 = vpop.xlane.xlu0 %989 }
 0x3ea   : > { %v4425_v31 = vpop.eup %4424  ;;  %v1024_v54 = vadd.f32 1e-06, %v1008_v49  ;;  %v1009_v22 = vmul.f32 0.0078125, %v990_v63 }
 0x3eb   : > { %1360 = vmatmul.mubr.bf16.vlgmr.msra.gmra.mrb[0].mxu1 %v1105_v26  ;;  %1473 = vmatmul.mubr.bf16.vlgmr.msra.gmra.mrb[16].mxu0 %v1105_v26  ;;  %v4427_v6 = vpop.eup %4426  ;;  %v1092_v41 = vadd.f32 %v5562_v37, %v1070_v1  ;;  %v1050_v43 = vmul.f32 %v4425_v31, %v5493_v52  ;;  %v992_v57 = vpop.xlane.xlu1 %991 }
 0x3ec   : > { %1369 = vmatprep.mubr.bf16.mxu1 %v4920_v34  ;;  %1482 = vmatprep.mubr.bf16.mxu0 %v4920_v34  ;;  %v1049_v12 = vmul.f32 %v4427_v6, %v5488_v45  ;;  %4436 = vrsqrt.f32 %v1024_v54  ;;  %v1010_v17 = vmul.f32 0.0078125, %v992_v57  ;;  %v1025_v38 = vadd.f32 1e-06, %v1009_v22 }
 0x3ed   : > { %4035 = vmatpush3.bf16.msra.mxu1 %v4353_v30  ;;  %v1106_v50 = vpack.c.bf16 %v1092_v41, %v1091_v10  ;;  %v1072_v51 = vmul.f32 %v5554_v23, %v1050_v43  ;;  %4438 = vrsqrt.f32 %v1023_v60  ;;  %v994_v39 = vpop.xlane.xlu0 %993 }
 0x3ee   : > { %v4429_v14 = vpop.eup %4428  ;;  %v1071_v15 = vmul.f32 %v5554_v23, %v1049_v12  ;;  %v1011_v47 = vmul.f32 0.0078125, %v994_v39 }
 0x3ef   : > { %v4431_v52 = vpop.eup %4430  ;;  %v1094_v45 = vadd.f32 %v5562_v37, %v1072_v51  ;;  %v1052_v59 = vmul.f32 %v4429_v14, %v5503_v53  ;;  %v1026_v53 = vadd.f32 1e-06, %v1010_v17  ;;  %v996_v30 = vpop.xlane.xlu1 %995 }
 0x3f0   : > { %v1093_v28 = vadd.f32 %v5562_v37, %v1071_v15  ;;  %v1051_v24 = vmul.f32 %v4431_v52, %v5498_v4  ;;  %v1012_v44 = vmul.f32 0.0078125, %v996_v30  ;;  %v4354_v30 = vld [vmem:[#allocation8 + $0x48] sm:$0xff]  }
 0x3f1   : > { %v1074_v58 = vmul.f32 %v5554_v23, %v1052_v59  ;;  %4440 = vrsqrt.f32 %v1026_v53  ;;  %4036 = vmatprep.subr.bf16.mxu1 %v4354_v30 }
 0x3f2   : > { %v1107_v19 = vpack.c.bf16 %v1094_v45, %v1093_v28  ;;  %v4433_v20 = vpop.eup %4432  ;;  %v1073_v26 = vmul.f32 %v5554_v23, %v1051_v24  ;;  %4442 = vrsqrt.f32 %v1025_v38 }
 0x3f3   : > { %1370 = vmatmul.mubr.bf16.gmra.mrb[4].mxu1 %v1106_v50  ;;  %1483 = vmatmul.mubr.bf16.gmra.mrb[20].mxu0 %v1106_v50  ;;  %v4435_v1 = vpop.eup %4434  ;;  %v1096_v4 = vadd.f32 %v5562_v37, %v1074_v58  ;;  %v1054_v31 = vmul.f32 %v4433_v20, %v5513_v48  ;;  %v1028_v48 = vadd.f32 1e-06, %v1012_v44  ;;  %v1027_v50 = vadd.f32 1e-06, %v1011_v47 }
 0x3f4   : > { %1379 = vmatprep.mubr.bf16.mxu1 %v4920_v34  ;;  %1492 = vmatprep.mubr.bf16.mxu0 %v4920_v34  ;;  %v1095_v6 = vadd.f32 %v5562_v37, %v1073_v26  ;;  %v1053_v29 = vmul.f32 %v4435_v1, %v5508_v8 }
 0x3f5   : > { %v1076_v43 = vmul.f32 %v5554_v23, %v1054_v31  ;;  %4444 = vrsqrt.f32 %v1028_v48  ;;  %v4357_v31 = vld [vmem:[#allocation8 + $0x10] sm:$0xff]  }
 0x3f6   : > { %v1108_v41 = vpack.c.bf16 %v1096_v4, %v1095_v6  ;;  %v4437_v46 = vpop.eup %4436  ;;  %v1075_v10 = vmul.f32 %v5554_v23, %v1053_v29  ;;  %4446 = vrsqrt.f32 %v1027_v50  ;;  %v4356_v4 = vld [vmem:[#allocation8 + $0x50] sm:$0xff]  }
 0x3f7   : > { %v4439_v12 = vpop.eup %4438  ;;  %v1098_v8 = vadd.f32 %v5562_v37, %v1076_v43  ;;  %v1056_v49 = vmul.f32 %v4437_v46, %v5523_v56 }
 0x3f8   : > { %v1097_v51 = vadd.f32 %v5562_v37, %v1075_v10  ;;  %v1055_v14 = vmul.f32 %v4439_v12, %v5518_v13 }
 0x3f9   : > { %v1078_v15 = vmul.f32 %v5554_v23, %v1056_v49 }
 0x3fa   : > { %v1109_v21 = vpack.c.bf16 %v1098_v8, %v1097_v51  ;;  %v1077_v54 = vmul.f32 %v5554_v23, %v1055_v14 }
 0x3fb   : > { %1380 = vmatmul.mubr.bf16.gmra.mrb[8].mxu1 %v1107_v19  ;;  %1493 = vmatmul.mubr.bf16.gmra.mrb[24].mxu0 %v1107_v19  ;;  %v4441_v52 = vpop.eup %4440  ;;  %v1100_v56 = vadd.f32 %v5562_v37, %v1078_v15 }
 0x3fc   : > { %1389 = vmatprep.mubr.bf16.mxu1 %v4920_v34  ;;  %1502 = vmatprep.mubr.bf16.mxu0 %v4920_v34  ;;  %v4443_v57 = vpop.eup %4442  ;;  %v1058_v45 = vmul.f32 %v4441_v52, %v5533_v0  ;;  %v1099_v13 = vadd.f32 %v5562_v37, %v1077_v54 }
 0x3fd   : > { %v1057_v59 = vmul.f32 %v4443_v57, %v5528_v35 }
 0x3fe   : > { %v1110_v60 = vpack.c.bf16 %v1100_v56, %v1099_v13  ;;  %v1080_v63 = vmul.f32 %v5554_v23, %v1058_v45 }
 0x3ff   : > { %v4445_v28 = vpop.eup %4444  ;;  %v1079_v24 = vmul.f32 %v5554_v23, %v1057_v59 }
 0x400   : > { %v4447_v17 = vpop.eup %4446  ;;  %v1102_v19 = vadd.f32 %v5562_v37, %v1080_v63  ;;  %v1060_v0 = vmul.f32 %v4445_v28, %v5543_v61 }
 0x401   : > { %v1101_v58 = vadd.f32 %v5562_v37, %v1079_v24  ;;  %v1059_v35 = vmul.f32 %v4447_v17, %v5538_v33  ;;  %v4355_v33 = vld [vmem:[#allocation8 + $0x8] sm:$0xff]  }
 0x402   : > { %v1082_v22 = vmul.f32 %v5554_v23, %v1060_v0  ;;  %4037 = vmatpush3.bf16.msra.mxu1 %v4355_v33 }
 0x403   : > { %1390 = vmatmul.mubr.bf16.gmra.mrb[12].mxu1 %v1108_v41  ;;  %1503 = vmatmul.mubr.bf16.gmra.mrb[28].mxu0 %v1108_v41  ;;  %v1111_v20 = vpack.c.bf16 %v1102_v19, %v1101_v58  ;;  %v1081_v26 = vmul.f32 %v5554_v23, %v1059_v35  ;;  %v1147_v23 = vlaneseq }
 0x404   : > { %1399 = vmatprep.mubr.bf16.mxu1 %v4920_v34  ;;  %1512 = vmatprep.mubr.bf16.mxu0 %v4920_v34  ;;  %v1104_v1 = vadd.f32 %v5562_v37, %v1082_v22 }
 0x405   : > { %v1103_v53 = vadd.f32 %v5562_v37, %v1081_v26  ;;  %4038 = vmatprep.subr.bf16.mxu1 %v4356_v4  ;;  %v1148_v38 = vshrl.u32 %v1147_v23, 7  ;;  %v1145_v37 = vld [vmem:[%s7887_s24] sm:$0xf] }
 0x406   : > { %4039 = vmatpush3.bf16.msra.mxu1 %v4357_v31  ;;  %v4359_v31 = vld [vmem:[#allocation8 + $0x18] sm:$0xff]  }
 0x407   : > { %v1112_v61 = vpack.c.bf16 %v1104_v1, %v1103_v53  ;;  %v1149_v39 = vsub.s32 0, %v1148_v38  ;;  %v1157_v6 = vsub.s32 2, %v1148_v38  ;;  %v1153_v29 = vsub.s32 1, %v1148_v38 }
 0x408   : > { %v1161_v10 = vsub.s32 3, %v1148_v38 }
 0x409   : > { %v5626_v44 = vrot.slane %v1145_v37, %v1149_v39  ;;  %v5628_v41 = vrot.slane %v1145_v37, %v1157_v6  ;;  %v5630_v43 = vrot.slane %v1145_v37, %v1153_v29 }
 0x40a   : > { %v5647_v52 = vrot.slane %v1145_v37, %v1161_v10 }
 0x40b   : > { %1400 = vmatmul.mubr.bf16.gmra.mrb[16].mxu1 %v1109_v21  ;;  %1513 = vmatmul.mubr.bf16.gmra.mrb[32].mxu0 %v1109_v21 }
 0x40c   : > { %1409 = vmatprep.mubr.bf16.mxu1 %v4920_v34  ;;  %1522 = vmatprep.mubr.bf16.mxu0 %v4920_v34 }
 0x413   : > { %1410 = vmatmul.mubr.bf16.gmra.mrb[20].mxu1 %v1110_v60  ;;  %1523 = vmatmul.mubr.bf16.gmra.mrb[36].mxu0 %v1110_v60 }
 0x414   : > { %1419 = vmatprep.mubr.bf16.mxu1 %v4920_v34  ;;  %1532 = vmatprep.mubr.bf16.mxu0 %v4920_v34 }
 0x41b   : > { %1420 = vmatmul.mubr.bf16.gmra.mrb[24].mxu1 %v1111_v20  ;;  %1533 = vmatmul.mubr.bf16.gmra.mrb[40].mxu0 %v1111_v20 }
 0x41c   : > { %1429 = vmatprep.mubr.bf16.mxu1 %v4920_v34  ;;  %1542 = vmatprep.mubr.bf16.mxu0 %v4920_v34  ;;  %v4358_v34 = vld [vmem:[#allocation8 + $0x58] sm:$0xff]  }
 0x41d   : > { %4040 = vmatprep.subr.bf16.mxu1 %v4358_v34 }
 0x41e   : > { %4041 = vmatpush3.bf16.msra.mxu1 %v4359_v31 }
 0x423   : > { %1430 = vmatmul.mubr.bf16.gmra.mrb[28].mxu1 %v1112_v61  ;;  %1543 = vmatmul.mubr.bf16.gmra.mrb[44].mxu0 %v1112_v61 }
 0x4be   : > { %v1361_v46 = vpop.f32.mrb[0].mxu1  ;;  %v1474_v47 = vpop.f32.mrb[16].mxu0 }
 0x4bf   : > { %v5633_v12 = vadd.f32 %v1361_v46, %v5626_v44  ;;  %v5636_v48 = vadd.f32 %v1474_v47, %v5628_v41  ;;  %v1363_v8 = vpop.f32.mrb[1].mxu1  ;;  %v1476_v49 = vpop.f32.mrb[17].mxu0 }
 0x4c0   : > { %v1365_v50 = vpop.f32.mrb[2].mxu1  ;;  %v1478_v51 = vpop.f32.mrb[18].mxu0  ;;  %v5645_v15 = vadd.f32 %v1363_v8, %v5630_v43  ;;  %v5655_v59 = vadd.f32 %v1476_v49, %v5647_v52 }
 0x4c1   : > { %v5639_v14 = vmul.f32 0.70710677, %v5633_v12  ;;  %v5642_v21 = vmul.f32 0.70710677, %v5636_v48  ;;  %v1367_v28 = vpop.f32.mrb[3].mxu1  ;;  %v1480_v24 = vpop.f32.mrb[19].mxu0  ;;  %v5663_v58 = vadd.f32 %v1365_v50, %v5626_v44  ;;  %v5673_v26 = vadd.f32 %v1478_v51, %v5628_v41 }
 0x4c2   : > { %v5652_v13 = vmul.f32 0.70710677, %v5645_v15  ;;  %v5670_v22 = vmul.f32 0.70710677, %v5655_v59  ;;  %v5683_v30 = vadd.f32 %v1367_v28, %v5630_v43  ;;  %v5717_v11 = vadd.f32 %v1480_v24, %v5647_v52 }
 0x4c3   : > { %v1681_v54 = vand.u32 2147483647, %v5639_v14  ;;  %v1683_v57 = vand.u32 2147483647, %v5642_v21  ;;  %v5680_v61 = vmul.f32 0.70710677, %v5663_v58 }
 0x4c4   : > { %v5660_v0 = vand.u32 2147483647, %v5652_v13  ;;  %v5690_v38 = vmul.f32 0.70710677, %v5673_v26  ;;  %v5696_v37 = vmul.f32 0.70710677, %v5683_v30 }
 0x4c5   : > { %v1745_v56 = vmul.f32 0.3275911, %v1681_v54  ;;  %v1747_v45 = vmul.f32 0.3275911, %v1683_v57  ;;  %v2577_v23 = vsub.f32 0.0, %v1681_v54  ;;  %v2579_v50 = vsub.f32 0.0, %v1683_v57 }
 0x4c6   : > { %v1371_v17 = vpop.f32.mrb[4].mxu1  ;;  %v5657_v19 = vpop.f32.mrb[20].mxu0  ;;  %v1746_v39 = vmul.f32 0.3275911, %v5660_v0  ;;  %v1685_v6 = vand.u32 2147483647, %v5680_v61 }
 0x4c7   : > { %v1809_v60 = vadd.f32 1.0, %v1745_v56  ;;  %v1811_v63 = vadd.f32 1.0, %v1747_v45  ;;  %v5665_v35 = vpop.f32.mrb[5].mxu1  ;;  %v5667_v20 = vpop.f32.mrb[21].mxu0  ;;  %v1687_v34 = vand.u32 2147483647, %v5690_v38  ;;  %v2641_v49 = vmul.f32 %v2577_v23, %v1681_v54 }
 0x4c8   : > { %v5675_v1 = vpop.f32.mrb[6].mxu1  ;;  %v5677_v53 = vpop.f32.mrb[22].mxu0  ;;  %v5701_v46 = vand.u32 2147483647, %v5670_v22  ;;  %v1749_v47 = vmul.f32 0.3275911, %v1685_v6 }
 0x4c9   : > { %4448 = vrcp.f32 %v1809_v60  ;;  %v5685_v33 = vpop.f32.mrb[7].mxu1  ;;  %v5687_v4 = vpop.f32.mrb[23].mxu0  ;;  %v1751_v51 = vmul.f32 0.3275911, %v1687_v34  ;;  %v5710_v60 = vand.u32 2147483647, %v5696_v37 }
 0x4ca   : > { %4450 = vrcp.f32 %v1811_v63  ;;  %v1813_v45 = vadd.f32 1.0, %v1749_v47  ;;  %v1810_v31 = vadd.f32 1.0, %v1746_v39  ;;  %v1748_v47 = vmul.f32 0.3275911, %v5701_v46 }
 0x4cb   : > { %v1815_v36 = vadd.f32 1.0, %v1751_v51  ;;  %v2705_v40 = vmul.f32 1.442695, %v2641_v49  ;;  %v2643_v39 = vmul.f32 %v2579_v50, %v1683_v57  ;;  %v2581_v51 = vsub.f32 0.0, %v1685_v6 }
 0x4cc   : > { %4452 = vrcp.f32 %v1813_v45  ;;  %v1750_v5 = vmul.f32 0.3275911, %v5710_v60  ;;  %v5732_v3 = vmul.f32 0.70710677, %v5717_v11  ;;  %v5735_v45 = vadd.f32 %v1371_v17, %v5626_v44 }
 0x4cd   : > { %4454 = vrcp.f32 %v1815_v36  ;;  %v1812_v36 = vadd.f32 1.0, %v1748_v47  ;;  %v2709_v25 = vmul.f32 1.442695, %v2643_v39  ;;  %v2583_v9 = vsub.f32 0.0, %v1687_v34 }
 0x4ce   : > { %v5698_v29 = vpop.f32.mrb[8].mxu1  ;;  %v5703_v10 = vpop.f32.mrb[24].mxu0  ;;  %4456 = vrcp.f32 %v1810_v31  ;;  %v2645_v31 = vmul.f32 %v2581_v51, %v1685_v6  ;;  %v1814_v55 = vadd.f32 1.0, %v1750_v5  ;;  %v5746_v18 = vmul.f32 0.70710677, %v5735_v45 }
 0x4cf   : > { %v5705_v8 = vpop.f32.mrb[9].mxu1  ;;  %v5707_v56 = vpop.f32.mrb[25].mxu0  ;;  %4458 = vpow2.f32 %v2705_v40  ;;  %v5749_v16 = vand.u32 2147483647, %v5732_v3  ;;  %v2647_v51 = vmul.f32 %v2583_v9, %v1687_v34  ;;  %vm2961_vm0 = vcmp.ge.f32.partialorder %v5639_v14, 0.0 }
 0x4d0   : > { %7888 = vst [vmem:[#allocation33_spill] sm:$0xff] %v5705_v8  ;;  %7889 = vst [vmem:[#allocation34_spill] sm:$0xff] %v5707_v56  ;;  %v5712_v63 = vpop.f32.mrb[10].mxu1  ;;  %v5714_v28 = vpop.f32.mrb[26].mxu0  ;;  %4460 = vrcp.f32 %v1812_v36  ;;  %v2713_v6 = vmul.f32 1.442695, %v2645_v31 }
 0x4d1   : > { %7890 = vst [vmem:[#allocation35_spill] sm:$0xff] %v5712_v63  ;;  %7891 = vst [vmem:[#allocation36_spill] sm:$0xff] %v5714_v28  ;;  %v5719_v62 = vpop.f32.mrb[11].mxu1  ;;  %v5721_v54 = vpop.f32.mrb[27].mxu0  ;;  %4462 = vpow2.f32 %v2709_v25  ;;  %v1752_v36 = vmul.f32 0.3275911, %v5749_v16 }
 0x4d2   : > { %7892 = vst [vmem:[#allocation37_spill] sm:$0xff] %v5719_v62  ;;  %7893 = vst [vmem:[#allocation38_spill] sm:$0xff] %v5721_v54  ;;  %4464 = vrcp.f32 %v1814_v55  ;;  %vm2963_vm1 = vcmp.ge.f32.partialorder %v5642_v21, 0.0  ;;  %vm2965_vm2 = vcmp.ge.f32.partialorder %v5680_v61, 0.0  ;;  %vm2967_vm3 = vcmp.ge.f32.partialorder %v5690_v38, 0.0 }
 0x4d3   : > { %v5723_v23 = vpop.eup %4448  ;;  %v1816_v54 = vadd.f32 1.0, %v1752_v36  ;;  %4466 = vpow2.f32 %v2713_v6  ;;  %v5825_v21 = vadd.f32 %v5665_v35, %v5630_v43  ;;  %v1559_v35 = vmul.f32 0.5, %v5673_v26 }
 0x4d4   : > { %v5726_v42 = vpop.eup %4450  ;;  %v2001_v7 = vmul.f32 1.0614054, %v5723_v23  ;;  %vm2962_vm4 = vcmp.ge.f32.partialorder %v5652_v13, 0.0  ;;  %vm2964_vm5 = vcmp.ge.f32.partialorder %v5670_v22, 0.0  ;;  %vm2966_vm6 = vcmp.ge.f32.partialorder %v5696_v37, 0.0 }
 0x4d5   : > { %v2003_v24 = vmul.f32 1.0614054, %v5726_v42  ;;  %vm2968_vm7 = vcmp.ge.f32.partialorder %v5732_v3, 0.0  ;;  %v5990_v37 = vmul.f32 0.5, %v5735_v45  ;;  %vm2969_vm8 = vcmp.ge.f32.partialorder %v5746_v18, 0.0 }
 0x4d6   : > { %v2065_v32 = vadd.f32 -1.4531521, %v2001_v7  ;;  %v5737_v27 = vpop.f32.mrb[12].mxu1  ;;  %v5739_v2 = vpop.f32.mrb[28].mxu0 }
 0x4d7   : > { %7894 = vst [vmem:[#allocation39_spill] sm:$0xff] %v5737_v27  ;;  %7895 = vst [vmem:[#allocation40_spill] sm:$0xff] %v5739_v2  ;;  %v2067_v57 = vadd.f32 -1.4531521, %v2003_v24  ;;  %v5741_v49 = vpop.f32.mrb[13].mxu1  ;;  %v5755_v39 = vpop.eup %4452 }
 0x4d8   : > { %7896 = vst [vmem:[#allocation41_spill] sm:$0xff] %v5741_v49  ;;  %v2129_v50 = vmul.f32 %v5723_v23, %v2065_v32  ;;  %v5753_v32 = vand.u32 2147483647, %v5746_v18  ;;  %v5767_v34 = vpop.f32.mrb[29].mxu0  ;;  %v7917_v18 = vld [vmem:[#allocation33_spill] sm:$0xff] }
 0x4d9   : > { %v2131_v7 = vmul.f32 %v5726_v42, %v2067_v57  ;;  %v5758_v57 = vpop.eup %4454  ;;  %7897 = vst [vmem:[#allocation42_spill] sm:$0xff] %v5767_v34 }
 0x4da   : > { %v2193_v17 = vadd.f32 1.4214138, %v2129_v50  ;;  %v2005_v50 = vmul.f32 1.0614054, %v5755_v39  ;;  %v2007_v25 = vmul.f32 1.0614054, %v5758_v57  ;;  %v5763_v49 = vpop.eup %4456 }
 0x4db   : > { %v2195_v24 = vadd.f32 1.4214138, %v2131_v7  ;;  %v1753_v31 = vmul.f32 0.3275911, %v5753_v32  ;;  %v2002_v28 = vmul.f32 1.0614054, %v5763_v49 }
 0x4dc   : > { %v2257_v47 = vmul.f32 %v5723_v23, %v2193_v17  ;;  %v4360_v17 = vld [vmem:[#allocation8 + $0x60] sm:$0xff]   ;;  %v2069_v27 = vadd.f32 -1.4531521, %v2005_v50  ;;  %v2071_v9 = vadd.f32 -1.4531521, %v2007_v25 }
 0x4dd   : > { %v2259_v5 = vmul.f32 %v5726_v42, %v2195_v24  ;;  %v2717_v24 = vmul.f32 1.442695, %v2647_v51  ;;  %4042 = vmatprep.subr.bf16.mxu1 %v4360_v17  ;;  %v1817_v34 = vadd.f32 1.0, %v1753_v31 }
 0x4de   : > { %v2321_v40 = vadd.f32 -0.28449672, %v2257_v47  ;;  %v2135_v63 = vmul.f32 %v5758_v57, %v2071_v9  ;;  %v4363_v9 = vld [vmem:[#allocation8 + $0x80] sm:$0xff]  }
 0x4df   : > { %v2323_v7 = vadd.f32 -0.28449672, %v2259_v5  ;;  %v2133_v5 = vmul.f32 %v5755_v39, %v2069_v27  ;;  %4468 = vpow2.f32 %v2717_v24  ;;  %4099 = vmatpush3.bf16.msra.mxu0 %v4363_v9 }
 0x4e0   : > { %v2385_v2 = vmul.f32 %v5723_v23, %v2321_v40  ;;  %v4459_v40 = vpop.eup %4458  ;;  %4470 = vrcp.f32 %v1816_v54  ;;  %v5785_v54 = vpop.f32.mrb[14].mxu1 }
 0x4e1   : > { %v2387_v55 = vmul.f32 %v5726_v42, %v2323_v7  ;;  %v2197_v56 = vadd.f32 1.4214138, %v2133_v5  ;;  %v5774_v8 = vpop.eup %4460  ;;  %v2199_v7 = vadd.f32 1.4214138, %v2135_v63  ;;  %4472 = vrcp.f32 %v1817_v34  ;;  %7898 = vst [vmem:[#allocation43_spill] sm:$0xff] %v5785_v54 }
 0x4e2   : > { %v2449_v47 = vadd.f32 0.2548296, %v2385_v2  ;;  %v4463_v2 = vpop.eup %4462  ;;  %v2004_v6 = vmul.f32 1.0614054, %v5774_v8  ;;  %v1553_v34 = vmul.f32 0.5, %v5633_v12 }
 0x4e3   : > { %v2451_v62 = vadd.f32 0.2548296, %v2387_v55  ;;  %v2261_v36 = vmul.f32 %v5755_v39, %v2197_v56  ;;  %v5778_v25 = vpop.eup %4464  ;;  %v2066_v55 = vadd.f32 -1.4531521, %v2002_v28 }
 0x4e4   : > { %v2513_v50 = vmul.f32 %v5723_v23, %v2449_v47  ;;  %v2263_v23 = vmul.f32 %v5758_v57, %v2199_v7  ;;  %v2006_v56 = vmul.f32 1.0614054, %v5778_v25  ;;  %v2580_v7 = vsub.f32 0.0, %v5701_v46 }
 0x4e5   : > { %v2515_v51 = vmul.f32 %v5726_v42, %v2451_v62  ;;  %v2325_v31 = vadd.f32 -0.28449672, %v2261_v36  ;;  %v2578_v42 = vsub.f32 0.0, %v5660_v0  ;;  %v2130_v5 = vmul.f32 %v5763_v49, %v2066_v55 }
 0x4e6   : > { %v2833_v27 = vmul.f32 %v4459_v40, %v2513_v50  ;;  %v2327_v62 = vadd.f32 -0.28449672, %v2263_v23  ;;  %v2068_v40 = vadd.f32 -1.4531521, %v2004_v6  ;;  %v1555_v23 = vmul.f32 0.5, %v5636_v48  ;;  %v5797_v6 = vpop.f32.mrb[30].mxu0 }
 0x4e7   : > { %v2835_v17 = vmul.f32 %v4463_v2, %v2515_v51  ;;  %v2389_v24 = vmul.f32 %v5755_v39, %v2325_v31  ;;  %v2642_v51 = vmul.f32 %v2578_v42, %v5660_v0  ;;  %7899 = vst [vmem:[#allocation44_spill] sm:$0xff] %v5797_v6  ;;  %v2194_v42 = vadd.f32 1.4214138, %v2130_v5  ;;  %v4362_v6 = vld [vmem:[#allocation8 + $0x20] sm:$0xff]   ;;  %v5844_v38 = vpop.f32.mrb[31].mxu0 }
 0x4e8   : > { %v2897_v63 = vsub.f32 1.0, %v2833_v27  ;;  %v2391_v28 = vmul.f32 %v5758_v57, %v2327_v62  ;;  %v4467_v27 = vpop.eup %4466  ;;  %v2132_v62 = vmul.f32 %v5774_v8, %v2068_v40  ;;  %v5804_v48 = vadd.f32 %v5657_v19, %v5628_v41  ;;  %7903 = vst [vmem:[#allocation48_spill] sm:$0xff] %v5844_v38  ;;  %4043 = vmatpush3.bf16.msra.mxu1 %v4362_v6 }
 0x4e9   : > { %v2899_v47 = vsub.f32 1.0, %v2835_v17  ;;  %v2453_v50 = vadd.f32 0.2548296, %v2389_v24  ;;  %v2070_v17 = vadd.f32 -1.4531521, %v2006_v56  ;;  %v4469_v9 = vpop.eup %4468  ;;  %v2644_v14 = vmul.f32 %v2580_v7, %v5701_v46 }
 0x4ea   : > { %v2455_v2 = vadd.f32 0.2548296, %v2391_v28  ;;  %v3025_v36 = vsub.f32 0.0, %v2897_v63  ;;  %v5799_v0 = vpop.eup %4470  ;;  %v1557_v56 = vmul.f32 0.5, %v5663_v58  ;;  %v2258_v46 = vmul.f32 %v5763_v49, %v2194_v42 }
 0x4eb   : > { %v2517_v31 = vmul.f32 %v5755_v39, %v2453_v50  ;;  %v3027_v55 = vsub.f32 0.0, %v2899_v47  ;;  %v2707_v39 = vmul.f32 1.442695, %v2642_v51  ;;  %v5808_v50 = vpop.eup %4472  ;;  %v2134_v5 = vmul.f32 %v5778_v25, %v2070_v17 }
 0x4ec   : > { %v2519_v12 = vmul.f32 %v5758_v57, %v2455_v2  ;;  %v3089_v57 = vsel %vm2961_vm0, %v2897_v63, %v3025_v36  ;;  %v2008_v19 = vmul.f32 1.0614054, %v5799_v0  ;;  %v2196_v58 = vadd.f32 1.4214138, %v2132_v62  ;;  %v5820_v63 = vpop.f32.mrb[15].mxu1 }
 0x4ed   : > { %v2837_v24 = vmul.f32 %v4467_v27, %v2517_v31  ;;  %v3091_v40 = vsel %vm2963_vm1, %v2899_v47, %v3027_v55  ;;  %v5818_v7 = vmul.f32 0.70710677, %v5804_v48  ;;  %7900 = vst [vmem:[#allocation45_spill] sm:$0xff] %v5820_v63  ;;  %v3153_v36 = vadd.f32 1.0, %v3089_v57 }
 0x4ee   : > { %v2839_v28 = vmul.f32 %v4469_v9, %v2519_v12  ;;  %v2009_v17 = vmul.f32 1.0614054, %v5808_v50  ;;  %v3155_v47 = vadd.f32 1.0, %v3091_v40  ;;  %v2198_v55 = vadd.f32 1.4214138, %v2134_v5 }
 0x4ef   : > { %v2901_v2 = vsub.f32 1.0, %v2837_v24  ;;  %v5830_v12 = vand.u32 2147483647, %v5818_v7  ;;  %v2582_v24 = vsub.f32 0.0, %v5710_v60  ;;  %v2322_v57 = vadd.f32 -0.28449672, %v2258_v46 }
 0x4f0   : > { %v2903_v27 = vsub.f32 1.0, %v2839_v28  ;;  %v2072_v28 = vadd.f32 -1.4531521, %v2008_v19  ;;  %v2260_v63 = vmul.f32 %v5774_v8, %v2196_v58  ;;  %v5837_v61 = vmul.f32 %v3153_v36, %v1553_v34 }
 0x4f1   : > { %v3029_v51 = vsub.f32 0.0, %v2901_v2  ;;  %v2073_v5 = vadd.f32 -1.4531521, %v2009_v17  ;;  %v2262_v46 = vmul.f32 %v5778_v25, %v2198_v55  ;;  %v1755_v26 = vmul.f32 0.3275911, %v5830_v12  ;;  %v4364_v55 = vld [vmem:[#allocation8 + $0xc8] sm:$0xff]  }
 0x4f2   : > { %v3031_v31 = vsub.f32 0.0, %v2903_v27  ;;  %7901 = vst [vmem:[#allocation46_spill] sm:$0xff] %v5837_v61  ;;  %v2136_v58 = vmul.f32 %v5799_v0, %v2072_v28  ;;  %v2386_v17 = vmul.f32 %v5763_v49, %v2322_v57  ;;  %4474 = vpow2.f32 %v2707_v39  ;;  %4100 = vmatprep.subr.bf16.mxu0 %v4364_v55 }
 0x4f3   : > { %v3093_v9 = vsel %vm2965_vm2, %v2901_v2, %v3029_v51  ;;  %v5842_v51 = vmul.f32 0.70710677, %v5825_v21  ;;  %v2137_v6 = vmul.f32 %v5808_v50, %v2073_v5  ;;  %v5875_v39 = vadd.f32 %v5677_v53, %v5628_v41 }
 0x4f4   : > { %v3157_v42 = vadd.f32 1.0, %v3093_v9  ;;  %v3095_v62 = vsel %vm2967_vm3, %v2903_v27, %v3031_v31  ;;  %v5846_v27 = vmul.f32 %v3155_v47, %v1555_v23  ;;  %v2711_v31 = vmul.f32 1.442695, %v2644_v14 }
 0x4f5   : > { %v3159_v40 = vadd.f32 1.0, %v3095_v62  ;;  %v5857_v36 = vand.u32 2147483647, %v5842_v51  ;;  %v2324_v47 = vadd.f32 -0.28449672, %v2260_v63  ;;  %v2584_v9 = vsub.f32 0.0, %v5749_v16 }
 0x4f6   : > { %v5839_v2 = vmul.f32 %v3157_v42, %v1557_v56  ;;  %7904 = vst [vmem:[#allocation49_spill] sm:$0xff] %v5846_v27  ;;  %v2646_v56 = vmul.f32 %v2582_v24, %v5710_v60  ;;  %v2326_v42 = vadd.f32 -0.28449672, %v2262_v46  ;;  %v1819_v60 = vadd.f32 1.0, %v1755_v26  ;;  %v4365_v62 = vld [vmem:[#allocation8 + $0x88] sm:$0xff]  }
 0x4f7   : > { %v5848_v19 = vmul.f32 %v3159_v40, %v1559_v35  ;;  %v2200_v28 = vadd.f32 1.4214138, %v2136_v58  ;;  %v1754_v35 = vmul.f32 0.3275911, %v5857_v36  ;;  %v5867_v14 = vadd.f32 %v5667_v20, %v5647_v52  ;;  %4101 = vmatpush3.bf16.msra.mxu0 %v4365_v62 }
 0x4f8   : > { %7902 = vst [vmem:[#allocation47_spill] sm:$0xff] %v5839_v2  ;;  %v2715_v24 = vmul.f32 1.442695, %v2646_v56  ;;  %4476 = vpow2.f32 %v2711_v31  ;;  %v5871_v63 = vadd.f32 %v5675_v1, %v5626_v44  ;;  %v2450_v57 = vadd.f32 0.2548296, %v2386_v17  ;;  %v5886_v56 = vpop.f32.mrb[16].mxu1 }
 0x4f9   : > { %7905 = vst [vmem:[#allocation50_spill] sm:$0xff] %v5848_v19  ;;  %v2388_v40 = vmul.f32 %v5774_v8, %v2324_v47  ;;  %v2648_v5 = vmul.f32 %v2584_v9, %v5749_v16  ;;  %v2201_v46 = vadd.f32 1.4214138, %v2137_v6  ;;  %v2390_v20 = vmul.f32 %v5778_v25, %v2326_v42  ;;  %7906 = vst [vmem:[#allocation51_spill] sm:$0xff] %v5886_v56  ;;  %v5890_v17 = vpop.f32.mrb[32].mxu0 }
 0x4fa   : > { %4478 = vrcp.f32 %v1819_v60  ;;  %v5881_v26 = vmul.f32 0.70710677, %v5867_v14  ;;  %v5884_v1 = vmul.f32 0.70710677, %v5871_v63  ;;  %v2264_v53 = vmul.f32 %v5799_v0, %v2200_v28  ;;  %7907 = vst [vmem:[#allocation52_spill] sm:$0xff] %v5890_v17  ;;  %v5965_v13 = vpop.f32.mrb[33].mxu0 }
 0x4fb   : > { %4480 = vpow2.f32 %v2715_v24  ;;  %v2585_v58 = vsub.f32 0.0, %v5753_v32  ;;  %v1818_v31 = vadd.f32 1.0, %v1754_v35  ;;  %v5899_v9 = vmul.f32 0.70710677, %v5875_v39  ;;  %7911 = vst [vmem:[#allocation56_spill] sm:$0xff] %v5965_v13 }
 0x4fc   : > { %v5893_v16 = vand.u32 2147483647, %v5881_v26  ;;  %v5896_v47 = vand.u32 2147483647, %v5884_v1  ;;  %v2514_v6 = vmul.f32 %v5763_v49, %v2450_v57  ;;  %v2452_v55 = vadd.f32 0.2548296, %v2388_v40  ;;  %v4475_v23 = vpop.eup %4474 }
 0x4fd   : > { %v2454_v42 = vadd.f32 0.2548296, %v2390_v20  ;;  %v2265_v60 = vmul.f32 %v5808_v50, %v2201_v46  ;;  %v2328_v24 = vadd.f32 -0.28449672, %v2264_v53  ;;  %v2719_v28 = vmul.f32 1.442695, %v2648_v5 }
 0x4fe   : > { %v1756_v62 = vmul.f32 0.3275911, %v5893_v16  ;;  %4482 = vrcp.f32 %v1818_v31  ;;  %v1757_v35 = vmul.f32 0.3275911, %v5896_v47  ;;  %v2649_v34 = vmul.f32 %v2585_v58, %v5753_v32  ;;  %v5916_v32 = vpop.f32.mrb[17].mxu1 }
 0x4ff   : > { %v5907_v19 = vand.u32 2147483647, %v5899_v9  ;;  %v5911_v49 = vadd.f32 %v5685_v33, %v5630_v43  ;;  %v2834_v57 = vmul.f32 %v4475_v23, %v2514_v6  ;;  %v2516_v46 = vmul.f32 %v5774_v8, %v2452_v55  ;;  %7908 = vst [vmem:[#allocation53_spill] sm:$0xff] %v5916_v32 }
 0x500   : > { %v1820_v27 = vadd.f32 1.0, %v1756_v62  ;;  %v2518_v5 = vmul.f32 %v5778_v25, %v2454_v42  ;;  %v2329_v20 = vadd.f32 -0.28449672, %v2265_v60  ;;  %v2392_v53 = vmul.f32 %v5799_v0, %v2328_v24 }
 0x501   : > { %v1821_v31 = vadd.f32 1.0, %v1757_v35  ;;  %v2721_v62 = vmul.f32 1.442695, %v2649_v34  ;;  %v1759_v33 = vmul.f32 0.3275911, %v5907_v19  ;;  %v2898_v8 = vsub.f32 1.0, %v2834_v57 }
 0x502   : > { %v4477_v40 = vpop.eup %4476  ;;  %4484 = vrcp.f32 %v1820_v27  ;;  %v5922_v23 = vmul.f32 0.70710677, %v5911_v49  ;;  %v5926_v25 = vadd.f32 %v5687_v4, %v5647_v52  ;;  %v5930_v27 = vadd.f32 %v5698_v29, %v5626_v44 }
 0x503   : > { %4486 = vpow2.f32 %v2719_v28  ;;  %v2836_v55 = vmul.f32 %v4477_v40, %v2516_v46  ;;  %v2393_v60 = vmul.f32 %v5808_v50, %v2329_v20  ;;  %v2456_v24 = vadd.f32 0.2548296, %v2392_v53 }
 0x504   : > { %v5918_v58 = vpop.eup %4478  ;;  %v5934_v34 = vand.u32 2147483647, %v5922_v23  ;;  %4488 = vrcp.f32 %v1821_v31  ;;  %v5938_v35 = vmul.f32 0.70710677, %v5926_v25  ;;  %v1823_v4 = vadd.f32 1.0, %v1759_v33 }
 0x505   : > { %v4481_v6 = vpop.eup %4480  ;;  %v2011_v28 = vmul.f32 1.0614054, %v5918_v58  ;;  %4490 = vpow2.f32 %v2721_v62  ;;  %v5947_v46 = vmul.f32 0.70710677, %v5930_v27  ;;  %v2900_v20 = vsub.f32 1.0, %v2836_v55 }
 0x506   : > { %v2838_v42 = vmul.f32 %v4481_v6, %v2518_v5  ;;  %7909 = vst [vmem:[#allocation54_spill] sm:$0xff] %v5938_v35  ;;  %v1758_v57 = vmul.f32 0.3275911, %v5934_v34  ;;  %v5944_v40 = vand.u32 2147483647, %v5938_v35  ;;  %v3026_v5 = vsub.f32 0.0, %v2898_v8 }
 0x507   : > { %7910 = vst [vmem:[#allocation55_spill] sm:$0xff] %v5947_v46  ;;  %v2457_v6 = vadd.f32 0.2548296, %v2393_v60  ;;  %v2520_v31 = vmul.f32 %v5799_v0, %v2456_v24  ;;  %v2075_v61 = vadd.f32 -1.4531521, %v2011_v28  ;;  %v1554_v2 = vmul.f32 0.5, %v5645_v15 }
 0x508   : > { %v5941_v29 = vpop.eup %4482  ;;  %v2902_v53 = vsub.f32 1.0, %v2838_v42  ;;  %v1760_v62 = vmul.f32 0.3275911, %v5944_v40  ;;  %v5952_v33 = vand.u32 2147483647, %v5947_v46  ;;  %4492 = vrcp.f32 %v1823_v4  ;;  %v4366_v60 = vld [vmem:[#allocation8 + $0x68] sm:$0xff]  }
 0x509   : > { %v2010_v32 = vmul.f32 1.0614054, %v5941_v29  ;;  %v1822_v17 = vadd.f32 1.0, %v1758_v57  ;;  %v1556_v55 = vmul.f32 0.5, %v5655_v59  ;;  %v3090_v28 = vsel %vm2962_vm4, %v2898_v8, %v3026_v5  ;;  %4044 = vmatprep.subr.bf16.mxu1 %v4366_v60  ;;  %v4368_v5 = vld [vmem:[#allocation8 + $0xd0] sm:$0xff]  }
 0x50a   : > { %v1824_v42 = vadd.f32 1.0, %v1760_v62  ;;  %v1761_v0 = vmul.f32 0.3275911, %v5952_v33  ;;  %v3028_v38 = vsub.f32 0.0, %v2900_v20  ;;  %v1558_v15 = vmul.f32 0.5, %v5683_v30  ;;  %4102 = vmatprep.subr.bf16.mxu0 %v4368_v5 }
 0x50b   : > { %v3030_v54 = vsub.f32 0.0, %v2902_v53  ;;  %v2521_v57 = vmul.f32 %v5808_v50, %v2457_v6  ;;  %v2139_v46 = vmul.f32 %v5918_v58, %v2075_v61  ;;  %v5968_v59 = vmul.f32 0.5, %v5717_v11 }
 0x50c   : > { %v5956_v56 = vpop.eup %4484  ;;  %v2074_v62 = vadd.f32 -1.4531521, %v2010_v32  ;;  %4494 = vrcp.f32 %v1822_v17  ;;  %v2587_v30 = vsub.f32 0.0, %v5830_v12  ;;  %v5976_v50 = vadd.f32 %v5703_v10, %v5628_v41 }
 0x50d   : > { %v4487_v24 = vpop.eup %4486  ;;  %v2012_v8 = vmul.f32 1.0614054, %v5956_v56  ;;  %4496 = vrcp.f32 %v1824_v42  ;;  %v3154_v6 = vadd.f32 1.0, %v3090_v28  ;;  %v3092_v11 = vsel %vm2964_vm5, %v2900_v20, %v3028_v38  ;;  %v5982_v42 = vpop.f32.mrb[18].mxu1 }
 0x50e   : > { %v2840_v4 = vmul.f32 %v4487_v24, %v2520_v31  ;;  %v5971_v35 = vpop.eup %4488  ;;  %v1825_v31 = vadd.f32 1.0, %v1761_v0  ;;  %v3094_v17 = vsel %vm2966_vm6, %v2902_v53, %v3030_v54  ;;  %v2203_v24 = vadd.f32 1.4214138, %v2139_v46  ;;  %7912 = vst [vmem:[#allocation57_spill] sm:$0xff] %v5982_v42 }
 0x50f   : > { %v4491_v61 = vpop.eup %4490  ;;  %v2138_v0 = vmul.f32 %v5941_v29, %v2074_v62  ;;  %v2076_v10 = vadd.f32 -1.4531521, %v2012_v8  ;;  %v2013_v13 = vmul.f32 1.0614054, %v5971_v35  ;;  %v5987_v28 = vmul.f32 0.70710677, %v5976_v50 }
 0x510   : > { %v2904_v32 = vsub.f32 1.0, %v2840_v4  ;;  %v2841_v60 = vmul.f32 %v4491_v61, %v2521_v57  ;;  %v3156_v22 = vadd.f32 1.0, %v3092_v11  ;;  %v2651_v38 = vmul.f32 %v2587_v30, %v5830_v12 }
 0x511   : > { %4498 = vrcp.f32 %v1825_v31  ;;  %v3158_v46 = vadd.f32 1.0, %v3094_v17  ;;  %v5997_v20 = vmul.f32 0.5, %v5804_v48  ;;  %v2586_v53 = vsub.f32 0.0, %v5857_v36 }
 0x512   : > { %v5993_v54 = vpop.eup %4492  ;;  %v6001_v4 = vand.u32 2147483647, %v5987_v28  ;;  %v6003_v57 = vmul.f32 %v3154_v6, %v1554_v2  ;;  %v3032_v45 = vsub.f32 0.0, %v2904_v32  ;;  %v2905_v62 = vsub.f32 1.0, %v2841_v60 }
 0x513   : > { %v2267_v12 = vmul.f32 %v5918_v58, %v2203_v24  ;;  %v2202_v8 = vadd.f32 1.4214138, %v2138_v0  ;;  %v2140_v5 = vmul.f32 %v5956_v56, %v2076_v10  ;;  %v2077_v30 = vadd.f32 -1.4531521, %v2013_v13 }
 0x514   : > { %7913 = vst [vmem:[#allocation58_spill] sm:$0xff] %v6003_v57  ;;  %v1763_v31 = vmul.f32 0.3275911, %v6001_v4  ;;  %v6008_v61 = vmul.f32 %v3156_v22, %v1556_v55  ;;  %v2725_v48 = vmul.f32 1.442695, %v2651_v38  ;;  %v2588_v11 = vsub.f32 0.0, %v5893_v16 }
 0x515   : > { %v2015_v17 = vmul.f32 1.0614054, %v5993_v54  ;;  %v6014_v2 = vmul.f32 %v3158_v46, %v1558_v15  ;;  %v6017_v6 = vmul.f32 0.5, %v5825_v21  ;;  %v2650_v60 = vmul.f32 %v2586_v53, %v5857_v36 }
 0x516   : > { %7914 = vst [vmem:[#allocation59_spill] sm:$0xff] %v6008_v61  ;;  %v6012_v42 = vpop.eup %4494  ;;  %v1827_v24 = vadd.f32 1.0, %v1763_v31  ;;  %v3096_v55 = vsel %vm2968_vm7, %v2904_v32, %v3032_v45  ;;  %v3033_v0 = vsub.f32 0.0, %v2905_v62  ;;  %v2589_v10 = vsub.f32 0.0, %v5896_v47  ;;  %v6028_v61 = vpop.f32.mrb[34].mxu0  ;;  %v4367_v32 = vld [vmem:[#allocation8 + $0x28] sm:$0xff]  }
 0x517   : > { %7915 = vst [vmem:[#allocation60_spill] sm:$0xff] %v6014_v2  ;;  %v6020_v13 = vpop.eup %4496  ;;  %v2591_v22 = vsub.f32 0.0, %v5907_v19  ;;  %v2331_v38 = vadd.f32 -0.28449672, %v2267_v12  ;;  %v2266_v15 = vmul.f32 %v5941_v29, %v2202_v8  ;;  %v2204_v46 = vadd.f32 1.4214138, %v2140_v5  ;;  %4045 = vmatpush3.bf16.msra.mxu1 %v4367_v32 }
 0x518   : > { %v2141_v21 = vmul.f32 %v5971_v35, %v2077_v30  ;;  %7916 = vst [vmem:[#allocation61_spill] sm:$0xff] %v6028_v61  ;;  %4500 = vpow2.f32 %v2725_v48  ;;  %v2652_v36 = vmul.f32 %v2588_v11, %v5893_v16  ;;  %v2079_v53 = vadd.f32 -1.4531521, %v2015_v17  ;;  %v6065_v32 = vpop.f32.mrb[19].mxu1 }
 0x519   : > { %v2014_v3 = vmul.f32 1.0614054, %v6012_v42  ;;  %v3160_v45 = vadd.f32 1.0, %v3096_v55  ;;  %v2723_v31 = vmul.f32 1.442695, %v2650_v60  ;;  %4502 = vrcp.f32 %v1827_v24  ;;  %7919 = vst [vmem:[#allocation62_spill] sm:$0xff] %v6065_v32 }
 0x51a   : > { %v2016_v2 = vmul.f32 1.0614054, %v6020_v13  ;;  %v3097_v8 = vsel %vm2969_vm8, %v2905_v62, %v3033_v0  ;;  %v6038_v5 = vmul.f32 0.5, %v5867_v14  ;;  %v2653_v30 = vmul.f32 %v2589_v10, %v5896_v47  ;;  %v4369_v10 = vld [vmem:[#allocation8 + $0x90] sm:$0xff]  }
 0x51b   : > { %v6033_v12 = vpop.eup %4498  ;;  %v2655_v16 = vmul.f32 %v2591_v22, %v5907_v19  ;;  %v2395_v48 = vmul.f32 %v5918_v58, %v2331_v38  ;;  %v2330_v11 = vadd.f32 -0.28449672, %v2266_v15  ;;  %v2268_v17 = vmul.f32 %v5956_v56, %v2204_v46  ;;  %4103 = vmatpush3.bf16.msra.mxu0 %v4369_v10 }
 0x51c   : > { %v2205_v60 = vadd.f32 1.4214138, %v2141_v21  ;;  %v2727_v24 = vmul.f32 1.442695, %v2652_v36  ;;  %v2143_v55 = vmul.f32 %v5993_v54, %v2079_v53  ;;  %v2078_v57 = vadd.f32 -1.4531521, %v2014_v3 }
 0x51d   : > { %v6047_v62 = vadd.f32 %v7917_v18, %v5630_v43  ;;  %v6050_v14 = vmul.f32 %v3160_v45, %v5968_v59  ;;  %v6053_v19 = vmul.f32 0.5, %v5871_v63  ;;  %v2080_v47 = vadd.f32 -1.4531521, %v2016_v2 }
 0x51e   : > { %v2017_v0 = vmul.f32 1.0614054, %v6033_v12  ;;  %v3161_v22 = vadd.f32 1.0, %v3097_v8  ;;  %4504 = vpow2.f32 %v2723_v31  ;;  %v2729_v38 = vmul.f32 1.442695, %v2653_v30 }
 0x51f   : > { %7918 = vst [vmem:[#allocation33_spill] sm:$0xff] %v6050_v14  ;;  %v2733_v15 = vmul.f32 1.442695, %v2655_v16  ;;  %v2459_v46 = vadd.f32 0.2548296, %v2395_v48  ;;  %v2394_v21 = vmul.f32 %v5941_v29, %v2330_v11  ;;  %v2269_v53 = vmul.f32 %v5971_v35, %v2205_v60 }
 0x520   : > { %v2332_v36 = vadd.f32 -0.28449672, %v2268_v17  ;;  %v6059_v59 = vmul.f32 0.5, %v5875_v39  ;;  %v2207_v63 = vadd.f32 1.4214138, %v2143_v55  ;;  %v2142_v2 = vmul.f32 %v6012_v42, %v2078_v57 }
 0x521   : > { %v6063_v3 = vmul.f32 0.70710677, %v6047_v62  ;;  %4506 = vpow2.f32 %v2727_v24  ;;  %v2590_v45 = vsub.f32 0.0, %v5934_v34  ;;  %v2144_v31 = vmul.f32 %v6020_v13, %v2080_v47  ;;  %v6084_v47 = vpop.f32.mrb[35].mxu0 }
 0x522   : > { %v2081_v8 = vadd.f32 -1.4531521, %v2017_v0  ;;  %v4501_v30 = vpop.eup %4500  ;;  %v6070_v16 = vmul.f32 %v3161_v22, %v5990_v37  ;;  %4508 = vpow2.f32 %v2729_v38  ;;  %v6073_v39 = vmul.f32 0.5, %v5911_v49  ;;  %7921 = vst [vmem:[#allocation64_spill] sm:$0xff] %v6084_v47 }
 0x523   : > { %v2592_v57 = vsub.f32 0.0, %v5944_v40  ;;  %v6076_v48 = vpop.eup %4502  ;;  %v2523_v11 = vmul.f32 %v5918_v58, %v2459_v46  ;;  %v2458_v17 = vadd.f32 0.2548296, %v2394_v21  ;;  %v2333_v60 = vadd.f32 -0.28449672, %v2269_v53 }
 0x524   : > { %7920 = vst [vmem:[#allocation63_spill] sm:$0xff] %v6070_v16  ;;  %v6080_v24 = vand.u32 2147483647, %v6063_v3  ;;  %v2396_v55 = vmul.f32 %v5956_v56, %v2332_v36  ;;  %v2271_v37 = vmul.f32 %v5993_v54, %v2207_v63  ;;  %4510 = vpow2.f32 %v2733_v15  ;;  %v4370_v63 = vld [vmem:[#allocation8 + $0xd8] sm:$0xff]  }
 0x525   : > { %v2206_v18 = vadd.f32 1.4214138, %v2142_v2  ;;  %v2654_v49 = vmul.f32 %v2590_v45, %v5934_v34  ;;  %v2208_v0 = vadd.f32 1.4214138, %v2144_v31  ;;  %v2145_v10 = vmul.f32 %v6033_v12, %v2081_v8  ;;  %4104 = vmatprep.subr.bf16.mxu0 %v4370_v63 }
 0x526   : > { %v1762_v58 = vmul.f32 0.3275911, %v6080_v24  ;;  %v6090_v22 = vmul.f32 0.5, %v5926_v25  ;;  %v2656_v38 = vmul.f32 %v2592_v57, %v5944_v40  ;;  %v2593_v46 = vsub.f32 0.0, %v5952_v33  ;;  %v7922_v25 = vld [vmem:[#allocation34_spill] sm:$0xff]  ;;  %v4371_v40 = vld [vmem:[#allocation8 + $0x98] sm:$0xff]  }
 0x527   : > { %v2019_v21 = vmul.f32 1.0614054, %v6076_v48  ;;  %v2843_v15 = vmul.f32 %v4501_v30, %v2523_v11  ;;  %v2522_v36 = vmul.f32 %v5941_v29, %v2458_v17  ;;  %v2397_v53 = vmul.f32 %v5971_v35, %v2333_v60  ;;  %v7923_v29 = vld [vmem:[#allocation35_spill] sm:$0xff]  ;;  %4105 = vmatpush3.bf16.msra.mxu0 %v4371_v40 }
 0x528   : > { %v1826_v34 = vadd.f32 1.0, %v1762_v58  ;;  %v4505_v2 = vpop.eup %4504  ;;  %v2460_v45 = vadd.f32 0.2548296, %v2396_v55  ;;  %v2335_v31 = vadd.f32 -0.28449672, %v2271_v37  ;;  %v2270_v8 = vmul.f32 %v6012_v42, %v2206_v18 }
 0x529   : > { %v6100_v16 = vadd.f32 %v7922_v25, %v5647_v52  ;;  %v2731_v57 = vmul.f32 1.442695, %v2654_v49  ;;  %v2272_v14 = vmul.f32 %v6020_v13, %v2208_v0  ;;  %v2209_v30 = vadd.f32 1.4214138, %v2145_v10 }
 0x52a   : > { %v6105_v11 = vadd.f32 %v7923_v29, %v5626_v44  ;;  %vm2971_vm9 = vcmp.ge.f32.partialorder %v5818_v7, 0.0  ;;  %v2735_v17 = vmul.f32 1.442695, %v2656_v38  ;;  %v2657_v60 = vmul.f32 %v2593_v46, %v5952_v33  ;;  %v6119_v33 = vpop.f32.mrb[20].mxu1 }
 0x52b   : > { %v2083_v55 = vadd.f32 -1.4531521, %v2019_v21  ;;  %4512 = vrcp.f32 %v1826_v34  ;;  %v4507_v37 = vpop.eup %4506  ;;  %v2907_v18 = vsub.f32 1.0, %v2843_v15  ;;  %v6109_v58 = vmul.f32 %v4505_v2, %v2522_v36  ;;  %7925 = vst [vmem:[#allocation35_spill] sm:$0xff] %v6119_v33  ;;  %v6125_v36 = vpop.f32.mrb[36].mxu0  ;;  %v7927_v33 = vld [vmem:[#allocation36_spill] sm:$0xff] }
 0x52c   : > { %v2461_v49 = vadd.f32 0.2548296, %v2397_v53  ;;  %v6112_v0 = vmul.f32 0.70710677, %v6100_v16  ;;  %v4509_v10 = vpop.eup %4508  ;;  %v2524_v25 = vmul.f32 %v5956_v56, %v2460_v45  ;;  %v2399_v63 = vmul.f32 %v5993_v54, %v2335_v31  ;;  %7926 = vst [vmem:[#allocation65_spill] sm:$0xff] %v6125_v36 }
 0x52d   : > { %v2334_v29 = vadd.f32 -0.28449672, %v2270_v8  ;;  %v6117_v38 = vmul.f32 0.70710677, %v6105_v11  ;;  %4514 = vpow2.f32 %v2731_v57  ;;  %v2336_v46 = vadd.f32 -0.28449672, %v2272_v14 }
 0x52e   : > { %v2273_v21 = vmul.f32 %v6033_v12, %v2209_v30  ;;  %v6123_v15 = vand.u32 2147483647, %v6112_v0  ;;  %v4511_v53 = vpop.eup %4510  ;;  %4516 = vpow2.f32 %v2735_v17  ;;  %v2737_v56 = vmul.f32 1.442695, %v2657_v60 }
 0x52f   : > { %7924 = vst [vmem:[#allocation34_spill] sm:$0xff] %v6117_v38  ;;  %v2147_v34 = vmul.f32 %v6076_v48, %v2083_v55  ;;  %v6129_v2 = vand.u32 2147483647, %v6117_v38  ;;  %v3035_v45 = vsub.f32 0.0, %v2907_v18  ;;  %v2906_v31 = vsub.f32 1.0, %v6109_v58 }
 0x530   : > { %v2525_v14 = vmul.f32 %v5971_v35, %v2461_v49  ;;  %v1764_v8 = vmul.f32 0.3275911, %v6123_v15  ;;  %v6134_v40 = vmul.f32 %v4507_v37, %v2524_v25  ;;  %v2463_v57 = vadd.f32 0.2548296, %v2399_v63 }
 0x531   : > { %v2595_v30 = vsub.f32 0.0, %v6001_v4  ;;  %v1765_v17 = vmul.f32 0.3275911, %v6129_v2  ;;  %v2398_v60 = vmul.f32 %v6012_v42, %v2334_v29  ;;  %v2400_v55 = vmul.f32 %v6020_v13, %v2336_v46 }
 0x532   : > { %v2337_v36 = vadd.f32 -0.28449672, %v2273_v21  ;;  %v6142_v47 = vadd.f32 %v7927_v33, %v5628_v41  ;;  %v6145_v35 = vmul.f32 0.5, %v5930_v27  ;;  %4518 = vpow2.f32 %v2737_v56 }
 0x533   : > { %v2211_v37 = vadd.f32 1.4214138, %v2147_v34  ;;  %v1828_v58 = vadd.f32 1.0, %v1764_v8  ;;  %v3099_v49 = vsel %vm2971_vm9, %v2907_v18, %v3035_v45  ;;  %vm2970_vm10 = vcmp.ge.f32.partialorder %v5842_v51, 0.0  ;;  %v6161_v18 = vpop.f32.mrb[21].mxu1  ;;  %v7930_v8 = vld [vmem:[#allocation37_spill] sm:$0xff] }
 0x534   : > { %v6150_v25 = vmul.f32 %v4509_v10, %v2525_v14  ;;  %v1829_v63 = vadd.f32 1.0, %v1765_v17  ;;  %v6153_v29 = vmul.f32 0.70710677, %v6142_v47  ;;  %v3034_v33 = vsub.f32 0.0, %v2906_v31  ;;  %7929 = vst [vmem:[#allocation66_spill] sm:$0xff] %v6161_v18 }
 0x535   : > { %v6155_v46 = vpop.eup %4512  ;;  %v2908_v27 = vsub.f32 1.0, %v6134_v40  ;;  %vm2972_vm11 = vcmp.ge.f32.partialorder %v5881_v26, 0.0  ;;  %v2527_v21 = vmul.f32 %v5993_v54, %v2463_v57  ;;  %v2659_v7 = vmul.f32 %v2595_v30, %v6001_v4  ;;  %v7931_v54 = vld [vmem:[#allocation38_spill] sm:$0xff] }
 0x536   : > { %7928 = vst [vmem:[#allocation36_spill] sm:$0xff] %v6153_v29  ;;  %v2462_v56 = vadd.f32 0.2548296, %v2398_v60  ;;  %v2464_v10 = vadd.f32 0.2548296, %v2400_v55  ;;  %v2401_v34 = vmul.f32 %v6033_v12, %v2337_v36  ;;  %v2275_v14 = vmul.f32 %v6076_v48, %v2211_v37 }
 0x537   : > { %v6165_v45 = vand.u32 2147483647, %v6153_v29  ;;  %4520 = vrcp.f32 %v1828_v58  ;;  %v6170_v40 = vadd.f32 %v7930_v8, %v5630_v43  ;;  %v6174_v57 = vadd.f32 %v7931_v54, %v5647_v52  ;;  %v4515_v4 = vpop.eup %4514 }
 0x538   : > { %v2909_v30 = vsub.f32 1.0, %v6150_v25  ;;  %vm2973_vm12 = vcmp.ge.f32.partialorder %v5884_v1, 0.0  ;;  %v2018_v36 = vmul.f32 1.0614054, %v6155_v46  ;;  %4522 = vrcp.f32 %v1829_v63  ;;  %v4517_v60 = vpop.eup %4516 }
 0x539   : > { %v1767_v17 = vmul.f32 0.3275911, %v6165_v45  ;;  %v3036_v55 = vsub.f32 0.0, %v2908_v27  ;;  %v6180_v37 = vmul.f32 %v4511_v53, %v2527_v21  ;;  %v2741_v58 = vmul.f32 1.442695, %v2659_v7  ;;  %v4372_v21 = vld [vmem:[#allocation8 + $0x70] sm:$0xff]  }
 0x53a   : > { %v6183_v8 = vmul.f32 0.70710677, %v6170_v40  ;;  %v2526_v54 = vmul.f32 %v6012_v42, %v2462_v56  ;;  %v2465_v18 = vadd.f32 0.2548296, %v2401_v34  ;;  %v6187_v25 = vmul.f32 0.70710677, %v6174_v57  ;;  %4046 = vmatprep.subr.bf16.mxu1 %v4372_v21 }
 0x53b   : > { %v1831_v32 = vadd.f32 1.0, %v1767_v17  ;;  %v2528_v61 = vmul.f32 %v6020_v13, %v2464_v10  ;;  %v6191_v63 = vmul.f32 0.5, %v5976_v50  ;;  %v2339_v29 = vadd.f32 -0.28449672, %v2275_v14  ;;  %v6199_v56 = vpop.f32.mrb[37].mxu0  ;;  %v7934_v17 = vld [vmem:[#allocation39_spill] sm:$0xff] }
 0x53c   : > { %7932 = vst [vmem:[#allocation37_spill] sm:$0xff] %v6187_v25  ;;  %v6194_v53 = vand.u32 2147483647, %v6183_v8  ;;  %v3163_v7 = vadd.f32 1.0, %v3099_v49  ;;  %v2082_v38 = vadd.f32 -1.4531521, %v2018_v36  ;;  %v4519_v34 = vpop.eup %4518  ;;  %v3098_v13 = vsel %vm2970_vm10, %v2906_v31, %v3034_v33 }
 0x53d   : > { %4524 = vrcp.f32 %v1831_v32  ;;  %v6197_v42 = vand.u32 2147483647, %v6187_v25  ;;  %7933 = vst [vmem:[#allocation38_spill] sm:$0xff] %v6199_v56  ;;  %v3037_v10 = vsub.f32 0.0, %v2909_v30  ;;  %v2911_v50 = vsub.f32 1.0, %v6180_v37 }
 0x53e   : > { %vm2975_vm13 = vcmp.ge.f32.partialorder %v5899_v9, 0.0  ;;  %v1766_v14 = vmul.f32 0.3275911, %v6194_v53  ;;  %v3100_v32 = vsel %vm2972_vm11, %v2908_v27, %v3036_v55  ;;  %v6208_v49 = vmul.f32 %v4515_v4, %v2526_v54 }
 0x53f   : > { %v1768_v36 = vmul.f32 0.3275911, %v6197_v42  ;;  %v6213_v56 = vadd.f32 %v7934_v17, %v5626_v44  ;;  %v6215_v51 = vmul.f32 %v4517_v60, %v2528_v61  ;;  %v2529_v31 = vmul.f32 %v6033_v12, %v2465_v18  ;;  %v7935_v60 = vld [vmem:[#allocation54_spill] sm:$0xff] }
 0x540   : > { %v2403_v33 = vmul.f32 %v6076_v48, %v2339_v29  ;;  %v1830_v37 = vadd.f32 1.0, %v1766_v14  ;;  %v3162_v25 = vadd.f32 1.0, %v3098_v13  ;;  %4526 = vpow2.f32 %v2741_v58  ;;  %v7936_v58 = vld [vmem:[#allocation40_spill] sm:$0xff] }
 0x541   : > { %v2146_v26 = vmul.f32 %v6155_v46, %v2082_v38  ;;  %v1832_v27 = vadd.f32 1.0, %v1768_v36  ;;  %v6220_v4 = vpop.eup %4520  ;;  %v3164_v55 = vadd.f32 1.0, %v3100_v32  ;;  %v3101_v54 = vsel %vm2973_vm12, %v2909_v30, %v3037_v10  ;;  %v4374_v10 = vld [vmem:[#allocation8 + $0xe0] sm:$0xff]  }
 0x542   : > { %v3039_v21 = vsub.f32 0.0, %v2911_v50  ;;  %4528 = vrcp.f32 %v1830_v37  ;;  %v6224_v61 = vpop.eup %4522  ;;  %v2910_v12 = vsub.f32 1.0, %v6208_v49  ;;  %vm2974_vm14 = vcmp.ge.f32.partialorder %v5922_v23, 0.0  ;;  %4106 = vmatprep.subr.bf16.mxu0 %v4374_v10  ;;  %v7941_v37 = vld [vmem:[#allocation55_spill] sm:$0xff] }
 0x543   : > { %v2594_v29 = vsub.f32 0.0, %v6080_v24  ;;  %4530 = vrcp.f32 %v1832_v27  ;;  %v6230_v38 = vmul.f32 0.70710677, %v6213_v56  ;;  %v2912_v18 = vsub.f32 1.0, %v6215_v51 }
 0x544   : > { %vm2976_vm15 = vcmp.ge.f32.partialorder %v7935_v60, 0.0  ;;  %v2849_v1 = vmul.f32 %v4519_v34, %v2529_v31  ;;  %v2467_v30 = vadd.f32 0.2548296, %v2403_v33  ;;  %v6236_v13 = vadd.f32 %v7936_v58, %v5628_v41  ;;  %v6252_v33 = vpop.f32.mrb[22].mxu1  ;;  %v7945_v60 = vld [vmem:[#allocation41_spill] sm:$0xff] }
 0x545   : > { %v6239_v14 = vmul.f32 %v3163_v7, %v5997_v20  ;;  %v2210_v32 = vadd.f32 1.4214138, %v2146_v26  ;;  %v2020_v49 = vmul.f32 1.0614054, %v6220_v4  ;;  %v6243_v36 = vand.u32 2147483647, %v6230_v38 }
 0x546   : > { %v6246_v17 = vmul.f32 %v3162_v25, %v6017_v6  ;;  %v3165_v51 = vadd.f32 1.0, %v3101_v54  ;;  %v2021_v34 = vmul.f32 1.0614054, %v6224_v61  ;;  %v6250_v31 = vmul.f32 0.70710677, %v6236_v13  ;;  %7940 = vst [vmem:[#allocation67_spill] sm:$0xff] %v6252_v33 }
 0x547   : > { %7937 = vst [vmem:[#allocation39_spill] sm:$0xff] %v6239_v14  ;;  %v6254_v20 = vpop.eup %4524  ;;  %v3103_v7 = vsel %vm2975_vm13, %v2911_v50, %v3039_v21  ;;  %vm2977_vm0 = vcmp.ge.f32.partialorder %v7941_v37, 0.0  ;;  %v6260_v26 = vmul.f32 0.5, %v6047_v62  ;;  %v2658_v6 = vmul.f32 %v2594_v29, %v6080_v24 }
 0x548   : > { %7938 = vst [vmem:[#allocation54_spill] sm:$0xff] %v6246_v17  ;;  %7939 = vst [vmem:[#allocation40_spill] sm:$0xff] %v6250_v31  ;;  %v1769_v25 = vmul.f32 0.3275911, %v6243_v36  ;;  %v3038_v27 = vsub.f32 0.0, %v2910_v12  ;;  %v2913_v54 = vsub.f32 1.0, %v2849_v1  ;;  %v2531_v58 = vmul.f32 %v6076_v48, %v2467_v30 }
 0x549   : > { %v6266_v10 = vand.u32 2147483647, %v6250_v31  ;;  %v3040_v14 = vsub.f32 0.0, %v2912_v18  ;;  %v2274_v9 = vmul.f32 %v6155_v46, %v2210_v32  ;;  %v2084_v50 = vadd.f32 -1.4531521, %v2020_v49 }
 0x54a   : > { %v1833_v21 = vadd.f32 1.0, %v1769_v25  ;;  %v6270_v17 = vmul.f32 %v3164_v55, %v6038_v5  ;;  %v6273_v62 = vmul.f32 %v3165_v51, %v6053_v19  ;;  %v2085_v24 = vadd.f32 -1.4531521, %v2021_v34  ;;  %v4527_v1 = vpop.eup %4526  ;;  %v4373_v19 = vld [vmem:[#allocation8 + $0x30] sm:$0xff]  }
 0x54b   : > { %v2023_v29 = vmul.f32 1.0614054, %v6254_v20  ;;  %v3167_v33 = vadd.f32 1.0, %v3103_v7  ;;  %v2739_v48 = vmul.f32 1.442695, %v2658_v6  ;;  %v3102_v32 = vsel %vm2974_vm14, %v2910_v12, %v3038_v27  ;;  %4047 = vmatpush3.bf16.msra.mxu1 %v4373_v19 }
 0x54c   : > { %7942 = vst [vmem:[#allocation55_spill] sm:$0xff] %v6270_v17  ;;  %7943 = vst [vmem:[#allocation68_spill] sm:$0xff] %v6273_v62  ;;  %4532 = vrcp.f32 %v1833_v21  ;;  %v1771_v30 = vmul.f32 0.3275911, %v6266_v10  ;;  %v6277_v31 = vpop.eup %4528  ;;  %v3041_v49 = vsub.f32 0.0, %v2913_v54  ;;  %v2851_v5 = vmul.f32 %v4527_v1, %v2531_v58  ;;  %v6290_v21 = vpop.f32.mrb[38].mxu0 }
 0x54d   : > { %v6282_v55 = vmul.f32 0.5, %v6100_v16  ;;  %v6284_v51 = vpop.eup %4530  ;;  %v3104_v34 = vsel %vm2976_vm15, %v2912_v18, %v3040_v14  ;;  %v2338_v7 = vadd.f32 -0.28449672, %v2274_v9  ;;  %v2148_v6 = vmul.f32 %v6220_v4, %v2084_v50  ;;  %7944 = vst [vmem:[#allocation69_spill] sm:$0xff] %v6290_v21  ;;  %v7958_v17 = vld [vmem:[#allocation45_spill] sm:$0xff] }
 0x54e   : > { %v2596_v25 = vsub.f32 0.0, %v6123_v15  ;;  %v2149_v23 = vmul.f32 %v6224_v61, %v2085_v24  ;;  %v2087_v12 = vadd.f32 -1.4531521, %v2023_v29  ;;  %v2022_v27 = vmul.f32 1.0614054, %v6277_v31 }
 0x54f   : > { %v1835_v16 = vadd.f32 1.0, %v1771_v30  ;;  %v3166_v58 = vadd.f32 1.0, %v3102_v32  ;;  %vm2979_vm1 = vcmp.ge.f32.partialorder %v5987_v28, 0.0  ;;  %4534 = vpow2.f32 %v2739_v48  ;;  %v6351_v28 = vpop.f32.mrb[39].mxu0 }
 0x550   : > { %v2024_v18 = vmul.f32 1.0614054, %v6284_v51  ;;  %v6298_v14 = vadd.f32 %v7945_v60, %v5630_v43  ;;  %v3168_v9 = vadd.f32 1.0, %v3104_v34  ;;  %v3105_v50 = vsel %vm2977_vm0, %v2913_v54, %v3041_v49 }
 0x551   : > { %v2915_v24 = vsub.f32 1.0, %v2851_v5  ;;  %v2597_v29 = vsub.f32 0.0, %v6129_v2  ;;  %v2402_v1 = vmul.f32 %v6155_v46, %v2338_v7  ;;  %v2212_v30 = vadd.f32 1.4214138, %v2148_v6  ;;  %v4375_v5 = vld [vmem:[#allocation8 + $0xa0] sm:$0xff]  }
 0x552   : > { %v2660_v32 = vmul.f32 %v2596_v25, %v6123_v15  ;;  %v6306_v48 = vmul.f32 0.5, %v6105_v11  ;;  %v2213_v19 = vadd.f32 1.4214138, %v2149_v23  ;;  %v2151_v62 = vmul.f32 %v6254_v20, %v2087_v12  ;;  %4107 = vmatpush3.bf16.msra.mxu0 %v4375_v5  ;;  %v7951_v5 = vld [vmem:[#allocation42_spill] sm:$0xff] }
 0x553   : > { %v2086_v60 = vadd.f32 -1.4531521, %v2022_v27  ;;  %4536 = vrcp.f32 %v1835_v16  ;;  %v6310_v34 = vmul.f32 %v3167_v33, %v6059_v59  ;;  %v3169_v37 = vadd.f32 1.0, %v3105_v50  ;;  %7952 = vst [vmem:[#allocation42_spill] sm:$0xff] %v6351_v28 }
 0x554   : > { %v2088_v54 = vadd.f32 -1.4531521, %v2024_v18  ;;  %v6313_v49 = vmul.f32 0.70710677, %v6298_v14  ;;  %v6316_v7 = vmul.f32 %v3166_v58, %v6073_v39  ;;  %v6319_v11 = vmul.f32 %v3168_v9, %v6090_v22  ;;  %v6333_v58 = vpop.f32.mrb[23].mxu1 }
 0x555   : > { %7946 = vst [vmem:[#allocation41_spill] sm:$0xff] %v6310_v34  ;;  %v3043_v15 = vsub.f32 0.0, %v2915_v24  ;;  %v2661_v6 = vmul.f32 %v2597_v29, %v6129_v2  ;;  %v2466_v23 = vadd.f32 0.2548296, %v2402_v1  ;;  %v2276_v59 = vmul.f32 %v6220_v4, %v2212_v30  ;;  %7949 = vst [vmem:[#allocation72_spill] sm:$0xff] %v6333_v58 }
 0x556   : > { %7947 = vst [vmem:[#allocation70_spill] sm:$0xff] %v6316_v7  ;;  %7948 = vst [vmem:[#allocation71_spill] sm:$0xff] %v6319_v11  ;;  %v6322_v25 = vpop.eup %4532  ;;  %v2743_v33 = vmul.f32 1.442695, %v2660_v32  ;;  %v6326_v12 = vand.u32 2147483647, %v6313_v49  ;;  %v2277_v27 = vmul.f32 %v6224_v61, %v2213_v19  ;;  %v2150_v16 = vmul.f32 %v6277_v31, %v2086_v60 }
 0x557   : > { %v6330_v39 = vmul.f32 0.5, %v6142_v47  ;;  %v2215_v22 = vadd.f32 1.4214138, %v2151_v62  ;;  %v6336_v2 = vmul.f32 %v3169_v37, %v6145_v35  ;;  %v2599_v18 = vsub.f32 0.0, %v6165_v45 }
 0x558   : > { %v2152_v9 = vmul.f32 %v6284_v51, %v2088_v54  ;;  %v1770_v50 = vmul.f32 0.3275911, %v6326_v12  ;;  %v3107_v29 = vsel %vm2979_vm1, %v2915_v24, %v3043_v15  ;;  %v2745_v1 = vmul.f32 1.442695, %v2661_v6 }
 0x559   : > { %7950 = vst [vmem:[#allocation73_spill] sm:$0xff] %v6336_v2  ;;  %v2598_v47 = vsub.f32 0.0, %v6194_v53  ;;  %v2025_v62 = vmul.f32 1.0614054, %v6322_v25  ;;  %v4535_v30 = vpop.eup %4534  ;;  %v2530_v32 = vmul.f32 %v6155_v46, %v2466_v23  ;;  %v2340_v19 = vadd.f32 -0.28449672, %v2276_v59 }
 0x55a   : > { %4538 = vpow2.f32 %v2743_v33  ;;  %v1834_v35 = vadd.f32 1.0, %v1770_v50  ;;  %v2341_v60 = vadd.f32 -0.28449672, %v2277_v27  ;;  %v2279_v37 = vmul.f32 %v6254_v20, %v2215_v22 }
 0x55b   : > { %v2214_v54 = vadd.f32 1.4214138, %v2150_v16  ;;  %v6349_v2 = vadd.f32 %v7951_v5, %v5647_v52  ;;  %v3171_v24 = vadd.f32 1.0, %v3107_v29  ;;  %v2663_v15 = vmul.f32 %v2599_v18, %v6165_v45 }
 0x55c   : > { %v2216_v6 = vadd.f32 1.4214138, %v2152_v9  ;;  %4540 = vrcp.f32 %v1834_v35  ;;  %v2662_v46 = vmul.f32 %v2598_v47, %v6194_v53  ;;  %v2600_v23 = vsub.f32 0.0, %v6197_v42 }
 0x55d   : > { %v6354_v34 = vpop.eup %4536  ;;  %4542 = vpow2.f32 %v2745_v1  ;;  %v2089_v59 = vadd.f32 -1.4531521, %v2025_v62  ;;  %v6358_v33 = vmul.f32 %v4535_v30, %v2530_v32  ;;  %v2404_v27 = vmul.f32 %v6220_v4, %v2340_v19 }
 0x55e   : > { %v6362_v22 = vmul.f32 0.5, %v6170_v40  ;;  %v6365_v16 = vmul.f32 0.5, %v6174_v57  ;;  %v2405_v45 = vmul.f32 %v6224_v61, %v2341_v60  ;;  %v2343_v18 = vadd.f32 -0.28449672, %v2279_v37 }
 0x55f   : > { %v2278_v9 = vmul.f32 %v6277_v31, %v2214_v54  ;;  %v6370_v53 = vmul.f32 0.70710677, %v6349_v2  ;;  %v6373_v50 = vmul.f32 %v3171_v24, %v6191_v63  ;;  %v2749_v29 = vmul.f32 1.442695, %v2663_v15  ;;  %v7954_v63 = vld [vmem:[#allocation43_spill] sm:$0xff] }
 0x560   : > { %v2280_v1 = vmul.f32 %v6284_v51, %v2216_v6  ;;  %v2027_v40 = vmul.f32 1.0614054, %v6354_v34  ;;  %v2747_v47 = vmul.f32 1.442695, %v2662_v46  ;;  %v2664_v57 = vmul.f32 %v2600_v23, %v6197_v42  ;;  %v4376_v23 = vld [vmem:[#allocation8 + $0xe8] sm:$0xff]  }
 0x561   : > { %7953 = vst [vmem:[#allocation74_spill] sm:$0xff] %v6373_v50  ;;  %v2153_v62 = vmul.f32 %v6322_v25, %v2089_v59  ;;  %v6380_v30 = vand.u32 2147483647, %v6370_v53  ;;  %v2914_v32 = vsub.f32 1.0, %v6358_v33  ;;  %v2468_v19 = vadd.f32 0.2548296, %v2404_v27  ;;  %4108 = vmatprep.subr.bf16.mxu0 %v4376_v23 }
 0x562   : > { %v2601_v35 = vsub.f32 0.0, %v6243_v36  ;;  %v6386_v60 = vadd.f32 %v7954_v63, %v5626_v44  ;;  %vm2978_vm2 = vcmp.ge.f32.partialorder %v6063_v3, 0.0  ;;  %v2469_v37 = vadd.f32 0.2548296, %v2405_v45  ;;  %v4377_v63 = vld [vmem:[#allocation8 + $0xa8] sm:$0xff]  }
 0x563   : > { %v2407_v54 = vmul.f32 %v6254_v20, %v2343_v18  ;;  %v2342_v42 = vadd.f32 -0.28449672, %v2278_v9  ;;  %v1772_v5 = vmul.f32 0.3275911, %v6380_v30  ;;  %4544 = vpow2.f32 %v2749_v29  ;;  %4109 = vmatpush3.bf16.msra.mxu0 %v4377_v63  ;;  %v7959_v3 = vld [vmem:[#allocation34_spill] sm:$0xff] }
 0x564   : > { %v4539_v24 = vpop.eup %4538  ;;  %v2344_v15 = vadd.f32 -0.28449672, %v2280_v1  ;;  %v6392_v6 = vmul.f32 0.5, %v6213_v56  ;;  %v2091_v46 = vadd.f32 -1.4531521, %v2027_v40  ;;  %4546 = vpow2.f32 %v2747_v47 }
 0x565   : > { %v2751_v59 = vmul.f32 1.442695, %v2664_v57  ;;  %v2217_v33 = vadd.f32 1.4214138, %v2153_v62  ;;  %v1836_v27 = vadd.f32 1.0, %v1772_v5  ;;  %v3042_v45 = vsub.f32 0.0, %v2914_v32 }
 0x566   : > { %v6394_v50 = vpop.eup %4540  ;;  %v2532_v18 = vmul.f32 %v6220_v4, %v2468_v19  ;;  %v2665_v9 = vmul.f32 %v2601_v35, %v6243_v36  ;;  %v6399_v29 = vmul.f32 0.70710677, %v6386_v60  ;;  %v2533_v1 = vmul.f32 %v6224_v61, %v2469_v37  ;;  %v7955_v4 = vld [vmem:[#allocation44_spill] sm:$0xff]  ;;  %v6414_v37 = vpop.f32.mrb[24].mxu1 }
 0x567   : > { %v4543_v56 = vpop.eup %4542  ;;  %v2471_v40 = vadd.f32 0.2548296, %v2407_v54  ;;  %v2406_v47 = vmul.f32 %v6277_v31, %v2342_v42  ;;  %v2026_v57 = vmul.f32 1.0614054, %v6394_v50  ;;  %v2408_v62 = vmul.f32 %v6284_v51, %v2344_v15  ;;  %7956 = vst [vmem:[#allocation43_spill] sm:$0xff] %v6414_v37  ;;  %v6416_v54 = vpop.f32.mrb[40].mxu0 }
 0x568   : > { %v2155_v5 = vmul.f32 %v6354_v34, %v2091_v46  ;;  %4548 = vrcp.f32 %v1836_v27  ;;  %v6408_v36 = vadd.f32 %v7955_v4, %v5628_v41  ;;  %v2281_v19 = vmul.f32 %v6322_v25, %v2217_v33  ;;  %7957 = vst [vmem:[#allocation44_spill] sm:$0xff] %v6416_v54 }
 0x569   : > { %4550 = vpow2.f32 %v2751_v59  ;;  %v2090_v35 = vadd.f32 -1.4531521, %v2026_v57  ;;  %v6412_v61 = vand.u32 2147483647, %v6399_v29  ;;  %v6418_v42 = vmul.f32 %v4539_v24, %v2532_v18 }
 0x56a   : > { %v2753_v15 = vmul.f32 1.442695, %v2665_v9  ;;  %v6421_v46 = vmul.f32 0.5, %v6236_v13  ;;  %v2603_v23 = vsub.f32 0.0, %v6266_v10  ;;  %v2853_v27 = vmul.f32 %v4543_v56, %v2533_v1 }
 0x56b   : > { %v2535_v59 = vmul.f32 %v6254_v20, %v2471_v40  ;;  %v2470_v33 = vadd.f32 0.2548296, %v2406_v47  ;;  %v1773_v63 = vmul.f32 0.3275911, %v6412_v61  ;;  %v3106_v57 = vsel %vm2978_vm2, %v2914_v32, %v3042_v45 }
 0x56c   : > { %v2472_v4 = vadd.f32 0.2548296, %v2408_v62  ;;  %v2219_v11 = vadd.f32 1.4214138, %v2155_v5  ;;  %v6429_v24 = vmul.f32 0.70710677, %v6408_v36  ;;  %v2154_v13 = vmul.f32 %v6394_v50, %v2090_v35 }
 0x56d   : > { %v2345_v18 = vadd.f32 -0.28449672, %v2281_v19  ;;  %v1837_v9 = vadd.f32 1.0, %v1773_v63  ;;  %v6434_v56 = vadd.f32 %v7958_v17, %v5630_v43  ;;  %v4545_v20 = vpop.eup %4544  ;;  %v2916_v1 = vsub.f32 1.0, %v6418_v42 }
 0x56e   : > { %vm2980_vm3 = vcmp.ge.f32.partialorder %v6112_v0, 0.0  ;;  %vm2981_vm4 = vcmp.ge.f32.partialorder %v7959_v3, 0.0  ;;  %4552 = vpow2.f32 %v2753_v15  ;;  %v2667_v32 = vmul.f32 %v2603_v23, %v6266_v10  ;;  %v4547_v40 = vpop.eup %4546  ;;  %v6449_v15 = vpop.f32.mrb[25].mxu1 }
 0x56f   : > { %v6441_v45 = vand.u32 2147483647, %v6429_v24  ;;  %v2917_v47 = vsub.f32 1.0, %v2853_v27  ;;  %v6443_v62 = vmul.f32 %v4545_v20, %v2535_v59  ;;  %v2602_v17 = vsub.f32 0.0, %v6326_v12  ;;  %7960 = vst [vmem:[#allocation45_spill] sm:$0xff] %v6449_v15 }
 0x570   : > { %4554 = vrcp.f32 %v1837_v9  ;;  %v3170_v5 = vadd.f32 1.0, %v3106_v57  ;;  %v2534_v19 = vmul.f32 %v6277_v31, %v2470_v33  ;;  %v2283_v35 = vmul.f32 %v6354_v34, %v2219_v11  ;;  %v7961_v31 = vld [vmem:[#allocation48_spill] sm:$0xff] }
 0x571   : > { %v1775_v42 = vmul.f32 0.3275911, %v6441_v45  ;;  %v2536_v10 = vmul.f32 %v6284_v51, %v2472_v4  ;;  %v2409_v23 = vmul.f32 %v6322_v25, %v2345_v18  ;;  %v2218_v63 = vadd.f32 1.4214138, %v2154_v13  ;;  %v4378_v33 = vld [vmem:[#allocation8 + $0x78] sm:$0xff]  }
 0x572   : > { %v6454_v27 = vmul.f32 0.70710677, %v6434_v56  ;;  %v6456_v59 = vpop.eup %4548  ;;  %v3044_v9 = vsub.f32 0.0, %v2916_v1  ;;  %v2757_v57 = vmul.f32 1.442695, %v2667_v32  ;;  %v6460_v11 = vadd.f32 %v7961_v31, %v5647_v52  ;;  %v7962_v4 = vld [vmem:[#allocation36_spill] sm:$0xff]  ;;  %4048 = vmatprep.subr.bf16.mxu1 %v4378_v33 }
 0x573   : > { %v1839_v20 = vadd.f32 1.0, %v1775_v42  ;;  %v4551_v7 = vpop.eup %4550  ;;  %v3045_v15 = vsub.f32 0.0, %v2917_v47  ;;  %v2919_v51 = vsub.f32 1.0, %v6443_v62  ;;  %vm2983_vm5 = vcmp.ge.f32.partialorder %v7962_v4, 0.0 }
 0x574   : > { %v2666_v18 = vmul.f32 %v2602_v17, %v6326_v12  ;;  %v6466_v13 = vand.u32 2147483647, %v6454_v27  ;;  %v6469_v54 = vmul.f32 %v3170_v5, %v6260_v26  ;;  %v6471_v32 = vmul.f32 %v4547_v40, %v2534_v19  ;;  %v7964_v26 = vld [vmem:[#allocation51_spill] sm:$0xff]  ;;  %v6485_v5 = vpop.f32.mrb[41].mxu0 }
 0x575   : > { %v2347_v42 = vadd.f32 -0.28449672, %v2283_v35  ;;  %4556 = vrcp.f32 %v1839_v20  ;;  %v6473_v31 = vmul.f32 %v4551_v7, %v2536_v10  ;;  %v2473_v37 = vadd.f32 0.2548296, %v2409_v23  ;;  %7965 = vst [vmem:[#allocation48_spill] sm:$0xff] %v6485_v5 }
 0x576   : > { %7963 = vst [vmem:[#allocation34_spill] sm:$0xff] %v6469_v54  ;;  %v2282_v62 = vmul.f32 %v6394_v50, %v2218_v63  ;;  %v2028_v28 = vmul.f32 1.0614054, %v6456_v59  ;;  %4558 = vpow2.f32 %v2757_v57  ;;  %v1774_v12 = vmul.f32 0.3275911, %v6466_v13 }
 0x577   : > { %v6479_v17 = vmul.f32 0.70710677, %v6460_v11  ;;  %v6483_v40 = vadd.f32 %v7964_v26, %v5626_v44  ;;  %v3108_v7 = vsel %vm2980_vm3, %v2916_v1, %v3044_v9  ;;  %v3109_v19 = vsel %vm2981_vm4, %v2917_v47, %v3045_v15  ;;  %v7966_v1 = vld [vmem:[#allocation37_spill] sm:$0xff] }
 0x578   : > { %v3047_v35 = vsub.f32 0.0, %v2919_v51  ;;  %v2755_v10 = vmul.f32 1.442695, %v2666_v18  ;;  %v4553_v23 = vpop.eup %4552  ;;  %v2918_v63 = vsub.f32 1.0, %v6471_v32  ;;  %vm2982_vm6 = vcmp.ge.f32.partialorder %v6183_v8, 0.0 }
 0x579   : > { %v2411_v57 = vmul.f32 %v6354_v34, %v2347_v42  ;;  %v1838_v20 = vadd.f32 1.0, %v1774_v12  ;;  %v6495_v33 = vand.u32 2147483647, %v6479_v17  ;;  %v2920_v0 = vsub.f32 1.0, %v6473_v31  ;;  %v4380_v42 = vld [vmem:[#allocation8 + $0xf0] sm:$0xff]  }
 0x57a   : > { %v6497_v26 = vpop.eup %4554  ;;  %vm2984_vm7 = vcmp.ge.f32.partialorder %v7966_v1, 0.0  ;;  %v2537_v3 = vmul.f32 %v6322_v25, %v2473_v37  ;;  %v2346_v47 = vadd.f32 -0.28449672, %v2282_v62  ;;  %v6503_v15 = vmul.f32 0.70710677, %v6483_v40  ;;  %4110 = vmatprep.subr.bf16.mxu0 %v4380_v42 }
 0x57b   : > { %v6506_v9 = vmul.f32 0.5, %v6298_v14  ;;  %v2092_v18 = vadd.f32 -1.4531521, %v2028_v28  ;;  %4560 = vrcp.f32 %v1838_v20  ;;  %v1776_v32 = vmul.f32 0.3275911, %v6495_v33  ;;  %v6515_v14 = vpop.f32.mrb[26].mxu1 }
 0x57c   : > { %7967 = vst [vmem:[#allocation36_spill] sm:$0xff] %v6503_v15  ;;  %v3172_v12 = vadd.f32 1.0, %v3108_v7  ;;  %v3173_v54 = vadd.f32 1.0, %v3109_v19  ;;  %v2029_v31 = vmul.f32 1.0614054, %v6497_v26  ;;  %v3111_v25 = vsel %vm2983_vm5, %v2919_v51, %v3047_v35  ;;  %7968 = vst [vmem:[#allocation51_spill] sm:$0xff] %v6515_v14 }
 0x57d   : > { %v6511_v5 = vand.u32 2147483647, %v6503_v15  ;;  %v2475_v37 = vadd.f32 0.2548296, %v2411_v57  ;;  %4562 = vpow2.f32 %v2755_v10  ;;  %v1840_v62 = vadd.f32 1.0, %v1776_v32  ;;  %v7969_v51 = vld [vmem:[#allocation52_spill] sm:$0xff] }
 0x57e   : > { %v3046_v28 = vsub.f32 0.0, %v2918_v63  ;;  %v3048_v20 = vsub.f32 0.0, %v2920_v0  ;;  %v6517_v58 = vmul.f32 %v4553_v23, %v2537_v3  ;;  %v2410_v21 = vmul.f32 %v6394_v50, %v2346_v47  ;;  %v4379_v35 = vld [vmem:[#allocation8 + $0x38] sm:$0xff]  }
 0x57f   : > { %v1777_v7 = vmul.f32 0.3275911, %v6511_v5  ;;  %v6520_v19 = vpop.eup %4556  ;;  %v2156_v15 = vmul.f32 %v6456_v59, %v2092_v18  ;;  %4564 = vrcp.f32 %v1840_v62  ;;  %v6526_v4 = vadd.f32 %v7969_v51, %v5628_v41  ;;  %4049 = vmatpush3.bf16.msra.mxu1 %v4379_v35  ;;  %v6565_v35 = vpop.f32.mrb[42].mxu0 }
 0x580   : > { %v2604_v10 = vsub.f32 0.0, %v6380_v30  ;;  %v2093_v57 = vadd.f32 -1.4531521, %v2029_v31  ;;  %v2031_v23 = vmul.f32 1.0614054, %v6520_v19  ;;  %v4559_v32 = vpop.eup %4558  ;;  %v6531_v42 = vmul.f32 %v3172_v12, %v6282_v55  ;;  %v4704_v55 = vld [vmem:[#allocation8 + $0xc0] sm:$0xff]  }
 0x581   : > { %v1841_v3 = vadd.f32 1.0, %v1777_v7  ;;  %v6534_v47 = vmul.f32 %v3173_v54, %v6306_v48  ;;  %v2539_v18 = vmul.f32 %v6354_v34, %v2475_v37  ;;  %v6538_v62 = vmul.f32 0.5, %v6349_v2  ;;  %4194 = vmatprep.subr.bf16.mxu1 %v4704_v55 }
 0x582   : > { %7970 = vst [vmem:[#allocation37_spill] sm:$0xff] %v6531_v42  ;;  %v3175_v51 = vadd.f32 1.0, %v3111_v25  ;;  %v3110_v31 = vsel %vm2982_vm6, %v2918_v63, %v3046_v28  ;;  %v2921_v14 = vsub.f32 1.0, %v6517_v58  ;;  %vm2985_vm8 = vcmp.ge.f32.partialorder %v6230_v38, 0.0  ;;  %v7972_v58 = vld [vmem:[#allocation53_spill] sm:$0xff] }
 0x583   : > { %7971 = vst [vmem:[#allocation52_spill] sm:$0xff] %v6534_v47  ;;  %4566 = vrcp.f32 %v1841_v3  ;;  %v3112_v48 = vsel %vm2984_vm7, %v2920_v0, %v3048_v20  ;;  %v2474_v54 = vadd.f32 0.2548296, %v2410_v21  ;;  %v2220_v34 = vadd.f32 1.4214138, %v2156_v15  ;;  %7973 = vst [vmem:[#allocation53_spill] sm:$0xff] %v6565_v35 }
 0x584   : > { %v6547_v2 = vmul.f32 0.70710677, %v6526_v4  ;;  %v2668_v12 = vmul.f32 %v2604_v10, %v6380_v30  ;;  %v2157_v8 = vmul.f32 %v6497_v26, %v2093_v57  ;;  %v2095_v63 = vadd.f32 -1.4531521, %v2031_v23 }
 0x585   : > { %v6553_v25 = vadd.f32 %v7972_v58, %v5630_v43  ;;  %v6555_v37 = vpop.eup %4560  ;;  %v3174_v28 = vadd.f32 1.0, %v3110_v31  ;;  %v2859_v7 = vmul.f32 %v4559_v32, %v2539_v18  ;;  %v6558_v0 = vmul.f32 0.5, %v6386_v60  ;;  %v7975_v18 = vld [vmem:[#allocation40_spill] sm:$0xff] }
 0x586   : > { %v6561_v21 = vand.u32 2147483647, %v6547_v2  ;;  %v3176_v1 = vadd.f32 1.0, %v3112_v48  ;;  %v3049_v15 = vsub.f32 0.0, %v2921_v14  ;;  %v2605_v30 = vsub.f32 0.0, %v6412_v61 }
 0x587   : > { %v2030_v20 = vmul.f32 1.0614054, %v6555_v37  ;;  %v4563_v10 = vpop.eup %4562  ;;  %v2538_v57 = vmul.f32 %v6394_v50, %v2474_v54  ;;  %v2284_v23 = vmul.f32 %v6456_v59, %v2220_v34  ;;  %v6571_v60 = vmul.f32 0.70710677, %v6553_v25 }
 0x588   : > { %v1779_v3 = vmul.f32 0.3275911, %v6561_v21  ;;  %v6574_v32 = vmul.f32 %v3175_v51, %v6330_v39  ;;  %vm2987_vm9 = vcmp.ge.f32.partialorder %v7975_v18, 0.0  ;;  %v2759_v31 = vmul.f32 1.442695, %v2668_v12 }
 0x589   : > { %v2221_v55 = vadd.f32 1.4214138, %v2157_v8  ;;  %v2159_v48 = vmul.f32 %v6520_v19, %v2095_v63  ;;  %v6578_v58 = vpop.eup %4564  ;;  %v2923_v47 = vsub.f32 1.0, %v2859_v7  ;;  %v2094_v50 = vadd.f32 -1.4531521, %v2030_v20  ;;  %v4381_v8 = vld [vmem:[#allocation8 + $0xb0] sm:$0xff]  }
 0x58a   : > { %7974 = vst [vmem:[#allocation75_spill] sm:$0xff] %v6574_v32  ;;  %v1843_v54 = vadd.f32 1.0, %v1779_v3  ;;  %v6581_v34 = vand.u32 2147483647, %v6571_v60  ;;  %v6584_v42 = vmul.f32 %v3174_v28, %v6362_v22  ;;  %v6587_v39 = vmul.f32 %v3176_v1, %v6365_v16  ;;  %4111 = vmatpush3.bf16.msra.mxu0 %v4381_v8 }
 0x58b   : > { %v2669_v51 = vmul.f32 %v2605_v30, %v6412_v61  ;;  %v2032_v12 = vmul.f32 1.0614054, %v6578_v58  ;;  %v3113_v63 = vsel %vm2985_vm8, %v2921_v14, %v3049_v15  ;;  %v2858_v7 = vmul.f32 %v4563_v10, %v2538_v57  ;;  %v6600_v14 = vpop.f32.mrb[27].mxu1  ;;  %v7979_v57 = vld [vmem:[#allocation56_spill] sm:$0xff] }
 0x58c   : > { %7976 = vst [vmem:[#allocation40_spill] sm:$0xff] %v6584_v42  ;;  %7977 = vst [vmem:[#allocation76_spill] sm:$0xff] %v6587_v39  ;;  %v2348_v20 = vadd.f32 -0.28449672, %v2284_v23  ;;  %v1778_v3 = vmul.f32 0.3275911, %v6581_v34  ;;  %v2285_v22 = vmul.f32 %v6497_v26, %v2221_v55  ;;  %4568 = vrcp.f32 %v1843_v54 }
 0x58d   : > { %v6594_v32 = vpop.eup %4566  ;;  %v2223_v28 = vadd.f32 1.4214138, %v2159_v48  ;;  %v2607_v16 = vsub.f32 0.0, %v6441_v45  ;;  %v3051_v61 = vsub.f32 0.0, %v2923_v47  ;;  %4570 = vpow2.f32 %v2759_v31  ;;  %7978 = vst [vmem:[#allocation77_spill] sm:$0xff] %v6600_v14 }
 0x58e   : > { %v2158_v1 = vmul.f32 %v6555_v37, %v2094_v50  ;;  %v2033_v38 = vmul.f32 1.0614054, %v6594_v32  ;;  %vm2986_vm10 = vcmp.ge.f32.partialorder %v6313_v49, 0.0  ;;  %v2761_v15 = vmul.f32 1.442695, %v2669_v51 }
 0x58f   : > { %v2096_v30 = vadd.f32 -1.4531521, %v2032_v12  ;;  %v1842_v10 = vadd.f32 1.0, %v1778_v3  ;;  %v6605_v23 = vadd.f32 %v7979_v57, %v5647_v52  ;;  %v3177_v55 = vadd.f32 1.0, %v3113_v63  ;;  %v6636_v57 = vpop.f32.mrb[43].mxu0 }
 0x590   : > { %v2922_v48 = vsub.f32 1.0, %v2858_v7  ;;  %v2412_v54 = vmul.f32 %v6456_v59, %v2348_v20  ;;  %v2097_v31 = vadd.f32 -1.4531521, %v2033_v38  ;;  %v2349_v8 = vadd.f32 -0.28449672, %v2285_v22  ;;  %7981 = vst [vmem:[#allocation78_spill] sm:$0xff] %v6636_v57 }
 0x591   : > { %v2287_v50 = vmul.f32 %v6520_v19, %v2223_v28  ;;  %v2671_v39 = vmul.f32 %v2607_v16, %v6441_v45  ;;  %4572 = vrcp.f32 %v1842_v10  ;;  %v3115_v51 = vsel %vm2987_vm9, %v2923_v47, %v3051_v61 }
 0x592   : > { %v6613_v12 = vmul.f32 0.5, %v6408_v36  ;;  %v6616_v3 = vmul.f32 0.5, %v6434_v56  ;;  %v2222_v63 = vadd.f32 1.4214138, %v2158_v1  ;;  %v2606_v7 = vsub.f32 0.0, %v6466_v13 }
 0x593   : > { %v2160_v20 = vmul.f32 %v6578_v58, %v2096_v30  ;;  %v2608_v22 = vsub.f32 0.0, %v6495_v33  ;;  %v6622_v28 = vmul.f32 0.70710677, %v6605_v23  ;;  %v3050_v45 = vsub.f32 0.0, %v2922_v48 }
 0x594   : > { %v2476_v16 = vadd.f32 0.2548296, %v2412_v54  ;;  %4574 = vpow2.f32 %v2761_v15  ;;  %v2161_v47 = vmul.f32 %v6594_v32, %v2097_v31  ;;  %v6626_v36 = vmul.f32 %v3177_v55, %v6392_v6 }
 0x595   : > { %v2413_v56 = vmul.f32 %v6497_v26, %v2349_v8  ;;  %v2351_v18 = vadd.f32 -0.28449672, %v2287_v50  ;;  %v2765_v61 = vmul.f32 1.442695, %v2671_v39  ;;  %v3179_v1 = vadd.f32 1.0, %v3115_v51 }
 0x596   : > { %7980 = vst [vmem:[#allocation56_spill] sm:$0xff] %v6626_v36  ;;  %v2286_v38 = vmul.f32 %v6555_v37, %v2222_v63  ;;  %v6631_v30 = vmul.f32 0.5, %v6460_v11  ;;  %v6634_v10 = vand.u32 2147483647, %v6622_v28  ;;  %v6638_v15 = vpop.eup %4568  ;;  %v2670_v6 = vmul.f32 %v2606_v7, %v6466_v13 }
 0x597   : > { %v2224_v55 = vadd.f32 1.4214138, %v2160_v20  ;;  %v2672_v54 = vmul.f32 %v2608_v22, %v6495_v33  ;;  %v2609_v39 = vsub.f32 0.0, %v6511_v5  ;;  %v4571_v31 = vpop.eup %4570  ;;  %v3114_v8 = vsel %vm2986_vm10, %v2922_v48, %v3050_v45  ;;  %v7982_v22 = vld [vmem:[#allocation57_spill] sm:$0xff]  ;;  %v4382_v48 = vld [vmem:[#allocation8 + $0xf8] sm:$0xff]  }
 0x598   : > { %v2540_v11 = vmul.f32 %v6456_v59, %v2476_v16  ;;  %v2225_v50 = vadd.f32 1.4214138, %v2161_v47  ;;  %v1780_v51 = vmul.f32 0.3275911, %v6634_v10  ;;  %v2477_v63 = vadd.f32 0.2548296, %v2413_v56  ;;  %4112 = vmatprep.subr.bf16.mxu0 %v4382_v48 }
 0x599   : > { %v2415_v36 = vmul.f32 %v6520_v19, %v2351_v18  ;;  %4576 = vpow2.f32 %v2765_v61  ;;  %v6649_v13 = vmul.f32 0.5, %v6483_v40  ;;  %v2350_v7 = vadd.f32 -0.28449672, %v2286_v38  ;;  %v4383_v18 = vld [vmem:[#allocation8 + $0xb8] sm:$0xff]  }
 0x59a   : > { %v2035_v33 = vmul.f32 1.0614054, %v6638_v15  ;;  %v1844_v20 = vadd.f32 1.0, %v1780_v51  ;;  %v6654_v49 = vadd.f32 %v7982_v22, %v5626_v44  ;;  %v3178_v45 = vadd.f32 1.0, %v3114_v8  ;;  %v7983_v8 = vld [vmem:[#allocation61_spill] sm:$0xff]  ;;  %4113 = vmatpush3.bf16.msra.mxu0 %v4383_v18 }
 0x59b   : > { %v6656_v59 = vpop.eup %4572  ;;  %v2763_v16 = vmul.f32 1.442695, %v2670_v6  ;;  %v2288_v47 = vmul.f32 %v6578_v58, %v2224_v55  ;;  %v2767_v56 = vmul.f32 1.442695, %v2672_v54  ;;  %v6659_v61 = vmul.f32 %v4571_v31, %v2540_v11 }
 0x59c   : > { %v2289_v40 = vmul.f32 %v6594_v32, %v2225_v50  ;;  %v2673_v38 = vmul.f32 %v2609_v39, %v6511_v5  ;;  %v2034_v51 = vmul.f32 1.0614054, %v6656_v59  ;;  %v2541_v22 = vmul.f32 %v6497_v26, %v2477_v63  ;;  %v6677_v50 = vpop.f32.mrb[28].mxu1  ;;  %v6679_v63 = vpop.f32.mrb[44].mxu0 }
 0x59d   : > { %v2479_v42 = vadd.f32 0.2548296, %v2415_v36  ;;  %4578 = vrcp.f32 %v1844_v20  ;;  %v6667_v6 = vadd.f32 %v7983_v8, %v5628_v41  ;;  %v2414_v54 = vmul.f32 %v6555_v37, %v2350_v7  ;;  %7985 = vst [vmem:[#allocation61_spill] sm:$0xff] %v6677_v50  ;;  %7986 = vst [vmem:[#allocation79_spill] sm:$0xff] %v6679_v63 }
 0x59e   : > { %v4575_v55 = vpop.eup %4574  ;;  %v2099_v31 = vadd.f32 -1.4531521, %v2035_v33  ;;  %v2611_v11 = vsub.f32 0.0, %v6561_v21  ;;  %v6672_v5 = vmul.f32 0.70710677, %v6654_v49  ;;  %v6675_v39 = vmul.f32 %v3179_v1, %v6421_v46 }
 0x59f   : > { %4580 = vpow2.f32 %v2763_v16  ;;  %v2352_v26 = vadd.f32 -0.28449672, %v2288_v47  ;;  %v2098_v36 = vadd.f32 -1.4531521, %v2034_v51  ;;  %v2924_v20 = vsub.f32 1.0, %v6659_v61 }
 0x5a0   : > { %7984 = vst [vmem:[#allocation57_spill] sm:$0xff] %v6675_v39  ;;  %vm2988_vm11 = vcmp.ge.f32.partialorder %v6370_v53, 0.0  ;;  %4582 = vpow2.f32 %v2767_v56  ;;  %v2353_v7 = vadd.f32 -0.28449672, %v2289_v40  ;;  %v2769_v33 = vmul.f32 1.442695, %v2673_v38 }
 0x5a1   : > { %v2861_v48 = vmul.f32 %v4575_v55, %v2541_v22  ;;  %v2543_v18 = vmul.f32 %v6520_v19, %v2479_v42  ;;  %v6685_v46 = vand.u32 2147483647, %v6672_v5  ;;  %v6688_v1 = vmul.f32 0.70710677, %v6667_v6  ;;  %v7989_v53 = vld [vmem:[#allocation64_spill] sm:$0xff] }
 0x5a2   : > { %v2478_v16 = vadd.f32 0.2548296, %v2414_v54  ;;  %v6691_v47 = vmul.f32 0.5, %v6526_v4  ;;  %v2163_v61 = vmul.f32 %v6638_v15, %v2099_v31  ;;  %v2675_v51 = vmul.f32 %v2611_v11, %v6561_v21 }
 0x5a3   : > { %v4577_v56 = vpop.eup %4576  ;;  %v2416_v40 = vmul.f32 %v6578_v58, %v2352_v26  ;;  %v2162_v38 = vmul.f32 %v6656_v59, %v2098_v36  ;;  %v1781_v19 = vmul.f32 0.3275911, %v6685_v46  ;;  %v6699_v42 = vand.u32 2147483647, %v6688_v1 }
 0x5a4   : > { %v6702_v22 = vmul.f32 %v3178_v45, %v6506_v9  ;;  %v3052_v8 = vsub.f32 0.0, %v2924_v20  ;;  %vm2989_vm12 = vcmp.ge.f32.partialorder %v6399_v29, 0.0  ;;  %v2417_v4 = vmul.f32 %v6594_v32, %v2353_v7 }
 0x5a5   : > { %4584 = vpow2.f32 %v2769_v33  ;;  %v2925_v21 = vsub.f32 1.0, %v2861_v48  ;;  %v2863_v55 = vmul.f32 %v4577_v56, %v2543_v18  ;;  %v1845_v54 = vadd.f32 1.0, %v1781_v19 }
 0x5a6   : > { %7987 = vst [vmem:[#allocation80_spill] sm:$0xff] %v6702_v22  ;;  %v1783_v31 = vmul.f32 0.3275911, %v6699_v42  ;;  %v2542_v11 = vmul.f32 %v6555_v37, %v2478_v16  ;;  %v2227_v26 = vadd.f32 1.4214138, %v2163_v61  ;;  %v6709_v39 = vmul.f32 0.5, %v6553_v25 }
 0x5a7   : > { %v2773_v36 = vmul.f32 1.442695, %v2675_v51  ;;  %v6711_v9 = vpop.eup %4578  ;;  %v2480_v45 = vadd.f32 0.2548296, %v2416_v40  ;;  %v2226_v22 = vadd.f32 1.4214138, %v2162_v38  ;;  %4586 = vrcp.f32 %v1845_v54 }
 0x5a8   : > { %v1847_v63 = vadd.f32 1.0, %v1783_v31  ;;  %vm2991_vm13 = vcmp.ge.f32.partialorder %v6429_v24, 0.0  ;;  %v2481_v7 = vadd.f32 0.2548296, %v2417_v4  ;;  %v2610_v33 = vsub.f32 0.0, %v6581_v34  ;;  %v7988_v51 = vld [vmem:[#allocation62_spill] sm:$0xff] }
 0x5a9   : > { %v6716_v48 = vmul.f32 0.5, %v6605_v23  ;;  %v2036_v37 = vmul.f32 1.0614054, %v6711_v9  ;;  %v4581_v18 = vpop.eup %4580  ;;  %v3116_v25 = vsel %vm2988_vm11, %v2924_v20, %v3052_v8  ;;  %v3053_v16 = vsub.f32 0.0, %v2925_v21 }
 0x5aa   : > { %v2927_v61 = vsub.f32 1.0, %v2863_v55  ;;  %v6723_v56 = vadd.f32 %v7988_v51, %v5630_v43  ;;  %v4583_v40 = vpop.eup %4582  ;;  %v2862_v38 = vmul.f32 %v4581_v18, %v2542_v11  ;;  %v2291_v19 = vmul.f32 %v6638_v15, %v2227_v26  ;;  %v6747_v18 = vpop.f32.mrb[45].mxu0 }
 0x5ab   : > { %v2100_v4 = vadd.f32 -1.4531521, %v2036_v37  ;;  %4588 = vrcp.f32 %v1847_v63  ;;  %v2544_v23 = vmul.f32 %v6578_v58, %v2480_v45  ;;  %v2290_v54 = vmul.f32 %v6656_v59, %v2226_v22  ;;  %v6738_v37 = vpop.f32.mrb[29].mxu1  ;;  %7991 = vst [vmem:[#allocation64_spill] sm:$0xff] %v6747_v18 }
 0x5ac   : > { %v6729_v31 = vmul.f32 0.70710677, %v6723_v56  ;;  %v6733_v20 = vadd.f32 %v7989_v53, %v5647_v52  ;;  %v3180_v8 = vadd.f32 1.0, %v3116_v25  ;;  %v2545_v55 = vmul.f32 %v6594_v32, %v2481_v7  ;;  %7990 = vst [vmem:[#allocation62_spill] sm:$0xff] %v6738_v37  ;;  %v7992_v25 = vld [vmem:[#allocation35_spill] sm:$0xff]  ;;  %v6785_v57 = vpop.f32.mrb[30].mxu1 }
 0x5ad   : > { %v2674_v11 = vmul.f32 %v2610_v33, %v6581_v34  ;;  %v2164_v26 = vmul.f32 %v6711_v9, %v2100_v4  ;;  %v3117_v58 = vsel %vm2989_vm12, %v2925_v21, %v3053_v16  ;;  %v3055_v63 = vsub.f32 0.0, %v2927_v61 }
 0x5ae   : > { %vm2990_vm14 = vcmp.ge.f32.partialorder %v6454_v27, 0.0  ;;  %v2612_v22 = vsub.f32 0.0, %v6634_v10  ;;  %v6745_v45 = vand.u32 2147483647, %v6729_v31  ;;  %v2926_v7 = vsub.f32 1.0, %v2862_v38 }
 0x5af   : > { %v4585_v32 = vpop.eup %4584  ;;  %v2355_v34 = vadd.f32 -0.28449672, %v2291_v19  ;;  %v6750_v33 = vmul.f32 0.70710677, %v6733_v20  ;;  %v6754_v29 = vadd.f32 %v7992_v25, %v5626_v44  ;;  %v2864_v21 = vmul.f32 %v4583_v40, %v2544_v23 }
 0x5b0   : > { %4590 = vpow2.f32 %v2773_v36  ;;  %v2354_v16 = vadd.f32 -0.28449672, %v2290_v54  ;;  %v1782_v51 = vmul.f32 0.3275911, %v6745_v45  ;;  %v2865_v4 = vmul.f32 %v4585_v32, %v2545_v55 }
 0x5b1   : > { %v2771_v53 = vmul.f32 1.442695, %v2674_v11  ;;  %v2228_v37 = vadd.f32 1.4214138, %v2164_v26  ;;  %v6758_v18 = vand.u32 2147483647, %v6750_v33  ;;  %v6760_v38 = vpop.eup %4586  ;;  %v3119_v50 = vsel %vm2991_vm13, %v2927_v61, %v3055_v63 }
 0x5b2   : > { %v6762_v19 = vadd.f32 1.0, %v3117_v58  ;;  %v2676_v25 = vmul.f32 %v2612_v22, %v6634_v10  ;;  %v1846_v40 = vadd.f32 1.0, %v1782_v51  ;;  %v3054_v36 = vsub.f32 0.0, %v2926_v7  ;;  %v7993_v26 = vld [vmem:[#allocation36_spill] sm:$0xff] }
 0x5b3   : > { %vm2992_vm15 = vcmp.ge.f32.partialorder %v6479_v17, 0.0  ;;  %v2419_v23 = vmul.f32 %v6638_v15, %v2355_v34  ;;  %v2037_v54 = vmul.f32 1.0614054, %v6760_v38  ;;  %v6771_v55 = vmul.f32 0.70710677, %v6754_v29  ;;  %7995 = vst [vmem:[#allocation36_spill] sm:$0xff] %v6785_v57 }
 0x5b4   : > { %v2928_v11 = vsub.f32 1.0, %v2864_v21  ;;  %vm2993_vm0 = vcmp.ge.f32.partialorder %v7993_v26, 0.0  ;;  %v2418_v58 = vmul.f32 %v6656_v59, %v2354_v16  ;;  %4592 = vrcp.f32 %v1846_v40 }
 0x5b5   : > { %v1784_v24 = vmul.f32 0.3275911, %v6758_v18  ;;  %v6776_v10 = vpop.eup %4588  ;;  %v6778_v61 = vadd.f32 1.0, %v3119_v50  ;;  %v2929_v63 = vsub.f32 1.0, %v2865_v4  ;;  %4594 = vpow2.f32 %v2771_v53 }
 0x5b6   : > { %v2292_v22 = vmul.f32 %v6711_v9, %v2228_v37  ;;  %v6782_v32 = vmul.f32 %v3180_v8, %v6538_v62  ;;  %v2101_v34 = vadd.f32 -1.4531521, %v2037_v54  ;;  %v2039_v21 = vmul.f32 1.0614054, %v6776_v10 }
 0x5b7   : > { %v1848_v51 = vadd.f32 1.0, %v1784_v24  ;;  %v3118_v16 = vsel %vm2990_vm14, %v2926_v7, %v3054_v36  ;;  %v2483_v40 = vadd.f32 0.2548296, %v2419_v23  ;;  %v2775_v14 = vmul.f32 1.442695, %v2676_v25  ;;  %v7996_v36 = vld [vmem:[#allocation65_spill] sm:$0xff] }
 0x5b8   : > { %7994 = vst [vmem:[#allocation35_spill] sm:$0xff] %v6782_v32  ;;  %v6790_v50 = vand.u32 2147483647, %v6771_v55  ;;  %v3056_v4 = vsub.f32 0.0, %v2928_v11  ;;  %v2482_v53 = vadd.f32 0.2548296, %v2418_v58  ;;  %v2165_v27 = vmul.f32 %v6760_v38, %v2101_v34 }
 0x5b9   : > { %v2103_v37 = vadd.f32 -1.4531521, %v2039_v21  ;;  %4596 = vrcp.f32 %v1848_v51  ;;  %v3057_v62 = vsub.f32 0.0, %v2929_v63  ;;  %v2356_v8 = vadd.f32 -0.28449672, %v2292_v22 }
 0x5ba   : > { %v6793_v54 = vmul.f32 0.5, %v6654_v49  ;;  %v1785_v24 = vmul.f32 0.3275911, %v6790_v50  ;;  %v4591_v32 = vpop.eup %4590  ;;  %v6798_v7 = vmul.f32 0.5, %v6667_v6  ;;  %v6803_v23 = vadd.f32 %v7996_v36, %v5628_v41  ;;  %v7997_v49 = vld [vmem:[#allocation66_spill] sm:$0xff]  ;;  %v6817_v36 = vpop.f32.mrb[46].mxu0 }
 0x5bb   : > { %v2167_v25 = vmul.f32 %v6776_v10, %v2103_v37  ;;  %v3182_v58 = vadd.f32 1.0, %v3118_v16  ;;  %v2547_v22 = vmul.f32 %v6638_v15, %v2483_v40  ;;  %v6808_v51 = vadd.f32 %v7997_v49, %v5630_v43  ;;  %7999 = vst [vmem:[#allocation66_spill] sm:$0xff] %v6817_v36 }
 0x5bc   : > { %v1849_v21 = vadd.f32 1.0, %v1785_v24  ;;  %v3120_v34 = vsel %vm2992_vm15, %v2928_v11, %v3056_v4  ;;  %v2546_v6 = vmul.f32 %v6656_v59, %v2482_v53  ;;  %v2613_v57 = vsub.f32 0.0, %v6685_v46 }
 0x5bd   : > { %v6815_v37 = vmul.f32 0.70710677, %v6803_v23  ;;  %v3121_v15 = vsel %vm2993_vm0, %v2929_v63, %v3057_v62  ;;  %v2420_v16 = vmul.f32 %v6711_v9, %v2356_v8  ;;  %v2615_v40 = vsub.f32 0.0, %v6699_v42 }
 0x5be   : > { %4598 = vrcp.f32 %v1849_v21  ;;  %v6823_v24 = vpop.eup %4592  ;;  %v2229_v17 = vadd.f32 1.4214138, %v2165_v27  ;;  %v2231_v59 = vadd.f32 1.4214138, %v2167_v25  ;;  %v3184_v53 = vadd.f32 1.0, %v3120_v34 }
 0x5bf   : > { %7998 = vst [vmem:[#allocation65_spill] sm:$0xff] %v6815_v37  ;;  %4600 = vpow2.f32 %v2775_v14  ;;  %v6826_v11 = vand.u32 2147483647, %v6815_v37  ;;  %v4595_v4 = vpop.eup %4594  ;;  %v2867_v49 = vmul.f32 %v4591_v32, %v2547_v22  ;;  %v2038_v36 = vmul.f32 1.0614054, %v6823_v24 }
 0x5c0   : > { %v6830_v26 = vmul.f32 0.70710677, %v6808_v51  ;;  %v3185_v63 = vadd.f32 1.0, %v3121_v15  ;;  %v2866_v62 = vmul.f32 %v4595_v4, %v2546_v6  ;;  %v2677_v8 = vmul.f32 %v2613_v57, %v6685_v46 }
 0x5c1   : > { %v1787_v21 = vmul.f32 0.3275911, %v6826_v11  ;;  %v6836_v14 = vmul.f32 %v6762_v19, %v6558_v0  ;;  %v2484_v27 = vadd.f32 0.2548296, %v2420_v16  ;;  %v2102_v25 = vadd.f32 -1.4531521, %v2038_v36 }
 0x5c2   : > { %8000 = vst [vmem:[#allocation81_spill] sm:$0xff] %v6830_v26  ;;  %v6839_v34 = vand.u32 2147483647, %v6830_v26  ;;  %vm2995_vm1 = vcmp.ge.f32.partialorder %v6547_v2, 0.0  ;;  %v2293_v22 = vmul.f32 %v6760_v38, %v2229_v17  ;;  %v2295_v6 = vmul.f32 %v6776_v10, %v2231_v59  ;;  %v6850_v16 = vpop.f32.mrb[31].mxu1 }
 0x5c3   : > { %8001 = vst [vmem:[#allocation82_spill] sm:$0xff] %v6836_v14  ;;  %v6841_v32 = vpop.eup %4596  ;;  %v2679_v57 = vmul.f32 %v2615_v40, %v6699_v42  ;;  %v1851_v46 = vadd.f32 1.0, %v1787_v21  ;;  %v2931_v15 = vsub.f32 1.0, %v2867_v49  ;;  %v2166_v0 = vmul.f32 %v6823_v24, %v2102_v25  ;;  %8002 = vst [vmem:[#allocation83_spill] sm:$0xff] %v6850_v16 }
 0x5c4   : > { %v2040_v19 = vmul.f32 1.0614054, %v6841_v32  ;;  %v1786_v36 = vmul.f32 0.3275911, %v6839_v34  ;;  %v2930_v4 = vsub.f32 1.0, %v2866_v62  ;;  %vm2994_vm2 = vcmp.ge.f32.partialorder %v6571_v60, 0.0 }
 0x5c5   : > { %v2777_v14 = vmul.f32 1.442695, %v2677_v8  ;;  %v2614_v17 = vsub.f32 0.0, %v6745_v45  ;;  %4602 = vrcp.f32 %v1851_v46  ;;  %v2548_v59 = vmul.f32 %v6711_v9, %v2484_v27  ;;  %v8003_v46 = vld [vmem:[#allocation38_spill] sm:$0xff] }
 0x5c6   : > { %v2230_v42 = vadd.f32 1.4214138, %v2166_v0  ;;  %v2104_v40 = vadd.f32 -1.4531521, %v2040_v19  ;;  %v1850_v49 = vadd.f32 1.0, %v1786_v36  ;;  %v6857_v21 = vmul.f32 %v6778_v61, %v6613_v12 }
 0x5c7   : > { %v2357_v25 = vadd.f32 -0.28449672, %v2293_v22  ;;  %v2359_v35 = vadd.f32 -0.28449672, %v2295_v6  ;;  %v2781_v26 = vmul.f32 1.442695, %v2679_v57  ;;  %v6864_v37 = vadd.f32 %v8003_v46, %v5647_v52 }
 0x5c8   : > { %v6859_v16 = vpop.eup %4598  ;;  %v3059_v62 = vsub.f32 0.0, %v2931_v15  ;;  %v2168_v8 = vmul.f32 %v6841_v32, %v2104_v40  ;;  %4604 = vrcp.f32 %v1850_v49  ;;  %v6867_v27 = vmul.f32 %v3182_v58, %v6616_v3  ;;  %v6880_v58 = vpop.f32.mrb[47].mxu0 }
 0x5c9   : > { %v4601_v9 = vpop.eup %4600  ;;  %v6870_v12 = vmul.f32 %v3184_v53, %v6631_v30  ;;  %v2678_v61 = vmul.f32 %v2614_v17, %v6745_v45  ;;  %v2041_v22 = vmul.f32 1.0614054, %v6859_v16  ;;  %v3058_v6 = vsub.f32 0.0, %v2930_v4 }
 0x5ca   : > { %v2868_v57 = vmul.f32 %v4601_v9, %v2548_v59  ;;  %4606 = vpow2.f32 %v2777_v14  ;;  %v2294_v0 = vmul.f32 %v6823_v24, %v2230_v42  ;;  %v6876_v19 = vmul.f32 %v3185_v63, %v6649_v13 }
 0x5cb   : > { %v2421_v36 = vmul.f32 %v6760_v38, %v2357_v25  ;;  %v2423_v3 = vmul.f32 %v6776_v10, %v2359_v35  ;;  %4608 = vpow2.f32 %v2781_v26  ;;  %v3123_v30 = vsel %vm2995_vm1, %v2931_v15, %v3059_v62  ;;  %v8005_v62 = vld [vmem:[#allocation67_spill] sm:$0xff] }
 0x5cc   : > { %8004 = vst [vmem:[#allocation38_spill] sm:$0xff] %v6876_v19  ;;  %v2232_v45 = vadd.f32 1.4214138, %v2168_v8  ;;  %v2105_v53 = vadd.f32 -1.4531521, %v2041_v22  ;;  %v6888_v14 = vmul.f32 0.5, %v6723_v56  ;;  %v3122_v26 = vsel %vm2994_vm2, %v2930_v4, %v3058_v6 }
 0x5cd   : > { %v6885_v17 = vmul.f32 0.70710677, %v6864_v37  ;;  %v2779_v13 = vmul.f32 1.442695, %v2678_v61  ;;  %v6891_v63 = vmul.f32 0.5, %v6733_v20  ;;  %v2616_v35 = vsub.f32 0.0, %v6758_v18 }
 0x5ce   : > { %v2932_v59 = vsub.f32 1.0, %v2868_v57  ;;  %vm2996_vm3 = vcmp.ge.f32.partialorder %v6622_v28, 0.0  ;;  %v2358_v2 = vadd.f32 -0.28449672, %v2294_v0  ;;  %v3187_v56 = vadd.f32 1.0, %v3123_v30 }
 0x5cf   : > { %v6898_v15 = vand.u32 2147483647, %v6885_v17  ;;  %v6900_v42 = vpop.eup %4602  ;;  %v2485_v40 = vadd.f32 0.2548296, %v2421_v36  ;;  %v2487_v49 = vadd.f32 0.2548296, %v2423_v3  ;;  %v2296_v25 = vmul.f32 %v6841_v32, %v2232_v45 }
 0x5d0   : > { %v6903_v20 = vmul.f32 0.5, %v6754_v29  ;;  %v2169_v60 = vmul.f32 %v6859_v16, %v2105_v53  ;;  %v2043_v4 = vmul.f32 1.0614054, %v6900_v42  ;;  %v6910_v8 = vadd.f32 %v8005_v62, %v5626_v44 }
 0x5d1   : > { %v3186_v46 = vadd.f32 1.0, %v3122_v26  ;;  %4610 = vpow2.f32 %v2779_v13  ;;  %v2680_v9 = vmul.f32 %v2616_v35, %v6758_v18  ;;  %v1788_v61 = vmul.f32 0.3275911, %v6898_v15 }
 0x5d2   : > { %v6914_v22 = vpop.eup %4604  ;;  %v3060_v29 = vsub.f32 0.0, %v2932_v59  ;;  %v2422_v6 = vmul.f32 %v6823_v24, %v2358_v2  ;;  %v2617_v57 = vsub.f32 0.0, %v6790_v50  ;;  %v2107_v0 = vadd.f32 -1.4531521, %v2043_v4 }
 0x5d3   : > { %v2549_v36 = vmul.f32 %v6760_v38, %v2485_v40  ;;  %v2551_v3 = vmul.f32 %v6776_v10, %v2487_v49  ;;  %v2619_v30 = vsub.f32 0.0, %v6826_v11  ;;  %v1852_v45 = vadd.f32 1.0, %v1788_v61 }
 0x5d4   : > { %v4607_v53 = vpop.eup %4606  ;;  %v6922_v18 = vmul.f32 %v3187_v56, %v6691_v47  ;;  %v2360_v13 = vadd.f32 -0.28449672, %v2296_v25  ;;  %v2233_v35 = vadd.f32 1.4214138, %v2169_v60  ;;  %v6925_v26 = vmul.f32 0.70710677, %v6910_v8 }
 0x5d5   : > { %v4609_v2 = vpop.eup %4608  ;;  %v2783_v62 = vmul.f32 1.442695, %v2680_v9  ;;  %v2171_v4 = vmul.f32 %v6900_v42, %v2107_v0  ;;  %v2042_v38 = vmul.f32 1.0614054, %v6914_v22  ;;  %4612 = vrcp.f32 %v1852_v45 }
 0x5d6   : > { %8006 = vst [vmem:[#allocation67_spill] sm:$0xff] %v6922_v18  ;;  %v6930_v10 = vmul.f32 %v3186_v46, %v6709_v39  ;;  %v2486_v40 = vadd.f32 0.2548296, %v2422_v6  ;;  %v2681_v49 = vmul.f32 %v2617_v57, %v6790_v50  ;;  %v6934_v47 = vand.u32 2147483647, %v6925_v26  ;;  %v8008_v46 = vld [vmem:[#allocation69_spill] sm:$0xff] }
 0x5d7   : > { %v3124_v56 = vsel %vm2996_vm3, %v2932_v59, %v3060_v29  ;;  %v2869_v25 = vmul.f32 %v4607_v53, %v2549_v36  ;;  %v2871_v60 = vmul.f32 %v4609_v2, %v2551_v3  ;;  %v2683_v9 = vmul.f32 %v2619_v30, %v6826_v11 }
 0x5d8   : > { %8007 = vst [vmem:[#allocation84_spill] sm:$0xff] %v6930_v10  ;;  %v2424_v61 = vmul.f32 %v6841_v32, %v2360_v13  ;;  %v2297_v0 = vmul.f32 %v6859_v16, %v2233_v35  ;;  %v1789_v39 = vmul.f32 0.3275911, %v6934_v47  ;;  %v6944_v6 = vadd.f32 %v8008_v46, %v5628_v41 }
 0x5d9   : > { %4614 = vpow2.f32 %v2783_v62  ;;  %v6947_v50 = vmul.f32 0.5, %v6803_v23  ;;  %v2235_v28 = vadd.f32 1.4214138, %v2171_v4  ;;  %v2106_v59 = vadd.f32 -1.4531521, %v2042_v38  ;;  %v8009_v38 = vld [vmem:[#allocation72_spill] sm:$0xff] }
 0x5da   : > { %v3188_v29 = vadd.f32 1.0, %v3124_v56  ;;  %vm2997_vm4 = vcmp.ge.f32.partialorder %v6672_v5, 0.0  ;;  %vm2999_vm5 = vcmp.ge.f32.partialorder %v6688_v1, 0.0  ;;  %v2550_v11 = vmul.f32 %v6823_v24, %v2486_v40 }
 0x5db   : > { %v2785_v57 = vmul.f32 1.442695, %v2681_v49  ;;  %v1853_v36 = vadd.f32 1.0, %v1789_v39  ;;  %v4611_v3 = vpop.eup %4610  ;;  %v2933_v30 = vsub.f32 1.0, %v2869_v25  ;;  %v2935_v45 = vsub.f32 1.0, %v2871_v60 }
 0x5dc   : > { %v2789_v53 = vmul.f32 1.442695, %v2683_v9  ;;  %v6953_v13 = vmul.f32 0.5, %v6808_v51  ;;  %v2488_v23 = vadd.f32 0.2548296, %v2424_v61  ;;  %v2299_v62 = vmul.f32 %v6900_v42, %v2235_v28 }
 0x5dd   : > { %v2361_v35 = vadd.f32 -0.28449672, %v2297_v0  ;;  %4616 = vrcp.f32 %v1853_v36  ;;  %v6956_v2 = vmul.f32 0.70710677, %v6944_v6  ;;  %v2170_v4 = vmul.f32 %v6914_v22, %v2106_v59 }
 0x5de   : > { %v2618_v24 = vsub.f32 0.0, %v6839_v34  ;;  %v6963_v40 = vadd.f32 %v8009_v38, %v5630_v43  ;;  %v6966_v49 = vmul.f32 %v3188_v29, %v6716_v48  ;;  %v2870_v51 = vmul.f32 %v4611_v3, %v2550_v11 }
 0x5df   : > { %4618 = vpow2.f32 %v2785_v57  ;;  %v6969_v56 = vand.u32 2147483647, %v6956_v2  ;;  %v6971_v25 = vpop.eup %4612  ;;  %v3061_v60 = vsub.f32 0.0, %v2933_v30  ;;  %v3063_v9 = vsub.f32 0.0, %v2935_v45 }
 0x5e0   : > { %8010 = vst [vmem:[#allocation69_spill] sm:$0xff] %v6966_v49  ;;  %4620 = vpow2.f32 %v2789_v53  ;;  %v2620_v61 = vsub.f32 0.0, %v6898_v15  ;;  %v2552_v0 = vmul.f32 %v6841_v32, %v2488_v23  ;;  %v2425_v39 = vmul.f32 %v6859_v16, %v2361_v35  ;;  %v8011_v32 = vld [vmem:[#allocation42_spill] sm:$0xff] }
 0x5e1   : > { %v2044_v46 = vmul.f32 1.0614054, %v6971_v25  ;;  %v1791_v48 = vmul.f32 0.3275911, %v6969_v56  ;;  %vm2998_vm6 = vcmp.ge.f32.partialorder %v6729_v31, 0.0  ;;  %v2682_v29 = vmul.f32 %v2618_v24, %v6839_v34 }
 0x5e2   : > { %v2363_v28 = vadd.f32 -0.28449672, %v2299_v62  ;;  %v2234_v59 = vadd.f32 1.4214138, %v2170_v4  ;;  %v6981_v11 = vmul.f32 0.70710677, %v6963_v40  ;;  %v6985_v53 = vadd.f32 %v8011_v32, %v5647_v52 }
 0x5e3   : > { %v2934_v57 = vsub.f32 1.0, %v2870_v51  ;;  %v2108_v36 = vadd.f32 -1.4531521, %v2044_v46  ;;  %v1855_v3 = vadd.f32 1.0, %v1791_v48  ;;  %v4615_v23 = vpop.eup %4614  ;;  %v3125_v35 = vsel %vm2997_vm4, %v2933_v30, %v3061_v60 }
 0x5e4   : > { %v3127_v62 = vsel %vm2999_vm5, %v2935_v45, %v3063_v9  ;;  %v2684_v4 = vmul.f32 %v2620_v61, %v6898_v15  ;;  %v6993_v34 = vand.u32 2147483647, %v6981_v11  ;;  %v2872_v24 = vmul.f32 %v4615_v23, %v2552_v0 }
 0x5e5   : > { %v2489_v38 = vadd.f32 0.2548296, %v2425_v39  ;;  %v2172_v51 = vmul.f32 %v6971_v25, %v2108_v36  ;;  %4622 = vrcp.f32 %v1855_v3  ;;  %v2427_v46 = vmul.f32 %v6900_v42, %v2363_v28 }
 0x5e6   : > { %v2298_v48 = vmul.f32 %v6914_v22, %v2234_v59  ;;  %v2787_v32 = vmul.f32 1.442695, %v2682_v29  ;;  %v1790_v5 = vmul.f32 0.3275911, %v6993_v34  ;;  %v3062_v1 = vsub.f32 0.0, %v2934_v57 }
 0x5e7   : > { %v6999_v30 = vpop.eup %4616  ;;  %v7002_v15 = vmul.f32 0.5, %v6864_v37  ;;  %v2236_v45 = vadd.f32 1.4214138, %v2172_v51  ;;  %v7005_v60 = vmul.f32 0.70710677, %v6985_v53  ;;  %v3189_v9 = vadd.f32 1.0, %v3125_v35 }
 0x5e8   : > { %v3191_v61 = vadd.f32 1.0, %v3127_v62  ;;  %vm3000_vm7 = vcmp.ge.f32.partialorder %v6750_v33, 0.0  ;;  %v2045_v0 = vmul.f32 1.0614054, %v6999_v30  ;;  %v1854_v39 = vadd.f32 1.0, %v1790_v5  ;;  %v8017_v33 = vld [vmem:[#allocation45_spill] sm:$0xff] }
 0x5e9   : > { %v4619_v28 = vpop.eup %4618  ;;  %v2936_v59 = vsub.f32 1.0, %v2872_v24  ;;  %v2553_v29 = vmul.f32 %v6859_v16, %v2489_v38  ;;  %v2791_v36 = vmul.f32 1.442695, %v2684_v4  ;;  %v7011_v3 = vand.u32 2147483647, %v7005_v60  ;;  %v8012_v24 = vld [vmem:[#allocation43_spill] sm:$0xff] }
 0x5ea   : > { %v4621_v37 = vpop.eup %4620  ;;  %v2491_v23 = vadd.f32 0.2548296, %v2427_v46  ;;  %v2362_v51 = vadd.f32 -0.28449672, %v2298_v48  ;;  %v2109_v18 = vadd.f32 -1.4531521, %v2045_v0  ;;  %4624 = vrcp.f32 %v1854_v39 }
 0x5eb   : > { %v3126_v35 = vsel %vm2998_vm6, %v2934_v57, %v3062_v1  ;;  %v2300_v62 = vmul.f32 %v6971_v25, %v2236_v45  ;;  %v1792_v5 = vmul.f32 0.3275911, %v7011_v3  ;;  %v7019_v19 = vadd.f32 %v8012_v24, %v5626_v44 }
 0x5ec   : > { %v7022_v16 = vmul.f32 %v3189_v9, %v6793_v54  ;;  %4626 = vpow2.f32 %v2787_v32  ;;  %v7025_v4 = vmul.f32 0.5, %v6910_v8  ;;  %v2621_v38 = vsub.f32 0.0, %v6934_v47 }
 0x5ed   : > { %v3064_v46 = vsub.f32 0.0, %v2936_v59  ;;  %v2873_v31 = vmul.f32 %v4619_v28, %v2553_v29  ;;  %v2173_v57 = vmul.f32 %v6999_v30, %v2109_v18  ;;  %v1856_v48 = vadd.f32 1.0, %v1792_v5  ;;  %v8015_v28 = vld [vmem:[#allocation44_spill] sm:$0xff] }
 0x5ee   : > { %8013 = vst [vmem:[#allocation72_spill] sm:$0xff] %v7022_v16  ;;  %v3190_v1 = vadd.f32 1.0, %v3126_v35  ;;  %v2555_v45 = vmul.f32 %v6900_v42, %v2491_v23  ;;  %v2426_v0 = vmul.f32 %v6914_v22, %v2362_v51  ;;  %4628 = vpow2.f32 %v2791_v36 }
 0x5ef   : > { %v7031_v39 = vpop.eup %4622  ;;  %v7034_v54 = vmul.f32 %v3191_v61, %v6798_v7  ;;  %v2364_v8 = vadd.f32 -0.28449672, %v2300_v62  ;;  %4630 = vrcp.f32 %v1856_v48  ;;  %v7037_v32 = vmul.f32 0.70710677, %v7019_v19  ;;  %v8018_v48 = vld [vmem:[#allocation65_spill] sm:$0xff] }
 0x5f0   : > { %vm3001_vm8 = vcmp.ge.f32.partialorder %v6771_v55, 0.0  ;;  %v2685_v18 = vmul.f32 %v2621_v38, %v6934_v47  ;;  %v7042_v9 = vmul.f32 0.5, %v6944_v6  ;;  %v2047_v42 = vmul.f32 1.0614054, %v7031_v39 }
 0x5f1   : > { %8014 = vst [vmem:[#allocation42_spill] sm:$0xff] %v7034_v54  ;;  %v7047_v29 = vadd.f32 %v8015_v28, %v5628_v41  ;;  %v3128_v7 = vsel %vm3000_vm7, %v2936_v59, %v3064_v46  ;;  %v2937_v61 = vsub.f32 1.0, %v2873_v31  ;;  %v2237_v36 = vadd.f32 1.4214138, %v2173_v57 }
 0x5f2   : > { %v7052_v23 = vand.u32 2147483647, %v7037_v32  ;;  %v7055_v51 = vmul.f32 %v3190_v1, %v6888_v14  ;;  %v2875_v47 = vmul.f32 %v4621_v37, %v2555_v45  ;;  %v2490_v6 = vadd.f32 0.2548296, %v2426_v0 }
 0x5f3   : > { %v2111_v35 = vadd.f32 -1.4531521, %v2047_v42  ;;  %v2428_v62 = vmul.f32 %v6971_v25, %v2364_v8  ;;  %v7060_v24 = vmul.f32 0.70710677, %v7047_v29  ;;  %v7064_v59 = vadd.f32 %v8017_v33, %v5630_v43 }
 0x5f4   : > { %8016 = vst [vmem:[#allocation43_spill] sm:$0xff] %v7055_v51  ;;  %v1793_v5 = vmul.f32 0.3275911, %v7052_v23  ;;  %v7066_v38 = vpop.eup %4624  ;;  %v3192_v46 = vadd.f32 1.0, %v3128_v7  ;;  %v2793_v31 = vmul.f32 1.442695, %v2685_v18  ;;  %v2301_v1 = vmul.f32 %v6999_v30, %v2237_v36 }
 0x5f5   : > { %v2175_v14 = vmul.f32 %v7031_v39, %v2111_v35  ;;  %v2623_v37 = vsub.f32 0.0, %v6969_v56  ;;  %v3065_v57 = vsub.f32 0.0, %v2937_v61  ;;  %vm3003_vm9 = vcmp.ge.f32.partialorder %v8018_v48, 0.0 }
 0x5f6   : > { %v2046_v45 = vmul.f32 1.0614054, %v7066_v38  ;;  %v1857_v0 = vadd.f32 1.0, %v1793_v5  ;;  %v4627_v8 = vpop.eup %4626  ;;  %v2939_v42 = vsub.f32 1.0, %v2875_v47  ;;  %v2554_v28 = vmul.f32 %v6914_v22, %v2490_v6 }
 0x5f7   : > { %v2239_v33 = vadd.f32 1.4214138, %v2175_v14  ;;  %v7075_v7 = vand.u32 2147483647, %v7060_v24  ;;  %v2492_v18 = vadd.f32 0.2548296, %v2428_v62  ;;  %v2687_v36 = vmul.f32 %v2623_v37, %v6969_v56 }
 0x5f8   : > { %v2110_v35 = vadd.f32 -1.4531521, %v2046_v45  ;;  %4632 = vrcp.f32 %v1857_v0  ;;  %v7078_v54 = vmul.f32 0.70710677, %v7064_v59  ;;  %v4629_v16 = vpop.eup %4628  ;;  %v7082_v5 = vmul.f32 0.5, %v6963_v40 }
 0x5f9   : > { %4634 = vpow2.f32 %v2793_v31  ;;  %v1795_v47 = vmul.f32 0.3275911, %v7075_v7  ;;  %v7085_v22 = vpop.eup %4630  ;;  %v3129_v6 = vsel %vm3001_vm8, %v2937_v61, %v3065_v57  ;;  %v2365_v62 = vadd.f32 -0.28449672, %v2301_v1 }
 0x5fa   : > { %v2303_v14 = vmul.f32 %v7031_v39, %v2239_v33  ;;  %v2174_v45 = vmul.f32 %v7066_v38, %v2110_v35  ;;  %v3067_v0 = vsub.f32 0.0, %v2939_v42  ;;  %v2874_v49 = vmul.f32 %v4627_v8, %v2554_v28 }
 0x5fb   : > { %v2622_v31 = vsub.f32 0.0, %v6993_v34  ;;  %v2048_v56 = vmul.f32 1.0614054, %v7085_v22  ;;  %v2556_v40 = vmul.f32 %v6971_v25, %v2492_v18  ;;  %v1859_v51 = vadd.f32 1.0, %v1795_v47  ;;  %v8019_v18 = vld [vmem:[#allocation81_spill] sm:$0xff] }
 0x5fc   : > { %v2238_v37 = vadd.f32 1.4214138, %v2174_v45  ;;  %v7095_v10 = vand.u32 2147483647, %v7078_v54  ;;  %v3193_v55 = vadd.f32 1.0, %v3129_v6  ;;  %v2624_v1 = vsub.f32 0.0, %v7011_v3 }
 0x5fd   : > { %v2797_v61 = vmul.f32 1.442695, %v2687_v36  ;;  %v2112_v57 = vadd.f32 -1.4531521, %v2048_v56  ;;  %v2429_v33 = vmul.f32 %v6999_v30, %v2365_v62  ;;  %v2367_v35 = vadd.f32 -0.28449672, %v2303_v14 }
 0x5fe   : > { %4636 = vrcp.f32 %v1859_v51  ;;  %v1794_v8 = vmul.f32 0.3275911, %v7095_v10  ;;  %v3131_v28 = vsel %vm3003_vm9, %v2939_v42, %v3067_v0  ;;  %v2938_v25 = vsub.f32 1.0, %v2874_v49  ;;  %v8020_v62 = vld [vmem:[#allocation48_spill] sm:$0xff] }
 0x5ff   : > { %vm3002_vm10 = vcmp.ge.f32.partialorder %v8019_v18, 0.0  ;;  %v2302_v47 = vmul.f32 %v7066_v38, %v2238_v37  ;;  %v2176_v6 = vmul.f32 %v7085_v22, %v2112_v57  ;;  %v2876_v36 = vmul.f32 %v4629_v16, %v2556_v40 }
 0x600   : > { %v2686_v45 = vmul.f32 %v2622_v31, %v6993_v34  ;;  %v1858_v56 = vadd.f32 1.0, %v1794_v8  ;;  %v7108_v14 = vadd.f32 %v8020_v62, %v5647_v52  ;;  %v7111_v51 = vmul.f32 %v3192_v46, %v6891_v63 }
 0x601   : > { %4638 = vpow2.f32 %v2797_v61  ;;  %v2240_v48 = vadd.f32 1.4214138, %v2176_v6  ;;  %v2688_v49 = vmul.f32 %v2624_v1, %v7011_v3  ;;  %v7117_v0 = vmul.f32 %v3193_v55, %v6903_v20  ;;  %v8022_v20 = vld [vmem:[#allocation51_spill] sm:$0xff] }
 0x602   : > { %v7114_v42 = vpop.eup %4632  ;;  %v2493_v16 = vadd.f32 0.2548296, %v2429_v33  ;;  %v2431_v34 = vmul.f32 %v7031_v39, %v2367_v35  ;;  %4640 = vrcp.f32 %v1858_v56  ;;  %v3195_v40 = vadd.f32 1.0, %v3131_v28 }
 0x603   : > { %8021 = vst [vmem:[#allocation44_spill] sm:$0xff] %v7117_v0  ;;  %v4635_v31 = vpop.eup %4634  ;;  %v3066_v37 = vsub.f32 0.0, %v2938_v25  ;;  %v2366_v57 = vadd.f32 -0.28449672, %v2302_v47  ;;  %v2049_v63 = vmul.f32 1.0614054, %v7114_v42  ;;  %v7127_v55 = vadd.f32 %v8022_v20, %v5626_v44 }
 0x604   : > { %v2940_v46 = vsub.f32 1.0, %v2876_v36  ;;  %vm3004_vm11 = vcmp.ge.f32.partialorder %v6885_v17, 0.0  ;;  %v2795_v61 = vmul.f32 1.442695, %v2686_v45  ;;  %v7123_v3 = vmul.f32 0.70710677, %v7108_v14 }
 0x605   : > { %v7130_v1 = vmul.f32 0.5, %v6985_v53  ;;  %v2304_v33 = vmul.f32 %v7085_v22, %v2240_v48  ;;  %v2799_v35 = vmul.f32 1.442695, %v2688_v49  ;;  %v2113_v8 = vadd.f32 -1.4531521, %v2049_v63  ;;  %v8024_v17 = vld [vmem:[#allocation53_spill] sm:$0xff] }
 0x606   : > { %v2557_v28 = vmul.f32 %v6999_v30, %v2493_v16  ;;  %v2495_v47 = vadd.f32 0.2548296, %v2431_v34  ;;  %v2625_v6 = vsub.f32 0.0, %v7052_v23  ;;  %v7136_v36 = vand.u32 2147483647, %v7123_v3 }
 0x607   : > { %v7139_v45 = vmul.f32 %v3195_v40, %v6947_v50  ;;  %v2430_v56 = vmul.f32 %v7066_v38, %v2366_v57  ;;  %v2177_v53 = vmul.f32 %v7114_v42, %v2113_v8  ;;  %v7144_v62 = vmul.f32 0.70710677, %v7127_v55 }
 0x608   : > { %v7146_v48 = vpop.eup %4636  ;;  %v3130_v30 = vsel %vm3002_vm10, %v2938_v25, %v3066_v37  ;;  %v3068_v49 = vsub.f32 0.0, %v2940_v46  ;;  %4642 = vpow2.f32 %v2795_v61  ;;  %v1796_v16 = vmul.f32 0.3275911, %v7136_v36 }
 0x609   : > { %8023 = vst [vmem:[#allocation45_spill] sm:$0xff] %v7139_v45  ;;  %v2368_v34 = vadd.f32 -0.28449672, %v2304_v33  ;;  %4644 = vpow2.f32 %v2799_v35  ;;  %v2241_v50 = vadd.f32 1.4214138, %v2177_v53  ;;  %v2877_v57 = vmul.f32 %v4635_v31, %v2557_v28 }
 0x60a   : > { %v2051_v40 = vmul.f32 1.0614054, %v7146_v48  ;;  %v2559_v63 = vmul.f32 %v7031_v39, %v2495_v47  ;;  %v2689_v20 = vmul.f32 %v2625_v6, %v7052_v23  ;;  %v1860_v8 = vadd.f32 1.0, %v1796_v16 }
 0x60b   : > { %v4639_v45 = vpop.eup %4638  ;;  %v2494_v0 = vadd.f32 0.2548296, %v2430_v56  ;;  %v2305_v18 = vmul.f32 %v7114_v42, %v2241_v50  ;;  %v7156_v37 = vand.u32 2147483647, %v7144_v62  ;;  %v3194_v33 = vadd.f32 1.0, %v3130_v30 }
 0x60c   : > { %v2115_v25 = vadd.f32 -1.4531521, %v2051_v40  ;;  %v7158_v61 = vpop.eup %4640  ;;  %v7161_v35 = vmul.f32 0.5, %v7019_v19  ;;  %v2627_v31 = vsub.f32 0.0, %v7075_v7  ;;  %4646 = vrcp.f32 %v1860_v8 }
 0x60d   : > { %v3132_v39 = vsel %vm3004_vm11, %v2940_v46, %v3068_v49  ;;  %vm3005_vm12 = vcmp.ge.f32.partialorder %v6925_v26, 0.0  ;;  %v2432_v23 = vmul.f32 %v7085_v22, %v2368_v34  ;;  %v2050_v47 = vmul.f32 1.0614054, %v7158_v61 }
 0x60e   : > { %v2179_v28 = vmul.f32 %v7146_v48, %v2115_v25  ;;  %v2941_v6 = vsub.f32 1.0, %v2877_v57  ;;  %v2879_v56 = vmul.f32 %v4639_v45, %v2559_v63  ;;  %v2369_v53 = vadd.f32 -0.28449672, %v2305_v18 }
 0x60f   : > { %v1797_v19 = vmul.f32 0.3275911, %v7156_v37  ;;  %v2558_v30 = vmul.f32 %v7066_v38, %v2494_v0  ;;  %v2801_v16 = vmul.f32 1.442695, %v2689_v20  ;;  %v7174_v46 = vadd.f32 %v8024_v17, %v5628_v41 }
 0x610   : > { %v2243_v50 = vadd.f32 1.4214138, %v2179_v28  ;;  %v7177_v49 = vmul.f32 %v3194_v33, %v6953_v13  ;;  %v2691_v34 = vmul.f32 %v2627_v31, %v7075_v7  ;;  %v2114_v40 = vadd.f32 -1.4531521, %v2050_v47  ;;  %v8026_v28 = vld [vmem:[#allocation77_spill] sm:$0xff] }
 0x611   : > { %v1861_v8 = vadd.f32 1.0, %v1797_v19  ;;  %v3196_v57 = vadd.f32 1.0, %v3132_v39  ;;  %v2496_v45 = vadd.f32 0.2548296, %v2432_v23  ;;  %v7181_v63 = vmul.f32 0.5, %v7047_v29 }
 0x612   : > { %8025 = vst [vmem:[#allocation65_spill] sm:$0xff] %v7177_v49  ;;  %v2307_v38 = vmul.f32 %v7146_v48, %v2243_v50  ;;  %v4643_v0 = vpop.eup %4642  ;;  %v3069_v20 = vsub.f32 0.0, %v2941_v6  ;;  %v2943_v18 = vsub.f32 1.0, %v2879_v56  ;;  %vm3007_vm13 = vcmp.ge.f32.partialorder %v6956_v2, 0.0 }
 0x613   : > { %v2433_v25 = vmul.f32 %v7114_v42, %v2369_v53  ;;  %4648 = vrcp.f32 %v1861_v8  ;;  %v4645_v13 = vpop.eup %4644  ;;  %v2878_v33 = vmul.f32 %v4643_v0, %v2558_v30  ;;  %v2178_v7 = vmul.f32 %v7158_v61, %v2114_v40 }
 0x614   : > { %4650 = vpow2.f32 %v2801_v16  ;;  %v7188_v31 = vmul.f32 0.70710677, %v7174_v46  ;;  %v2805_v29 = vmul.f32 1.442695, %v2691_v34  ;;  %v7191_v39 = vmul.f32 0.5, %v7064_v59 }
 0x615   : > { %v2626_v23 = vsub.f32 0.0, %v7095_v10  ;;  %v7196_v47 = vadd.f32 %v8026_v28, %v5630_v43  ;;  %v7199_v56 = vmul.f32 %v3196_v57, %v7002_v15  ;;  %v2560_v53 = vmul.f32 %v7085_v22, %v2496_v45 }
 0x616   : > { %v2371_v19 = vadd.f32 -0.28449672, %v2307_v38  ;;  %v7203_v30 = vand.u32 2147483647, %v7188_v31  ;;  %v7205_v16 = vpop.eup %4646  ;;  %v3133_v59 = vsel %vm3005_vm12, %v2941_v6, %v3069_v20  ;;  %v3071_v50 = vsub.f32 0.0, %v2943_v18 }
 0x617   : > { %8027 = vst [vmem:[#allocation81_spill] sm:$0xff] %v7199_v56  ;;  %v2497_v17 = vadd.f32 0.2548296, %v2433_v25  ;;  %v7210_v34 = vmul.f32 0.70710677, %v7196_v47  ;;  %v2942_v40 = vsub.f32 1.0, %v2878_v33  ;;  %4652 = vpow2.f32 %v2805_v29 }
 0x618   : > { %vm3006_vm14 = vcmp.ge.f32.partialorder %v6981_v11, 0.0  ;;  %v2242_v15 = vadd.f32 1.4214138, %v2178_v7  ;;  %v2052_v22 = vmul.f32 1.0614054, %v7205_v16  ;;  %v2628_v8 = vsub.f32 0.0, %v7136_v36 }
 0x619   : > { %v2690_v57 = vmul.f32 %v2626_v23, %v7095_v10  ;;  %v1799_v45 = vmul.f32 0.3275911, %v7203_v30  ;;  %v7218_v26 = vand.u32 2147483647, %v7210_v34  ;;  %v3197_v6 = vadd.f32 1.0, %v3133_v59 }
 0x61a   : > { %v2880_v38 = vmul.f32 %v4645_v13, %v2560_v53  ;;  %v2435_v0 = vmul.f32 %v7146_v48, %v2371_v19  ;;  %v2116_v20 = vadd.f32 -1.4531521, %v2052_v22  ;;  %v2561_v25 = vmul.f32 %v7114_v42, %v2497_v17  ;;  %v8028_v53 = vld [vmem:[#allocation78_spill] sm:$0xff] }
 0x61b   : > { %v7223_v33 = vmul.f32 0.5, %v7108_v14  ;;  %v1863_v7 = vadd.f32 1.0, %v1799_v45  ;;  %v1798_v29 = vmul.f32 0.3275911, %v7218_v26  ;;  %v3135_v10 = vsel %vm3007_vm13, %v2943_v18, %v3071_v50 }
 0x61c   : > { %v3070_v23 = vsub.f32 0.0, %v2942_v40  ;;  %v2306_v28 = vmul.f32 %v7158_v61, %v2242_v15  ;;  %v2692_v59 = vmul.f32 %v2628_v8, %v7136_v36  ;;  %vm3008_vm15 = vcmp.ge.f32.partialorder %v7005_v60, 0.0 }
 0x61d   : > { %v7230_v13 = vpop.eup %4648  ;;  %v2180_v42 = vmul.f32 %v7205_v16, %v2116_v20  ;;  %4654 = vrcp.f32 %v1863_v7  ;;  %v1862_v14 = vadd.f32 1.0, %v1798_v29  ;;  %v7236_v19 = vadd.f32 %v8028_v53, %v5647_v52 }
 0x61e   : > { %v4651_v17 = vpop.eup %4650  ;;  %v2944_v2 = vsub.f32 1.0, %v2880_v38  ;;  %v2499_v18 = vadd.f32 0.2548296, %v2435_v0  ;;  %v2053_v50 = vmul.f32 1.0614054, %v7230_v13  ;;  %v2629_v15 = vsub.f32 0.0, %v7156_v37 }
 0x61f   : > { %v7241_v36 = vmul.f32 %v3197_v6, %v7025_v4  ;;  %v2881_v22 = vmul.f32 %v4651_v17, %v2561_v25  ;;  %v2803_v8 = vmul.f32 1.442695, %v2690_v57  ;;  %4656 = vrcp.f32 %v1862_v14  ;;  %v8029_v57 = vld [vmem:[#allocation61_spill] sm:$0xff] }
 0x620   : > { %v3199_v45 = vadd.f32 1.0, %v3135_v10  ;;  %v2370_v20 = vadd.f32 -0.28449672, %v2306_v28  ;;  %v2117_v7 = vadd.f32 -1.4531521, %v2053_v50  ;;  %v2631_v29 = vsub.f32 0.0, %v7203_v30 }
 0x621   : > { %v3134_v53 = vsel %vm3006_vm14, %v2942_v40, %v3070_v23  ;;  %v2244_v38 = vadd.f32 1.4214138, %v2180_v42  ;;  %v2807_v0 = vmul.f32 1.442695, %v2692_v59  ;;  %v7247_v56 = vmul.f32 0.70710677, %v7236_v19  ;;  %v4653_v10 = vpop.eup %4652 }
 0x622   : > { %v3072_v49 = vsub.f32 0.0, %v2944_v2  ;;  %v2563_v4 = vmul.f32 %v7146_v48, %v2499_v18  ;;  %v2693_v6 = vmul.f32 %v2629_v15, %v7156_v37  ;;  %v7253_v25 = vadd.f32 %v8029_v57, %v5626_v44 }
 0x623   : > { %v2945_v28 = vsub.f32 1.0, %v2881_v22  ;;  %vm3009_vm0 = vcmp.ge.f32.partialorder %v7037_v32, 0.0  ;;  %4658 = vpow2.f32 %v2803_v8  ;;  %v2181_v11 = vmul.f32 %v7230_v13, %v2117_v7 }
 0x624   : > { %v7258_v40 = vand.u32 2147483647, %v7247_v56  ;;  %v3198_v23 = vadd.f32 1.0, %v3134_v53  ;;  %v2434_v59 = vmul.f32 %v7158_v61, %v2370_v20  ;;  %v7262_v48 = vmul.f32 0.5, %v7127_v55  ;;  %v8031_v20 = vld [vmem:[#allocation60_spill] sm:$0xff] }
 0x625   : > { %v2695_v37 = vmul.f32 %v2631_v29, %v7203_v30  ;;  %v7266_v42 = vmul.f32 %v3199_v45, %v7042_v9  ;;  %v2308_v14 = vmul.f32 %v7205_v16, %v2244_v38  ;;  %4660 = vpow2.f32 %v2807_v0  ;;  %v8030_v45 = vld [vmem:[#allocation58_spill] sm:$0xff] }
 0x626   : > { %v1800_v17 = vmul.f32 0.3275911, %v7258_v40  ;;  %v3136_v18 = vsel %vm3008_vm15, %v2944_v2, %v3072_v49  ;;  %v7272_v50 = vmul.f32 %v4653_v10, %v2563_v4  ;;  %v2809_v15 = vmul.f32 1.442695, %v2693_v6  ;;  %v8032_v4 = vld [vmem:[#allocation79_spill] sm:$0xff] }
 0x627   : > { %v7275_v22 = vmul.f32 0.70710677, %v7253_v25  ;;  %v7277_v55 = vpop.eup %4654  ;;  %v3073_v30 = vsub.f32 0.0, %v2945_v28  ;;  %v2245_v8 = vadd.f32 1.4214138, %v2181_v11  ;;  %v3282_v7 = vpack.c.bf16 %v8031_v20, %v8030_v45 }
 0x628   : > { %v1864_v9 = vadd.f32 1.0, %v1800_v17  ;;  %v7282_v29 = vmul.f32 %v3198_v23, %v7082_v5  ;;  %v2498_v53 = vadd.f32 0.2548296, %v2434_v59  ;;  %v2055_v60 = vmul.f32 1.0614054, %v7277_v55  ;;  %v8034_v23 = vld [vmem:[#allocation47_spill] sm:$0xff] }
 0x629   : > { %v2813_v49 = vmul.f32 1.442695, %v2695_v37  ;;  %v7285_v2 = vpop.eup %4656  ;;  %vm3011_vm1 = vcmp.ge.f32.partialorder %v7060_v24, 0.0  ;;  %v2372_v38 = vadd.f32 -0.28449672, %v2308_v14  ;;  %v7293_v6 = vadd.f32 %v8032_v4, %v5628_v41  ;;  %3608 = vmatprep.mubr.bf16.mxu1 %v3282_v7  ;;  %v8035_v59 = vld [vmem:[#allocation46_spill] sm:$0xff] }
 0x62a   : > { %4662 = vrcp.f32 %v1864_v9  ;;  %v7289_v0 = vand.u32 2147483647, %v7275_v22  ;;  %v7295_v5 = vadd.f32 1.0, %v3136_v18  ;;  %v2947_v57 = vsub.f32 1.0, %v7272_v50  ;;  %v4705_v18 = vld [vmem:[#allocation8 + $0x80] sm:$0xff]   ;;  %v4706_v7 = vld [vmem:[#allocation8 + $0xc8] sm:$0xff]  }
 0x62b   : > { %8033 = vst [vmem:[#allocation48_spill] sm:$0xff] %v7293_v6  ;;  %v7299_v10 = vmul.f32 0.5, %v7174_v46  ;;  %v2119_v11 = vadd.f32 -1.4531521, %v2055_v60  ;;  %v8036_v37 = vpack.c.bf16 %v8034_v23, %v8035_v59  ;;  %v2309_v14 = vmul.f32 %v7230_v13, %v2245_v8 }
 0x62c   : > { %v2054_v17 = vmul.f32 1.0614054, %v7285_v2  ;;  %v2630_v9 = vsub.f32 0.0, %v7218_v26  ;;  %v1801_v45 = vmul.f32 0.3275911, %v7289_v0  ;;  %v3137_v50 = vsel %vm3009_vm0, %v2945_v28, %v3073_v30  ;;  %v8038_v28 = vld [vmem:[#allocation59_spill] sm:$0xff] }
 0x62d   : > { %3609 = vmatmul.mubr.bf16.vlgmr.msra.gmra.mrb[32].mxu1 %v8036_v37  ;;  %v2562_v46 = vmul.f32 %v7158_v61, %v2498_v53  ;;  %v2183_v20 = vmul.f32 %v7277_v55, %v2119_v11  ;;  %4664 = vpow2.f32 %v2813_v49  ;;  %v4659_v60 = vpop.eup %4658  ;;  %v2436_v8 = vmul.f32 %v7205_v16, %v2372_v38  ;;  %v8039_v30 = vld [vmem:[#allocation33_spill] sm:$0xff]  ;;  %v4707_v38 = vld [vmem:[#allocation8 + $0x88] sm:$0xff]  }
 0x62e   : > { %4202 = vmatpush3.bf16.msra.mxu1 %v4705_v18  ;;  %v2118_v4 = vadd.f32 -1.4531521, %v2054_v17  ;;  %v1865_v23 = vadd.f32 1.0, %v1801_v45  ;;  %v7314_v59 = vmul.f32 0.70710677, %v7293_v6  ;;  %v3075_v37 = vsub.f32 0.0, %v2947_v57 }
 0x62f   : > { %4195 = vmatprep.subr.bf16.mxu1 %v4706_v7  ;;  %v2247_v18 = vadd.f32 1.4214138, %v2183_v20  ;;  %v2632_v32 = vsub.f32 0.0, %v7258_v40  ;;  %v3284_v61 = vpack.c.bf16 %v8039_v30, %v8038_v28  ;;  %v4661_v53 = vpop.eup %4660  ;;  %v2373_v11 = vadd.f32 -0.28449672, %v2309_v14  ;;  %v4708_v28 = vld [vmem:[#allocation8 + $0xd0] sm:$0xff]  }
 0x630   : > { %8037 = vst [vmem:[#allocation51_spill] sm:$0xff] %v7314_v59  ;;  %v2182_v49 = vmul.f32 %v7285_v2, %v2118_v4  ;;  %4666 = vrcp.f32 %v1865_v23  ;;  %v7321_v7 = vand.u32 2147483647, %v7314_v59  ;;  %v7323_v17 = vadd.f32 1.0, %v3137_v50  ;;  %v8040_v30 = vld [vmem:[#allocation50_spill] sm:$0xff]  ;;  %v8041_v59 = vld [vmem:[#allocation49_spill] sm:$0xff] }
 0x631   : > { %v2311_v45 = vmul.f32 %v7277_v55, %v2247_v18  ;;  %v7327_v20 = vmul.f32 0.5, %v7196_v47  ;;  %v2694_v6 = vmul.f32 %v2630_v9, %v7218_v26  ;;  %3705 = vmatprep.mubr.bf16.mxu0 %v3284_v61  ;;  %v2500_v14 = vadd.f32 0.2548296, %v2436_v8  ;;  %v8043_v26 = vld [vmem:[#allocation62_spill] sm:$0xff] }
 0x632   : > { %4203 = vmatpush3.bf16.msra.mxu1 %v4707_v38  ;;  %4668 = vpow2.f32 %v2809_v15  ;;  %v2246_v4 = vadd.f32 1.4214138, %v2182_v49  ;;  %v1803_v23 = vmul.f32 0.3275911, %v7321_v7  ;;  %v8042_v38 = vpack.c.bf16 %v8040_v30, %v8041_v59 }
 0x633   : > { %4196 = vmatprep.subr.bf16.mxu1 %v4708_v28  ;;  %v3139_v50 = vsel %vm3011_vm1, %v2947_v57, %v3075_v37  ;;  %v7336_v18 = vmul.f32 %v4659_v60, %v2562_v46  ;;  %v2375_v47 = vadd.f32 -0.28449672, %v2311_v45  ;;  %v7340_v9 = vadd.f32 %v8043_v26, %v5630_v43  ;;  %v4709_v28 = vld [vmem:[#allocation8 + $0x90] sm:$0xff]   ;;  %v4710_v37 = vld [vmem:[#allocation8 + $0xd8] sm:$0xff]  }
 0x634   : > { %3706 = vmatmul.mubr.bf16.vlgmr.msra.gmra.mrb[48].mxu0 %v8042_v38  ;;  %v7342_v61 = vpop.eup %4662  ;;  %v2437_v15 = vmul.f32 %v7230_v13, %v2373_v11  ;;  %v2310_v8 = vmul.f32 %v7285_v2, %v2246_v4  ;;  %v2696_v49 = vmul.f32 %v2632_v32, %v7258_v40  ;;  %v1867_v59 = vadd.f32 1.0, %v1803_v23  ;;  %v4711_v26 = vld [vmem:[#allocation8 + $0x98] sm:$0xff]  }
 0x635   : > { %v2439_v24 = vmul.f32 %v7277_v55, %v2375_v47  ;;  %v2811_v57 = vmul.f32 1.442695, %v2694_v6  ;;  %v7349_v46 = vmul.f32 0.5, %v7236_v19  ;;  %v2056_v60 = vmul.f32 1.0614054, %v7342_v61  ;;  %v8044_v6 = vld [vmem:[#allocation64_spill] sm:$0xff] }
 0x636   : > { %4204 = vmatpush3.bf16.msra.mxu1 %v4709_v28  ;;  %v2564_v45 = vmul.f32 %v7205_v16, %v2500_v14  ;;  %v2374_v11 = vadd.f32 -0.28449672, %v2310_v8  ;;  %4670 = vrcp.f32 %v1867_v59  ;;  %v7354_v4 = vmul.f32 0.70710677, %v7340_v9  ;;  %v4712_v28 = vld [vmem:[#allocation8 + $0xe0] sm:$0xff]  }
 0x637   : > { %4197 = vmatprep.subr.bf16.mxu1 %v4710_v37  ;;  %v4665_v40 = vpop.eup %4664  ;;  %v3203_v32 = vadd.f32 1.0, %v3139_v50  ;;  %v2503_v23 = vadd.f32 0.2548296, %v2439_v24  ;;  %v2120_v30 = vadd.f32 -1.4531521, %v2056_v60  ;;  %v7358_v38 = vadd.f32 %v8044_v6, %v5647_v52 }
 0x638   : > { %v7362_v19 = vmul.f32 %v7295_v5, %v7130_v1  ;;  %v2501_v47 = vadd.f32 0.2548296, %v2437_v15  ;;  %vm3015_vm2 = vcmp.ge.f32.partialorder %v7188_v31, 0.0  ;;  %v2815_v16 = vmul.f32 1.442695, %v2696_v49 }
 0x639   : > { %8045 = vst [vmem:[#allocation53_spill] sm:$0xff] %v7358_v38  ;;  %v7366_v14 = vand.u32 2147483647, %v7354_v4  ;;  %v2946_v50 = vsub.f32 1.0, %v7336_v18  ;;  %v2567_v8 = vmul.f32 %v7277_v55, %v2503_v23  ;;  %4672 = vpow2.f32 %v2811_v57 }
 0x63a   : > { %4205 = vmatpush3.bf16.msra.mxu1 %v4711_v26  ;;  %v2184_v59 = vmul.f32 %v7342_v61, %v2120_v30  ;;  %v7371_v1 = vpop.eup %4666  ;;  %v7373_v5 = vmul.f32 %v4661_v53, %v2564_v45  ;;  %v2438_v15 = vmul.f32 %v7285_v2, %v2374_v11  ;;  %v7377_v49 = vmul.f32 0.5, %v7253_v25  ;;  %v4713_v25 = vld [vmem:[#allocation8 + $0xa0] sm:$0xff]   ;;  %v4714_v26 = vld [vmem:[#allocation8 + $0xe8] sm:$0xff]  }
 0x63b   : > { %4198 = vmatprep.subr.bf16.mxu1 %v4712_v28  ;;  %v1802_v24 = vmul.f32 0.3275911, %v7366_v14  ;;  %vm3010_vm3 = vcmp.ge.f32.partialorder %v7078_v54, 0.0  ;;  %v2887_v18 = vmul.f32 %v4665_v40, %v2567_v8  ;;  %v2057_v57 = vmul.f32 1.0614054, %v7371_v1 }
 0x63c   : > { %v2248_v55 = vadd.f32 1.4214138, %v2184_v59  ;;  %v7383_v60 = vmul.f32 0.70710677, %v7358_v38  ;;  %v4669_v37 = vpop.eup %4668  ;;  %v2565_v53 = vmul.f32 %v7230_v13, %v2501_v47  ;;  %4674 = vpow2.f32 %v2815_v16  ;;  %v8047_v13 = vld [vmem:[#allocation36_spill] sm:$0xff] }
 0x63d   : > { %v2633_v45 = vsub.f32 0.0, %v7289_v0  ;;  %v1866_v11 = vadd.f32 1.0, %v1802_v24  ;;  %v2951_v23 = vsub.f32 1.0, %v2887_v18  ;;  %v2121_v6 = vadd.f32 -1.4531521, %v2057_v57 }
 0x63e   : > { %4206 = vmatpush3.bf16.msra.mxu1 %v4713_v25  ;;  %v2312_v30 = vmul.f32 %v7342_v61, %v2248_v55  ;;  %v7389_v40 = vand.u32 2147483647, %v7383_v60  ;;  %v7392_v8 = vmul.f32 %v3203_v32, %v7181_v63  ;;  %v2502_v59 = vadd.f32 0.2548296, %v2438_v15  ;;  %v4715_v32 = vld [vmem:[#allocation8 + $0xa8] sm:$0xff]  }
 0x63f   : > { %4199 = vmatprep.subr.bf16.mxu1 %v4714_v26  ;;  %4676 = vrcp.f32 %v1866_v11  ;;  %v7396_v47 = vadd.f32 %v8047_v13, %v5626_v44  ;;  %v3079_v16 = vsub.f32 0.0, %v2951_v23  ;;  %v2185_v24 = vmul.f32 %v7371_v1, %v2121_v6  ;;  %v4716_v6 = vld [vmem:[#allocation8 + $0xf0] sm:$0xff]  }
 0x640   : > { %8046 = vst [vmem:[#allocation77_spill] sm:$0xff] %v7392_v8  ;;  %v2376_v28 = vadd.f32 -0.28449672, %v2312_v30  ;;  %v1804_v18 = vmul.f32 0.3275911, %v7389_v40  ;;  %v7400_v55 = vpop.eup %4670  ;;  %v3074_v57 = vsub.f32 0.0, %v2946_v50  ;;  %v7403_v26 = vmul.f32 %v4669_v37, %v2565_v53 }
 0x641   : > { %v2697_v63 = vmul.f32 %v2633_v45, %v7289_v0  ;;  %v3143_v44 = vsel %vm3015_vm2, %v2951_v23, %v3079_v16  ;;  %v2249_v11 = vadd.f32 1.4214138, %v2185_v24  ;;  %v2059_v30 = vmul.f32 1.0614054, %v7400_v55 }
 0x642   : > { %4207 = vmatpush3.bf16.msra.mxu1 %v4715_v32  ;;  %v2440_v15 = vmul.f32 %v7342_v61, %v2376_v28  ;;  %v3207_v13 = vadd.f32 1.0, %v3143_v44  ;;  %v2566_v38 = vmul.f32 %v7285_v2, %v2502_v59  ;;  %v2635_v37 = vsub.f32 0.0, %v7321_v7  ;;  %v4717_v2 = vld [vmem:[#allocation8 + $0xb0] sm:$0xff]  }
 0x643   : > { %4200 = vmatprep.subr.bf16.mxu1 %v4716_v6  ;;  %v1868_v53 = vadd.f32 1.0, %v1804_v18  ;;  %v4673_v25 = vpop.eup %4672  ;;  %v2313_v45 = vmul.f32 %v7371_v1, %v2249_v11  ;;  %v2123_v32 = vadd.f32 -1.4531521, %v2059_v30  ;;  %v7414_v31 = vmul.f32 0.70710677, %v7396_v47 }
 0x644   : > { %v2504_v0 = vadd.f32 0.2548296, %v2440_v15  ;;  %v3138_v23 = vsel %vm3010_vm3, %v2946_v50, %v3074_v57  ;;  %v7419_v16 = vmul.f32 %v3207_v13, %v7299_v10  ;;  %v2817_v28 = vmul.f32 1.442695, %v2697_v63  ;;  %v4718_v15 = vld [vmem:[#allocation8 + $0xf8] sm:$0xff]  }
 0x645   : > { %4678 = vrcp.f32 %v1868_v53  ;;  %vm3012_vm4 = vcmp.ge.f32.partialorder %v7123_v3, 0.0  ;;  %v2949_v59 = vsub.f32 1.0, %v7403_v26  ;;  %v2377_v18 = vadd.f32 -0.28449672, %v2313_v45 }
 0x646   : > { %8048 = vst [vmem:[#allocation78_spill] sm:$0xff] %v7419_v16  ;;  %4208 = vmatpush3.bf16.msra.mxu1 %v4717_v2  ;;  %v2568_v24 = vmul.f32 %v7342_v61, %v2504_v0  ;;  %v2187_v44 = vmul.f32 %v7400_v55, %v2123_v32  ;;  %v4675_v54 = vpop.eup %4674  ;;  %v2886_v50 = vmul.f32 %v4673_v25, %v2566_v38  ;;  %v1741_v63 = vand.u32 2147483647, %v7414_v31  ;;  %v8050_v38 = vld [vmem:[#allocation66_spill] sm:$0xff]  ;;  %v4719_v25 = vld [vmem:[#allocation8 + $0xb8] sm:$0xff]   ;;  %v8085_v16 = vld [vmem:[#allocation45_spill] sm:$0xff] }
 0x647   : > { %4201 = vmatprep.subr.bf16.mxu1 %v4718_v15  ;;  %v2699_v57 = vmul.f32 %v2635_v37, %v7321_v7  ;;  %v3202_v11 = vadd.f32 1.0, %v3138_v23  ;;  %v8049_v30 = vsub.f32 1.0, %v7373_v5  ;;  %vm3013_vm5 = vcmp.ge.f32.partialorder %v7144_v62, 0.0 }
 0x648   : > { %v2441_v61 = vmul.f32 %v7371_v1, %v2377_v18  ;;  %v2251_v6 = vadd.f32 1.4214138, %v2187_v44  ;;  %4680 = vpow2.f32 %v2817_v28  ;;  %v2634_v53 = vsub.f32 0.0, %v7366_v14 }
 0x649   : > { %v3076_v26 = vsub.f32 0.0, %v8049_v30  ;;  %v7433_v13 = vpop.eup %4676  ;;  %v1805_v0 = vmul.f32 0.3275911, %v1741_v63  ;;  %v7438_v7 = vadd.f32 %v8050_v38, %v5628_v41  ;;  %v3077_v37 = vsub.f32 0.0, %v2949_v59 }
 0x64a   : > { %4209 = vmatpush3.bf16.msra.mxu1 %v4719_v25  ;;  %v2888_v45 = vmul.f32 %v4675_v54, %v2568_v24  ;;  %v2315_v32 = vmul.f32 %v7400_v55, %v2251_v6  ;;  %v2058_v23 = vmul.f32 1.0614054, %v7433_v13  ;;  %v2950_v2 = vsub.f32 1.0, %v2886_v50 }
 0x64b   : > { %vm3014_vm6 = vcmp.ge.f32.partialorder %v7210_v34, 0.0  ;;  %v2821_v18 = vmul.f32 1.442695, %v2699_v57  ;;  %v1869_v28 = vadd.f32 1.0, %v1805_v0  ;;  %v7444_v44 = vmul.f32 0.70710677, %v7438_v7 }
 0x64c   : > { %v7448_v41 = vmul.f32 %v7323_v17, %v7161_v35  ;;  %v2505_v15 = vadd.f32 0.2548296, %v2441_v61  ;;  %v2379_v30 = vadd.f32 -0.28449672, %v2315_v32  ;;  %v2122_v38 = vadd.f32 -1.4531521, %v2058_v23 }
 0x64d   : > { %vm3016_vm7 = vcmp.ge.f32.partialorder %v7247_v56, 0.0  ;;  %v2698_v24 = vmul.f32 %v2634_v53, %v7366_v14  ;;  %v2636_v54 = vsub.f32 0.0, %v7389_v40  ;;  %4682 = vrcp.f32 %v1869_v28  ;;  %v8051_v35 = vld [vmem:[#allocation83_spill] sm:$0xff] }
 0x64e   : > { %v1743_v50 = vand.u32 2147483647, %v7444_v44  ;;  %v2952_v57 = vsub.f32 1.0, %v2888_v45  ;;  %v2443_v6 = vmul.f32 %v7400_v55, %v2379_v30  ;;  %v2186_v0 = vmul.f32 %v7433_v13, %v2122_v38 }
 0x64f   : > { %v7458_v17 = vadd.f32 %v8051_v35, %v5630_v43  ;;  %v7460_v61 = vpop.eup %4678  ;;  %v7463_v25 = vmul.f32 %v3202_v11, %v7191_v39  ;;  %v8052_v14 = vsub.f32 1.0, %v7373_v5  ;;  %4684 = vpow2.f32 %v2821_v18 }
 0x650   : > { %v1807_v45 = vmul.f32 0.3275911, %v1743_v50  ;;  %v3078_v32 = vsub.f32 0.0, %v2950_v2  ;;  %v2569_v23 = vmul.f32 %v7371_v1, %v2505_v15  ;;  %v2250_v28 = vadd.f32 1.4214138, %v2186_v0 }
 0x651   : > { %v3140_v53 = vsel %vm3012_vm4, %v8052_v14, %v3076_v26  ;;  %v2637_v30 = vsub.f32 0.0, %v1741_v63  ;;  %v3141_v43 = vsel %vm3013_vm5, %v2949_v59, %v3077_v37  ;;  %v2819_v38 = vmul.f32 1.442695, %v2698_v24 }
 0x652   : > { %v2060_v35 = vmul.f32 1.0614054, %v7460_v61  ;;  %v1871_v39 = vadd.f32 1.0, %v1807_v45  ;;  %v3080_v11 = vsub.f32 0.0, %v2952_v57  ;;  %v2507_v10 = vadd.f32 0.2548296, %v2443_v6  ;;  %v4681_v26 = vpop.eup %4680 }
 0x653   : > { %v2700_v5 = vmul.f32 %v2636_v54, %v7389_v40  ;;  %v7475_v3 = vmul.f32 0.70710677, %v7458_v17  ;;  %v2314_v18 = vmul.f32 %v7433_v13, %v2250_v28  ;;  %v7480_v62 = vadd.f32 %v6880_v58, %v5647_v52 }
 0x654   : > { %v2124_v1 = vadd.f32 -1.4531521, %v2060_v35  ;;  %4686 = vrcp.f32 %v1871_v39  ;;  %v3142_v59 = vsel %vm3014_vm6, %v2950_v2, %v3078_v32  ;;  %v2889_v37 = vmul.f32 %v4681_v26, %v2569_v23 }
 0x655   : > { %8053 = vst [vmem:[#allocation61_spill] sm:$0xff] %v7480_v62  ;;  %v2701_v15 = vmul.f32 %v2637_v30, %v1741_v63  ;;  %v7485_v24 = vand.u32 2147483647, %v7475_v3  ;;  %v3204_v40 = vadd.f32 1.0, %v3140_v53  ;;  %v3205_v54 = vadd.f32 1.0, %v3141_v43 }
 0x656   : > { %v2188_v6 = vmul.f32 %v7460_v61, %v2124_v1  ;;  %v2639_v0 = vsub.f32 0.0, %v1743_v50  ;;  %v3144_v14 = vsel %vm3016_vm7, %v2952_v57, %v3080_v11  ;;  %4688 = vpow2.f32 %v2819_v38 }
 0x657   : > { %v2823_v45 = vmul.f32 1.442695, %v2700_v5  ;;  %v1806_v52 = vmul.f32 0.3275911, %v7485_v24  ;;  %v7491_v58 = vpop.eup %4682  ;;  %v3206_v34 = vadd.f32 1.0, %v3142_v59  ;;  %vm3017_vm8 = vcmp.ge.f32.partialorder %v7275_v22, 0.0 }
 0x658   : > { %v2571_v63 = vmul.f32 %v7400_v55, %v2507_v10  ;;  %v2378_v2 = vadd.f32 -0.28449672, %v2314_v18  ;;  %v7496_v53 = vmul.f32 0.70710677, %v7480_v62  ;;  %v2953_v32 = vsub.f32 1.0, %v2889_v37  ;;  %v8055_v59 = vld [vmem:[#allocation70_spill] sm:$0xff] }
 0x659   : > { %v2061_v23 = vmul.f32 1.0614054, %v7491_v58  ;;  %v2825_v56 = vmul.f32 1.442695, %v2701_v15  ;;  %v1870_v57 = vadd.f32 1.0, %v1806_v52  ;;  %v4685_v28 = vpop.eup %4684  ;;  %v3208_v30 = vadd.f32 1.0, %v3144_v14 }
 0x65a   : > { %v2252_v43 = vadd.f32 1.4214138, %v2188_v6  ;;  %v2703_v38 = vmul.f32 %v2639_v0, %v1743_v50  ;;  %v7500_v35 = vand.u32 2147483647, %v7496_v53  ;;  %v7503_v39 = vmul.f32 %v3204_v40, %v7223_v33  ;;  %v8054_v33 = vld [vmem:[#allocation54_spill] sm:$0xff]  ;;  %v8082_v62 = vld [vmem:[#allocation65_spill] sm:$0xff] }
 0x65b   : > { %v7506_v55 = vmul.f32 %v3205_v54, %v7262_v48  ;;  %v2125_v10 = vadd.f32 -1.4531521, %v2061_v23  ;;  %4690 = vrcp.f32 %v1870_v57  ;;  %v7509_v11 = vmul.f32 %v3206_v34, %v7327_v20  ;;  %v8056_v34 = vld [vmem:[#allocation55_spill] sm:$0xff] }
 0x65c   : > { %v7511_v5 = vmul.f32 %v4685_v28, %v2571_v63  ;;  %v2442_v26 = vmul.f32 %v7433_v13, %v2378_v2  ;;  %4692 = vpow2.f32 %v2823_v45  ;;  %v3081_v50 = vsub.f32 0.0, %v2953_v32  ;;  %v8057_v63 = vld [vmem:[#allocation71_spill] sm:$0xff] }
 0x65d   : > { %v2189_v18 = vmul.f32 %v7491_v58, %v2125_v10  ;;  %v1808_v1 = vmul.f32 0.3275911, %v7500_v35  ;;  %v3286_v37 = vpack.c.bf16 %v8055_v59, %v8054_v33  ;;  %v7521_v15 = vmul.f32 %v3208_v30, %v7349_v46  ;;  %v8058_v23 = vld [vmem:[#allocation63_spill] sm:$0xff]  ;;  %v8059_v46 = vld [vmem:[#allocation68_spill] sm:$0xff] }
 0x65e   : > { %v7518_v48 = vpop.eup %4686  ;;  %v2316_v20 = vmul.f32 %v7460_v61, %v2252_v43  ;;  %4694 = vpow2.f32 %v2825_v56  ;;  %v2829_v40 = vmul.f32 1.442695, %v2703_v38  ;;  %v2638_v0 = vsub.f32 0.0, %v7485_v24  ;;  %v8060_v10 = vld [vmem:[#allocation39_spill] sm:$0xff]  ;;  %v8063_v33 = vld [vmem:[#allocation40_spill] sm:$0xff] }
 0x65f   : > { %v2253_v54 = vadd.f32 1.4214138, %v2189_v18  ;;  %v2063_v6 = vmul.f32 1.0614054, %v7518_v48  ;;  %v1872_v14 = vadd.f32 1.0, %v1808_v1  ;;  %3616 = vmatprep.mubr.bf16.mxu1 %v3286_v37  ;;  %v7844_v45 = vsub.f32 1.0, %v7511_v5 }
 0x660   : > { %v2506_v52 = vadd.f32 0.2548296, %v2442_v26  ;;  %v3288_v2 = vpack.c.bf16 %v8057_v63, %v8056_v34  ;;  %v3285_v57 = vpack.c.bf16 %v8059_v46, %v8058_v23  ;;  %v7531_v28 = vpop.eup %4688  ;;  %v7535_v56 = vsel %vm3017_vm8, %v2953_v32, %v3081_v50  ;;  %v8061_v26 = vld [vmem:[#allocation41_spill] sm:$0xff]  ;;  %v8062_v1 = vld [vmem:[#allocation34_spill] sm:$0xff]  ;;  %v8065_v50 = vld [vmem:[#allocation76_spill] sm:$0xff] }
 0x661   : > { %v2317_v30 = vmul.f32 %v7491_v58, %v2253_v54  ;;  %v2127_v43 = vadd.f32 -1.4531521, %v2063_v6  ;;  %4696 = vrcp.f32 %v1872_v14  ;;  %v2380_v38 = vadd.f32 -0.28449672, %v2316_v20  ;;  %v8064_v32 = vld [vmem:[#allocation37_spill] sm:$0xff]  ;;  %v8067_v14 = vld [vmem:[#allocation52_spill] sm:$0xff] }
 0x662   : > { %4698 = vpow2.f32 %v2829_v40  ;;  %3713 = vmatprep.mubr.bf16.mxu0 %v3288_v2  ;;  %3617 = vmatmul.mubr.bf16.gmra.mrb[36].mxu1 %v3285_v57  ;;  %v3287_v18 = vpack.c.bf16 %v8061_v26, %v8060_v10  ;;  %v3290_v59 = vpack.c.bf16 %v8063_v33, %v8062_v1  ;;  %v2702_v22 = vmul.f32 %v2638_v0, %v7485_v24  ;;  %v8066_v6 = vld [vmem:[#allocation73_spill] sm:$0xff]  ;;  %v8068_v2 = vld [vmem:[#allocation74_spill] sm:$0xff]  ;;  %v8069_v23 = vld [vmem:[#allocation75_spill] sm:$0xff] }
 0x663   : > { %v2381_v37 = vadd.f32 -0.28449672, %v2317_v30  ;;  %v2191_v34 = vmul.f32 %v7518_v48, %v2127_v43  ;;  %v3292_v54 = vpack.c.bf16 %v8065_v50, %v8064_v32  ;;  %v7548_v20 = vsub.f32 0.0, %v7844_v45  ;;  %v8070_v30 = vld [vmem:[#allocation80_spill] sm:$0xff]  ;;  %v8071_v10 = vld [vmem:[#allocation35_spill] sm:$0xff]  ;;  %v8074_v50 = vld [vmem:[#allocation57_spill] sm:$0xff] }
 0x664   : > { %v2570_v40 = vmul.f32 %v7433_v13, %v2506_v52  ;;  %3714 = vmatmul.mubr.bf16.gmra.mrb[52].mxu0 %v3287_v18  ;;  %3624 = vmatprep.mubr.bf16.mxu1 %v3290_v59  ;;  %v3289_v63 = vpack.c.bf16 %v8067_v14, %v8066_v6  ;;  %v3291_v46 = vpack.c.bf16 %v8069_v23, %v8068_v2  ;;  %v2640_v1 = vsub.f32 0.0, %v7500_v35  ;;  %v8072_v33 = vld [vmem:[#allocation56_spill] sm:$0xff]  ;;  %v8073_v59 = vld [vmem:[#allocation82_spill] sm:$0xff]  ;;  %v8076_v6 = vld [vmem:[#allocation43_spill] sm:$0xff] }
 0x665   : > { %v7555_v57 = vpop.eup %4690  ;;  %v2445_v24 = vmul.f32 %v7491_v58, %v2381_v37  ;;  %v2255_v0 = vadd.f32 1.4214138, %v2191_v34  ;;  %3721 = vmatprep.mubr.bf16.mxu0 %v3292_v54  ;;  %v3294_v43 = vpack.c.bf16 %v6867_v27, %v8070_v30  ;;  %v3296_v13 = vpack.c.bf16 %v6870_v12, %v8071_v10  ;;  %v8075_v54 = vld [vmem:[#allocation84_spill] sm:$0xff]  ;;  %v8078_v10 = vld [vmem:[#allocation38_spill] sm:$0xff] }
 0x666   : > { %v7562_v52 = vpop.eup %4692  ;;  %v2444_v26 = vmul.f32 %v7460_v61, %v2380_v38  ;;  %v2062_v18 = vmul.f32 1.0614054, %v7555_v57  ;;  %v3293_v32 = vpack.c.bf16 %v8073_v59, %v8072_v33  ;;  %v3295_v27 = vpack.c.bf16 %v6857_v21, %v8074_v50  ;;  %v8077_v38 = vld [vmem:[#allocation69_spill] sm:$0xff]  ;;  %v8079_v45 = vld [vmem:[#allocation72_spill] sm:$0xff]  ;;  %v8080_v59 = vld [vmem:[#allocation67_spill] sm:$0xff] }
 0x667   : > { %v2509_v37 = vadd.f32 0.2548296, %v2445_v24  ;;  %v2319_v34 = vmul.f32 %v7518_v48, %v2255_v0  ;;  %v3298_v12 = vpack.c.bf16 %v8076_v6, %v8075_v54  ;;  %v2827_v23 = vmul.f32 1.442695, %v2702_v22  ;;  %v8081_v0 = vld [vmem:[#allocation42_spill] sm:$0xff]  ;;  %v8083_v22 = vld [vmem:[#allocation81_spill] sm:$0xff] }
 0x668   : > { %v4695_v14 = vpop.eup %4694  ;;  %v2126_v2 = vadd.f32 -1.4531521, %v2062_v18  ;;  %v3300_v30 = vpack.c.bf16 %v7111_v51, %v8077_v38  ;;  %v2704_v18 = vmul.f32 %v2640_v1, %v7500_v35  ;;  %v3304_v51 = vpack.c.bf16 %v7362_v19, %v8083_v22  ;;  %v8084_v54 = vld [vmem:[#allocation44_spill] sm:$0xff] }
 0x669   : > { %v2573_v33 = vmul.f32 %v7491_v58, %v2509_v37  ;;  %v2383_v24 = vadd.f32 -0.28449672, %v2319_v34  ;;  %v2508_v58 = vadd.f32 0.2548296, %v2444_v26  ;;  %4700 = vpow2.f32 %v2827_v23 }
 0x66a   : > { %v2190_v50 = vmul.f32 %v7555_v57, %v2126_v2  ;;  %3625 = vmatmul.mubr.bf16.gmra.mrb[40].mxu1 %v3289_v63  ;;  %v2831_v1 = vmul.f32 1.442695, %v2704_v18  ;;  %vm3021_vm10 = vcmp.ge.f32.partialorder %v7414_v31, 0.0  ;;  %vm3023_vm11 = vcmp.ge.f32.partialorder %v7444_v44, 0.0 }
 0x66b   : > { %v7589_v38 = vpop.eup %4696  ;;  %v2893_v37 = vmul.f32 %v4695_v14, %v2573_v33  ;;  %v2447_v34 = vmul.f32 %v7518_v48, %v2383_v24  ;;  %3632 = vmatprep.mubr.bf16.mxu1 %v3294_v43  ;;  %v3308_v43 = vpack.c.bf16 %v7521_v15, %v7503_v39  ;;  %v8086_v14 = vld [vmem:[#allocation51_spill] sm:$0xff]  ;;  %v2890_v33 = vmul.f32 %v7531_v28, %v2570_v40 }
 0x66c   : > { %v4699_v2 = vpop.eup %4698  ;;  %v2254_v8 = vadd.f32 1.4214138, %v2190_v50  ;;  %v2064_v35 = vmul.f32 1.0614054, %v7589_v38  ;;  %3722 = vmatmul.mubr.bf16.gmra.mrb[56].mxu0 %v3291_v46  ;;  %vm3019_vm9 = vcmp.ge.f32.partialorder %v8086_v14, 0.0  ;;  %v3209_v50 = vadd.f32 1.0, %v7535_v56 }
 0x66d   : > { %v2957_v6 = vsub.f32 1.0, %v2893_v37  ;;  %v2511_v26 = vadd.f32 0.2548296, %v2447_v34  ;;  %3729 = vmatprep.mubr.bf16.mxu0 %v3296_v13  ;;  %v2572_v37 = vmul.f32 %v7460_v61, %v2508_v58  ;;  %v8087_v34 = vsub.f32 1.0, %v7511_v5 }
 0x66e   : > { %v2318_v24 = vmul.f32 %v7555_v57, %v2254_v8  ;;  %v2128_v46 = vadd.f32 -1.4531521, %v2064_v35  ;;  %v1613_v8 = vmul.f32 0.5, %v7396_v47  ;;  %v2954_v56 = vsub.f32 1.0, %v2890_v33 }
 0x66f   : > { %v3085_v21 = vsub.f32 0.0, %v2957_v6  ;;  %v2575_v63 = vmul.f32 %v7518_v48, %v2511_v26  ;;  %v3147_v28 = vsel %vm3019_vm9, %v8087_v34, %v7548_v20  ;;  %v7615_v61 = vmul.f32 %v3209_v50, %v7377_v49 }
 0x670   : > { %v2382_v13 = vadd.f32 -0.28449672, %v2318_v24  ;;  %v2192_v23 = vmul.f32 %v7589_v38, %v2128_v46  ;;  %4702 = vpow2.f32 %v2831_v1  ;;  %v2892_v58 = vmul.f32 %v7562_v52, %v2572_v37  ;;  %v8088_v52 = vld [vmem:[#allocation48_spill] sm:$0xff] }
 0x671   : > { %v3149_v40 = vsel %vm3021_vm10, %v2957_v6, %v3085_v21  ;;  %v2895_v35 = vmul.f32 %v4699_v2, %v2575_v63  ;;  %v3211_v21 = vadd.f32 1.0, %v3147_v28  ;;  %v1611_v1 = vmul.f32 0.5, %v8088_v52 }
 0x672   : > { %v3213_v14 = vadd.f32 1.0, %v3149_v40  ;;  %v2446_v48 = vmul.f32 %v7555_v57, %v2382_v13  ;;  %v2256_v18 = vadd.f32 1.4214138, %v2192_v23  ;;  %3633 = vmatmul.mubr.bf16.gmra.mrb[44].mxu1 %v3293_v32  ;;  %v3082_v32 = vsub.f32 0.0, %v2954_v56 }
 0x673   : > { %v2959_v31 = vsub.f32 1.0, %v2895_v35  ;;  %3640 = vmatprep.mubr.bf16.mxu1 %v3298_v12  ;;  %v4701_v63 = vpop.eup %4700  ;;  %v1615_v26 = vmul.f32 0.5, %v7438_v7  ;;  %v2956_v24 = vsub.f32 1.0, %v2892_v58  ;;  %v3275_v50 = vmul.f32 %v3211_v21, %v1611_v1 }
 0x674   : > { %v7618_v5 = vmul.f32 %v3213_v14, %v1613_v8  ;;  %v2510_v20 = vadd.f32 0.2548296, %v2446_v48  ;;  %v2320_v47 = vmul.f32 %v7589_v38, %v2256_v18  ;;  %3730 = vmatmul.mubr.bf16.gmra.mrb[60].mxu0 %v3295_v27  ;;  %vm3018_vm12 = vcmp.ge.f32.partialorder %v7354_v4, 0.0 }
 0x675   : > { %v3087_v6 = vsub.f32 0.0, %v2959_v31  ;;  %3737 = vmatprep.mubr.bf16.mxu0 %v3300_v30  ;;  %v3146_v30 = vsel %vm3018_vm12, %v2954_v56, %v3082_v32  ;;  %v8089_v23 = vpack.c.bf16 %v8079_v45, %v8078_v10  ;;  %v8090_v7 = vpack.c.bf16 %v7282_v29, %v8082_v62 }
 0x676   : > { %v2574_v49 = vmul.f32 %v7555_v57, %v2510_v20  ;;  %v2384_v2 = vadd.f32 -0.28449672, %v2320_v47  ;;  %v3309_v12 = vpack.c.bf16 %v7618_v5, %v7615_v61  ;;  %v3084_v34 = vsub.f32 0.0, %v2956_v24 }
 0x677   : > { %v3151_v33 = vsel %vm3023_vm11, %v2959_v31, %v3087_v6  ;;  %v8091_v40 = vpack.c.bf16 %v8081_v0, %v8080_v59  ;;  %v3210_v56 = vadd.f32 1.0, %v3146_v30  ;;  %vm3022_vm13 = vcmp.ge.f32.partialorder %v7475_v3, 0.0  ;;  %v8096_v31 = vld [vmem:[#allocation61_spill] sm:$0xff] }
 0x678   : > { %v3215_v27 = vadd.f32 1.0, %v3151_v33  ;;  %v2894_v46 = vmul.f32 %v4701_v63, %v2574_v49  ;;  %v2448_v44 = vmul.f32 %v7589_v38, %v2384_v2  ;;  %v1610_v62 = vmul.f32 0.5, %v7340_v9 }
 0x679   : > { %vm3020_vm14 = vcmp.ge.f32.partialorder %v7383_v60, 0.0  ;;  %v1614_v10 = vmul.f32 0.5, %v7458_v17  ;;  %v8092_v3 = vpack.c.bf16 %v7241_v36, %v8084_v54  ;;  %vm3024_vm15 = vcmp.ge.f32.partialorder %v7496_v53, 0.0 }
 0x67a   : > { %v3279_v57 = vmul.f32 %v3215_v27, %v1615_v26  ;;  %v2958_v37 = vsub.f32 1.0, %v2894_v46  ;;  %v2512_v13 = vadd.f32 0.2548296, %v2448_v44  ;;  %3641 = vmatmul.mubr.bf16.gmra.mrb[48].mxu1 %v8089_v23  ;;  %v4703_v35 = vpop.eup %4702  ;;  %v3148_v59 = vsel %vm3020_vm14, %v2956_v24, %v3084_v34  ;;  %v8102_v26 = vld [vmem:[#allocation17_spill] sm:$0xff]  ;;  %v8103_v27 = vld [vmem:[#allocation18_spill] sm:$0xff] }
 0x67b   : > { %3648 = vmatprep.mubr.bf16.mxu1 %v8090_v7  ;;  %v3274_v14 = vmul.f32 %v3210_v56, %v1610_v62  ;;  %v3212_v19 = vadd.f32 1.0, %v3148_v59  ;;  %v8093_v9 = vpack.c.bf16 %v7509_v11, %v7463_v25  ;;  %v8094_v17 = vpack.c.bf16 %v7266_v42, %v8085_v16  ;;  %v8098_v42 = vld [vmem:[#allocation78_spill] sm:$0xff]  ;;  %v8099_v16 = vld [vmem:[#allocation77_spill] sm:$0xff]  ;;  %v8105_v59 = vld [vmem:[#allocation20_spill] sm:$0xff] }
 0x67c   : > { %v3086_v28 = vsub.f32 0.0, %v2958_v37  ;;  %v2576_v8 = vmul.f32 %v7589_v38, %v2512_v13  ;;  %3738 = vmatmul.mubr.bf16.gmra.mrb[64].mxu0 %v8091_v40  ;;  %v3311_v4 = vpack.c.bf16 %v3279_v57, %v3275_v50  ;;  %v1616_v58 = vmul.f32 0.5, %v8096_v31 }
 0x67d   : > { %3745 = vmatprep.mubr.bf16.mxu0 %v3304_v51  ;;  %v8095_v51 = vld [vmem:[#allocation53_spill] sm:$0xff]  ;;  %v8097_v53 = vpack.c.bf16 %v7506_v55, %v7448_v41  ;;  %v8100_v25 = vpack.c.bf16 %v8098_v42, %v8099_v16  ;;  %v8107_v42 = vld [vmem:[#allocation22_spill] sm:$0xff] }
 0x67e   : > { %v3150_v45 = vsel %vm3022_vm13, %v2958_v37, %v3086_v28  ;;  %v2896_v29 = vmul.f32 %v4703_v35, %v2576_v8  ;;  %v1612_v61 = vmul.f32 0.5, %v8095_v51  ;;  %v7670_v41 = vld [vmem:[%s8101_s25] ss:$0 sm:$0xff] }
 0x67f   : > { %v3214_v38 = vadd.f32 1.0, %v3150_v45  ;;  %v8104_v45 = vld [vmem:[#allocation19_spill] sm:$0xff] }
 0x680   : > { %v2960_v0 = vsub.f32 1.0, %v2896_v29  ;;  %v3276_v36 = vmul.f32 %v3212_v19, %v1612_v61 }
 0x681   : > { %v3278_v48 = vmul.f32 %v3214_v38, %v1614_v10 }
 0x682   : > { %v3088_v18 = vsub.f32 0.0, %v2960_v0  ;;  %3649 = vmatmul.mubr.bf16.gmra.mrb[52].mxu1 %v8092_v3 }
 0x683   : > { %3656 = vmatprep.mubr.bf16.mxu1 %v8093_v9  ;;  %v3310_v60 = vpack.c.bf16 %v3278_v48, %v3274_v14 }
 0x684   : > { %v3152_v22 = vsel %vm3024_vm15, %v2960_v0, %v3088_v18  ;;  %3746 = vmatmul.mubr.bf16.gmra.mrb[68].mxu0 %v8094_v17 }
 0x685   : > { %v3216_v5 = vadd.f32 1.0, %v3152_v22 }
 0x687   : > { %v3280_v54 = vmul.f32 %v3216_v5, %v1616_v58  ;;  %v8106_v5 = vld [vmem:[#allocation21_spill] sm:$0xff] }
 0x689   : > { %v3312_v20 = vpack.c.bf16 %v3280_v54, %v3276_v36 }
 0x68a   : > { %3657 = vmatmul.mubr.bf16.gmra.mrb[56].mxu1 %v8097_v53 }
 0x68b   : > { %3664 = vmatprep.mubr.bf16.mxu1 %v3310_v60 }
 0x692   : > { %3665 = vmatmul.mubr.bf16.gmra.mrb[60].mxu1 %v3309_v12 }
 0x693   : > { %3753 = vmatprep.mubr.bf16.mxu1 %v3308_v43 }
 0x69a   : > { %3754 = vmatmul.mubr.bf16.vlgmr.msra.gmra.mrb[64].mxu1 %v8100_v25 }
 0x69b   : > { %3761 = vmatprep.mubr.bf16.mxu1 %v3312_v20 }
 0x6a2   : > { %3762 = vmatmul.mubr.bf16.gmra.mrb[68].mxu1 %v3311_v4 }
 0x700   : > { %v4050_v11 = vpop.f32.mrb[32].mxu1 }
 0x701   : > { %v4051_v47 = vpop.f32.mrb[33].mxu1 }
 0x702   : > { %v4052_v21 = vadd.f32 %v4051_v47, %v4050_v11  ;;  %v4053_v6 = vpop.f32.mrb[34].mxu1 }
 0x703   : > { %v4054_v32 = vpop.f32.mrb[35].mxu1 }
 0x704   : > { %v4055_v55 = vadd.f32 %v4054_v32, %v4053_v6  ;;  %v3611_v15 = vadd.f32 %v4052_v21, %v7670_v41 }
 0x706   : > { %v3614_v12 = vadd.f32 %v4055_v55, %v7670_v41 }
 0x707   : > { %v4114_v39 = vpop.f32.mrb[48].mxu0 }
 0x708   : > { %v4115_v43 = vpop.f32.mrb[49].mxu0 }
 0x709   : > { %v4116_v49 = vadd.f32 %v4115_v43, %v4114_v39  ;;  %v4117_v2 = vpop.f32.mrb[50].mxu0 }
 0x70a   : > { %v4118_v63 = vpop.f32.mrb[51].mxu0 }
 0x70b   : > { %v3708_v52 = vadd.f32 %v4116_v49, %v3611_v15  ;;  %v4119_v1 = vadd.f32 %v4118_v63, %v4117_v2  ;;  %v8108_v63 = vld [vmem:[#allocation23_spill] sm:$0xff] }
 0x70d   : > { %v3770_v33 = vadd.f32 %v3708_v52, %v8102_v26  ;;  %v3711_v24 = vadd.f32 %v4119_v1, %v3614_v12 }
 0x70f   : > { %3786 = vst [vmem:[%s7677_s16] sm:$0xff] %v3770_v33  ;;  %v3771_v46 = vadd.f32 %v3711_v24, %v8103_v27  ;;  %v8109_v24 = vld [vmem:[#allocation24_spill] sm:$0xff] }
 0x711   : > { %3787 = vst [vmem:[%s7677_s16 + $0x8] sm:$0xff] %v3771_v46 }
 0x735   : > { %v4056_v44 = vpop.f32.mrb[36].mxu1 }
 0x736   : > { %v4057_v50 = vpop.f32.mrb[37].mxu1 }
 0x737   : > { %v4120_v30 = vpop.f32.mrb[52].mxu0  ;;  %v4058_v57 = vadd.f32 %v4057_v50, %v4056_v44  ;;  %v4059_v37 = vpop.f32.mrb[38].mxu1 }
 0x738   : > { %v4121_v13 = vpop.f32.mrb[53].mxu0  ;;  %v4060_v23 = vpop.f32.mrb[39].mxu1 }
 0x739   : > { %v3619_v7 = vadd.f32 %v4058_v57, %v7670_v41  ;;  %v4122_v34 = vadd.f32 %v4121_v13, %v4120_v30  ;;  %v4123_v28 = vpop.f32.mrb[54].mxu0  ;;  %v4061_v8 = vadd.f32 %v4060_v23, %v4059_v37 }
 0x73a   : > { %v4124_v40 = vpop.f32.mrb[55].mxu0 }
 0x73b   : > { %v3716_v4 = vadd.f32 %v4122_v34, %v3619_v7  ;;  %v3622_v35 = vadd.f32 %v4061_v8, %v7670_v41  ;;  %v4125_v56 = vadd.f32 %v4124_v40, %v4123_v28 }
 0x73d   : > { %v3772_v29 = vadd.f32 %v3716_v4, %v8104_v45  ;;  %v3719_v62 = vadd.f32 %v4125_v56, %v3622_v35  ;;  %v4062_v10 = vpop.f32.mrb[40].mxu1  ;;  %v8110_v4 = vld [vmem:[#allocation25_spill] sm:$0xff] }
 0x73e   : > { %v4063_v38 = vpop.f32.mrb[41].mxu1 }
 0x73f   : > { %3788 = vst [vmem:[%s7677_s16 + $0x10] sm:$0xff] %v3772_v29  ;;  %v3773_v0 = vadd.f32 %v3719_v62, %v8105_v59  ;;  %v4126_v14 = vpop.f32.mrb[56].mxu0  ;;  %v4064_v48 = vadd.f32 %v4063_v38, %v4062_v10  ;;  %v4065_v18 = vpop.f32.mrb[42].mxu1  ;;  %v8111_v62 = vld [vmem:[#allocation26_spill] sm:$0xff] }
 0x740   : > { %v4127_v3 = vpop.f32.mrb[57].mxu0  ;;  %v4066_v19 = vpop.f32.mrb[43].mxu1 }
 0x741   : > { %3789 = vst [vmem:[%s7677_s16 + $0x18] sm:$0xff] %v3773_v0  ;;  %v3627_v9 = vadd.f32 %v4064_v48, %v7670_v41  ;;  %v4128_v60 = vadd.f32 %v4127_v3, %v4126_v14  ;;  %v4129_v22 = vpop.f32.mrb[58].mxu0  ;;  %v4067_v17 = vadd.f32 %v4066_v19, %v4065_v18 }
 0x742   : > { %v4130_v51 = vpop.f32.mrb[59].mxu0 }
 0x743   : > { %v3724_v61 = vadd.f32 %v4128_v60, %v3627_v9  ;;  %v3630_v31 = vadd.f32 %v4067_v17, %v7670_v41  ;;  %v4131_v58 = vadd.f32 %v4130_v51, %v4129_v22 }
 0x745   : > { %v3774_v36 = vadd.f32 %v3724_v61, %v8106_v5  ;;  %v3727_v54 = vadd.f32 %v4131_v58, %v3630_v31  ;;  %v4068_v20 = vpop.f32.mrb[44].mxu1  ;;  %v8112_v61 = vld [vmem:[#allocation27_spill] sm:$0xff] }
 0x746   : > { %v4069_v53 = vpop.f32.mrb[45].mxu1 }
 0x747   : > { %3790 = vst [vmem:[%s7677_s16 + $0x20] sm:$0xff] %v3774_v36  ;;  %v3775_v16 = vadd.f32 %v3727_v54, %v8107_v42  ;;  %v4132_v25 = vpop.f32.mrb[60].mxu0  ;;  %v4070_v11 = vadd.f32 %v4069_v53, %v4068_v20  ;;  %v4071_v47 = vpop.f32.mrb[46].mxu1  ;;  %v8113_v54 = vld [vmem:[#allocation28_spill] sm:$0xff] }
 0x748   : > { %v4133_v21 = vpop.f32.mrb[61].mxu0  ;;  %v4072_v6 = vpop.f32.mrb[47].mxu1 }
 0x749   : > { %3791 = vst [vmem:[%s7677_s16 + $0x28] sm:$0xff] %v3775_v16  ;;  %v3635_v32 = vadd.f32 %v4070_v11, %v7670_v41  ;;  %v4134_v55 = vadd.f32 %v4133_v21, %v4132_v25  ;;  %v4135_v39 = vpop.f32.mrb[62].mxu0  ;;  %v4073_v15 = vadd.f32 %v4072_v6, %v4071_v47 }
 0x74a   : > { %v4136_v43 = vpop.f32.mrb[63].mxu0 }
 0x74b   : > { %v3732_v49 = vadd.f32 %v4134_v55, %v3635_v32  ;;  %v3638_v2 = vadd.f32 %v4073_v15, %v7670_v41  ;;  %v4137_v12 = vadd.f32 %v4136_v43, %v4135_v39 }
 0x74d   : > { %v3776_v52 = vadd.f32 %v3732_v49, %v8108_v63  ;;  %v3735_v1 = vadd.f32 %v4137_v12, %v3638_v2  ;;  %v4074_v26 = vpop.f32.mrb[48].mxu1 }
 0x74e   : > { %v4075_v33 = vpop.f32.mrb[49].mxu1 }
 0x74f   : > { %3792 = vst [vmem:[%s7677_s16 + $0x30] sm:$0xff] %v3776_v52  ;;  %v3777_v27 = vadd.f32 %v3735_v1, %v8109_v24  ;;  %v4138_v46 = vpop.f32.mrb[64].mxu0  ;;  %v4076_v44 = vadd.f32 %v4075_v33, %v4074_v26  ;;  %v4077_v50 = vpop.f32.mrb[50].mxu1  ;;  %v8114_v26 = vld [vmem:[#allocation29_spill] sm:$0xff] }
 0x750   : > { %v4139_v30 = vpop.f32.mrb[65].mxu0  ;;  %v4078_v57 = vpop.f32.mrb[51].mxu1 }
 0x751   : > { %3793 = vst [vmem:[%s7677_s16 + $0x38] sm:$0xff] %v3777_v27  ;;  %v3643_v37 = vadd.f32 %v4076_v44, %v7670_v41  ;;  %v4140_v13 = vadd.f32 %v4139_v30, %v4138_v46  ;;  %v4141_v23 = vpop.f32.mrb[66].mxu0  ;;  %v4079_v7 = vadd.f32 %v4078_v57, %v4077_v50  ;;  %v8115_v27 = vld [vmem:[#allocation30_spill] sm:$0xff] }
 0x752   : > { %v4142_v34 = vpop.f32.mrb[67].mxu0 }
 0x753   : > { %v3740_v28 = vadd.f32 %v4140_v13, %v3643_v37  ;;  %v3646_v8 = vadd.f32 %v4079_v7, %v7670_v41  ;;  %v4143_v40 = vadd.f32 %v4142_v34, %v4141_v23 }
 0x755   : > { %v3778_v35 = vadd.f32 %v3740_v28, %v8110_v4  ;;  %v3743_v56 = vadd.f32 %v4143_v40, %v3646_v8  ;;  %v4080_v45 = vpop.f32.mrb[52].mxu1  ;;  %v8116_v28 = vld [vmem:[#allocation31_spill] sm:$0xff]  ;;  %v8118_v4 = vld [vmem:[#allocation32_spill] sm:$0xff] }
 0x756   : > { %v4081_v29 = vpop.f32.mrb[53].mxu1 }
 0x757   : > { %3794 = vst [vmem:[%s7677_s16 + $0x40] sm:$0xff] %v3778_v35  ;;  %v3779_v10 = vadd.f32 %v3743_v56, %v8111_v62  ;;  %v4144_v38 = vpop.f32.mrb[68].mxu0  ;;  %v4082_v59 = vadd.f32 %v4081_v29, %v4080_v45  ;;  %v4083_v0 = vpop.f32.mrb[54].mxu1 }
 0x758   : > { %v4145_v14 = vpop.f32.mrb[69].mxu0  ;;  %v4084_v48 = vpop.f32.mrb[55].mxu1 }
 0x759   : > { %3795 = vst [vmem:[%s7677_s16 + $0x48] sm:$0xff] %v3779_v10  ;;  %v3651_v18 = vadd.f32 %v4082_v59, %v7670_v41  ;;  %v4146_v3 = vadd.f32 %v4145_v14, %v4144_v38  ;;  %v4147_v19 = vpop.f32.mrb[70].mxu0  ;;  %v4085_v9 = vadd.f32 %v4084_v48, %v4083_v0 }
 0x75a   : > { %v4148_v60 = vpop.f32.mrb[71].mxu0 }
 0x75b   : > { %v3748_v22 = vadd.f32 %v4146_v3, %v3651_v18  ;;  %v3654_v17 = vadd.f32 %v4085_v9, %v7670_v41  ;;  %v4149_v51 = vadd.f32 %v4148_v60, %v4147_v19 }
 0x75d   : > { %v3780_v31 = vadd.f32 %v3748_v22, %v8112_v61  ;;  %v3751_v58 = vadd.f32 %v4149_v51, %v3654_v17  ;;  %v4086_v5 = vpop.f32.mrb[56].mxu1 }
 0x75e   : > { %v4087_v36 = vpop.f32.mrb[57].mxu1 }
 0x75f   : > { %3796 = vst [vmem:[%s7677_s16 + $0x50] sm:$0xff] %v3780_v31  ;;  %v3781_v20 = vadd.f32 %v3751_v58, %v8113_v54  ;;  %v4088_v53 = vadd.f32 %v4087_v36, %v4086_v5  ;;  %v4089_v42 = vpop.f32.mrb[58].mxu1 }
 0x760   : > { %v4090_v16 = vpop.f32.mrb[59].mxu1 }
 0x761   : > { %3797 = vst [vmem:[%s7677_s16 + $0x58] sm:$0xff] %v3781_v20  ;;  %v4091_v25 = vadd.f32 %v4090_v16, %v4089_v42  ;;  %v3659_v43 = vadd.f32 %v4088_v53, %v7670_v41 }
 0x763   : > { %v3662_v63 = vadd.f32 %v4091_v25, %v7670_v41 }
 0x765   : > { %v4092_v11 = vpop.f32.mrb[60].mxu1 }
 0x766   : > { %v4093_v47 = vpop.f32.mrb[61].mxu1 }
 0x767   : > { %v4094_v21 = vadd.f32 %v4093_v47, %v4092_v11  ;;  %v4095_v6 = vpop.f32.mrb[62].mxu1 }
 0x768   : > { %v4096_v32 = vpop.f32.mrb[63].mxu1 }
 0x769   : > { %v4097_v55 = vadd.f32 %v4096_v32, %v4095_v6  ;;  %v3667_v30 = vadd.f32 %v4094_v21, %v7670_v41 }
 0x76b   : > { %v3670_v23 = vadd.f32 %v4097_v55, %v7670_v41 }
 0x76d   : > { %v4150_v39 = vpop.f32.mrb[64].mxu1 }
 0x76e   : > { %v4151_v15 = vpop.f32.mrb[65].mxu1 }
 0x76f   : > { %v4152_v49 = vadd.f32 %v4151_v15, %v4150_v39  ;;  %v4153_v2 = vpop.f32.mrb[66].mxu1 }
 0x770   : > { %v4154_v12 = vpop.f32.mrb[67].mxu1 }
 0x771   : > { %v3756_v52 = vadd.f32 %v4152_v49, %v3659_v43  ;;  %v4155_v1 = vadd.f32 %v4154_v12, %v4153_v2 }
 0x773   : > { %v3782_v33 = vadd.f32 %v3756_v52, %v8114_v26  ;;  %v3759_v24 = vadd.f32 %v4155_v1, %v3662_v63 }
 0x775   : > { %3798 = vst [vmem:[%s7677_s16 + $0x60] sm:$0xff] %v3782_v33  ;;  %v3783_v46 = vadd.f32 %v3759_v24, %v8115_v27  ;;  %v4156_v44 = vpop.f32.mrb[68].mxu1 }
 0x776   : > { %v4157_v50 = vpop.f32.mrb[69].mxu1 }
 0x777   : > { %3799 = vst [vmem:[%s7677_s16 + $0x68] sm:$0xff] %v3783_v46  ;;  %v4158_v57 = vadd.f32 %v4157_v50, %v4156_v44  ;;  %v4159_v37 = vpop.f32.mrb[70].mxu1 }
 0x778   : > { %v4160_v13 = vpop.f32.mrb[71].mxu1 }
 0x779   : > { %v3764_v7 = vadd.f32 %v4158_v57, %v3667_v30  ;;  %v4161_v34 = vadd.f32 %v4160_v13, %v4159_v37 }
 0x77b   : > { %v3784_v8 = vadd.f32 %v3764_v7, %v8116_v28  ;;  %v3767_v40 = vadd.f32 %v4161_v34, %v3670_v23 }
 0x77d   : > { %3800 = vst [vmem:[%s7677_s16 + $0x70] sm:$0xff] %v3784_v8  ;;  %v3785_v41 = vadd.f32 %v3767_v40, %v8118_v4 }
 0x77f   : > { %3801 = vst [vmem:[%s7677_s16 + $0x78] sm:$0xff] %v3785_v41 }
 0x780   : > { %4847 = shalt.err (!%p4844_p4)
}
 0x781   : > { %s4848_s24 = scalar_lea.hbm %s7726_s29, 2048  ;;  %s4852_s25 = scalar_lea.hbm %s8117_s11, 4096 }
 0x782   : > { %p4849_p9 = scmp.ne.s32.totalorder %s7726_s29, %s4848_s24  ;;  %p4853_p8 = scmp.lt.u32.totalorder %s7726_s29, %s8117_s11 }
 0x783   : > { %p4854_p13 = scmp.lt.u32.totalorder %s4852_s25, %s4848_s24  ;;  %p4856_p10 = scmp.lt.u32.totalorder %s4848_s24, %s7726_s29 }
 0x784   : > { %p4850_p0 = pnand %p4849_p9, %p5132_p5 }
 0x785   : > { %p4855_p6 = por %p4854_p13, %p4853_p8 }
 0x786   : > { %p4851_p11 = pneg %p4850_p0 }
 0x787   : > { %p4857_p3 = por %p4856_p10, %p4855_p6 }
 0x789   : > { %p4858_p7 = pnand %p4857_p3, %p4851_p11 }
 0x78b   : > { %4861 = shalt.err (!%p4858_p7)
}
 0x78c   : > { %s4922_s13 = smov 128   ;;  %s4923_s14 = smov 8  }
 0x78d   : > { %4224 = dma.vmem_to_hbm [thread:$0]  (%p5132_p5), %s7728_s30, 2048, %s7726_s29, %s3803_s12, %s4922_s13, %s4922_s13, %s4923_s14  }
 0x78e PF: > { %s8119_s21 = sld [smem:[#allocation15_spill]]  ;;  %s8120_s27 = sld [smem:[#allocation16_spill]] }
 0x78f   : > { %p8122_p1 = scmp.ge.s32.totalorder %s4908_s20, 2 }
 0x794   : > { %s3831_s3 = sand.u32 1, %s8119_s21   ;;  %p8121_p12 = scmp.ne.s32.totalorder %s8120_s27, 0 }
 0x795   : > { %s3832_s8 = scalar_lea.sflag [#allocation4], %s3831_s3 }
 0x796   : > { %p4241_p2 = pnand %p8122_p1, %p8121_p12 }
 0x798   : > { %4891 = dma.done.wait (!%p4241_p2), %s3832_s8, 2048  }
 0x799   : > { %4893 = vsyncadd (!%p4241_p2), %s3832_s8, 4294965248  ;;  %s8123_s24 = smov %s5128_s17  ;;  %p26_p4 = scmp.ge.s32.totalorder %s5097_s26, 4  }
 0x79a   : > { %s8124_s17 = smov %s4900_s18  ;;  %s8125_s18 = smov %s4904_s19 }
 0x79b   : > { %s8126_s19 = smov %s8123_s24  ;;  %s8127_s20 = smov %s5097_s26 }
 0x79c   :  { %28 = sbr.rel (!%p26_p4) target bundleno = 12 (0xc), region = 121 }
 0x7a3   :  { %3837 = vsyncpa [#allocation3], 1 }
 0x7a4   :  { %3839 = vsyncpa [#allocation3 + $0x1], 1 }
 0x7a5   :  { %3840 = vsyncpa [#allocation6], 1 }
 0x7a6   :  { %3841 = vsyncpa [#allocation9], 1 }
 0x7a7   :  { %3842 = vsyncpa [#allocation4], 1 }
 0x7a8   :  { %3844 = vsyncpa [#allocation4 + $0x1], 1 }

// kernel: tpu_custom_call.1
= control target key start
LH: loop header
LB: loop body
LE: loop exit
PB: predicated region body
PF: predicated region fallthrough
CT: control target
= control target key end

     0   :  { %s7775_s0 = inlined_call_operand.hbm [shape: f32[256,128], index: 0, kind: input, shape index: {}]   ;;  %s7776_s1 = inlined_call_operand.vmem [shape: f32[1,128], index: 1, kind: input, shape index: {}]   ;;  %s7777_s2 = inlined_call_operand.vmem [shape: f32[1,128], index: 2, kind: input, shape index: {}]   ;;  %s7778_s3 = inlined_call_operand.hbm [shape: bf16[128,128], index: 3, kind: input, shape index: {}]   ;;  %s7779_s4 = inlined_call_operand.vmem [shape: f32[1,128], index: 4, kind: input, shape index: {}]   ;;  %s7780_s5 = inlined_call_operand.vmem [shape: f32[1,128], index: 5, kind: input, shape index: {}]   ;;  %s7781_s6 = inlined_call_operand.vmem [shape: f32[1,128], index: 6, kind: input, shape index: {}]   ;;  %s7782_s7 = inlined_call_operand.hbm [shape: bf16[128,512], index: 7, kind: input, shape index: {}]   ;;  %s7783_s8 = inlined_call_operand.vmem [shape: f32[1,512], index: 8, kind: input, shape index: {}]   ;;  %s7784_s9 = inlined_call_operand.hbm [shape: bf16[512,128], index: 9, kind: input, shape index: {}]   ;;  %s7785_s10 = inlined_call_operand.vmem [shape: f32[1,128], index: 10, kind: input, shape index: {}]   ;;  %s7786_s11 = inlined_call_operand.hbm [shape: f32[256,128], index: 11, kind: output, shape index: {}]  }
   0x1   :  { %7848 = sst [smem:[#allocation85_spill]] %s7778_s3 }
   0x2   :  { %7849 = sst [smem:[#allocation86_spill]] %s7783_s8 }
   0x3   :  { %7850 = sst [smem:[#allocation87_spill]] %s7785_s10 }
   0x4   :  { %7851 = sst [smem:[#allocation88_spill]] %s7786_s11 }
   0x5   :  { %16 = vsyncpa [#allocation3], 0 }
   0x6   :  { %18 = vsyncpa [#allocation3 + $0x1], 0 }
   0x7   :  { %19 = vsyncpa [#allocation6], 0 }
   0x8   :  { %20 = vsyncpa [#allocation9], 0 }
   0x9   :  { %21 = vsyncpa [#allocation4], 0 }
   0xa   :  { %23 = vsyncpa [#allocation4 + $0x1], 0  ;;  %s4984_s17 = smov 0   ;;  %s4986_s18 = smov 0  }
   0xb   :  { %s4988_s19 = smov 0   ;;  %s4990_s20 = smov 0  }
   0xc LB: > { %7852 = sst [smem:[#allocation15_spill]] %s4896_s17  ;;  %s5005_s21 = sadd.s32 4294967295, %s4908_s20   ;;  %s4908_s20 = sphi %s4990_s20, %s8127_s20   ;;  %s4904_s19 = sphi %s4988_s19, %s8126_s19   ;;  %s4900_s18 = sphi %s4986_s18, %s8125_s18   ;;  %s4896_s17 = sphi %s4984_s17, %s8124_s17  }
   0xd   : > { %s3918_s22 = sadd.s32 4294967294, %s4908_s20   ;;  %p49_p0 = scmp.ne.s32.totalorder %s4900_s18, %s4896_s17 }
   0xe   : > { %p7787_p1 = scmp.eq.s32.totalorder %s5005_s21, 0  ;;  %p289_p3 = scmp.eq.s32.totalorder %s3918_s22, 1 }
   0xf   : > { %p3919_p5 = scmp.ge.s32.totalorder %s4908_s20, 1  ;;  %p296_p7 = scmp.lt.s32.totalorder %s4908_s20, 3 }
  0x10   : > { %p5014_p4 = por %p7787_p1, %p49_p0  ;;  %p5019_p6 = por %p289_p3, %p49_p0 }
  0x11   : > { %p5024_p8 = pnand %p3919_p5, %p296_p7  ;;  %s4910_s26 = smov [#allocation5]  }
  0x12   : > { %s7853_s23 = scalar_select %p5014_p4, 1, 0 }
  0x13   : > { %s7854_s24 = scalar_select %p5019_p6, 1, 0 }
  0x14   : > { %s7856_s25 = scalar_select %p5024_p8, 1, 0 }
  0x15   : > { %7855 = sst [smem:[#allocation16_spill]] %s7854_s24  ;;  %s314_s27 = sshll.u32 %s4910_s26, 4  ;;  %s5028_s27 = int_to_ptr.vmem [resolvable:$true] %s314_s27 }
  0x16   : > { %p4226_p9 = pneg %p5024_p8  ;;  %s4911_s29 = smov [#allocation7]  }
  0x17   : > { %s336_s30 = sshll.u32 %s4911_s29, 4  ;;  %s7858_s3 = sld [smem:[#allocation85_spill]]  ;;  %s5039_s30 = int_to_ptr.vmem [resolvable:$true] %s336_s30 }
  0x18   : > { %p5035_p11 = pnand %p4226_p9, %p7787_p1 }
  0x1a   : > { %p5049_p13 = pneg %p5035_p11 }
  0x1d   : > { %s4720_s14 = scalar_lea.hbm %s7858_s3, 1024 }
  0x1e   : > { %p4721_p12 = scmp.ne.s32.totalorder %s7858_s3, %s4720_s14  ;;  %p4727_p5 = scmp.lt.u32.totalorder %s4720_s14, %s7858_s3 }
  0x20   : > { %p4723_p0 = pnand %p5049_p13, %p4721_p12 }
  0x22   : > { %p4724_p3 = pneg %p4723_p0 }
  0x24   : > { %p4729_p7 = pnand %p4727_p5, %p4724_p3 }
  0x26   : > { %4732 = shalt.err (!%p4729_p7)
}
  0x27   : > { %s4733_s12 = scalar_lea.vmem %s5028_s27, 1024  ;;  %p4741_p2 = scmp.lt.s32.totalorder %s5028_s27, %s5028_s27 }
  0x28   : > { %p4734_p9 = scmp.ne.s32.totalorder %s5028_s27, %s4733_s12  ;;  %p4742_p6 = scmp.lt.s32.totalorder %s4733_s12, %s4733_s12 }
  0x2a   : > { %p4736_p10 = pnand %p4734_p9, %p5049_p13  ;;  %p4743_p12 = por %p4742_p6, %p4741_p2 }
  0x2c   : > { %p4737_p1 = pneg %p4736_p10 }
  0x2e   : > { %p4744_p0 = pnand %p4743_p12, %p4737_p1 }
  0x30   : > { %4747 = shalt.err (!%p4744_p0)
}
  0x31   : > { %s7791_s13 = smov 64   ;;  %s7792_s14 = smov 4  }
  0x32   : > { %4229 = dma.hbm_to_vmem [thread:$0]  (!%p5035_p11), %s7858_s3, 1024, %s5028_s27, [#allocation6], %s7791_s13, %s7791_s13, %s7792_s14  }
  0x33   : > { %s4748_s12 = scalar_lea.hbm %s7782_s7, 4096 }
  0x34   : > { %p4749_p1 = scmp.ne.s32.totalorder %s7782_s7, %s4748_s12  ;;  %p4755_p10 = scmp.lt.u32.totalorder %s4748_s12, %s7782_s7 }
  0x36   : > { %p4751_p2 = pnand %p4749_p1, %p5049_p13 }
  0x38   : > { %p4752_p6 = pneg %p4751_p2 }
  0x3a   : > { %p4757_p3 = pnand %p4755_p10, %p4752_p6 }
  0x3c   : > { %4760 = shalt.err (!%p4757_p3)
}
  0x3d   : > { %s4761_s27 = scalar_lea.vmem %s5039_s30, 4096  ;;  %p4769_p12 = scmp.lt.s32.totalorder %s5039_s30, %s5039_s30 }
  0x3e   : > { %p4762_p5 = scmp.ne.s32.totalorder %s5039_s30, %s4761_s27  ;;  %p4770_p0 = scmp.lt.s32.totalorder %s4761_s27, %s4761_s27 }
  0x40   : > { %p4764_p7 = pnand %p4762_p5, %p5049_p13  ;;  %p4771_p1 = por %p4770_p0, %p4769_p12 }
  0x42   : > { %p4765_p9 = pneg %p4764_p7 }
  0x44   : > { %p4772_p2 = pnand %p4771_p1, %p4765_p9 }
  0x46   : > { %4775 = shalt.err (!%p4772_p2)
}
  0x47   : > { %s4914_s17 = smov 256   ;;  %s4915_s10 = smov 16  }
  0x48   : > { %4232 = dma.hbm_to_vmem [thread:$0]  (!%p5035_p11), %s7782_s7, 4096, %s5039_s30, [#allocation6], %s4914_s17, %s4914_s17, %s4915_s10  }
  0x49   : > { %s4916_s15 = smov [#allocation8]   ;;  %s5097_s26 = sadd.s32 1, %s4908_s20  }
  0x4a   : > { %s352_s16 = sshll.u32 %s4916_s15, 4  ;;  %s4776_s27 = scalar_lea.hbm %s7784_s9, 4096  ;;  %s353_s16 = int_to_ptr.vmem [resolvable:$true] %s352_s16 }
  0x4b   : > { %p4777_p6 = scmp.ne.s32.totalorder %s7784_s9, %s4776_s27  ;;  %p4783_p5 = scmp.lt.u32.totalorder %s4776_s27, %s7784_s9 }
  0x4d   : > { %p4779_p10 = pnand %p4777_p6, %p5049_p13 }
  0x4f   : > { %p4780_p3 = pneg %p4779_p10 }
  0x51   : > { %p4785_p7 = pnand %p4783_p5, %p4780_p3 }
  0x53   : > { %4788 = shalt.err (!%p4785_p7)
}
  0x54   : > { %s4789_s30 = scalar_lea.vmem %s353_s16, 4096  ;;  %p4797_p1 = scmp.lt.s32.totalorder %s353_s16, %s353_s16 }
  0x55   : > { %p4790_p9 = scmp.ne.s32.totalorder %s353_s16, %s4789_s30  ;;  %p4798_p2 = scmp.lt.s32.totalorder %s4789_s30, %s4789_s30 }
  0x57   : > { %p4792_p12 = pnand %p4790_p9, %p5049_p13  ;;  %p4799_p4 = por %p4798_p2, %p4797_p1 }
  0x59   : > { %p4793_p0 = pneg %p4792_p12 }
  0x5b   : > { %p4800_p8 = pnand %p4799_p4, %p4793_p0 }
  0x5d   : > { %4803 = shalt.err (!%p4800_p8)
}
  0x5e   : > { %s7860_s13 = smov 4   ;;  %s7861_s14 = smov 64  }
  0x5f   : > { %4235 = dma.hbm_to_vmem [thread:$0]  (!%p5035_p11), %s7784_s9, 4096, %s353_s16, [#allocation9], %s7861_s14, %s7861_s14, %s7860_s13  }
  0x60   : > { %s33_s22 = ssub.s32 %s4908_s20, %s5097_s26  ;;  %s36_s28 = sadd.s32 1, %s4904_s19 }
  0x61   : > { %p34_p4 = scmp.eq.s32.totalorder %s33_s22, 0  ;;  %p43_p8 = scmp.ne.s32.totalorder %s4904_s19, %s4900_s18 }
  0x62   : > { %p44_p13 = scmp.eq.s32.totalorder %s4908_s20, 0  ;;  %p4247_p6 = scmp.lt.s32.totalorder %s4908_s20, 2 }
  0x63   : > { %s5128_s17 = scalar_select %p34_p4, %s4904_s19, %s36_s28  }
  0x64   : > { %p45_p10 = por %p44_p13, %p43_p8  ;;  %p7862_p3 = scmp.eq.s32.totalorder %s5005_s21, 1 }
  0x65   : > { %s369_s11 = sand.u32 1, %s4904_s19   ;;  %s4016_s24 = sshll.u32 %s4908_s20, 11 }
  0x66   : > { %p5132_p5 = por %p7862_p3, %p43_p8  ;;  %s3924_s15 = sshll.u32 %s369_s11, 7 }
  0x67   : > { %s5141_s16 = scalar_lea.hbm %s7775_s0, %s4016_s24  ;;  %s373_s27 = scalar_lea.vmem [#allocation2], %s3924_s15 }
  0x68   : > { %s380_s30 = sshll.u32 %s373_s27, 4  ;;  %p5143_p11 = pnand %p4247_p6, %p45_p10  ;;  %s5147_s30 = int_to_ptr.vmem [resolvable:$true] %s380_s30 }
  0x69   : > { %s5149_s14 = scalar_lea.sflag [#allocation3], %s369_s11  ;;  %s4804_s3 = scalar_lea.hbm %s5141_s16, 2048 }
  0x6a   : > { %p4805_p7 = scmp.ne.s32.totalorder %s5141_s16, %s4804_s3  ;;  %p4806_p9 = pneg %p5143_p11 }
  0x6b   : > { %s4809_s28 = scalar_lea.hbm %s7775_s0, 4096  ;;  %p4810_p1 = scmp.lt.u32.totalorder %s5141_s16, %s7775_s0 }
  0x6c   : > { %p4807_p12 = pnand %p4806_p9, %p4805_p7  ;;  %p4811_p2 = scmp.lt.u32.totalorder %s4809_s28, %s4804_s3 }
  0x6d   : > { %p4813_p8 = scmp.lt.u32.totalorder %s4804_s3, %s5141_s16 }
  0x6e   : > { %p4808_p0 = pneg %p4807_p12  ;;  %p4812_p4 = por %p4811_p2, %p4810_p1 }
  0x70   : > { %p4814_p13 = por %p4813_p8, %p4812_p4 }
  0x72   : > { %p4815_p6 = pnand %p4814_p13, %p4808_p0 }
  0x74   : > { %4818 = shalt.err (!%p4815_p6)
}
  0x75   : > { %s4819_s11 = scalar_lea.vmem %s5147_s30, 2048  ;;  %s4917_s29 = smov [#allocation2]  }
  0x76   : > { %p4820_p10 = scmp.ne.s32.totalorder %s5147_s30, %s4819_s11  ;;  %s4824_s12 = sshll.u32 %s4917_s29, 4  ;;  %s4825_s12 = int_to_ptr.vmem [resolvable:$false] %s4824_s12 }
  0x77   : > { %s4826_s27 = scalar_lea.vmem %s4825_s12, 4096  ;;  %p4827_p12 = scmp.lt.s32.totalorder %s5147_s30, %s4825_s12 }
  0x78   : > { %p4822_p3 = pnand %p4820_p10, %p4806_p9  ;;  %p4828_p1 = scmp.lt.s32.totalorder %s4826_s27, %s4819_s11 }
  0x7a   : > { %p4823_p7 = pneg %p4822_p3  ;;  %p4829_p2 = por %p4828_p1, %p4827_p12 }
  0x7c   : > { %p4830_p4 = pnand %p4829_p2, %p4823_p7 }
  0x7e   : > { %4833 = shalt.err (!%p4830_p4)
}
  0x7f   : > { %s4918_s3 = smov 128   ;;  %s4919_s8 = smov 8  }
  0x80   : > { %4239 = dma.hbm_to_vmem [thread:$0]  (!%p5143_p11), %s5141_s16, 2048, %s5147_s30, %s5149_s14, %s4918_s3, %s4918_s3, %s4919_s8  }
  0x81   : > { %p7865_p9 = scmp.ne.s32.totalorder %s7856_s25, 0 }
  0x83   : > { %392 = sbr.rel (%p7865_p9) target bundleno = 1934 (0x78e), region = 64 }
  0x8a   : > { %s5180_s22 = sand.u32 1, %s4900_s18   ;;  %p7866_p0 = scmp.ne.s32.totalorder %s7853_s23, 0 }
  0x8b   : > { %s3928_s28 = sshll.u32 %s5180_s22, 7  ;;  %s395_s24 = scalar_lea.sflag [#allocation3], %s5180_s22 }
  0x8c   : > { %s5186_s15 = scalar_lea.vmem [#allocation2], %s3928_s28 }
  0x8d   : > { %4879 = dma.done.wait (%p7866_p0), %s395_s24, 2048  }
  0x8e   : > { %4881 = vsyncadd (%p7866_p0), %s395_s24, 4294965248  ;;  %p7867_p11 = scmp.eq.s32.totalorder %s5005_s21, 0 }
  0x90   : > { %4883 = dma.done.wait (%p7867_p11), [#allocation6], 5120   ;;  %p7868_p8 = pmov %p7867_p11 }
  0x92   : > { %4885 = vsyncadd (%p7868_p8), [#allocation6], 4294962176  ;;  %p7869_p13 = pmov %p7868_p8 }
  0x93   : > { %p7870_p6 = pmov %p7868_p8 }
  0x94   : > { %4887 = dma.done.wait (%p7869_p13), [#allocation9], 4096  }
  0x95   : > { %4889 = vsyncadd (%p7870_p6), [#allocation9], 4294963200  ;;  %v5201_v0 = vld [vmem:[%s5186_s15] sm:$0xff]  ;;  %v5204_v1 = vld [vmem:[%s5186_s15 + $0x10] sm:$0xff]  ;;  %s7887_s24 = sld [smem:[#allocation86_spill]]  ;;  %s8101_s25 = sld [smem:[#allocation87_spill]] }
  0x96   : > { %470 = vadd.xlane.f32.xlu0 %v5201_v0  ;;  %474 = vadd.xlane.f32.xlu1 %v5204_v1  ;;  %v5209_v2 = vld [vmem:[%s5186_s15 + $0x8] sm:$0xff]  ;;  %v5212_v3 = vld [vmem:[%s5186_s15 + $0x18] sm:$0xff]  ;;  %v5215_v4 = vld [vmem:[%s5186_s15 + $0x20] sm:$0xff]  ;;  %s7677_s16 = scalar_lea.vmem [#allocation10], %s3928_s28  ;;  %s4017_s28 = sshll.u32 %s5005_s21, 11 }
  0x97   : > { %v5220_v5 = vld [vmem:[%s5186_s15 + $0x28] sm:$0xff]  ;;  %v5223_v6 = vld [vmem:[%s5186_s15 + $0x30] sm:$0xff]  ;;  %v5226_v7 = vld [vmem:[%s5186_s15 + $0x38] sm:$0xff]  ;;  %s3816_s30 = sshll.u32 %s7677_s16, 4  ;;  %s8117_s11 = sld [smem:[#allocation88_spill]]  ;;  %s7728_s30 = int_to_ptr.vmem [resolvable:$true] %s3816_s30 }
  0x98   : > { %v5231_v8 = vld [vmem:[%s5186_s15 + $0x40] sm:$0xff]  ;;  %v5234_v9 = vld [vmem:[%s5186_s15 + $0x48] sm:$0xff]  ;;  %v5239_v10 = vld [vmem:[%s5186_s15 + $0x50] sm:$0xff]  ;;  %s3803_s12 = scalar_lea.sflag [#allocation4], %s5180_s22  ;;  %s4834_s21 = scalar_lea.vmem %s7728_s30, 2048 }
  0x99   : > { %v5242_v11 = vld [vmem:[%s5186_s15 + $0x58] sm:$0xff]  ;;  %v5247_v12 = vld [vmem:[%s5186_s15 + $0x60] sm:$0xff]  ;;  %v5250_v13 = vld [vmem:[%s5186_s15 + $0x68] sm:$0xff]  ;;  %p4835_p10 = scmp.ne.s32.totalorder %s7728_s30, %s4834_s21  ;;  %s4921_s27 = smov [#allocation10]  }
  0x9a   : > { %472 = vadd.xlane.f32.xlu0 %v5209_v2  ;;  %476 = vadd.xlane.f32.xlu1 %v5212_v3  ;;  %v5255_v14 = vld [vmem:[%s5186_s15 + $0x70] sm:$0xff]  ;;  %v5258_v15 = vld [vmem:[%s5186_s15 + $0x78] sm:$0xff]  ;;  %v4296_v16 = vld [vmem:[#allocation5] sm:$0xff]   ;;  %s4838_s3 = sshll.u32 %s4921_s27, 4  ;;  %s4839_s3 = int_to_ptr.vmem [resolvable:$false] %s4838_s3 }
  0x9b   : > { %4162 = vmatprep.subr.bf16.mxu0 %v4296_v16  ;;  %v4297_v60 = vld [vmem:[#allocation5 + $0x8] sm:$0xff]   ;;  %p4836_p3 = pnand %p4835_p10, %p5132_p5  ;;  %s4840_s8 = scalar_lea.vmem %s4839_s3, 4096 }
  0x9c   : > { %4163 = vmatpush3.bf16.msra.mxu0 %v4296_v16  ;;  %p4841_p12 = scmp.lt.s32.totalorder %s7728_s30, %s4839_s3  ;;  %p4842_p1 = scmp.lt.s32.totalorder %s4840_s8, %s4834_s21 }
  0x9d   : > { %4164 = vmatprep.subr.bf16.mxu0 %v4297_v60  ;;  %s7726_s29 = scalar_lea.hbm %s8117_s11, %s4017_s28  ;;  %p4837_p7 = pneg %p4836_p3 }
  0x9e   : > { %478 = vadd.xlane.f32.xlu0 %v5215_v4  ;;  %480 = vadd.xlane.f32.xlu1 %v5220_v5  ;;  %p4843_p2 = por %p4842_p1, %p4841_p12 }
  0xa0   : > { %4165 = vmatpush3.bf16.msra.mxu0 %v4297_v60  ;;  %p4844_p4 = pnand %p4843_p2, %p4837_p7 }
  0xa2   : > { %482 = vadd.xlane.f32.xlu0 %v5223_v6  ;;  %484 = vadd.xlane.f32.xlu1 %v5226_v7 }
  0xa6   : > { %486 = vadd.xlane.f32.xlu0 %v5231_v8  ;;  %488 = vadd.xlane.f32.xlu1 %v5234_v9 }
  0xaa   : > { %490 = vadd.xlane.f32.xlu0 %v5239_v10  ;;  %492 = vadd.xlane.f32.xlu1 %v5242_v11 }
  0xae   : > { %494 = vadd.xlane.f32.xlu0 %v5247_v12  ;;  %496 = vadd.xlane.f32.xlu1 %v5250_v13 }
  0xb2   : > { %498 = vadd.xlane.f32.xlu0 %v5255_v14  ;;  %500 = vadd.xlane.f32.xlu1 %v5258_v15 }
 0x123   : > { %v471_v17 = vpop.xlane.xlu0 %470  ;;  %v475_v18 = vpop.xlane.xlu1 %474 }
 0x124   : > { %v503_v19 = vmul.f32 0.0078125, %v471_v17  ;;  %v505_v20 = vmul.f32 0.0078125, %v475_v18 }
 0x126   : > { %v5265_v21 = vsub.f32 %v5201_v0, %v503_v19  ;;  %v5268_v22 = vsub.f32 %v5204_v1, %v505_v20 }
 0x127   : > { %v473_v23 = vpop.xlane.xlu0 %472  ;;  %v477_v24 = vpop.xlane.xlu1 %476 }
 0x128   : > { %v504_v25 = vmul.f32 0.0078125, %v473_v23  ;;  %v535_v26 = vmul.f32 %v5265_v21, %v5265_v21  ;;  %v506_v27 = vmul.f32 0.0078125, %v477_v24  ;;  %v537_v30 = vmul.f32 %v5268_v22, %v5268_v22 }
 0x12a   : > { %v5273_v28 = vsub.f32 %v5209_v2, %v504_v25  ;;  %551 = vadd.xlane.f32.xlu0 %v535_v26  ;;  %v5276_v29 = vsub.f32 %v5212_v3, %v506_v27  ;;  %v4298_v26 = vld [vmem:[#allocation5 + $0x10] sm:$0xff]  }
 0x12b   : > { %v479_v31 = vpop.xlane.xlu0 %478  ;;  %v481_v32 = vpop.xlane.xlu1 %480  ;;  %4166 = vmatprep.subr.bf16.mxu0 %v4298_v26 }
 0x12c   : > { %v507_v33 = vmul.f32 0.0078125, %v479_v31  ;;  %v536_v34 = vmul.f32 %v5273_v28, %v5273_v28  ;;  %v508_v35 = vmul.f32 0.0078125, %v481_v32  ;;  %v538_v38 = vmul.f32 %v5276_v29, %v5276_v29  ;;  %4167 = vmatpush3.bf16.msra.mxu0 %v4298_v26 }
 0x12e   : > { %v5283_v36 = vsub.f32 %v5215_v4, %v507_v33  ;;  %555 = vadd.xlane.f32.xlu0 %v537_v30  ;;  %553 = vadd.xlane.f32.xlu1 %v536_v34  ;;  %v5286_v37 = vsub.f32 %v5220_v5, %v508_v35 }
 0x12f   : > { %v483_v39 = vpop.xlane.xlu0 %482  ;;  %v485_v40 = vpop.xlane.xlu1 %484 }
 0x130   : > { %v509_v41 = vmul.f32 0.0078125, %v483_v39  ;;  %v539_v42 = vmul.f32 %v5283_v36, %v5283_v36  ;;  %v510_v43 = vmul.f32 0.0078125, %v485_v40  ;;  %v540_v46 = vmul.f32 %v5286_v37, %v5286_v37  ;;  %v4299_v39 = vld [vmem:[#allocation5 + $0x18] sm:$0xff]  }
 0x131   : > { %4168 = vmatprep.subr.bf16.mxu0 %v4299_v39 }
 0x132   : > { %v5293_v44 = vsub.f32 %v5223_v6, %v509_v41  ;;  %557 = vadd.xlane.f32.xlu1 %v538_v38  ;;  %559 = vadd.xlane.f32.xlu0 %v539_v42  ;;  %v5296_v45 = vsub.f32 %v5226_v7, %v510_v43  ;;  %v4300_v42 = vld [vmem:[#allocation5 + $0x20] sm:$0xff]   ;;  %v4301_v43 = vld [vmem:[#allocation5 + $0x28] sm:$0xff]  }
 0x133   : > { %v487_v47 = vpop.xlane.xlu0 %486  ;;  %v489_v48 = vpop.xlane.xlu1 %488  ;;  %4169 = vmatpush3.bf16.msra.mxu0 %v4299_v39 }
 0x134   : > { %v511_v49 = vmul.f32 0.0078125, %v487_v47  ;;  %v541_v50 = vmul.f32 %v5293_v44, %v5293_v44  ;;  %v512_v51 = vmul.f32 0.0078125, %v489_v48  ;;  %v542_v54 = vmul.f32 %v5296_v45, %v5296_v45  ;;  %4170 = vmatprep.subr.bf16.mxu0 %v4300_v42  ;;  %v4303_v47 = vld [vmem:[#allocation5 + $0x38] sm:$0xff]  }
 0x136   : > { %v5303_v52 = vsub.f32 %v5231_v8, %v511_v49  ;;  %561 = vadd.xlane.f32.xlu1 %v540_v46  ;;  %563 = vadd.xlane.f32.xlu0 %v541_v50  ;;  %v5306_v53 = vsub.f32 %v5234_v9, %v512_v51  ;;  %v4302_v46 = vld [vmem:[#allocation5 + $0x30] sm:$0xff]  }
 0x137   : > { %v491_v55 = vpop.xlane.xlu0 %490  ;;  %v493_v56 = vpop.xlane.xlu1 %492  ;;  %4171 = vmatpush3.bf16.msra.mxu0 %v4300_v42 }
 0x138   : > { %v513_v57 = vmul.f32 0.0078125, %v491_v55  ;;  %v543_v58 = vmul.f32 %v5303_v52, %v5303_v52  ;;  %v514_v59 = vmul.f32 0.0078125, %v493_v56  ;;  %v544_v63 = vmul.f32 %v5306_v53, %v5306_v53  ;;  %4172 = vmatprep.subr.bf16.mxu0 %v4301_v43 }
 0x13a   : > { %v5313_v61 = vsub.f32 %v5239_v10, %v513_v57  ;;  %565 = vadd.xlane.f32.xlu1 %v542_v54  ;;  %567 = vadd.xlane.f32.xlu0 %v543_v58  ;;  %v5316_v62 = vsub.f32 %v5242_v11, %v514_v59 }
 0x13b   : > { %v495_v16 = vpop.xlane.xlu0 %494  ;;  %v497_v17 = vpop.xlane.xlu1 %496  ;;  %4173 = vmatpush3.bf16.msra.mxu0 %v4301_v43 }
 0x13c   : > { %v515_v18 = vmul.f32 0.0078125, %v495_v16  ;;  %v545_v19 = vmul.f32 %v5313_v61, %v5313_v61  ;;  %v516_v20 = vmul.f32 0.0078125, %v497_v17  ;;  %v546_v25 = vmul.f32 %v5316_v62, %v5316_v62  ;;  %4174 = vmatprep.subr.bf16.mxu0 %v4302_v46 }
 0x13e   : > { %v5323_v23 = vsub.f32 %v5247_v12, %v515_v18  ;;  %569 = vadd.xlane.f32.xlu1 %v544_v63  ;;  %571 = vadd.xlane.f32.xlu0 %v545_v19  ;;  %v5326_v24 = vsub.f32 %v5250_v13, %v516_v20 }
 0x13f   : > { %v499_v27 = vpop.xlane.xlu0 %498  ;;  %v501_v30 = vpop.xlane.xlu1 %500  ;;  %4175 = vmatpush3.bf16.msra.mxu0 %v4302_v46 }
 0x140   : > { %v517_v31 = vmul.f32 0.0078125, %v499_v27  ;;  %v547_v32 = vmul.f32 %v5323_v23, %v5323_v23  ;;  %v518_v33 = vmul.f32 0.0078125, %v501_v30  ;;  %v548_v38 = vmul.f32 %v5326_v24, %v5326_v24  ;;  %4176 = vmatprep.subr.bf16.mxu0 %v4303_v47 }
 0x142   : > { %v5333_v34 = vsub.f32 %v5255_v14, %v517_v31  ;;  %573 = vadd.xlane.f32.xlu1 %v546_v25  ;;  %575 = vadd.xlane.f32.xlu0 %v547_v32  ;;  %v5336_v35 = vsub.f32 %v5258_v15, %v518_v33 }
 0x143   : > { %4177 = vmatpush3.bf16.msra.mxu0 %v4303_v47 }
 0x144   : > { %v549_v40 = vmul.f32 %v5333_v34, %v5333_v34  ;;  %v550_v41 = vmul.f32 %v5336_v35, %v5336_v35 }
 0x146   : > { %577 = vadd.xlane.f32.xlu1 %v548_v38  ;;  %579 = vadd.xlane.f32.xlu0 %v549_v40 }
 0x14a   : > { %581 = vadd.xlane.f32.xlu1 %v550_v41  ;;  %v5348_v41 = vld [vmem:[%s7776_s1] ss:$0 sm:$0xff] }
 0x1b7   : > { %v552_v48 = vpop.xlane.xlu0 %551 }
 0x1b8   : > { %v583_v49 = vmul.f32 0.0078125, %v552_v48 }
 0x1ba   : > { %v599_v50 = vadd.f32 1e-06, %v583_v49 }
 0x1bb   : > { %v554_v51 = vpop.xlane.xlu1 %553  ;;  %v556_v54 = vpop.xlane.xlu0 %555 }
 0x1bc   : > { %4384 = vrsqrt.f32 %v599_v50  ;;  %v584_v55 = vmul.f32 0.0078125, %v554_v51  ;;  %v585_v56 = vmul.f32 0.0078125, %v556_v54 }
 0x1be   : > { %v600_v57 = vadd.f32 1e-06, %v584_v55  ;;  %v601_v58 = vadd.f32 1e-06, %v585_v56  ;;  %v5355_v55 = vld [vmem:[%s7777_s2] ss:$0 sm:$0xff] }
 0x1bf   : > { %v558_v59 = vpop.xlane.xlu1 %557  ;;  %v560_v60 = vpop.xlane.xlu0 %559 }
 0x1c0   : > { %4386 = vrsqrt.f32 %v600_v57  ;;  %v586_v63 = vmul.f32 0.0078125, %v558_v59  ;;  %v587_v16 = vmul.f32 0.0078125, %v560_v60 }
 0x1c1   : > { %4388 = vrsqrt.f32 %v601_v58 }
 0x1c2   : > { %v602_v17 = vadd.f32 1e-06, %v586_v63  ;;  %v603_v18 = vadd.f32 1e-06, %v587_v16 }
 0x1c3   : > { %v562_v19 = vpop.xlane.xlu1 %561  ;;  %v564_v20 = vpop.xlane.xlu0 %563 }
 0x1c4   : > { %4390 = vrsqrt.f32 %v602_v17  ;;  %v588_v25 = vmul.f32 0.0078125, %v562_v19  ;;  %v589_v26 = vmul.f32 0.0078125, %v564_v20 }
 0x1c5   : > { %4392 = vrsqrt.f32 %v603_v18 }
 0x1c6   : > { %v4385_v27 = vpop.eup %4384  ;;  %v604_v30 = vadd.f32 1e-06, %v588_v25  ;;  %v605_v31 = vadd.f32 1e-06, %v589_v26 }
 0x1c7   : > { %v566_v32 = vpop.xlane.xlu1 %565  ;;  %v568_v33 = vpop.xlane.xlu0 %567  ;;  %v631_v38 = vmul.f32 %v4385_v27, %v5265_v21 }
 0x1c8   : > { %4394 = vrsqrt.f32 %v604_v30  ;;  %v590_v39 = vmul.f32 0.0078125, %v566_v32  ;;  %v591_v40 = vmul.f32 0.0078125, %v568_v33 }
 0x1c9   : > { %4396 = vrsqrt.f32 %v605_v31  ;;  %v653_v51 = vmul.f32 %v5348_v41, %v631_v38 }
 0x1ca   : > { %v4387_v42 = vpop.eup %4386  ;;  %v606_v43 = vadd.f32 1e-06, %v590_v39  ;;  %v607_v46 = vadd.f32 1e-06, %v591_v40 }
 0x1cb   : > { %v4389_v47 = vpop.eup %4388  ;;  %v570_v48 = vpop.xlane.xlu1 %569  ;;  %v632_v50 = vmul.f32 %v4387_v42, %v5273_v28  ;;  %v675_v17 = vadd.f32 %v5355_v55, %v653_v51 }
 0x1cc   : > { %v572_v49 = vpop.xlane.xlu0 %571  ;;  %4398 = vrsqrt.f32 %v606_v43  ;;  %v592_v21 = vmul.f32 0.0078125, %v570_v48  ;;  %v633_v56 = vmul.f32 %v4389_v47, %v5268_v22 }
 0x1cd   : > { %v593_v54 = vmul.f32 0.0078125, %v572_v49  ;;  %4400 = vrsqrt.f32 %v607_v46  ;;  %v654_v57 = vmul.f32 %v5348_v41, %v632_v50 }
 0x1ce   : > { %v4391_v58 = vpop.eup %4390  ;;  %v608_v59 = vadd.f32 1e-06, %v592_v21  ;;  %v655_v20 = vmul.f32 %v5348_v41, %v633_v56 }
 0x1cf   : > { %v609_v60 = vadd.f32 1e-06, %v593_v54  ;;  %v4393_v63 = vpop.eup %4392  ;;  %v574_v28 = vpop.xlane.xlu1 %573  ;;  %v676_v18 = vadd.f32 %v5355_v55, %v654_v57  ;;  %v634_v19 = vmul.f32 %v4391_v58, %v5276_v29 }
 0x1d0   : > { %v576_v16 = vpop.xlane.xlu0 %575  ;;  %4402 = vrsqrt.f32 %v608_v59  ;;  %v594_v25 = vmul.f32 0.0078125, %v574_v28  ;;  %v635_v30 = vmul.f32 %v4393_v63, %v5283_v36  ;;  %v677_v29 = vadd.f32 %v5355_v55, %v655_v20 }
 0x1d1   : > { %v595_v22 = vmul.f32 0.0078125, %v576_v16  ;;  %4404 = vrsqrt.f32 %v609_v60  ;;  %v691_v26 = vpack.c.bf16 %v676_v18, %v675_v17  ;;  %v656_v27 = vmul.f32 %v5348_v41, %v634_v19 }
 0x1d2   : > { %v4395_v31 = vpop.eup %4394  ;;  %v610_v32 = vadd.f32 1e-06, %v594_v25  ;;  %v657_v46 = vmul.f32 %v5348_v41, %v635_v30 }
 0x1d3   : > { %v611_v33 = vadd.f32 1e-06, %v595_v22  ;;  %v4397_v38 = vpop.eup %4396  ;;  %v578_v39 = vpop.xlane.xlu1 %577  ;;  %4178 = vmatprep.mubr.bf16.mxu0 %v691_v26  ;;  %v678_v42 = vadd.f32 %v5355_v55, %v656_v27  ;;  %v636_v43 = vmul.f32 %v4395_v31, %v5286_v37 }
 0x1d4   : > { %v580_v40 = vpop.xlane.xlu0 %579  ;;  %4406 = vrsqrt.f32 %v610_v32  ;;  %v596_v47 = vmul.f32 0.0078125, %v578_v39  ;;  %v637_v36 = vmul.f32 %v4397_v38, %v5293_v44  ;;  %v679_v58 = vadd.f32 %v5355_v55, %v657_v46 }
 0x1d5   : > { %v597_v48 = vmul.f32 0.0078125, %v580_v40  ;;  %4408 = vrsqrt.f32 %v611_v33  ;;  %v692_v49 = vpack.c.bf16 %v678_v42, %v677_v29  ;;  %v658_v50 = vmul.f32 %v5348_v41, %v636_v43 }
 0x1d6   : > { %v4399_v51 = vpop.eup %4398  ;;  %v612_v21 = vadd.f32 1e-06, %v596_v47  ;;  %v659_v60 = vmul.f32 %v5348_v41, %v637_v36 }
 0x1d7   : > { %v613_v54 = vadd.f32 1e-06, %v597_v48  ;;  %v4401_v56 = vpop.eup %4400  ;;  %v582_v57 = vpop.xlane.xlu1 %581  ;;  %4179 = vmatmul.mubr.bf16.vlgmr.msra.gmra.mrb[0].mxu0 %v692_v49  ;;  %v680_v37 = vadd.f32 %v5355_v55, %v658_v50  ;;  %v638_v59 = vmul.f32 %v4399_v51, %v5296_v45 }
 0x1d8   : > { %4410 = vrsqrt.f32 %v612_v21  ;;  %v598_v44 = vmul.f32 0.0078125, %v582_v57  ;;  %v639_v63 = vmul.f32 %v4401_v56, %v5303_v52  ;;  %v681_v20 = vadd.f32 %v5355_v55, %v659_v60 }
 0x1d9   : > { %4412 = vrsqrt.f32 %v613_v54  ;;  %v693_v28 = vpack.c.bf16 %v680_v37, %v679_v58  ;;  %v660_v16 = vmul.f32 %v5348_v41, %v638_v59  ;;  %v3935_v37 = vld [vmem:[%s7779_s4] ss:$0 sm:$0xff] }
 0x1da   : > { %v4403_v17 = vpop.eup %4402  ;;  %v614_v18 = vadd.f32 1e-06, %v598_v44  ;;  %v661_v22 = vmul.f32 %v5348_v41, %v639_v63 }
 0x1db   : > { %v4405_v19 = vpop.eup %4404  ;;  %4182 = vmatprep.mubr.bf16.mxu0 %v693_v28  ;;  %v682_v25 = vadd.f32 %v5355_v55, %v660_v16  ;;  %v640_v45 = vmul.f32 %v4403_v17, %v5306_v53 }
 0x1dc   : > { %4414 = vrsqrt.f32 %v614_v18  ;;  %v641_v26 = vmul.f32 %v4405_v19, %v5313_v61  ;;  %v683_v32 = vadd.f32 %v5355_v55, %v661_v22 }
 0x1dd   : > { %v694_v52 = vpack.c.bf16 %v682_v25, %v681_v20  ;;  %v662_v27 = vmul.f32 %v5348_v41, %v640_v45 }
 0x1de   : > { %v4407_v30 = vpop.eup %4406  ;;  %v663_v39 = vmul.f32 %v5348_v41, %v641_v26 }
 0x1df   : > { %v4409_v31 = vpop.eup %4408  ;;  %4183 = vmatmul.mubr.bf16.gmra.mrb[4].mxu0 %v694_v52  ;;  %v684_v33 = vadd.f32 %v5355_v55, %v662_v27  ;;  %v642_v38 = vmul.f32 %v4407_v30, %v5316_v62 }
 0x1e0   : > { %v643_v53 = vmul.f32 %v4409_v31, %v5323_v23  ;;  %v685_v43 = vadd.f32 %v5355_v55, %v663_v39 }
 0x1e1   : > { %v695_v40 = vpack.c.bf16 %v684_v33, %v683_v32  ;;  %v664_v29 = vmul.f32 %v5348_v41, %v642_v38 }
 0x1e2   : > { %v4411_v61 = vpop.eup %4410  ;;  %v665_v48 = vmul.f32 %v5348_v41, %v643_v53 }
 0x1e3   : > { %v4413_v42 = vpop.eup %4412  ;;  %4186 = vmatprep.mubr.bf16.mxu0 %v695_v40  ;;  %v686_v46 = vadd.f32 %v5355_v55, %v664_v29  ;;  %v644_v47 = vmul.f32 %v4411_v61, %v5326_v24 }
 0x1e4   : > { %v645_v62 = vmul.f32 %v4413_v42, %v5333_v34  ;;  %v687_v50 = vadd.f32 %v5355_v55, %v665_v48 }
 0x1e5   : > { %v696_v36 = vpack.c.bf16 %v686_v46, %v685_v43  ;;  %v666_v49 = vmul.f32 %v5348_v41, %v644_v47 }
 0x1e6   : > { %v4415_v23 = vpop.eup %4414  ;;  %v667_v54 = vmul.f32 %v5348_v41, %v645_v62 }
 0x1e7   : > { %4187 = vmatmul.mubr.bf16.gmra.mrb[8].mxu0 %v696_v36  ;;  %v688_v51 = vadd.f32 %v5355_v55, %v666_v49  ;;  %v646_v21 = vmul.f32 %v4415_v23, %v5336_v35  ;;  %v4306_v49 = vld [vmem:[#allocation7 + $0x8] ss:$16 sps:$4 sm:$0xff]   ;;  %v4308_v23 = vld [vmem:[#allocation7 + $0xc] ss:$16 sps:$4 sm:$0xff]  }
 0x1e8   : > { %v689_v57 = vadd.f32 %v5355_v55, %v667_v54  ;;  %1440 = vmatprep.subr.bf16.mxu0 %v4308_v23  ;;  %v4316_v23 = vld [vmem:[#allocation7 + $0x44] ss:$16 sps:$4 sm:$0xff]  }
 0x1e9   : > { %v697_v56 = vpack.c.bf16 %v688_v51, %v687_v50  ;;  %v668_v24 = vmul.f32 %v5348_v41, %v646_v21  ;;  %v4309_v50 = vld [vmem:[#allocation7] ss:$16 sps:$4 sm:$0xff]   ;;  %v4314_v51 = vld [vmem:[#allocation7 + $0x2c] ss:$16 sps:$4 sm:$0xff]   ;;  %1441 = vmatpush1.bf16.msra.mxu0 %v4306_v49 }
 0x1ea   : > { %v4315_v21 = vld [vmem:[#allocation7 + $0x20] ss:$16 sps:$4 sm:$0xff]   ;;  %1442 = vmatprep.subr.bf16.mxu0 %v4314_v51 }
 0x1eb   : > { %4190 = vmatprep.mubr.bf16.mxu0 %v697_v56  ;;  %v690_v34 = vadd.f32 %v5355_v55, %v668_v24 }
 0x1ed   : > { %v698_v58 = vpack.c.bf16 %v690_v34, %v689_v57 }
 0x1ef   : > { %4191 = vmatmul.mubr.bf16.gmra.mrb[12].mxu0 %v698_v58 }
 0x2aa   : > { %v4180_v59 = vpop.f32.mrb[0].mxu0 }
 0x2ab   : > { %v804_v60 = vpop.f32.mrb[1].mxu0  ;;  %v813_v28 = vadd.f32 %v4180_v59, %v3935_v37 }
 0x2ac   : > { %v805_v44 = vadd.f32 %v3935_v37, %v804_v60  ;;  %v4181_v35 = vpop.f32.mrb[2].mxu0 }
 0x2ad   : > { %v807_v63 = vpop.f32.mrb[3].mxu0  ;;  %v816_v17 = vadd.f32 %v4181_v35, %v3935_v37  ;;  %v5413_v55 = vadd.f32 %v813_v28, %v5204_v1 }
 0x2ae   : > { %v5406_v16 = vadd.f32 %v805_v44, %v5201_v0  ;;  %v808_v41 = vadd.f32 %v3935_v37, %v807_v63 }
 0x2af   : > { %7873 = vst [vmem:[#allocation19_spill] sm:$0xff] %v5413_v55  ;;  %v5417_v25 = vadd.f32 %v816_v17, %v5212_v3 }
 0x2b0   : > { %7871 = vst [vmem:[#allocation17_spill] sm:$0xff] %v5406_v16  ;;  %v5409_v18 = vadd.f32 %v808_v41, %v5209_v2  ;;  %885 = vadd.xlane.f32.xlu0 %v5406_v16 }
 0x2b1   : > { %7874 = vst [vmem:[#allocation20_spill] sm:$0xff] %v5417_v25 }
 0x2b2   : > { %7872 = vst [vmem:[#allocation18_spill] sm:$0xff] %v5409_v18  ;;  %887 = vadd.xlane.f32.xlu1 %v5409_v18  ;;  %v4184_v19 = vpop.f32.mrb[4].mxu0 }
 0x2b3   : > { %v820_v20 = vpop.f32.mrb[5].mxu0  ;;  %v829_v26 = vadd.f32 %v4184_v19, %v3935_v37 }
 0x2b4   : > { %v821_v45 = vadd.f32 %v3935_v37, %v820_v20  ;;  %889 = vadd.xlane.f32.xlu0 %v5413_v55  ;;  %v4185_v0 = vpop.f32.mrb[6].mxu0 }
 0x2b5   : > { %v823_v22 = vpop.f32.mrb[7].mxu0  ;;  %v832_v1 = vadd.f32 %v4185_v0, %v3935_v37  ;;  %v5429_v3 = vadd.f32 %v829_v26, %v5223_v6 }
 0x2b6   : > { %v5421_v2 = vadd.f32 %v821_v45, %v5215_v4  ;;  %v824_v52 = vadd.f32 %v3935_v37, %v823_v22  ;;  %891 = vadd.xlane.f32.xlu1 %v5417_v25 }
 0x2b7   : > { %7877 = vst [vmem:[#allocation23_spill] sm:$0xff] %v5429_v3  ;;  %v5433_v32 = vadd.f32 %v832_v1, %v5226_v7 }
 0x2b8   : > { %7875 = vst [vmem:[#allocation21_spill] sm:$0xff] %v5421_v2  ;;  %v5425_v27 = vadd.f32 %v824_v52, %v5220_v5  ;;  %893 = vadd.xlane.f32.xlu0 %v5421_v2 }
 0x2b9   : > { %7878 = vst [vmem:[#allocation24_spill] sm:$0xff] %v5433_v32 }
 0x2ba   : > { %7876 = vst [vmem:[#allocation22_spill] sm:$0xff] %v5425_v27  ;;  %895 = vadd.xlane.f32.xlu1 %v5425_v27  ;;  %v4188_v30 = vpop.f32.mrb[8].mxu0 }
 0x2bb   : > { %v836_v31 = vpop.f32.mrb[9].mxu0  ;;  %v845_v39 = vadd.f32 %v4188_v30, %v3935_v37 }
 0x2bc   : > { %v837_v4 = vadd.f32 %v3935_v37, %v836_v31  ;;  %897 = vadd.xlane.f32.xlu0 %v5429_v3  ;;  %v4189_v33 = vpop.f32.mrb[10].mxu0 }
 0x2bd   : > { %v839_v38 = vpop.f32.mrb[11].mxu0  ;;  %v848_v6 = vadd.f32 %v4189_v33, %v3935_v37  ;;  %v5445_v7 = vadd.f32 %v845_v39, %v5239_v10 }
 0x2be   : > { %v5437_v5 = vadd.f32 %v837_v4, %v5231_v8  ;;  %v840_v53 = vadd.f32 %v3935_v37, %v839_v38  ;;  %899 = vadd.xlane.f32.xlu1 %v5433_v32 }
 0x2bf   : > { %7881 = vst [vmem:[#allocation27_spill] sm:$0xff] %v5445_v7  ;;  %v5449_v42 = vadd.f32 %v848_v6, %v5242_v11 }
 0x2c0   : > { %7879 = vst [vmem:[#allocation25_spill] sm:$0xff] %v5437_v5  ;;  %v5441_v40 = vadd.f32 %v840_v53, %v5234_v9  ;;  %901 = vadd.xlane.f32.xlu0 %v5437_v5 }
 0x2c1   : > { %7882 = vst [vmem:[#allocation28_spill] sm:$0xff] %v5449_v42 }
 0x2c2   : > { %7880 = vst [vmem:[#allocation26_spill] sm:$0xff] %v5441_v40  ;;  %903 = vadd.xlane.f32.xlu1 %v5441_v40  ;;  %v4192_v29 = vpop.f32.mrb[12].mxu0 }
 0x2c3   : > { %v852_v61 = vpop.f32.mrb[13].mxu0  ;;  %v861_v47 = vadd.f32 %v4192_v29, %v3935_v37 }
 0x2c4   : > { %v853_v8 = vadd.f32 %v3935_v37, %v852_v61  ;;  %905 = vadd.xlane.f32.xlu0 %v5445_v7  ;;  %v4193_v43 = vpop.f32.mrb[14].mxu0 }
 0x2c5   : > { %v855_v46 = vpop.f32.mrb[15].mxu0  ;;  %v864_v10 = vadd.f32 %v4193_v43, %v3935_v37  ;;  %v5461_v11 = vadd.f32 %v861_v47, %v5255_v14  ;;  %v4312_v14 = vld [vmem:[#allocation7 + $0x28] ss:$16 sps:$4 sm:$0xff]  }
 0x2c6   : > { %v5453_v9 = vadd.f32 %v853_v8, %v5247_v12  ;;  %v856_v48 = vadd.f32 %v3935_v37, %v855_v46  ;;  %907 = vadd.xlane.f32.xlu1 %v5449_v42  ;;  %v4304_v12 = vld [vmem:[#allocation7 + $0x4] ss:$16 sps:$4 sm:$0xff]   ;;  %1443 = vmatpush1.bf16.msra.mxu0 %v4312_v14 }
 0x2c7   : > { %7885 = vst [vmem:[#allocation31_spill] sm:$0xff] %v5461_v11  ;;  %v5465_v36 = vadd.f32 %v864_v10, %v5258_v15  ;;  %1327 = vmatprep.subr.bf16.mxu1 %v4304_v12 }
 0x2c8   : > { %7883 = vst [vmem:[#allocation29_spill] sm:$0xff] %v5453_v9  ;;  %v5457_v62 = vadd.f32 %v856_v48, %v5250_v13  ;;  %909 = vadd.xlane.f32.xlu0 %v5453_v9  ;;  %v4310_v13 = vld [vmem:[#allocation7 + $0x24] ss:$16 sps:$4 sm:$0xff]   ;;  %1328 = vmatpush1.bf16.msra.mxu1 %v4309_v50  ;;  %v4320_v50 = vld [vmem:[#allocation7 + $0x4c] ss:$16 sps:$4 sm:$0xff]  }
 0x2c9   : > { %7886 = vst [vmem:[#allocation32_spill] sm:$0xff] %v5465_v36  ;;  %1329 = vmatprep.subr.bf16.mxu1 %v4310_v13  ;;  %1444 = vmatprep.subr.bf16.mxu0 %v4320_v50  ;;  %v4344_v50 = vld [vmem:[#allocation7 + $0xcc] ss:$16 sps:$4 sm:$0xff]  }
 0x2ca   : > { %7884 = vst [vmem:[#allocation30_spill] sm:$0xff] %v5457_v62  ;;  %911 = vadd.xlane.f32.xlu1 %v5457_v62 }
 0x2cc   : > { %913 = vadd.xlane.f32.xlu0 %v5461_v11  ;;  %1330 = vmatpush1.bf16.msra.mxu1 %v4315_v21  ;;  %v4318_v21 = vld [vmem:[#allocation7 + $0x48] ss:$16 sps:$4 sm:$0xff]  }
 0x2cd   : > { %1331 = vmatprep.subr.bf16.mxu1 %v4316_v23  ;;  %1445 = vmatpush1.bf16.msra.mxu0 %v4318_v21  ;;  %v4340_v23 = vld [vmem:[#allocation7 + $0xc4] ss:$16 sps:$4 sm:$0xff]  }
 0x2ce   : > { %915 = vadd.xlane.f32.xlu1 %v5465_v36  ;;  %v4346_v21 = vld [vmem:[#allocation7 + $0xe4] ss:$16 sps:$4 sm:$0xff]  }
 0x33d   : > { %v886_v15 = vpop.xlane.xlu0 %885 }
 0x33e   : > { %v917_v54 = vmul.f32 0.0078125, %v886_v15  ;;  %v4321_v15 = vld [vmem:[#allocation7 + $0x40] ss:$16 sps:$4 sm:$0xff]  }
 0x33f   : > { %v888_v56 = vpop.xlane.xlu1 %887  ;;  %1332 = vmatpush1.bf16.msra.mxu1 %v4321_v15  ;;  %v4350_v15 = vld [vmem:[#allocation7 + $0xec] ss:$16 sps:$4 sm:$0xff]  }
 0x340   : > { %v5470_v24 = vsub.f32 %v5406_v16, %v917_v54  ;;  %v918_v57 = vmul.f32 0.0078125, %v888_v56 }
 0x341   : > { %v890_v34 = vpop.xlane.xlu0 %889 }
 0x342   : > { %v5473_v58 = vsub.f32 %v5409_v18, %v918_v57  ;;  %v919_v37 = vmul.f32 0.0078125, %v890_v34  ;;  %v949_v59 = vmul.f32 %v5470_v24, %v5470_v24 }
 0x343   : > { %v892_v60 = vpop.xlane.xlu1 %891 }
 0x344   : > { %v5478_v44 = vsub.f32 %v5413_v55, %v919_v37  ;;  %v920_v35 = vmul.f32 0.0078125, %v892_v60  ;;  %965 = vadd.xlane.f32.xlu0 %v949_v59  ;;  %v950_v63 = vmul.f32 %v5473_v58, %v5473_v58  ;;  %v4322_v59 = vld [vmem:[#allocation7 + $0x64] ss:$16 sps:$4 sm:$0xff]   ;;  %v4326_v60 = vld [vmem:[#allocation7 + $0x6c] ss:$16 sps:$4 sm:$0xff]  }
 0x345   : > { %v894_v28 = vpop.xlane.xlu0 %893  ;;  %1333 = vmatprep.subr.bf16.mxu1 %v4322_v59  ;;  %1446 = vmatprep.subr.bf16.mxu0 %v4326_v60 }
 0x346   : > { %v5483_v41 = vsub.f32 %v5417_v25, %v920_v35  ;;  %v921_v17 = vmul.f32 0.0078125, %v894_v28  ;;  %967 = vadd.xlane.f32.xlu1 %v950_v63  ;;  %v951_v19 = vmul.f32 %v5478_v44, %v5478_v44 }
 0x347   : > { %v896_v20 = vpop.xlane.xlu1 %895 }
 0x348   : > { %v5488_v45 = vsub.f32 %v5421_v2, %v921_v17  ;;  %v922_v0 = vmul.f32 0.0078125, %v896_v20  ;;  %969 = vadd.xlane.f32.xlu0 %v951_v19  ;;  %v952_v22 = vmul.f32 %v5483_v41, %v5483_v41  ;;  %v4324_v17 = vld [vmem:[#allocation7 + $0x68] ss:$16 sps:$4 sm:$0xff]   ;;  %v4327_v19 = vld [vmem:[#allocation7 + $0x60] ss:$16 sps:$4 sm:$0xff]  }
 0x349   : > { %v898_v26 = vpop.xlane.xlu0 %897  ;;  %1334 = vmatpush1.bf16.msra.mxu1 %v4327_v19  ;;  %1447 = vmatpush1.bf16.msra.mxu0 %v4324_v17 }
 0x34a   : > { %v5493_v52 = vsub.f32 %v5425_v27, %v922_v0  ;;  %v923_v1 = vmul.f32 0.0078125, %v898_v26  ;;  %971 = vadd.xlane.f32.xlu1 %v952_v22  ;;  %v953_v30 = vmul.f32 %v5488_v45, %v5488_v45 }
 0x34b   : > { %v900_v31 = vpop.xlane.xlu1 %899 }
 0x34c   : > { %v5498_v4 = vsub.f32 %v5429_v3, %v923_v1  ;;  %v924_v33 = vmul.f32 0.0078125, %v900_v31  ;;  %973 = vadd.xlane.f32.xlu0 %v953_v30  ;;  %v954_v38 = vmul.f32 %v5493_v52, %v5493_v52  ;;  %v4328_v30 = vld [vmem:[#allocation7 + $0x84] ss:$16 sps:$4 sm:$0xff]   ;;  %v4332_v31 = vld [vmem:[#allocation7 + $0x8c] ss:$16 sps:$4 sm:$0xff]  }
 0x34d   : > { %v902_v39 = vpop.xlane.xlu0 %901  ;;  %1335 = vmatprep.subr.bf16.mxu1 %v4328_v30  ;;  %1448 = vmatprep.subr.bf16.mxu0 %v4332_v31 }
 0x34e   : > { %v5503_v53 = vsub.f32 %v5433_v32, %v924_v33  ;;  %v925_v6 = vmul.f32 0.0078125, %v902_v39  ;;  %975 = vadd.xlane.f32.xlu1 %v954_v38  ;;  %v955_v29 = vmul.f32 %v5498_v4, %v5498_v4 }
 0x34f   : > { %v904_v61 = vpop.xlane.xlu1 %903 }
 0x350   : > { %v5508_v8 = vsub.f32 %v5437_v5, %v925_v6  ;;  %v926_v43 = vmul.f32 0.0078125, %v904_v61  ;;  %977 = vadd.xlane.f32.xlu0 %v955_v29  ;;  %v956_v46 = vmul.f32 %v5503_v53, %v5503_v53  ;;  %v4330_v6 = vld [vmem:[#allocation7 + $0x88] ss:$16 sps:$4 sm:$0xff]   ;;  %v4333_v29 = vld [vmem:[#allocation7 + $0x80] ss:$16 sps:$4 sm:$0xff]  }
 0x351   : > { %v906_v47 = vpop.xlane.xlu0 %905  ;;  %1336 = vmatpush1.bf16.msra.mxu1 %v4333_v29  ;;  %1449 = vmatpush1.bf16.msra.mxu0 %v4330_v6 }
 0x352   : > { %v5513_v48 = vsub.f32 %v5441_v40, %v926_v43  ;;  %v927_v10 = vmul.f32 0.0078125, %v906_v47  ;;  %979 = vadd.xlane.f32.xlu1 %v956_v46  ;;  %v957_v12 = vmul.f32 %v5508_v8, %v5508_v8  ;;  %v4334_v46 = vld [vmem:[#allocation7 + $0xa4] ss:$16 sps:$4 sm:$0xff]   ;;  %v4338_v47 = vld [vmem:[#allocation7 + $0xac] ss:$16 sps:$4 sm:$0xff]  }
 0x353   : > { %v908_v49 = vpop.xlane.xlu1 %907  ;;  %1337 = vmatprep.subr.bf16.mxu1 %v4334_v46  ;;  %1450 = vmatprep.subr.bf16.mxu0 %v4338_v47 }
 0x354   : > { %v5518_v13 = vsub.f32 %v5445_v7, %v927_v10  ;;  %v928_v51 = vmul.f32 0.0078125, %v908_v49  ;;  %981 = vadd.xlane.f32.xlu0 %v957_v12  ;;  %v958_v14 = vmul.f32 %v5513_v48, %v5513_v48  ;;  %v4336_v12 = vld [vmem:[#allocation7 + $0xa8] ss:$16 sps:$4 sm:$0xff]   ;;  %v4339_v49 = vld [vmem:[#allocation7 + $0xa0] ss:$16 sps:$4 sm:$0xff]  }
 0x355   : > { %v910_v54 = vpop.xlane.xlu0 %909  ;;  %1338 = vmatpush1.bf16.msra.mxu1 %v4339_v49  ;;  %1451 = vmatpush1.bf16.msra.mxu0 %v4336_v12 }
 0x356   : > { %v5523_v56 = vsub.f32 %v5449_v42, %v928_v51  ;;  %v929_v57 = vmul.f32 0.0078125, %v910_v54  ;;  %983 = vadd.xlane.f32.xlu1 %v958_v14  ;;  %v959_v34 = vmul.f32 %v5518_v13, %v5518_v13  ;;  %v4342_v51 = vld [vmem:[#allocation7 + $0xc8] ss:$16 sps:$4 sm:$0xff]   ;;  %v4345_v14 = vld [vmem:[#allocation7 + $0xc0] ss:$16 sps:$4 sm:$0xff]   ;;  %1339 = vmatprep.subr.bf16.mxu1 %v4340_v23 }
 0x357   : > { %v912_v37 = vpop.xlane.xlu1 %911  ;;  %1452 = vmatprep.subr.bf16.mxu0 %v4344_v50  ;;  %v4348_v54 = vld [vmem:[#allocation7 + $0xe8] ss:$16 sps:$4 sm:$0xff]   ;;  %v5554_v23 = vld [vmem:[%s7780_s5] ss:$0 sm:$0xff] }
 0x358   : > { %v5528_v35 = vsub.f32 %v5453_v9, %v929_v57  ;;  %v930_v63 = vmul.f32 0.0078125, %v912_v37  ;;  %985 = vadd.xlane.f32.xlu0 %v959_v34  ;;  %v960_v28 = vmul.f32 %v5523_v56, %v5523_v56  ;;  %v4351_v57 = vld [vmem:[#allocation7 + $0xe0] ss:$16 sps:$4 sm:$0xff]   ;;  %v4920_v34 = vmov 0  }
 0x359   : > { %v914_v20 = vpop.xlane.xlu0 %913  ;;  %1340 = vmatpush1.bf16.msra.mxu1 %v4345_v14  ;;  %1453 = vmatpush1.bf16.msra.mxu0 %v4342_v51  ;;  %v4352_v37 = vld [vmem:[#allocation8 + $0x40] sm:$0xff]  }
 0x35a   : > { %v5533_v0 = vsub.f32 %v5457_v62, %v930_v63  ;;  %v931_v22 = vmul.f32 0.0078125, %v914_v20  ;;  %987 = vadd.xlane.f32.xlu1 %v960_v28  ;;  %v961_v26 = vmul.f32 %v5528_v35, %v5528_v35  ;;  %1341 = vmatprep.subr.bf16.mxu1 %v4346_v21  ;;  %v4361_v9 = vld [vmem:[#allocation8 + $0xc0] sm:$0xff]  }
 0x35b   : > { %v916_v1 = vpop.xlane.xlu1 %915  ;;  %1454 = vmatprep.subr.bf16.mxu0 %v4350_v15  ;;  %1359 = vmatprep.mubr.bf16.mxu1 %v4920_v34 }
 0x35c   : > { %v5538_v33 = vsub.f32 %v5461_v11, %v931_v22  ;;  %v932_v38 = vmul.f32 0.0078125, %v916_v1  ;;  %989 = vadd.xlane.f32.xlu0 %v961_v26  ;;  %v962_v39 = vmul.f32 %v5533_v0, %v5533_v0  ;;  %1472 = vmatprep.mubr.bf16.mxu0 %v4920_v34 }
 0x35d   : > { %1342 = vmatpush1.bf16.msra.mxu1 %v4351_v57  ;;  %1455 = vmatpush1.bf16.msra.mxu0 %v4348_v54 }
 0x35e   : > { %v5543_v61 = vsub.f32 %v5465_v36, %v932_v38  ;;  %991 = vadd.xlane.f32.xlu1 %v962_v39  ;;  %v963_v43 = vmul.f32 %v5538_v33, %v5538_v33  ;;  %4034 = vmatprep.subr.bf16.mxu1 %v4352_v37  ;;  %v5562_v37 = vld [vmem:[%s7781_s6] ss:$0 sm:$0xff] }
 0x35f   : > { %4098 = vmatprep.subr.bf16.mxu0 %v4361_v9 }
 0x360   : > { %993 = vadd.xlane.f32.xlu0 %v963_v43  ;;  %v964_v10 = vmul.f32 %v5543_v61, %v5543_v61 }
 0x362   : > { %995 = vadd.xlane.f32.xlu1 %v964_v10 }
 0x3d1   : > { %v966_v59 = vpop.xlane.xlu0 %965 }
 0x3d2   : > { %v997_v60 = vmul.f32 0.0078125, %v966_v59 }
 0x3d3   : > { %v968_v63 = vpop.xlane.xlu1 %967 }
 0x3d4   : > { %v1013_v28 = vadd.f32 1e-06, %v997_v60  ;;  %v998_v17 = vmul.f32 0.0078125, %v968_v63 }
 0x3d5   : > { %v970_v19 = vpop.xlane.xlu0 %969 }
 0x3d6   : > { %4416 = vrsqrt.f32 %v1013_v28  ;;  %v1014_v20 = vadd.f32 1e-06, %v998_v17  ;;  %v999_v22 = vmul.f32 0.0078125, %v970_v19 }
 0x3d7   : > { %v972_v26 = vpop.xlane.xlu1 %971 }
 0x3d8   : > { %4418 = vrsqrt.f32 %v1014_v20  ;;  %v1015_v1 = vadd.f32 1e-06, %v999_v22  ;;  %v1000_v30 = vmul.f32 0.0078125, %v972_v26 }
 0x3d9   : > { %v974_v31 = vpop.xlane.xlu0 %973 }
 0x3da   : > { %4420 = vrsqrt.f32 %v1015_v1  ;;  %v1016_v38 = vadd.f32 1e-06, %v1000_v30  ;;  %v1001_v39 = vmul.f32 0.0078125, %v974_v31  ;;  %v4353_v30 = vld [vmem:[#allocation8] sm:$0xff]  }
 0x3db   : > { %v976_v6 = vpop.xlane.xlu1 %975 }
 0x3dc   : > { %4422 = vrsqrt.f32 %v1016_v38  ;;  %v1002_v29 = vmul.f32 0.0078125, %v976_v6  ;;  %v1017_v43 = vadd.f32 1e-06, %v1001_v39 }
 0x3dd   : > { %v978_v47 = vpop.xlane.xlu0 %977 }
 0x3de   : > { %v1018_v46 = vadd.f32 1e-06, %v1002_v29  ;;  %v1003_v14 = vmul.f32 0.0078125, %v978_v47 }
 0x3df   : > { %v980_v10 = vpop.xlane.xlu1 %979 }
 0x3e0   : > { %v4417_v12 = vpop.eup %4416  ;;  %4424 = vrsqrt.f32 %v1018_v46  ;;  %v1004_v49 = vmul.f32 0.0078125, %v980_v10  ;;  %v1019_v28 = vadd.f32 1e-06, %v1003_v14 }
 0x3e1   : > { %v1045_v50 = vmul.f32 %v4417_v12, %v5470_v24  ;;  %4426 = vrsqrt.f32 %v1017_v43  ;;  %v982_v24 = vpop.xlane.xlu0 %981 }
 0x3e2   : > { %v4419_v51 = vpop.eup %4418  ;;  %v1020_v57 = vadd.f32 1e-06, %v1004_v49  ;;  %v1005_v38 = vmul.f32 0.0078125, %v982_v24 }
 0x3e3   : > { %v1046_v21 = vmul.f32 %v4419_v51, %v5473_v58  ;;  %v1067_v15 = vmul.f32 %v5554_v23, %v1045_v50  ;;  %v984_v59 = vpop.xlane.xlu1 %983 }
 0x3e4   : > { %v4421_v54 = vpop.eup %4420  ;;  %4428 = vrsqrt.f32 %v1020_v57  ;;  %v1006_v22 = vmul.f32 0.0078125, %v984_v59  ;;  %v1021_v46 = vadd.f32 1e-06, %v1005_v38 }
 0x3e5   : > { %v1068_v60 = vmul.f32 %v5554_v23, %v1046_v21  ;;  %v1089_v17 = vadd.f32 %v5562_v37, %v1067_v15  ;;  %v1047_v58 = vmul.f32 %v4421_v54, %v5478_v44  ;;  %4430 = vrsqrt.f32 %v1019_v28  ;;  %v986_v47 = vpop.xlane.xlu0 %985 }
 0x3e6   : > { %v4423_v63 = vpop.eup %4422  ;;  %v1022_v29 = vadd.f32 1e-06, %v1006_v22  ;;  %v1007_v21 = vmul.f32 0.0078125, %v986_v47 }
 0x3e7   : > { %v1090_v19 = vadd.f32 %v5562_v37, %v1068_v60  ;;  %v1048_v20 = vmul.f32 %v4423_v63, %v5483_v41  ;;  %v1069_v39 = vmul.f32 %v5554_v23, %v1047_v58  ;;  %v988_v44 = vpop.xlane.xlu1 %987 }
 0x3e8   : > { %4432 = vrsqrt.f32 %v1022_v29  ;;  %v1008_v49 = vmul.f32 0.0078125, %v988_v44  ;;  %v1023_v60 = vadd.f32 1e-06, %v1007_v21 }
 0x3e9   : > { %v1105_v26 = vpack.c.bf16 %v1090_v19, %v1089_v17  ;;  %v1070_v1 = vmul.f32 %v5554_v23, %v1048_v20  ;;  %v1091_v10 = vadd.f32 %v5562_v37, %v1069_v39  ;;  %4434 = vrsqrt.f32 %v1021_v46  ;;  %v990_v63 = vpop.xlane.xlu0 %989 }
 0x3ea   : > { %v4425_v31 = vpop.eup %4424  ;;  %v1024_v54 = vadd.f32 1e-06, %v1008_v49  ;;  %v1009_v22 = vmul.f32 0.0078125, %v990_v63 }
 0x3eb   : > { %1360 = vmatmul.mubr.bf16.vlgmr.msra.gmra.mrb[0].mxu1 %v1105_v26  ;;  %1473 = vmatmul.mubr.bf16.vlgmr.msra.gmra.mrb[16].mxu0 %v1105_v26  ;;  %v4427_v6 = vpop.eup %4426  ;;  %v1092_v41 = vadd.f32 %v5562_v37, %v1070_v1  ;;  %v1050_v43 = vmul.f32 %v4425_v31, %v5493_v52  ;;  %v992_v57 = vpop.xlane.xlu1 %991 }
 0x3ec   : > { %1369 = vmatprep.mubr.bf16.mxu1 %v4920_v34  ;;  %1482 = vmatprep.mubr.bf16.mxu0 %v4920_v34  ;;  %v1049_v12 = vmul.f32 %v4427_v6, %v5488_v45  ;;  %4436 = vrsqrt.f32 %v1024_v54  ;;  %v1010_v17 = vmul.f32 0.0078125, %v992_v57  ;;  %v1025_v38 = vadd.f32 1e-06, %v1009_v22 }
 0x3ed   : > { %4035 = vmatpush3.bf16.msra.mxu1 %v4353_v30  ;;  %v1106_v50 = vpack.c.bf16 %v1092_v41, %v1091_v10  ;;  %v1072_v51 = vmul.f32 %v5554_v23, %v1050_v43  ;;  %4438 = vrsqrt.f32 %v1023_v60  ;;  %v994_v39 = vpop.xlane.xlu0 %993 }
 0x3ee   : > { %v4429_v14 = vpop.eup %4428  ;;  %v1071_v15 = vmul.f32 %v5554_v23, %v1049_v12  ;;  %v1011_v47 = vmul.f32 0.0078125, %v994_v39 }
 0x3ef   : > { %v4431_v52 = vpop.eup %4430  ;;  %v1094_v45 = vadd.f32 %v5562_v37, %v1072_v51  ;;  %v1052_v59 = vmul.f32 %v4429_v14, %v5503_v53  ;;  %v1026_v53 = vadd.f32 1e-06, %v1010_v17  ;;  %v996_v30 = vpop.xlane.xlu1 %995 }
 0x3f0   : > { %v1093_v28 = vadd.f32 %v5562_v37, %v1071_v15  ;;  %v1051_v24 = vmul.f32 %v4431_v52, %v5498_v4  ;;  %v1012_v44 = vmul.f32 0.0078125, %v996_v30  ;;  %v4354_v30 = vld [vmem:[#allocation8 + $0x48] sm:$0xff]  }
 0x3f1   : > { %v1074_v58 = vmul.f32 %v5554_v23, %v1052_v59  ;;  %4440 = vrsqrt.f32 %v1026_v53  ;;  %4036 = vmatprep.subr.bf16.mxu1 %v4354_v30 }
 0x3f2   : > { %v1107_v19 = vpack.c.bf16 %v1094_v45, %v1093_v28  ;;  %v4433_v20 = vpop.eup %4432  ;;  %v1073_v26 = vmul.f32 %v5554_v23, %v1051_v24  ;;  %4442 = vrsqrt.f32 %v1025_v38 }
 0x3f3   : > { %1370 = vmatmul.mubr.bf16.gmra.mrb[4].mxu1 %v1106_v50  ;;  %1483 = vmatmul.mubr.bf16.gmra.mrb[20].mxu0 %v1106_v50  ;;  %v4435_v1 = vpop.eup %4434  ;;  %v1096_v4 = vadd.f32 %v5562_v37, %v1074_v58  ;;  %v1054_v31 = vmul.f32 %v4433_v20, %v5513_v48  ;;  %v1028_v48 = vadd.f32 1e-06, %v1012_v44  ;;  %v1027_v50 = vadd.f32 1e-06, %v1011_v47 }
 0x3f4   : > { %1379 = vmatprep.mubr.bf16.mxu1 %v4920_v34  ;;  %1492 = vmatprep.mubr.bf16.mxu0 %v4920_v34  ;;  %v1095_v6 = vadd.f32 %v5562_v37, %v1073_v26  ;;  %v1053_v29 = vmul.f32 %v4435_v1, %v5508_v8 }
 0x3f5   : > { %v1076_v43 = vmul.f32 %v5554_v23, %v1054_v31  ;;  %4444 = vrsqrt.f32 %v1028_v48  ;;  %v4357_v31 = vld [vmem:[#allocation8 + $0x10] sm:$0xff]  }
 0x3f6   : > { %v1108_v41 = vpack.c.bf16 %v1096_v4, %v1095_v6  ;;  %v4437_v46 = vpop.eup %4436  ;;  %v1075_v10 = vmul.f32 %v5554_v23, %v1053_v29  ;;  %4446 = vrsqrt.f32 %v1027_v50  ;;  %v4356_v4 = vld [vmem:[#allocation8 + $0x50] sm:$0xff]  }
 0x3f7   : > { %v4439_v12 = vpop.eup %4438  ;;  %v1098_v8 = vadd.f32 %v5562_v37, %v1076_v43  ;;  %v1056_v49 = vmul.f32 %v4437_v46, %v5523_v56 }
 0x3f8   : > { %v1097_v51 = vadd.f32 %v5562_v37, %v1075_v10  ;;  %v1055_v14 = vmul.f32 %v4439_v12, %v5518_v13 }
 0x3f9   : > { %v1078_v15 = vmul.f32 %v5554_v23, %v1056_v49 }
 0x3fa   : > { %v1109_v21 = vpack.c.bf16 %v1098_v8, %v1097_v51  ;;  %v1077_v54 = vmul.f32 %v5554_v23, %v1055_v14 }
 0x3fb   : > { %1380 = vmatmul.mubr.bf16.gmra.mrb[8].mxu1 %v1107_v19  ;;  %1493 = vmatmul.mubr.bf16.gmra.mrb[24].mxu0 %v1107_v19  ;;  %v4441_v52 = vpop.eup %4440  ;;  %v1100_v56 = vadd.f32 %v5562_v37, %v1078_v15 }
 0x3fc   : > { %1389 = vmatprep.mubr.bf16.mxu1 %v4920_v34  ;;  %1502 = vmatprep.mubr.bf16.mxu0 %v4920_v34  ;;  %v4443_v57 = vpop.eup %4442  ;;  %v1058_v45 = vmul.f32 %v4441_v52, %v5533_v0  ;;  %v1099_v13 = vadd.f32 %v5562_v37, %v1077_v54 }
 0x3fd   : > { %v1057_v59 = vmul.f32 %v4443_v57, %v5528_v35 }
 0x3fe   : > { %v1110_v60 = vpack.c.bf16 %v1100_v56, %v1099_v13  ;;  %v1080_v63 = vmul.f32 %v5554_v23, %v1058_v45 }
 0x3ff   : > { %v4445_v28 = vpop.eup %4444  ;;  %v1079_v24 = vmul.f32 %v5554_v23, %v1057_v59 }
 0x400   : > { %v4447_v17 = vpop.eup %4446  ;;  %v1102_v19 = vadd.f32 %v5562_v37, %v1080_v63  ;;  %v1060_v0 = vmul.f32 %v4445_v28, %v5543_v61 }
 0x401   : > { %v1101_v58 = vadd.f32 %v5562_v37, %v1079_v24  ;;  %v1059_v35 = vmul.f32 %v4447_v17, %v5538_v33  ;;  %v4355_v33 = vld [vmem:[#allocation8 + $0x8] sm:$0xff]  }
 0x402   : > { %v1082_v22 = vmul.f32 %v5554_v23, %v1060_v0  ;;  %4037 = vmatpush3.bf16.msra.mxu1 %v4355_v33 }
 0x403   : > { %1390 = vmatmul.mubr.bf16.gmra.mrb[12].mxu1 %v1108_v41  ;;  %1503 = vmatmul.mubr.bf16.gmra.mrb[28].mxu0 %v1108_v41  ;;  %v1111_v20 = vpack.c.bf16 %v1102_v19, %v1101_v58  ;;  %v1081_v26 = vmul.f32 %v5554_v23, %v1059_v35  ;;  %v1147_v23 = vlaneseq }
 0x404   : > { %1399 = vmatprep.mubr.bf16.mxu1 %v4920_v34  ;;  %1512 = vmatprep.mubr.bf16.mxu0 %v4920_v34  ;;  %v1104_v1 = vadd.f32 %v5562_v37, %v1082_v22 }
 0x405   : > { %v1103_v53 = vadd.f32 %v5562_v37, %v1081_v26  ;;  %4038 = vmatprep.subr.bf16.mxu1 %v4356_v4  ;;  %v1148_v38 = vshrl.u32 %v1147_v23, 7  ;;  %v1145_v37 = vld [vmem:[%s7887_s24] sm:$0xf] }
 0x406   : > { %4039 = vmatpush3.bf16.msra.mxu1 %v4357_v31  ;;  %v4359_v31 = vld [vmem:[#allocation8 + $0x18] sm:$0xff]  }
 0x407   : > { %v1112_v61 = vpack.c.bf16 %v1104_v1, %v1103_v53  ;;  %v1149_v39 = vsub.s32 0, %v1148_v38  ;;  %v1157_v6 = vsub.s32 2, %v1148_v38  ;;  %v1153_v29 = vsub.s32 1, %v1148_v38 }
 0x408   : > { %v1161_v10 = vsub.s32 3, %v1148_v38 }
 0x409   : > { %v5626_v44 = vrot.slane %v1145_v37, %v1149_v39  ;;  %v5628_v41 = vrot.slane %v1145_v37, %v1157_v6  ;;  %v5630_v43 = vrot.slane %v1145_v37, %v1153_v29 }
 0x40a   : > { %v5647_v52 = vrot.slane %v1145_v37, %v1161_v10 }
 0x40b   : > { %1400 = vmatmul.mubr.bf16.gmra.mrb[16].mxu1 %v1109_v21  ;;  %1513 = vmatmul.mubr.bf16.gmra.mrb[32].mxu0 %v1109_v21 }
 0x40c   : > { %1409 = vmatprep.mubr.bf16.mxu1 %v4920_v34  ;;  %1522 = vmatprep.mubr.bf16.mxu0 %v4920_v34 }
 0x413   : > { %1410 = vmatmul.mubr.bf16.gmra.mrb[20].mxu1 %v1110_v60  ;;  %1523 = vmatmul.mubr.bf16.gmra.mrb[36].mxu0 %v1110_v60 }
 0x414   : > { %1419 = vmatprep.mubr.bf16.mxu1 %v4920_v34  ;;  %1532 = vmatprep.mubr.bf16.mxu0 %v4920_v34 }
 0x41b   : > { %1420 = vmatmul.mubr.bf16.gmra.mrb[24].mxu1 %v1111_v20  ;;  %1533 = vmatmul.mubr.bf16.gmra.mrb[40].mxu0 %v1111_v20 }
 0x41c   : > { %1429 = vmatprep.mubr.bf16.mxu1 %v4920_v34  ;;  %1542 = vmatprep.mubr.bf16.mxu0 %v4920_v34  ;;  %v4358_v34 = vld [vmem:[#allocation8 + $0x58] sm:$0xff]  }
 0x41d   : > { %4040 = vmatprep.subr.bf16.mxu1 %v4358_v34 }
 0x41e   : > { %4041 = vmatpush3.bf16.msra.mxu1 %v4359_v31 }
 0x423   : > { %1430 = vmatmul.mubr.bf16.gmra.mrb[28].mxu1 %v1112_v61  ;;  %1543 = vmatmul.mubr.bf16.gmra.mrb[44].mxu0 %v1112_v61 }
 0x4be   : > { %v1361_v46 = vpop.f32.mrb[0].mxu1  ;;  %v1474_v47 = vpop.f32.mrb[16].mxu0 }
 0x4bf   : > { %v5633_v12 = vadd.f32 %v1361_v46, %v5626_v44  ;;  %v5636_v48 = vadd.f32 %v1474_v47, %v5628_v41  ;;  %v1363_v8 = vpop.f32.mrb[1].mxu1  ;;  %v1476_v49 = vpop.f32.mrb[17].mxu0 }
 0x4c0   : > { %v1365_v50 = vpop.f32.mrb[2].mxu1  ;;  %v1478_v51 = vpop.f32.mrb[18].mxu0  ;;  %v5645_v15 = vadd.f32 %v1363_v8, %v5630_v43  ;;  %v5655_v59 = vadd.f32 %v1476_v49, %v5647_v52 }
 0x4c1   : > { %v5639_v14 = vmul.f32 0.70710677, %v5633_v12  ;;  %v5642_v21 = vmul.f32 0.70710677, %v5636_v48  ;;  %v1367_v28 = vpop.f32.mrb[3].mxu1  ;;  %v1480_v24 = vpop.f32.mrb[19].mxu0  ;;  %v5663_v58 = vadd.f32 %v1365_v50, %v5626_v44  ;;  %v5673_v26 = vadd.f32 %v1478_v51, %v5628_v41 }
 0x4c2   : > { %v5652_v13 = vmul.f32 0.70710677, %v5645_v15  ;;  %v5670_v22 = vmul.f32 0.70710677, %v5655_v59  ;;  %v5683_v30 = vadd.f32 %v1367_v28, %v5630_v43  ;;  %v5717_v11 = vadd.f32 %v1480_v24, %v5647_v52 }
 0x4c3   : > { %v1681_v54 = vand.u32 2147483647, %v5639_v14  ;;  %v1683_v57 = vand.u32 2147483647, %v5642_v21  ;;  %v5680_v61 = vmul.f32 0.70710677, %v5663_v58 }
 0x4c4   : > { %v5660_v0 = vand.u32 2147483647, %v5652_v13  ;;  %v5690_v38 = vmul.f32 0.70710677, %v5673_v26  ;;  %v5696_v37 = vmul.f32 0.70710677, %v5683_v30 }
 0x4c5   : > { %v1745_v56 = vmul.f32 0.3275911, %v1681_v54  ;;  %v1747_v45 = vmul.f32 0.3275911, %v1683_v57  ;;  %v2577_v23 = vsub.f32 0.0, %v1681_v54  ;;  %v2579_v50 = vsub.f32 0.0, %v1683_v57 }
 0x4c6   : > { %v1371_v17 = vpop.f32.mrb[4].mxu1  ;;  %v5657_v19 = vpop.f32.mrb[20].mxu0  ;;  %v1746_v39 = vmul.f32 0.3275911, %v5660_v0  ;;  %v1685_v6 = vand.u32 2147483647, %v5680_v61 }
 0x4c7   : > { %v1809_v60 = vadd.f32 1.0, %v1745_v56  ;;  %v1811_v63 = vadd.f32 1.0, %v1747_v45  ;;  %v5665_v35 = vpop.f32.mrb[5].mxu1  ;;  %v5667_v20 = vpop.f32.mrb[21].mxu0  ;;  %v1687_v34 = vand.u32 2147483647, %v5690_v38  ;;  %v2641_v49 = vmul.f32 %v2577_v23, %v1681_v54 }
 0x4c8   : > { %v5675_v1 = vpop.f32.mrb[6].mxu1  ;;  %v5677_v53 = vpop.f32.mrb[22].mxu0  ;;  %v5701_v46 = vand.u32 2147483647, %v5670_v22  ;;  %v1749_v47 = vmul.f32 0.3275911, %v1685_v6 }
 0x4c9   : > { %4448 = vrcp.f32 %v1809_v60  ;;  %v5685_v33 = vpop.f32.mrb[7].mxu1  ;;  %v5687_v4 = vpop.f32.mrb[23].mxu0  ;;  %v1751_v51 = vmul.f32 0.3275911, %v1687_v34  ;;  %v5710_v60 = vand.u32 2147483647, %v5696_v37 }
 0x4ca   : > { %4450 = vrcp.f32 %v1811_v63  ;;  %v1813_v45 = vadd.f32 1.0, %v1749_v47  ;;  %v1810_v31 = vadd.f32 1.0, %v1746_v39  ;;  %v1748_v47 = vmul.f32 0.3275911, %v5701_v46 }
 0x4cb   : > { %v1815_v36 = vadd.f32 1.0, %v1751_v51  ;;  %v2705_v40 = vmul.f32 1.442695, %v2641_v49  ;;  %v2643_v39 = vmul.f32 %v2579_v50, %v1683_v57  ;;  %v2581_v51 = vsub.f32 0.0, %v1685_v6 }
 0x4cc   : > { %4452 = vrcp.f32 %v1813_v45  ;;  %v1750_v5 = vmul.f32 0.3275911, %v5710_v60  ;;  %v5732_v3 = vmul.f32 0.70710677, %v5717_v11  ;;  %v5735_v45 = vadd.f32 %v1371_v17, %v5626_v44 }
 0x4cd   : > { %4454 = vrcp.f32 %v1815_v36  ;;  %v1812_v36 = vadd.f32 1.0, %v1748_v47  ;;  %v2709_v25 = vmul.f32 1.442695, %v2643_v39  ;;  %v2583_v9 = vsub.f32 0.0, %v1687_v34 }
 0x4ce   : > { %v5698_v29 = vpop.f32.mrb[8].mxu1  ;;  %v5703_v10 = vpop.f32.mrb[24].mxu0  ;;  %4456 = vrcp.f32 %v1810_v31  ;;  %v2645_v31 = vmul.f32 %v2581_v51, %v1685_v6  ;;  %v1814_v55 = vadd.f32 1.0, %v1750_v5  ;;  %v5746_v18 = vmul.f32 0.70710677, %v5735_v45 }
 0x4cf   : > { %v5705_v8 = vpop.f32.mrb[9].mxu1  ;;  %v5707_v56 = vpop.f32.mrb[25].mxu0  ;;  %4458 = vpow2.f32 %v2705_v40  ;;  %v5749_v16 = vand.u32 2147483647, %v5732_v3  ;;  %v2647_v51 = vmul.f32 %v2583_v9, %v1687_v34  ;;  %vm2961_vm0 = vcmp.ge.f32.partialorder %v5639_v14, 0.0 }
 0x4d0   : > { %7888 = vst [vmem:[#allocation33_spill] sm:$0xff] %v5705_v8  ;;  %7889 = vst [vmem:[#allocation34_spill] sm:$0xff] %v5707_v56  ;;  %v5712_v63 = vpop.f32.mrb[10].mxu1  ;;  %v5714_v28 = vpop.f32.mrb[26].mxu0  ;;  %4460 = vrcp.f32 %v1812_v36  ;;  %v2713_v6 = vmul.f32 1.442695, %v2645_v31 }
 0x4d1   : > { %7890 = vst [vmem:[#allocation35_spill] sm:$0xff] %v5712_v63  ;;  %7891 = vst [vmem:[#allocation36_spill] sm:$0xff] %v5714_v28  ;;  %v5719_v62 = vpop.f32.mrb[11].mxu1  ;;  %v5721_v54 = vpop.f32.mrb[27].mxu0  ;;  %4462 = vpow2.f32 %v2709_v25  ;;  %v1752_v36 = vmul.f32 0.3275911, %v5749_v16 }
 0x4d2   : > { %7892 = vst [vmem:[#allocation37_spill] sm:$0xff] %v5719_v62  ;;  %7893 = vst [vmem:[#allocation38_spill] sm:$0xff] %v5721_v54  ;;  %4464 = vrcp.f32 %v1814_v55  ;;  %vm2963_vm1 = vcmp.ge.f32.partialorder %v5642_v21, 0.0  ;;  %vm2965_vm2 = vcmp.ge.f32.partialorder %v5680_v61, 0.0  ;;  %vm2967_vm3 = vcmp.ge.f32.partialorder %v5690_v38, 0.0 }
 0x4d3   : > { %v5723_v23 = vpop.eup %4448  ;;  %v1816_v54 = vadd.f32 1.0, %v1752_v36  ;;  %4466 = vpow2.f32 %v2713_v6  ;;  %v5825_v21 = vadd.f32 %v5665_v35, %v5630_v43  ;;  %v1559_v35 = vmul.f32 0.5, %v5673_v26 }
 0x4d4   : > { %v5726_v42 = vpop.eup %4450  ;;  %v2001_v7 = vmul.f32 1.0614054, %v5723_v23  ;;  %vm2962_vm4 = vcmp.ge.f32.partialorder %v5652_v13, 0.0  ;;  %vm2964_vm5 = vcmp.ge.f32.partialorder %v5670_v22, 0.0  ;;  %vm2966_vm6 = vcmp.ge.f32.partialorder %v5696_v37, 0.0 }
 0x4d5   : > { %v2003_v24 = vmul.f32 1.0614054, %v5726_v42  ;;  %vm2968_vm7 = vcmp.ge.f32.partialorder %v5732_v3, 0.0  ;;  %v5990_v37 = vmul.f32 0.5, %v5735_v45  ;;  %vm2969_vm8 = vcmp.ge.f32.partialorder %v5746_v18, 0.0 }
 0x4d6   : > { %v2065_v32 = vadd.f32 -1.4531521, %v2001_v7  ;;  %v5737_v27 = vpop.f32.mrb[12].mxu1  ;;  %v5739_v2 = vpop.f32.mrb[28].mxu0 }
 0x4d7   : > { %7894 = vst [vmem:[#allocation39_spill] sm:$0xff] %v5737_v27  ;;  %7895 = vst [vmem:[#allocation40_spill] sm:$0xff] %v5739_v2  ;;  %v2067_v57 = vadd.f32 -1.4531521, %v2003_v24  ;;  %v5741_v49 = vpop.f32.mrb[13].mxu1  ;;  %v5755_v39 = vpop.eup %4452 }
 0x4d8   : > { %7896 = vst [vmem:[#allocation41_spill] sm:$0xff] %v5741_v49  ;;  %v2129_v50 = vmul.f32 %v5723_v23, %v2065_v32  ;;  %v5753_v32 = vand.u32 2147483647, %v5746_v18  ;;  %v5767_v34 = vpop.f32.mrb[29].mxu0  ;;  %v7917_v18 = vld [vmem:[#allocation33_spill] sm:$0xff] }
 0x4d9   : > { %v2131_v7 = vmul.f32 %v5726_v42, %v2067_v57  ;;  %v5758_v57 = vpop.eup %4454  ;;  %7897 = vst [vmem:[#allocation42_spill] sm:$0xff] %v5767_v34 }
 0x4da   : > { %v2193_v17 = vadd.f32 1.4214138, %v2129_v50  ;;  %v2005_v50 = vmul.f32 1.0614054, %v5755_v39  ;;  %v2007_v25 = vmul.f32 1.0614054, %v5758_v57  ;;  %v5763_v49 = vpop.eup %4456 }
 0x4db   : > { %v2195_v24 = vadd.f32 1.4214138, %v2131_v7  ;;  %v1753_v31 = vmul.f32 0.3275911, %v5753_v32  ;;  %v2002_v28 = vmul.f32 1.0614054, %v5763_v49 }
 0x4dc   : > { %v2257_v47 = vmul.f32 %v5723_v23, %v2193_v17  ;;  %v4360_v17 = vld [vmem:[#allocation8 + $0x60] sm:$0xff]   ;;  %v2069_v27 = vadd.f32 -1.4531521, %v2005_v50  ;;  %v2071_v9 = vadd.f32 -1.4531521, %v2007_v25 }
 0x4dd   : > { %v2259_v5 = vmul.f32 %v5726_v42, %v2195_v24  ;;  %v2717_v24 = vmul.f32 1.442695, %v2647_v51  ;;  %4042 = vmatprep.subr.bf16.mxu1 %v4360_v17  ;;  %v1817_v34 = vadd.f32 1.0, %v1753_v31 }
 0x4de   : > { %v2321_v40 = vadd.f32 -0.28449672, %v2257_v47  ;;  %v2135_v63 = vmul.f32 %v5758_v57, %v2071_v9  ;;  %v4363_v9 = vld [vmem:[#allocation8 + $0x80] sm:$0xff]  }
 0x4df   : > { %v2323_v7 = vadd.f32 -0.28449672, %v2259_v5  ;;  %v2133_v5 = vmul.f32 %v5755_v39, %v2069_v27  ;;  %4468 = vpow2.f32 %v2717_v24  ;;  %4099 = vmatpush3.bf16.msra.mxu0 %v4363_v9 }
 0x4e0   : > { %v2385_v2 = vmul.f32 %v5723_v23, %v2321_v40  ;;  %v4459_v40 = vpop.eup %4458  ;;  %4470 = vrcp.f32 %v1816_v54  ;;  %v5785_v54 = vpop.f32.mrb[14].mxu1 }
 0x4e1   : > { %v2387_v55 = vmul.f32 %v5726_v42, %v2323_v7  ;;  %v2197_v56 = vadd.f32 1.4214138, %v2133_v5  ;;  %v5774_v8 = vpop.eup %4460  ;;  %v2199_v7 = vadd.f32 1.4214138, %v2135_v63  ;;  %4472 = vrcp.f32 %v1817_v34  ;;  %7898 = vst [vmem:[#allocation43_spill] sm:$0xff] %v5785_v54 }
 0x4e2   : > { %v2449_v47 = vadd.f32 0.2548296, %v2385_v2  ;;  %v4463_v2 = vpop.eup %4462  ;;  %v2004_v6 = vmul.f32 1.0614054, %v5774_v8  ;;  %v1553_v34 = vmul.f32 0.5, %v5633_v12 }
 0x4e3   : > { %v2451_v62 = vadd.f32 0.2548296, %v2387_v55  ;;  %v2261_v36 = vmul.f32 %v5755_v39, %v2197_v56  ;;  %v5778_v25 = vpop.eup %4464  ;;  %v2066_v55 = vadd.f32 -1.4531521, %v2002_v28 }
 0x4e4   : > { %v2513_v50 = vmul.f32 %v5723_v23, %v2449_v47  ;;  %v2263_v23 = vmul.f32 %v5758_v57, %v2199_v7  ;;  %v2006_v56 = vmul.f32 1.0614054, %v5778_v25  ;;  %v2580_v7 = vsub.f32 0.0, %v5701_v46 }
 0x4e5   : > { %v2515_v51 = vmul.f32 %v5726_v42, %v2451_v62  ;;  %v2325_v31 = vadd.f32 -0.28449672, %v2261_v36  ;;  %v2578_v42 = vsub.f32 0.0, %v5660_v0  ;;  %v2130_v5 = vmul.f32 %v5763_v49, %v2066_v55 }
 0x4e6   : > { %v2833_v27 = vmul.f32 %v4459_v40, %v2513_v50  ;;  %v2327_v62 = vadd.f32 -0.28449672, %v2263_v23  ;;  %v2068_v40 = vadd.f32 -1.4531521, %v2004_v6  ;;  %v1555_v23 = vmul.f32 0.5, %v5636_v48  ;;  %v5797_v6 = vpop.f32.mrb[30].mxu0 }
 0x4e7   : > { %v2835_v17 = vmul.f32 %v4463_v2, %v2515_v51  ;;  %v2389_v24 = vmul.f32 %v5755_v39, %v2325_v31  ;;  %v2642_v51 = vmul.f32 %v2578_v42, %v5660_v0  ;;  %7899 = vst [vmem:[#allocation44_spill] sm:$0xff] %v5797_v6  ;;  %v2194_v42 = vadd.f32 1.4214138, %v2130_v5  ;;  %v4362_v6 = vld [vmem:[#allocation8 + $0x20] sm:$0xff]   ;;  %v5844_v38 = vpop.f32.mrb[31].mxu0 }
 0x4e8   : > { %v2897_v63 = vsub.f32 1.0, %v2833_v27  ;;  %v2391_v28 = vmul.f32 %v5758_v57, %v2327_v62  ;;  %v4467_v27 = vpop.eup %4466  ;;  %v2132_v62 = vmul.f32 %v5774_v8, %v2068_v40  ;;  %v5804_v48 = vadd.f32 %v5657_v19, %v5628_v41  ;;  %7903 = vst [vmem:[#allocation48_spill] sm:$0xff] %v5844_v38  ;;  %4043 = vmatpush3.bf16.msra.mxu1 %v4362_v6 }
 0x4e9   : > { %v2899_v47 = vsub.f32 1.0, %v2835_v17  ;;  %v2453_v50 = vadd.f32 0.2548296, %v2389_v24  ;;  %v2070_v17 = vadd.f32 -1.4531521, %v2006_v56  ;;  %v4469_v9 = vpop.eup %4468  ;;  %v2644_v14 = vmul.f32 %v2580_v7, %v5701_v46 }
 0x4ea   : > { %v2455_v2 = vadd.f32 0.2548296, %v2391_v28  ;;  %v3025_v36 = vsub.f32 0.0, %v2897_v63  ;;  %v5799_v0 = vpop.eup %4470  ;;  %v1557_v56 = vmul.f32 0.5, %v5663_v58  ;;  %v2258_v46 = vmul.f32 %v5763_v49, %v2194_v42 }
 0x4eb   : > { %v2517_v31 = vmul.f32 %v5755_v39, %v2453_v50  ;;  %v3027_v55 = vsub.f32 0.0, %v2899_v47  ;;  %v2707_v39 = vmul.f32 1.442695, %v2642_v51  ;;  %v5808_v50 = vpop.eup %4472  ;;  %v2134_v5 = vmul.f32 %v5778_v25, %v2070_v17 }
 0x4ec   : > { %v2519_v12 = vmul.f32 %v5758_v57, %v2455_v2  ;;  %v3089_v57 = vsel %vm2961_vm0, %v2897_v63, %v3025_v36  ;;  %v2008_v19 = vmul.f32 1.0614054, %v5799_v0  ;;  %v2196_v58 = vadd.f32 1.4214138, %v2132_v62  ;;  %v5820_v63 = vpop.f32.mrb[15].mxu1 }
 0x4ed   : > { %v2837_v24 = vmul.f32 %v4467_v27, %v2517_v31  ;;  %v3091_v40 = vsel %vm2963_vm1, %v2899_v47, %v3027_v55  ;;  %v5818_v7 = vmul.f32 0.70710677, %v5804_v48  ;;  %7900 = vst [vmem:[#allocation45_spill] sm:$0xff] %v5820_v63  ;;  %v3153_v36 = vadd.f32 1.0, %v3089_v57 }
 0x4ee   : > { %v2839_v28 = vmul.f32 %v4469_v9, %v2519_v12  ;;  %v2009_v17 = vmul.f32 1.0614054, %v5808_v50  ;;  %v3155_v47 = vadd.f32 1.0, %v3091_v40  ;;  %v2198_v55 = vadd.f32 1.4214138, %v2134_v5 }
 0x4ef   : > { %v2901_v2 = vsub.f32 1.0, %v2837_v24  ;;  %v5830_v12 = vand.u32 2147483647, %v5818_v7  ;;  %v2582_v24 = vsub.f32 0.0, %v5710_v60  ;;  %v2322_v57 = vadd.f32 -0.28449672, %v2258_v46 }
 0x4f0   : > { %v2903_v27 = vsub.f32 1.0, %v2839_v28  ;;  %v2072_v28 = vadd.f32 -1.4531521, %v2008_v19  ;;  %v2260_v63 = vmul.f32 %v5774_v8, %v2196_v58  ;;  %v5837_v61 = vmul.f32 %v3153_v36, %v1553_v34 }
 0x4f1   : > { %v3029_v51 = vsub.f32 0.0, %v2901_v2  ;;  %v2073_v5 = vadd.f32 -1.4531521, %v2009_v17  ;;  %v2262_v46 = vmul.f32 %v5778_v25, %v2198_v55  ;;  %v1755_v26 = vmul.f32 0.3275911, %v5830_v12  ;;  %v4364_v55 = vld [vmem:[#allocation8 + $0xc8] sm:$0xff]  }
 0x4f2   : > { %v3031_v31 = vsub.f32 0.0, %v2903_v27  ;;  %7901 = vst [vmem:[#allocation46_spill] sm:$0xff] %v5837_v61  ;;  %v2136_v58 = vmul.f32 %v5799_v0, %v2072_v28  ;;  %v2386_v17 = vmul.f32 %v5763_v49, %v2322_v57  ;;  %4474 = vpow2.f32 %v2707_v39  ;;  %4100 = vmatprep.subr.bf16.mxu0 %v4364_v55 }
 0x4f3   : > { %v3093_v9 = vsel %vm2965_vm2, %v2901_v2, %v3029_v51  ;;  %v5842_v51 = vmul.f32 0.70710677, %v5825_v21  ;;  %v2137_v6 = vmul.f32 %v5808_v50, %v2073_v5  ;;  %v5875_v39 = vadd.f32 %v5677_v53, %v5628_v41 }
 0x4f4   : > { %v3157_v42 = vadd.f32 1.0, %v3093_v9  ;;  %v3095_v62 = vsel %vm2967_vm3, %v2903_v27, %v3031_v31  ;;  %v5846_v27 = vmul.f32 %v3155_v47, %v1555_v23  ;;  %v2711_v31 = vmul.f32 1.442695, %v2644_v14 }
 0x4f5   : > { %v3159_v40 = vadd.f32 1.0, %v3095_v62  ;;  %v5857_v36 = vand.u32 2147483647, %v5842_v51  ;;  %v2324_v47 = vadd.f32 -0.28449672, %v2260_v63  ;;  %v2584_v9 = vsub.f32 0.0, %v5749_v16 }
 0x4f6   : > { %v5839_v2 = vmul.f32 %v3157_v42, %v1557_v56  ;;  %7904 = vst [vmem:[#allocation49_spill] sm:$0xff] %v5846_v27  ;;  %v2646_v56 = vmul.f32 %v2582_v24, %v5710_v60  ;;  %v2326_v42 = vadd.f32 -0.28449672, %v2262_v46  ;;  %v1819_v60 = vadd.f32 1.0, %v1755_v26  ;;  %v4365_v62 = vld [vmem:[#allocation8 + $0x88] sm:$0xff]  }
 0x4f7   : > { %v5848_v19 = vmul.f32 %v3159_v40, %v1559_v35  ;;  %v2200_v28 = vadd.f32 1.4214138, %v2136_v58  ;;  %v1754_v35 = vmul.f32 0.3275911, %v5857_v36  ;;  %v5867_v14 = vadd.f32 %v5667_v20, %v5647_v52  ;;  %4101 = vmatpush3.bf16.msra.mxu0 %v4365_v62 }
 0x4f8   : > { %7902 = vst [vmem:[#allocation47_spill] sm:$0xff] %v5839_v2  ;;  %v2715_v24 = vmul.f32 1.442695, %v2646_v56  ;;  %4476 = vpow2.f32 %v2711_v31  ;;  %v5871_v63 = vadd.f32 %v5675_v1, %v5626_v44  ;;  %v2450_v57 = vadd.f32 0.2548296, %v2386_v17  ;;  %v5886_v56 = vpop.f32.mrb[16].mxu1 }
 0x4f9   : > { %7905 = vst [vmem:[#allocation50_spill] sm:$0xff] %v5848_v19  ;;  %v2388_v40 = vmul.f32 %v5774_v8, %v2324_v47  ;;  %v2648_v5 = vmul.f32 %v2584_v9, %v5749_v16  ;;  %v2201_v46 = vadd.f32 1.4214138, %v2137_v6  ;;  %v2390_v20 = vmul.f32 %v5778_v25, %v2326_v42  ;;  %7906 = vst [vmem:[#allocation51_spill] sm:$0xff] %v5886_v56  ;;  %v5890_v17 = vpop.f32.mrb[32].mxu0 }
 0x4fa   : > { %4478 = vrcp.f32 %v1819_v60  ;;  %v5881_v26 = vmul.f32 0.70710677, %v5867_v14  ;;  %v5884_v1 = vmul.f32 0.70710677, %v5871_v63  ;;  %v2264_v53 = vmul.f32 %v5799_v0, %v2200_v28  ;;  %7907 = vst [vmem:[#allocation52_spill] sm:$0xff] %v5890_v17  ;;  %v5965_v13 = vpop.f32.mrb[33].mxu0 }
 0x4fb   : > { %4480 = vpow2.f32 %v2715_v24  ;;  %v2585_v58 = vsub.f32 0.0, %v5753_v32  ;;  %v1818_v31 = vadd.f32 1.0, %v1754_v35  ;;  %v5899_v9 = vmul.f32 0.70710677, %v5875_v39  ;;  %7911 = vst [vmem:[#allocation56_spill] sm:$0xff] %v5965_v13 }
 0x4fc   : > { %v5893_v16 = vand.u32 2147483647, %v5881_v26  ;;  %v5896_v47 = vand.u32 2147483647, %v5884_v1  ;;  %v2514_v6 = vmul.f32 %v5763_v49, %v2450_v57  ;;  %v2452_v55 = vadd.f32 0.2548296, %v2388_v40  ;;  %v4475_v23 = vpop.eup %4474 }
 0x4fd   : > { %v2454_v42 = vadd.f32 0.2548296, %v2390_v20  ;;  %v2265_v60 = vmul.f32 %v5808_v50, %v2201_v46  ;;  %v2328_v24 = vadd.f32 -0.28449672, %v2264_v53  ;;  %v2719_v28 = vmul.f32 1.442695, %v2648_v5 }
 0x4fe   : > { %v1756_v62 = vmul.f32 0.3275911, %v5893_v16  ;;  %4482 = vrcp.f32 %v1818_v31  ;;  %v1757_v35 = vmul.f32 0.3275911, %v5896_v47  ;;  %v2649_v34 = vmul.f32 %v2585_v58, %v5753_v32  ;;  %v5916_v32 = vpop.f32.mrb[17].mxu1 }
 0x4ff   : > { %v5907_v19 = vand.u32 2147483647, %v5899_v9  ;;  %v5911_v49 = vadd.f32 %v5685_v33, %v5630_v43  ;;  %v2834_v57 = vmul.f32 %v4475_v23, %v2514_v6  ;;  %v2516_v46 = vmul.f32 %v5774_v8, %v2452_v55  ;;  %7908 = vst [vmem:[#allocation53_spill] sm:$0xff] %v5916_v32 }
 0x500   : > { %v1820_v27 = vadd.f32 1.0, %v1756_v62  ;;  %v2518_v5 = vmul.f32 %v5778_v25, %v2454_v42  ;;  %v2329_v20 = vadd.f32 -0.28449672, %v2265_v60  ;;  %v2392_v53 = vmul.f32 %v5799_v0, %v2328_v24 }
 0x501   : > { %v1821_v31 = vadd.f32 1.0, %v1757_v35  ;;  %v2721_v62 = vmul.f32 1.442695, %v2649_v34  ;;  %v1759_v33 = vmul.f32 0.3275911, %v5907_v19  ;;  %v2898_v8 = vsub.f32 1.0, %v2834_v57 }
 0x502   : > { %v4477_v40 = vpop.eup %4476  ;;  %4484 = vrcp.f32 %v1820_v27  ;;  %v5922_v23 = vmul.f32 0.70710677, %v5911_v49  ;;  %v5926_v25 = vadd.f32 %v5687_v4, %v5647_v52  ;;  %v5930_v27 = vadd.f32 %v5698_v29, %v5626_v44 }
 0x503   : > { %4486 = vpow2.f32 %v2719_v28  ;;  %v2836_v55 = vmul.f32 %v4477_v40, %v2516_v46  ;;  %v2393_v60 = vmul.f32 %v5808_v50, %v2329_v20  ;;  %v2456_v24 = vadd.f32 0.2548296, %v2392_v53 }
 0x504   : > { %v5918_v58 = vpop.eup %4478  ;;  %v5934_v34 = vand.u32 2147483647, %v5922_v23  ;;  %4488 = vrcp.f32 %v1821_v31  ;;  %v5938_v35 = vmul.f32 0.70710677, %v5926_v25  ;;  %v1823_v4 = vadd.f32 1.0, %v1759_v33 }
 0x505   : > { %v4481_v6 = vpop.eup %4480  ;;  %v2011_v28 = vmul.f32 1.0614054, %v5918_v58  ;;  %4490 = vpow2.f32 %v2721_v62  ;;  %v5947_v46 = vmul.f32 0.70710677, %v5930_v27  ;;  %v2900_v20 = vsub.f32 1.0, %v2836_v55 }
 0x506   : > { %v2838_v42 = vmul.f32 %v4481_v6, %v2518_v5  ;;  %7909 = vst [vmem:[#allocation54_spill] sm:$0xff] %v5938_v35  ;;  %v1758_v57 = vmul.f32 0.3275911, %v5934_v34  ;;  %v5944_v40 = vand.u32 2147483647, %v5938_v35  ;;  %v3026_v5 = vsub.f32 0.0, %v2898_v8 }
 0x507   : > { %7910 = vst [vmem:[#allocation55_spill] sm:$0xff] %v5947_v46  ;;  %v2457_v6 = vadd.f32 0.2548296, %v2393_v60  ;;  %v2520_v31 = vmul.f32 %v5799_v0, %v2456_v24  ;;  %v2075_v61 = vadd.f32 -1.4531521, %v2011_v28  ;;  %v1554_v2 = vmul.f32 0.5, %v5645_v15 }
 0x508   : > { %v5941_v29 = vpop.eup %4482  ;;  %v2902_v53 = vsub.f32 1.0, %v2838_v42  ;;  %v1760_v62 = vmul.f32 0.3275911, %v5944_v40  ;;  %v5952_v33 = vand.u32 2147483647, %v5947_v46  ;;  %4492 = vrcp.f32 %v1823_v4  ;;  %v4366_v60 = vld [vmem:[#allocation8 + $0x68] sm:$0xff]  }
 0x509   : > { %v2010_v32 = vmul.f32 1.0614054, %v5941_v29  ;;  %v1822_v17 = vadd.f32 1.0, %v1758_v57  ;;  %v1556_v55 = vmul.f32 0.5, %v5655_v59  ;;  %v3090_v28 = vsel %vm2962_vm4, %v2898_v8, %v3026_v5  ;;  %4044 = vmatprep.subr.bf16.mxu1 %v4366_v60  ;;  %v4368_v5 = vld [vmem:[#allocation8 + $0xd0] sm:$0xff]  }
 0x50a   : > { %v1824_v42 = vadd.f32 1.0, %v1760_v62  ;;  %v1761_v0 = vmul.f32 0.3275911, %v5952_v33  ;;  %v3028_v38 = vsub.f32 0.0, %v2900_v20  ;;  %v1558_v15 = vmul.f32 0.5, %v5683_v30  ;;  %4102 = vmatprep.subr.bf16.mxu0 %v4368_v5 }
 0x50b   : > { %v3030_v54 = vsub.f32 0.0, %v2902_v53  ;;  %v2521_v57 = vmul.f32 %v5808_v50, %v2457_v6  ;;  %v2139_v46 = vmul.f32 %v5918_v58, %v2075_v61  ;;  %v5968_v59 = vmul.f32 0.5, %v5717_v11 }
 0x50c   : > { %v5956_v56 = vpop.eup %4484  ;;  %v2074_v62 = vadd.f32 -1.4531521, %v2010_v32  ;;  %4494 = vrcp.f32 %v1822_v17  ;;  %v2587_v30 = vsub.f32 0.0, %v5830_v12  ;;  %v5976_v50 = vadd.f32 %v5703_v10, %v5628_v41 }
 0x50d   : > { %v4487_v24 = vpop.eup %4486  ;;  %v2012_v8 = vmul.f32 1.0614054, %v5956_v56  ;;  %4496 = vrcp.f32 %v1824_v42  ;;  %v3154_v6 = vadd.f32 1.0, %v3090_v28  ;;  %v3092_v11 = vsel %vm2964_vm5, %v2900_v20, %v3028_v38  ;;  %v5982_v42 = vpop.f32.mrb[18].mxu1 }
 0x50e   : > { %v2840_v4 = vmul.f32 %v4487_v24, %v2520_v31  ;;  %v5971_v35 = vpop.eup %4488  ;;  %v1825_v31 = vadd.f32 1.0, %v1761_v0  ;;  %v3094_v17 = vsel %vm2966_vm6, %v2902_v53, %v3030_v54  ;;  %v2203_v24 = vadd.f32 1.4214138, %v2139_v46  ;;  %7912 = vst [vmem:[#allocation57_spill] sm:$0xff] %v5982_v42 }
 0x50f   : > { %v4491_v61 = vpop.eup %4490  ;;  %v2138_v0 = vmul.f32 %v5941_v29, %v2074_v62  ;;  %v2076_v10 = vadd.f32 -1.4531521, %v2012_v8  ;;  %v2013_v13 = vmul.f32 1.0614054, %v5971_v35  ;;  %v5987_v28 = vmul.f32 0.70710677, %v5976_v50 }
 0x510   : > { %v2904_v32 = vsub.f32 1.0, %v2840_v4  ;;  %v2841_v60 = vmul.f32 %v4491_v61, %v2521_v57  ;;  %v3156_v22 = vadd.f32 1.0, %v3092_v11  ;;  %v2651_v38 = vmul.f32 %v2587_v30, %v5830_v12 }
 0x511   : > { %4498 = vrcp.f32 %v1825_v31  ;;  %v3158_v46 = vadd.f32 1.0, %v3094_v17  ;;  %v5997_v20 = vmul.f32 0.5, %v5804_v48  ;;  %v2586_v53 = vsub.f32 0.0, %v5857_v36 }
 0x512   : > { %v5993_v54 = vpop.eup %4492  ;;  %v6001_v4 = vand.u32 2147483647, %v5987_v28  ;;  %v6003_v57 = vmul.f32 %v3154_v6, %v1554_v2  ;;  %v3032_v45 = vsub.f32 0.0, %v2904_v32  ;;  %v2905_v62 = vsub.f32 1.0, %v2841_v60 }
 0x513   : > { %v2267_v12 = vmul.f32 %v5918_v58, %v2203_v24  ;;  %v2202_v8 = vadd.f32 1.4214138, %v2138_v0  ;;  %v2140_v5 = vmul.f32 %v5956_v56, %v2076_v10  ;;  %v2077_v30 = vadd.f32 -1.4531521, %v2013_v13 }
 0x514   : > { %7913 = vst [vmem:[#allocation58_spill] sm:$0xff] %v6003_v57  ;;  %v1763_v31 = vmul.f32 0.3275911, %v6001_v4  ;;  %v6008_v61 = vmul.f32 %v3156_v22, %v1556_v55  ;;  %v2725_v48 = vmul.f32 1.442695, %v2651_v38  ;;  %v2588_v11 = vsub.f32 0.0, %v5893_v16 }
 0x515   : > { %v2015_v17 = vmul.f32 1.0614054, %v5993_v54  ;;  %v6014_v2 = vmul.f32 %v3158_v46, %v1558_v15  ;;  %v6017_v6 = vmul.f32 0.5, %v5825_v21  ;;  %v2650_v60 = vmul.f32 %v2586_v53, %v5857_v36 }
 0x516   : > { %7914 = vst [vmem:[#allocation59_spill] sm:$0xff] %v6008_v61  ;;  %v6012_v42 = vpop.eup %4494  ;;  %v1827_v24 = vadd.f32 1.0, %v1763_v31  ;;  %v3096_v55 = vsel %vm2968_vm7, %v2904_v32, %v3032_v45  ;;  %v3033_v0 = vsub.f32 0.0, %v2905_v62  ;;  %v2589_v10 = vsub.f32 0.0, %v5896_v47  ;;  %v6028_v61 = vpop.f32.mrb[34].mxu0  ;;  %v4367_v32 = vld [vmem:[#allocation8 + $0x28] sm:$0xff]  }
 0x517   : > { %7915 = vst [vmem:[#allocation60_spill] sm:$0xff] %v6014_v2  ;;  %v6020_v13 = vpop.eup %4496  ;;  %v2591_v22 = vsub.f32 0.0, %v5907_v19  ;;  %v2331_v38 = vadd.f32 -0.28449672, %v2267_v12  ;;  %v2266_v15 = vmul.f32 %v5941_v29, %v2202_v8  ;;  %v2204_v46 = vadd.f32 1.4214138, %v2140_v5  ;;  %4045 = vmatpush3.bf16.msra.mxu1 %v4367_v32 }
 0x518   : > { %v2141_v21 = vmul.f32 %v5971_v35, %v2077_v30  ;;  %7916 = vst [vmem:[#allocation61_spill] sm:$0xff] %v6028_v61  ;;  %4500 = vpow2.f32 %v2725_v48  ;;  %v2652_v36 = vmul.f32 %v2588_v11, %v5893_v16  ;;  %v2079_v53 = vadd.f32 -1.4531521, %v2015_v17  ;;  %v6065_v32 = vpop.f32.mrb[19].mxu1 }
 0x519   : > { %v2014_v3 = vmul.f32 1.0614054, %v6012_v42  ;;  %v3160_v45 = vadd.f32 1.0, %v3096_v55  ;;  %v2723_v31 = vmul.f32 1.442695, %v2650_v60  ;;  %4502 = vrcp.f32 %v1827_v24  ;;  %7919 = vst [vmem:[#allocation62_spill] sm:$0xff] %v6065_v32 }
 0x51a   : > { %v2016_v2 = vmul.f32 1.0614054, %v6020_v13  ;;  %v3097_v8 = vsel %vm2969_vm8, %v2905_v62, %v3033_v0  ;;  %v6038_v5 = vmul.f32 0.5, %v5867_v14  ;;  %v2653_v30 = vmul.f32 %v2589_v10, %v5896_v47  ;;  %v4369_v10 = vld [vmem:[#allocation8 + $0x90] sm:$0xff]  }
 0x51b   : > { %v6033_v12 = vpop.eup %4498  ;;  %v2655_v16 = vmul.f32 %v2591_v22, %v5907_v19  ;;  %v2395_v48 = vmul.f32 %v5918_v58, %v2331_v38  ;;  %v2330_v11 = vadd.f32 -0.28449672, %v2266_v15  ;;  %v2268_v17 = vmul.f32 %v5956_v56, %v2204_v46  ;;  %4103 = vmatpush3.bf16.msra.mxu0 %v4369_v10 }
 0x51c   : > { %v2205_v60 = vadd.f32 1.4214138, %v2141_v21  ;;  %v2727_v24 = vmul.f32 1.442695, %v2652_v36  ;;  %v2143_v55 = vmul.f32 %v5993_v54, %v2079_v53  ;;  %v2078_v57 = vadd.f32 -1.4531521, %v2014_v3 }
 0x51d   : > { %v6047_v62 = vadd.f32 %v7917_v18, %v5630_v43  ;;  %v6050_v14 = vmul.f32 %v3160_v45, %v5968_v59  ;;  %v6053_v19 = vmul.f32 0.5, %v5871_v63  ;;  %v2080_v47 = vadd.f32 -1.4531521, %v2016_v2 }
 0x51e   : > { %v2017_v0 = vmul.f32 1.0614054, %v6033_v12  ;;  %v3161_v22 = vadd.f32 1.0, %v3097_v8  ;;  %4504 = vpow2.f32 %v2723_v31  ;;  %v2729_v38 = vmul.f32 1.442695, %v2653_v30 }
 0x51f   : > { %7918 = vst [vmem:[#allocation33_spill] sm:$0xff] %v6050_v14  ;;  %v2733_v15 = vmul.f32 1.442695, %v2655_v16  ;;  %v2459_v46 = vadd.f32 0.2548296, %v2395_v48  ;;  %v2394_v21 = vmul.f32 %v5941_v29, %v2330_v11  ;;  %v2269_v53 = vmul.f32 %v5971_v35, %v2205_v60 }
 0x520   : > { %v2332_v36 = vadd.f32 -0.28449672, %v2268_v17  ;;  %v6059_v59 = vmul.f32 0.5, %v5875_v39  ;;  %v2207_v63 = vadd.f32 1.4214138, %v2143_v55  ;;  %v2142_v2 = vmul.f32 %v6012_v42, %v2078_v57 }
 0x521   : > { %v6063_v3 = vmul.f32 0.70710677, %v6047_v62  ;;  %4506 = vpow2.f32 %v2727_v24  ;;  %v2590_v45 = vsub.f32 0.0, %v5934_v34  ;;  %v2144_v31 = vmul.f32 %v6020_v13, %v2080_v47  ;;  %v6084_v47 = vpop.f32.mrb[35].mxu0 }
 0x522   : > { %v2081_v8 = vadd.f32 -1.4531521, %v2017_v0  ;;  %v4501_v30 = vpop.eup %4500  ;;  %v6070_v16 = vmul.f32 %v3161_v22, %v5990_v37  ;;  %4508 = vpow2.f32 %v2729_v38  ;;  %v6073_v39 = vmul.f32 0.5, %v5911_v49  ;;  %7921 = vst [vmem:[#allocation64_spill] sm:$0xff] %v6084_v47 }
 0x523   : > { %v2592_v57 = vsub.f32 0.0, %v5944_v40  ;;  %v6076_v48 = vpop.eup %4502  ;;  %v2523_v11 = vmul.f32 %v5918_v58, %v2459_v46  ;;  %v2458_v17 = vadd.f32 0.2548296, %v2394_v21  ;;  %v2333_v60 = vadd.f32 -0.28449672, %v2269_v53 }
 0x524   : > { %7920 = vst [vmem:[#allocation63_spill] sm:$0xff] %v6070_v16  ;;  %v6080_v24 = vand.u32 2147483647, %v6063_v3  ;;  %v2396_v55 = vmul.f32 %v5956_v56, %v2332_v36  ;;  %v2271_v37 = vmul.f32 %v5993_v54, %v2207_v63  ;;  %4510 = vpow2.f32 %v2733_v15  ;;  %v4370_v63 = vld [vmem:[#allocation8 + $0xd8] sm:$0xff]  }
 0x525   : > { %v2206_v18 = vadd.f32 1.4214138, %v2142_v2  ;;  %v2654_v49 = vmul.f32 %v2590_v45, %v5934_v34  ;;  %v2208_v0 = vadd.f32 1.4214138, %v2144_v31  ;;  %v2145_v10 = vmul.f32 %v6033_v12, %v2081_v8  ;;  %4104 = vmatprep.subr.bf16.mxu0 %v4370_v63 }
 0x526   : > { %v1762_v58 = vmul.f32 0.3275911, %v6080_v24  ;;  %v6090_v22 = vmul.f32 0.5, %v5926_v25  ;;  %v2656_v38 = vmul.f32 %v2592_v57, %v5944_v40  ;;  %v2593_v46 = vsub.f32 0.0, %v5952_v33  ;;  %v7922_v25 = vld [vmem:[#allocation34_spill] sm:$0xff]  ;;  %v4371_v40 = vld [vmem:[#allocation8 + $0x98] sm:$0xff]  }
 0x527   : > { %v2019_v21 = vmul.f32 1.0614054, %v6076_v48  ;;  %v2843_v15 = vmul.f32 %v4501_v30, %v2523_v11  ;;  %v2522_v36 = vmul.f32 %v5941_v29, %v2458_v17  ;;  %v2397_v53 = vmul.f32 %v5971_v35, %v2333_v60  ;;  %v7923_v29 = vld [vmem:[#allocation35_spill] sm:$0xff]  ;;  %4105 = vmatpush3.bf16.msra.mxu0 %v4371_v40 }
 0x528   : > { %v1826_v34 = vadd.f32 1.0, %v1762_v58  ;;  %v4505_v2 = vpop.eup %4504  ;;  %v2460_v45 = vadd.f32 0.2548296, %v2396_v55  ;;  %v2335_v31 = vadd.f32 -0.28449672, %v2271_v37  ;;  %v2270_v8 = vmul.f32 %v6012_v42, %v2206_v18 }
 0x529   : > { %v6100_v16 = vadd.f32 %v7922_v25, %v5647_v52  ;;  %v2731_v57 = vmul.f32 1.442695, %v2654_v49  ;;  %v2272_v14 = vmul.f32 %v6020_v13, %v2208_v0  ;;  %v2209_v30 = vadd.f32 1.4214138, %v2145_v10 }
 0x52a   : > { %v6105_v11 = vadd.f32 %v7923_v29, %v5626_v44  ;;  %vm2971_vm9 = vcmp.ge.f32.partialorder %v5818_v7, 0.0  ;;  %v2735_v17 = vmul.f32 1.442695, %v2656_v38  ;;  %v2657_v60 = vmul.f32 %v2593_v46, %v5952_v33  ;;  %v6119_v33 = vpop.f32.mrb[20].mxu1 }
 0x52b   : > { %v2083_v55 = vadd.f32 -1.4531521, %v2019_v21  ;;  %4512 = vrcp.f32 %v1826_v34  ;;  %v4507_v37 = vpop.eup %4506  ;;  %v2907_v18 = vsub.f32 1.0, %v2843_v15  ;;  %v6109_v58 = vmul.f32 %v4505_v2, %v2522_v36  ;;  %7925 = vst [vmem:[#allocation35_spill] sm:$0xff] %v6119_v33  ;;  %v6125_v36 = vpop.f32.mrb[36].mxu0  ;;  %v7927_v33 = vld [vmem:[#allocation36_spill] sm:$0xff] }
 0x52c   : > { %v2461_v49 = vadd.f32 0.2548296, %v2397_v53  ;;  %v6112_v0 = vmul.f32 0.70710677, %v6100_v16  ;;  %v4509_v10 = vpop.eup %4508  ;;  %v2524_v25 = vmul.f32 %v5956_v56, %v2460_v45  ;;  %v2399_v63 = vmul.f32 %v5993_v54, %v2335_v31  ;;  %7926 = vst [vmem:[#allocation65_spill] sm:$0xff] %v6125_v36 }
 0x52d   : > { %v2334_v29 = vadd.f32 -0.28449672, %v2270_v8  ;;  %v6117_v38 = vmul.f32 0.70710677, %v6105_v11  ;;  %4514 = vpow2.f32 %v2731_v57  ;;  %v2336_v46 = vadd.f32 -0.28449672, %v2272_v14 }
 0x52e   : > { %v2273_v21 = vmul.f32 %v6033_v12, %v2209_v30  ;;  %v6123_v15 = vand.u32 2147483647, %v6112_v0  ;;  %v4511_v53 = vpop.eup %4510  ;;  %4516 = vpow2.f32 %v2735_v17  ;;  %v2737_v56 = vmul.f32 1.442695, %v2657_v60 }
 0x52f   : > { %7924 = vst [vmem:[#allocation34_spill] sm:$0xff] %v6117_v38  ;;  %v2147_v34 = vmul.f32 %v6076_v48, %v2083_v55  ;;  %v6129_v2 = vand.u32 2147483647, %v6117_v38  ;;  %v3035_v45 = vsub.f32 0.0, %v2907_v18  ;;  %v2906_v31 = vsub.f32 1.0, %v6109_v58 }
 0x530   : > { %v2525_v14 = vmul.f32 %v5971_v35, %v2461_v49  ;;  %v1764_v8 = vmul.f32 0.3275911, %v6123_v15  ;;  %v6134_v40 = vmul.f32 %v4507_v37, %v2524_v25  ;;  %v2463_v57 = vadd.f32 0.2548296, %v2399_v63 }
 0x531   : > { %v2595_v30 = vsub.f32 0.0, %v6001_v4  ;;  %v1765_v17 = vmul.f32 0.3275911, %v6129_v2  ;;  %v2398_v60 = vmul.f32 %v6012_v42, %v2334_v29  ;;  %v2400_v55 = vmul.f32 %v6020_v13, %v2336_v46 }
 0x532   : > { %v2337_v36 = vadd.f32 -0.28449672, %v2273_v21  ;;  %v6142_v47 = vadd.f32 %v7927_v33, %v5628_v41  ;;  %v6145_v35 = vmul.f32 0.5, %v5930_v27  ;;  %4518 = vpow2.f32 %v2737_v56 }
 0x533   : > { %v2211_v37 = vadd.f32 1.4214138, %v2147_v34  ;;  %v1828_v58 = vadd.f32 1.0, %v1764_v8  ;;  %v3099_v49 = vsel %vm2971_vm9, %v2907_v18, %v3035_v45  ;;  %vm2970_vm10 = vcmp.ge.f32.partialorder %v5842_v51, 0.0  ;;  %v6161_v18 = vpop.f32.mrb[21].mxu1  ;;  %v7930_v8 = vld [vmem:[#allocation37_spill] sm:$0xff] }
 0x534   : > { %v6150_v25 = vmul.f32 %v4509_v10, %v2525_v14  ;;  %v1829_v63 = vadd.f32 1.0, %v1765_v17  ;;  %v6153_v29 = vmul.f32 0.70710677, %v6142_v47  ;;  %v3034_v33 = vsub.f32 0.0, %v2906_v31  ;;  %7929 = vst [vmem:[#allocation66_spill] sm:$0xff] %v6161_v18 }
 0x535   : > { %v6155_v46 = vpop.eup %4512  ;;  %v2908_v27 = vsub.f32 1.0, %v6134_v40  ;;  %vm2972_vm11 = vcmp.ge.f32.partialorder %v5881_v26, 0.0  ;;  %v2527_v21 = vmul.f32 %v5993_v54, %v2463_v57  ;;  %v2659_v7 = vmul.f32 %v2595_v30, %v6001_v4  ;;  %v7931_v54 = vld [vmem:[#allocation38_spill] sm:$0xff] }
 0x536   : > { %7928 = vst [vmem:[#allocation36_spill] sm:$0xff] %v6153_v29  ;;  %v2462_v56 = vadd.f32 0.2548296, %v2398_v60  ;;  %v2464_v10 = vadd.f32 0.2548296, %v2400_v55  ;;  %v2401_v34 = vmul.f32 %v6033_v12, %v2337_v36  ;;  %v2275_v14 = vmul.f32 %v6076_v48, %v2211_v37 }
 0x537   : > { %v6165_v45 = vand.u32 2147483647, %v6153_v29  ;;  %4520 = vrcp.f32 %v1828_v58  ;;  %v6170_v40 = vadd.f32 %v7930_v8, %v5630_v43  ;;  %v6174_v57 = vadd.f32 %v7931_v54, %v5647_v52  ;;  %v4515_v4 = vpop.eup %4514 }
 0x538   : > { %v2909_v30 = vsub.f32 1.0, %v6150_v25  ;;  %vm2973_vm12 = vcmp.ge.f32.partialorder %v5884_v1, 0.0  ;;  %v2018_v36 = vmul.f32 1.0614054, %v6155_v46  ;;  %4522 = vrcp.f32 %v1829_v63  ;;  %v4517_v60 = vpop.eup %4516 }
 0x539   : > { %v1767_v17 = vmul.f32 0.3275911, %v6165_v45  ;;  %v3036_v55 = vsub.f32 0.0, %v2908_v27  ;;  %v6180_v37 = vmul.f32 %v4511_v53, %v2527_v21  ;;  %v2741_v58 = vmul.f32 1.442695, %v2659_v7  ;;  %v4372_v21 = vld [vmem:[#allocation8 + $0x70] sm:$0xff]  }
 0x53a   : > { %v6183_v8 = vmul.f32 0.70710677, %v6170_v40  ;;  %v2526_v54 = vmul.f32 %v6012_v42, %v2462_v56  ;;  %v2465_v18 = vadd.f32 0.2548296, %v2401_v34  ;;  %v6187_v25 = vmul.f32 0.70710677, %v6174_v57  ;;  %4046 = vmatprep.subr.bf16.mxu1 %v4372_v21 }
 0x53b   : > { %v1831_v32 = vadd.f32 1.0, %v1767_v17  ;;  %v2528_v61 = vmul.f32 %v6020_v13, %v2464_v10  ;;  %v6191_v63 = vmul.f32 0.5, %v5976_v50  ;;  %v2339_v29 = vadd.f32 -0.28449672, %v2275_v14  ;;  %v6199_v56 = vpop.f32.mrb[37].mxu0  ;;  %v7934_v17 = vld [vmem:[#allocation39_spill] sm:$0xff] }
 0x53c   : > { %7932 = vst [vmem:[#allocation37_spill] sm:$0xff] %v6187_v25  ;;  %v6194_v53 = vand.u32 2147483647, %v6183_v8  ;;  %v3163_v7 = vadd.f32 1.0, %v3099_v49  ;;  %v2082_v38 = vadd.f32 -1.4531521, %v2018_v36  ;;  %v4519_v34 = vpop.eup %4518  ;;  %v3098_v13 = vsel %vm2970_vm10, %v2906_v31, %v3034_v33 }
 0x53d   : > { %4524 = vrcp.f32 %v1831_v32  ;;  %v6197_v42 = vand.u32 2147483647, %v6187_v25  ;;  %7933 = vst [vmem:[#allocation38_spill] sm:$0xff] %v6199_v56  ;;  %v3037_v10 = vsub.f32 0.0, %v2909_v30  ;;  %v2911_v50 = vsub.f32 1.0, %v6180_v37 }
 0x53e   : > { %vm2975_vm13 = vcmp.ge.f32.partialorder %v5899_v9, 0.0  ;;  %v1766_v14 = vmul.f32 0.3275911, %v6194_v53  ;;  %v3100_v32 = vsel %vm2972_vm11, %v2908_v27, %v3036_v55  ;;  %v6208_v49 = vmul.f32 %v4515_v4, %v2526_v54 }
 0x53f   : > { %v1768_v36 = vmul.f32 0.3275911, %v6197_v42  ;;  %v6213_v56 = vadd.f32 %v7934_v17, %v5626_v44  ;;  %v6215_v51 = vmul.f32 %v4517_v60, %v2528_v61  ;;  %v2529_v31 = vmul.f32 %v6033_v12, %v2465_v18  ;;  %v7935_v60 = vld [vmem:[#allocation54_spill] sm:$0xff] }
 0x540   : > { %v2403_v33 = vmul.f32 %v6076_v48, %v2339_v29  ;;  %v1830_v37 = vadd.f32 1.0, %v1766_v14  ;;  %v3162_v25 = vadd.f32 1.0, %v3098_v13  ;;  %4526 = vpow2.f32 %v2741_v58  ;;  %v7936_v58 = vld [vmem:[#allocation40_spill] sm:$0xff] }
 0x541   : > { %v2146_v26 = vmul.f32 %v6155_v46, %v2082_v38  ;;  %v1832_v27 = vadd.f32 1.0, %v1768_v36  ;;  %v6220_v4 = vpop.eup %4520  ;;  %v3164_v55 = vadd.f32 1.0, %v3100_v32  ;;  %v3101_v54 = vsel %vm2973_vm12, %v2909_v30, %v3037_v10  ;;  %v4374_v10 = vld [vmem:[#allocation8 + $0xe0] sm:$0xff]  }
 0x542   : > { %v3039_v21 = vsub.f32 0.0, %v2911_v50  ;;  %4528 = vrcp.f32 %v1830_v37  ;;  %v6224_v61 = vpop.eup %4522  ;;  %v2910_v12 = vsub.f32 1.0, %v6208_v49  ;;  %vm2974_vm14 = vcmp.ge.f32.partialorder %v5922_v23, 0.0  ;;  %4106 = vmatprep.subr.bf16.mxu0 %v4374_v10  ;;  %v7941_v37 = vld [vmem:[#allocation55_spill] sm:$0xff] }
 0x543   : > { %v2594_v29 = vsub.f32 0.0, %v6080_v24  ;;  %4530 = vrcp.f32 %v1832_v27  ;;  %v6230_v38 = vmul.f32 0.70710677, %v6213_v56  ;;  %v2912_v18 = vsub.f32 1.0, %v6215_v51 }
 0x544   : > { %vm2976_vm15 = vcmp.ge.f32.partialorder %v7935_v60, 0.0  ;;  %v2849_v1 = vmul.f32 %v4519_v34, %v2529_v31  ;;  %v2467_v30 = vadd.f32 0.2548296, %v2403_v33  ;;  %v6236_v13 = vadd.f32 %v7936_v58, %v5628_v41  ;;  %v6252_v33 = vpop.f32.mrb[22].mxu1  ;;  %v7945_v60 = vld [vmem:[#allocation41_spill] sm:$0xff] }
 0x545   : > { %v6239_v14 = vmul.f32 %v3163_v7, %v5997_v20  ;;  %v2210_v32 = vadd.f32 1.4214138, %v2146_v26  ;;  %v2020_v49 = vmul.f32 1.0614054, %v6220_v4  ;;  %v6243_v36 = vand.u32 2147483647, %v6230_v38 }
 0x546   : > { %v6246_v17 = vmul.f32 %v3162_v25, %v6017_v6  ;;  %v3165_v51 = vadd.f32 1.0, %v3101_v54  ;;  %v2021_v34 = vmul.f32 1.0614054, %v6224_v61  ;;  %v6250_v31 = vmul.f32 0.70710677, %v6236_v13  ;;  %7940 = vst [vmem:[#allocation67_spill] sm:$0xff] %v6252_v33 }
 0x547   : > { %7937 = vst [vmem:[#allocation39_spill] sm:$0xff] %v6239_v14  ;;  %v6254_v20 = vpop.eup %4524  ;;  %v3103_v7 = vsel %vm2975_vm13, %v2911_v50, %v3039_v21  ;;  %vm2977_vm0 = vcmp.ge.f32.partialorder %v7941_v37, 0.0  ;;  %v6260_v26 = vmul.f32 0.5, %v6047_v62  ;;  %v2658_v6 = vmul.f32 %v2594_v29, %v6080_v24 }
 0x548   : > { %7938 = vst [vmem:[#allocation54_spill] sm:$0xff] %v6246_v17  ;;  %7939 = vst [vmem:[#allocation40_spill] sm:$0xff] %v6250_v31  ;;  %v1769_v25 = vmul.f32 0.3275911, %v6243_v36  ;;  %v3038_v27 = vsub.f32 0.0, %v2910_v12  ;;  %v2913_v54 = vsub.f32 1.0, %v2849_v1  ;;  %v2531_v58 = vmul.f32 %v6076_v48, %v2467_v30 }
 0x549   : > { %v6266_v10 = vand.u32 2147483647, %v6250_v31  ;;  %v3040_v14 = vsub.f32 0.0, %v2912_v18  ;;  %v2274_v9 = vmul.f32 %v6155_v46, %v2210_v32  ;;  %v2084_v50 = vadd.f32 -1.4531521, %v2020_v49 }
 0x54a   : > { %v1833_v21 = vadd.f32 1.0, %v1769_v25  ;;  %v6270_v17 = vmul.f32 %v3164_v55, %v6038_v5  ;;  %v6273_v62 = vmul.f32 %v3165_v51, %v6053_v19  ;;  %v2085_v24 = vadd.f32 -1.4531521, %v2021_v34  ;;  %v4527_v1 = vpop.eup %4526  ;;  %v4373_v19 = vld [vmem:[#allocation8 + $0x30] sm:$0xff]  }
 0x54b   : > { %v2023_v29 = vmul.f32 1.0614054, %v6254_v20  ;;  %v3167_v33 = vadd.f32 1.0, %v3103_v7  ;;  %v2739_v48 = vmul.f32 1.442695, %v2658_v6  ;;  %v3102_v32 = vsel %vm2974_vm14, %v2910_v12, %v3038_v27  ;;  %4047 = vmatpush3.bf16.msra.mxu1 %v4373_v19 }
 0x54c   : > { %7942 = vst [vmem:[#allocation55_spill] sm:$0xff] %v6270_v17  ;;  %7943 = vst [vmem:[#allocation68_spill] sm:$0xff] %v6273_v62  ;;  %4532 = vrcp.f32 %v1833_v21  ;;  %v1771_v30 = vmul.f32 0.3275911, %v6266_v10  ;;  %v6277_v31 = vpop.eup %4528  ;;  %v3041_v49 = vsub.f32 0.0, %v2913_v54  ;;  %v2851_v5 = vmul.f32 %v4527_v1, %v2531_v58  ;;  %v6290_v21 = vpop.f32.mrb[38].mxu0 }
 0x54d   : > { %v6282_v55 = vmul.f32 0.5, %v6100_v16  ;;  %v6284_v51 = vpop.eup %4530  ;;  %v3104_v34 = vsel %vm2976_vm15, %v2912_v18, %v3040_v14  ;;  %v2338_v7 = vadd.f32 -0.28449672, %v2274_v9  ;;  %v2148_v6 = vmul.f32 %v6220_v4, %v2084_v50  ;;  %7944 = vst [vmem:[#allocation69_spill] sm:$0xff] %v6290_v21  ;;  %v7958_v17 = vld [vmem:[#allocation45_spill] sm:$0xff] }
 0x54e   : > { %v2596_v25 = vsub.f32 0.0, %v6123_v15  ;;  %v2149_v23 = vmul.f32 %v6224_v61, %v2085_v24  ;;  %v2087_v12 = vadd.f32 -1.4531521, %v2023_v29  ;;  %v2022_v27 = vmul.f32 1.0614054, %v6277_v31 }
 0x54f   : > { %v1835_v16 = vadd.f32 1.0, %v1771_v30  ;;  %v3166_v58 = vadd.f32 1.0, %v3102_v32  ;;  %vm2979_vm1 = vcmp.ge.f32.partialorder %v5987_v28, 0.0  ;;  %4534 = vpow2.f32 %v2739_v48  ;;  %v6351_v28 = vpop.f32.mrb[39].mxu0 }
 0x550   : > { %v2024_v18 = vmul.f32 1.0614054, %v6284_v51  ;;  %v6298_v14 = vadd.f32 %v7945_v60, %v5630_v43  ;;  %v3168_v9 = vadd.f32 1.0, %v3104_v34  ;;  %v3105_v50 = vsel %vm2977_vm0, %v2913_v54, %v3041_v49 }
 0x551   : > { %v2915_v24 = vsub.f32 1.0, %v2851_v5  ;;  %v2597_v29 = vsub.f32 0.0, %v6129_v2  ;;  %v2402_v1 = vmul.f32 %v6155_v46, %v2338_v7  ;;  %v2212_v30 = vadd.f32 1.4214138, %v2148_v6  ;;  %v4375_v5 = vld [vmem:[#allocation8 + $0xa0] sm:$0xff]  }
 0x552   : > { %v2660_v32 = vmul.f32 %v2596_v25, %v6123_v15  ;;  %v6306_v48 = vmul.f32 0.5, %v6105_v11  ;;  %v2213_v19 = vadd.f32 1.4214138, %v2149_v23  ;;  %v2151_v62 = vmul.f32 %v6254_v20, %v2087_v12  ;;  %4107 = vmatpush3.bf16.msra.mxu0 %v4375_v5  ;;  %v7951_v5 = vld [vmem:[#allocation42_spill] sm:$0xff] }
 0x553   : > { %v2086_v60 = vadd.f32 -1.4531521, %v2022_v27  ;;  %4536 = vrcp.f32 %v1835_v16  ;;  %v6310_v34 = vmul.f32 %v3167_v33, %v6059_v59  ;;  %v3169_v37 = vadd.f32 1.0, %v3105_v50  ;;  %7952 = vst [vmem:[#allocation42_spill] sm:$0xff] %v6351_v28 }
 0x554   : > { %v2088_v54 = vadd.f32 -1.4531521, %v2024_v18  ;;  %v6313_v49 = vmul.f32 0.70710677, %v6298_v14  ;;  %v6316_v7 = vmul.f32 %v3166_v58, %v6073_v39  ;;  %v6319_v11 = vmul.f32 %v3168_v9, %v6090_v22  ;;  %v6333_v58 = vpop.f32.mrb[23].mxu1 }
 0x555   : > { %7946 = vst [vmem:[#allocation41_spill] sm:$0xff] %v6310_v34  ;;  %v3043_v15 = vsub.f32 0.0, %v2915_v24  ;;  %v2661_v6 = vmul.f32 %v2597_v29, %v6129_v2  ;;  %v2466_v23 = vadd.f32 0.2548296, %v2402_v1  ;;  %v2276_v59 = vmul.f32 %v6220_v4, %v2212_v30  ;;  %7949 = vst [vmem:[#allocation72_spill] sm:$0xff] %v6333_v58 }
 0x556   : > { %7947 = vst [vmem:[#allocation70_spill] sm:$0xff] %v6316_v7  ;;  %7948 = vst [vmem:[#allocation71_spill] sm:$0xff] %v6319_v11  ;;  %v6322_v25 = vpop.eup %4532  ;;  %v2743_v33 = vmul.f32 1.442695, %v2660_v32  ;;  %v6326_v12 = vand.u32 2147483647, %v6313_v49  ;;  %v2277_v27 = vmul.f32 %v6224_v61, %v2213_v19  ;;  %v2150_v16 = vmul.f32 %v6277_v31, %v2086_v60 }
 0x557   : > { %v6330_v39 = vmul.f32 0.5, %v6142_v47  ;;  %v2215_v22 = vadd.f32 1.4214138, %v2151_v62  ;;  %v6336_v2 = vmul.f32 %v3169_v37, %v6145_v35  ;;  %v2599_v18 = vsub.f32 0.0, %v6165_v45 }
 0x558   : > { %v2152_v9 = vmul.f32 %v6284_v51, %v2088_v54  ;;  %v1770_v50 = vmul.f32 0.3275911, %v6326_v12  ;;  %v3107_v29 = vsel %vm2979_vm1, %v2915_v24, %v3043_v15  ;;  %v2745_v1 = vmul.f32 1.442695, %v2661_v6 }
 0x559   : > { %7950 = vst [vmem:[#allocation73_spill] sm:$0xff] %v6336_v2  ;;  %v2598_v47 = vsub.f32 0.0, %v6194_v53  ;;  %v2025_v62 = vmul.f32 1.0614054, %v6322_v25  ;;  %v4535_v30 = vpop.eup %4534  ;;  %v2530_v32 = vmul.f32 %v6155_v46, %v2466_v23  ;;  %v2340_v19 = vadd.f32 -0.28449672, %v2276_v59 }
 0x55a   : > { %4538 = vpow2.f32 %v2743_v33  ;;  %v1834_v35 = vadd.f32 1.0, %v1770_v50  ;;  %v2341_v60 = vadd.f32 -0.28449672, %v2277_v27  ;;  %v2279_v37 = vmul.f32 %v6254_v20, %v2215_v22 }
 0x55b   : > { %v2214_v54 = vadd.f32 1.4214138, %v2150_v16  ;;  %v6349_v2 = vadd.f32 %v7951_v5, %v5647_v52  ;;  %v3171_v24 = vadd.f32 1.0, %v3107_v29  ;;  %v2663_v15 = vmul.f32 %v2599_v18, %v6165_v45 }
 0x55c   : > { %v2216_v6 = vadd.f32 1.4214138, %v2152_v9  ;;  %4540 = vrcp.f32 %v1834_v35  ;;  %v2662_v46 = vmul.f32 %v2598_v47, %v6194_v53  ;;  %v2600_v23 = vsub.f32 0.0, %v6197_v42 }
 0x55d   : > { %v6354_v34 = vpop.eup %4536  ;;  %4542 = vpow2.f32 %v2745_v1  ;;  %v2089_v59 = vadd.f32 -1.4531521, %v2025_v62  ;;  %v6358_v33 = vmul.f32 %v4535_v30, %v2530_v32  ;;  %v2404_v27 = vmul.f32 %v6220_v4, %v2340_v19 }
 0x55e   : > { %v6362_v22 = vmul.f32 0.5, %v6170_v40  ;;  %v6365_v16 = vmul.f32 0.5, %v6174_v57  ;;  %v2405_v45 = vmul.f32 %v6224_v61, %v2341_v60  ;;  %v2343_v18 = vadd.f32 -0.28449672, %v2279_v37 }
 0x55f   : > { %v2278_v9 = vmul.f32 %v6277_v31, %v2214_v54  ;;  %v6370_v53 = vmul.f32 0.70710677, %v6349_v2  ;;  %v6373_v50 = vmul.f32 %v3171_v24, %v6191_v63  ;;  %v2749_v29 = vmul.f32 1.442695, %v2663_v15  ;;  %v7954_v63 = vld [vmem:[#allocation43_spill] sm:$0xff] }
 0x560   : > { %v2280_v1 = vmul.f32 %v6284_v51, %v2216_v6  ;;  %v2027_v40 = vmul.f32 1.0614054, %v6354_v34  ;;  %v2747_v47 = vmul.f32 1.442695, %v2662_v46  ;;  %v2664_v57 = vmul.f32 %v2600_v23, %v6197_v42  ;;  %v4376_v23 = vld [vmem:[#allocation8 + $0xe8] sm:$0xff]  }
 0x561   : > { %7953 = vst [vmem:[#allocation74_spill] sm:$0xff] %v6373_v50  ;;  %v2153_v62 = vmul.f32 %v6322_v25, %v2089_v59  ;;  %v6380_v30 = vand.u32 2147483647, %v6370_v53  ;;  %v2914_v32 = vsub.f32 1.0, %v6358_v33  ;;  %v2468_v19 = vadd.f32 0.2548296, %v2404_v27  ;;  %4108 = vmatprep.subr.bf16.mxu0 %v4376_v23 }
 0x562   : > { %v2601_v35 = vsub.f32 0.0, %v6243_v36  ;;  %v6386_v60 = vadd.f32 %v7954_v63, %v5626_v44  ;;  %vm2978_vm2 = vcmp.ge.f32.partialorder %v6063_v3, 0.0  ;;  %v2469_v37 = vadd.f32 0.2548296, %v2405_v45  ;;  %v4377_v63 = vld [vmem:[#allocation8 + $0xa8] sm:$0xff]  }
 0x563   : > { %v2407_v54 = vmul.f32 %v6254_v20, %v2343_v18  ;;  %v2342_v42 = vadd.f32 -0.28449672, %v2278_v9  ;;  %v1772_v5 = vmul.f32 0.3275911, %v6380_v30  ;;  %4544 = vpow2.f32 %v2749_v29  ;;  %4109 = vmatpush3.bf16.msra.mxu0 %v4377_v63  ;;  %v7959_v3 = vld [vmem:[#allocation34_spill] sm:$0xff] }
 0x564   : > { %v4539_v24 = vpop.eup %4538  ;;  %v2344_v15 = vadd.f32 -0.28449672, %v2280_v1  ;;  %v6392_v6 = vmul.f32 0.5, %v6213_v56  ;;  %v2091_v46 = vadd.f32 -1.4531521, %v2027_v40  ;;  %4546 = vpow2.f32 %v2747_v47 }
 0x565   : > { %v2751_v59 = vmul.f32 1.442695, %v2664_v57  ;;  %v2217_v33 = vadd.f32 1.4214138, %v2153_v62  ;;  %v1836_v27 = vadd.f32 1.0, %v1772_v5  ;;  %v3042_v45 = vsub.f32 0.0, %v2914_v32 }
 0x566   : > { %v6394_v50 = vpop.eup %4540  ;;  %v2532_v18 = vmul.f32 %v6220_v4, %v2468_v19  ;;  %v2665_v9 = vmul.f32 %v2601_v35, %v6243_v36  ;;  %v6399_v29 = vmul.f32 0.70710677, %v6386_v60  ;;  %v2533_v1 = vmul.f32 %v6224_v61, %v2469_v37  ;;  %v7955_v4 = vld [vmem:[#allocation44_spill] sm:$0xff]  ;;  %v6414_v37 = vpop.f32.mrb[24].mxu1 }
 0x567   : > { %v4543_v56 = vpop.eup %4542  ;;  %v2471_v40 = vadd.f32 0.2548296, %v2407_v54  ;;  %v2406_v47 = vmul.f32 %v6277_v31, %v2342_v42  ;;  %v2026_v57 = vmul.f32 1.0614054, %v6394_v50  ;;  %v2408_v62 = vmul.f32 %v6284_v51, %v2344_v15  ;;  %7956 = vst [vmem:[#allocation43_spill] sm:$0xff] %v6414_v37  ;;  %v6416_v54 = vpop.f32.mrb[40].mxu0 }
 0x568   : > { %v2155_v5 = vmul.f32 %v6354_v34, %v2091_v46  ;;  %4548 = vrcp.f32 %v1836_v27  ;;  %v6408_v36 = vadd.f32 %v7955_v4, %v5628_v41  ;;  %v2281_v19 = vmul.f32 %v6322_v25, %v2217_v33  ;;  %7957 = vst [vmem:[#allocation44_spill] sm:$0xff] %v6416_v54 }
 0x569   : > { %4550 = vpow2.f32 %v2751_v59  ;;  %v2090_v35 = vadd.f32 -1.4531521, %v2026_v57  ;;  %v6412_v61 = vand.u32 2147483647, %v6399_v29  ;;  %v6418_v42 = vmul.f32 %v4539_v24, %v2532_v18 }
 0x56a   : > { %v2753_v15 = vmul.f32 1.442695, %v2665_v9  ;;  %v6421_v46 = vmul.f32 0.5, %v6236_v13  ;;  %v2603_v23 = vsub.f32 0.0, %v6266_v10  ;;  %v2853_v27 = vmul.f32 %v4543_v56, %v2533_v1 }
 0x56b   : > { %v2535_v59 = vmul.f32 %v6254_v20, %v2471_v40  ;;  %v2470_v33 = vadd.f32 0.2548296, %v2406_v47  ;;  %v1773_v63 = vmul.f32 0.3275911, %v6412_v61  ;;  %v3106_v57 = vsel %vm2978_vm2, %v2914_v32, %v3042_v45 }
 0x56c   : > { %v2472_v4 = vadd.f32 0.2548296, %v2408_v62  ;;  %v2219_v11 = vadd.f32 1.4214138, %v2155_v5  ;;  %v6429_v24 = vmul.f32 0.70710677, %v6408_v36  ;;  %v2154_v13 = vmul.f32 %v6394_v50, %v2090_v35 }
 0x56d   : > { %v2345_v18 = vadd.f32 -0.28449672, %v2281_v19  ;;  %v1837_v9 = vadd.f32 1.0, %v1773_v63  ;;  %v6434_v56 = vadd.f32 %v7958_v17, %v5630_v43  ;;  %v4545_v20 = vpop.eup %4544  ;;  %v2916_v1 = vsub.f32 1.0, %v6418_v42 }
 0x56e   : > { %vm2980_vm3 = vcmp.ge.f32.partialorder %v6112_v0, 0.0  ;;  %vm2981_vm4 = vcmp.ge.f32.partialorder %v7959_v3, 0.0  ;;  %4552 = vpow2.f32 %v2753_v15  ;;  %v2667_v32 = vmul.f32 %v2603_v23, %v6266_v10  ;;  %v4547_v40 = vpop.eup %4546  ;;  %v6449_v15 = vpop.f32.mrb[25].mxu1 }
 0x56f   : > { %v6441_v45 = vand.u32 2147483647, %v6429_v24  ;;  %v2917_v47 = vsub.f32 1.0, %v2853_v27  ;;  %v6443_v62 = vmul.f32 %v4545_v20, %v2535_v59  ;;  %v2602_v17 = vsub.f32 0.0, %v6326_v12  ;;  %7960 = vst [vmem:[#allocation45_spill] sm:$0xff] %v6449_v15 }
 0x570   : > { %4554 = vrcp.f32 %v1837_v9  ;;  %v3170_v5 = vadd.f32 1.0, %v3106_v57  ;;  %v2534_v19 = vmul.f32 %v6277_v31, %v2470_v33  ;;  %v2283_v35 = vmul.f32 %v6354_v34, %v2219_v11  ;;  %v7961_v31 = vld [vmem:[#allocation48_spill] sm:$0xff] }
 0x571   : > { %v1775_v42 = vmul.f32 0.3275911, %v6441_v45  ;;  %v2536_v10 = vmul.f32 %v6284_v51, %v2472_v4  ;;  %v2409_v23 = vmul.f32 %v6322_v25, %v2345_v18  ;;  %v2218_v63 = vadd.f32 1.4214138, %v2154_v13  ;;  %v4378_v33 = vld [vmem:[#allocation8 + $0x78] sm:$0xff]  }
 0x572   : > { %v6454_v27 = vmul.f32 0.70710677, %v6434_v56  ;;  %v6456_v59 = vpop.eup %4548  ;;  %v3044_v9 = vsub.f32 0.0, %v2916_v1  ;;  %v2757_v57 = vmul.f32 1.442695, %v2667_v32  ;;  %v6460_v11 = vadd.f32 %v7961_v31, %v5647_v52  ;;  %v7962_v4 = vld [vmem:[#allocation36_spill] sm:$0xff]  ;;  %4048 = vmatprep.subr.bf16.mxu1 %v4378_v33 }
 0x573   : > { %v1839_v20 = vadd.f32 1.0, %v1775_v42  ;;  %v4551_v7 = vpop.eup %4550  ;;  %v3045_v15 = vsub.f32 0.0, %v2917_v47  ;;  %v2919_v51 = vsub.f32 1.0, %v6443_v62  ;;  %vm2983_vm5 = vcmp.ge.f32.partialorder %v7962_v4, 0.0 }
 0x574   : > { %v2666_v18 = vmul.f32 %v2602_v17, %v6326_v12  ;;  %v6466_v13 = vand.u32 2147483647, %v6454_v27  ;;  %v6469_v54 = vmul.f32 %v3170_v5, %v6260_v26  ;;  %v6471_v32 = vmul.f32 %v4547_v40, %v2534_v19  ;;  %v7964_v26 = vld [vmem:[#allocation51_spill] sm:$0xff]  ;;  %v6485_v5 = vpop.f32.mrb[41].mxu0 }
 0x575   : > { %v2347_v42 = vadd.f32 -0.28449672, %v2283_v35  ;;  %4556 = vrcp.f32 %v1839_v20  ;;  %v6473_v31 = vmul.f32 %v4551_v7, %v2536_v10  ;;  %v2473_v37 = vadd.f32 0.2548296, %v2409_v23  ;;  %7965 = vst [vmem:[#allocation48_spill] sm:$0xff] %v6485_v5 }
 0x576   : > { %7963 = vst [vmem:[#allocation34_spill] sm:$0xff] %v6469_v54  ;;  %v2282_v62 = vmul.f32 %v6394_v50, %v2218_v63  ;;  %v2028_v28 = vmul.f32 1.0614054, %v6456_v59  ;;  %4558 = vpow2.f32 %v2757_v57  ;;  %v1774_v12 = vmul.f32 0.3275911, %v6466_v13 }
 0x577   : > { %v6479_v17 = vmul.f32 0.70710677, %v6460_v11  ;;  %v6483_v40 = vadd.f32 %v7964_v26, %v5626_v44  ;;  %v3108_v7 = vsel %vm2980_vm3, %v2916_v1, %v3044_v9  ;;  %v3109_v19 = vsel %vm2981_vm4, %v2917_v47, %v3045_v15  ;;  %v7966_v1 = vld [vmem:[#allocation37_spill] sm:$0xff] }
 0x578   : > { %v3047_v35 = vsub.f32 0.0, %v2919_v51  ;;  %v2755_v10 = vmul.f32 1.442695, %v2666_v18  ;;  %v4553_v23 = vpop.eup %4552  ;;  %v2918_v63 = vsub.f32 1.0, %v6471_v32  ;;  %vm2982_vm6 = vcmp.ge.f32.partialorder %v6183_v8, 0.0 }
 0x579   : > { %v2411_v57 = vmul.f32 %v6354_v34, %v2347_v42  ;;  %v1838_v20 = vadd.f32 1.0, %v1774_v12  ;;  %v6495_v33 = vand.u32 2147483647, %v6479_v17  ;;  %v2920_v0 = vsub.f32 1.0, %v6473_v31  ;;  %v4380_v42 = vld [vmem:[#allocation8 + $0xf0] sm:$0xff]  }
 0x57a   : > { %v6497_v26 = vpop.eup %4554  ;;  %vm2984_vm7 = vcmp.ge.f32.partialorder %v7966_v1, 0.0  ;;  %v2537_v3 = vmul.f32 %v6322_v25, %v2473_v37  ;;  %v2346_v47 = vadd.f32 -0.28449672, %v2282_v62  ;;  %v6503_v15 = vmul.f32 0.70710677, %v6483_v40  ;;  %4110 = vmatprep.subr.bf16.mxu0 %v4380_v42 }
 0x57b   : > { %v6506_v9 = vmul.f32 0.5, %v6298_v14  ;;  %v2092_v18 = vadd.f32 -1.4531521, %v2028_v28  ;;  %4560 = vrcp.f32 %v1838_v20  ;;  %v1776_v32 = vmul.f32 0.3275911, %v6495_v33  ;;  %v6515_v14 = vpop.f32.mrb[26].mxu1 }
 0x57c   : > { %7967 = vst [vmem:[#allocation36_spill] sm:$0xff] %v6503_v15  ;;  %v3172_v12 = vadd.f32 1.0, %v3108_v7  ;;  %v3173_v54 = vadd.f32 1.0, %v3109_v19  ;;  %v2029_v31 = vmul.f32 1.0614054, %v6497_v26  ;;  %v3111_v25 = vsel %vm2983_vm5, %v2919_v51, %v3047_v35  ;;  %7968 = vst [vmem:[#allocation51_spill] sm:$0xff] %v6515_v14 }
 0x57d   : > { %v6511_v5 = vand.u32 2147483647, %v6503_v15  ;;  %v2475_v37 = vadd.f32 0.2548296, %v2411_v57  ;;  %4562 = vpow2.f32 %v2755_v10  ;;  %v1840_v62 = vadd.f32 1.0, %v1776_v32  ;;  %v7969_v51 = vld [vmem:[#allocation52_spill] sm:$0xff] }
 0x57e   : > { %v3046_v28 = vsub.f32 0.0, %v2918_v63  ;;  %v3048_v20 = vsub.f32 0.0, %v2920_v0  ;;  %v6517_v58 = vmul.f32 %v4553_v23, %v2537_v3  ;;  %v2410_v21 = vmul.f32 %v6394_v50, %v2346_v47  ;;  %v4379_v35 = vld [vmem:[#allocation8 + $0x38] sm:$0xff]  }
 0x57f   : > { %v1777_v7 = vmul.f32 0.3275911, %v6511_v5  ;;  %v6520_v19 = vpop.eup %4556  ;;  %v2156_v15 = vmul.f32 %v6456_v59, %v2092_v18  ;;  %4564 = vrcp.f32 %v1840_v62  ;;  %v6526_v4 = vadd.f32 %v7969_v51, %v5628_v41  ;;  %4049 = vmatpush3.bf16.msra.mxu1 %v4379_v35  ;;  %v6565_v35 = vpop.f32.mrb[42].mxu0 }
 0x580   : > { %v2604_v10 = vsub.f32 0.0, %v6380_v30  ;;  %v2093_v57 = vadd.f32 -1.4531521, %v2029_v31  ;;  %v2031_v23 = vmul.f32 1.0614054, %v6520_v19  ;;  %v4559_v32 = vpop.eup %4558  ;;  %v6531_v42 = vmul.f32 %v3172_v12, %v6282_v55  ;;  %v4704_v55 = vld [vmem:[#allocation8 + $0xc0] sm:$0xff]  }
 0x581   : > { %v1841_v3 = vadd.f32 1.0, %v1777_v7  ;;  %v6534_v47 = vmul.f32 %v3173_v54, %v6306_v48  ;;  %v2539_v18 = vmul.f32 %v6354_v34, %v2475_v37  ;;  %v6538_v62 = vmul.f32 0.5, %v6349_v2  ;;  %4194 = vmatprep.subr.bf16.mxu1 %v4704_v55 }
 0x582   : > { %7970 = vst [vmem:[#allocation37_spill] sm:$0xff] %v6531_v42  ;;  %v3175_v51 = vadd.f32 1.0, %v3111_v25  ;;  %v3110_v31 = vsel %vm2982_vm6, %v2918_v63, %v3046_v28  ;;  %v2921_v14 = vsub.f32 1.0, %v6517_v58  ;;  %vm2985_vm8 = vcmp.ge.f32.partialorder %v6230_v38, 0.0  ;;  %v7972_v58 = vld [vmem:[#allocation53_spill] sm:$0xff] }
 0x583   : > { %7971 = vst [vmem:[#allocation52_spill] sm:$0xff] %v6534_v47  ;;  %4566 = vrcp.f32 %v1841_v3  ;;  %v3112_v48 = vsel %vm2984_vm7, %v2920_v0, %v3048_v20  ;;  %v2474_v54 = vadd.f32 0.2548296, %v2410_v21  ;;  %v2220_v34 = vadd.f32 1.4214138, %v2156_v15  ;;  %7973 = vst [vmem:[#allocation53_spill] sm:$0xff] %v6565_v35 }
 0x584   : > { %v6547_v2 = vmul.f32 0.70710677, %v6526_v4  ;;  %v2668_v12 = vmul.f32 %v2604_v10, %v6380_v30  ;;  %v2157_v8 = vmul.f32 %v6497_v26, %v2093_v57  ;;  %v2095_v63 = vadd.f32 -1.4531521, %v2031_v23 }
 0x585   : > { %v6553_v25 = vadd.f32 %v7972_v58, %v5630_v43  ;;  %v6555_v37 = vpop.eup %4560  ;;  %v3174_v28 = vadd.f32 1.0, %v3110_v31  ;;  %v2859_v7 = vmul.f32 %v4559_v32, %v2539_v18  ;;  %v6558_v0 = vmul.f32 0.5, %v6386_v60  ;;  %v7975_v18 = vld [vmem:[#allocation40_spill] sm:$0xff] }
 0x586   : > { %v6561_v21 = vand.u32 2147483647, %v6547_v2  ;;  %v3176_v1 = vadd.f32 1.0, %v3112_v48  ;;  %v3049_v15 = vsub.f32 0.0, %v2921_v14  ;;  %v2605_v30 = vsub.f32 0.0, %v6412_v61 }
 0x587   : > { %v2030_v20 = vmul.f32 1.0614054, %v6555_v37  ;;  %v4563_v10 = vpop.eup %4562  ;;  %v2538_v57 = vmul.f32 %v6394_v50, %v2474_v54  ;;  %v2284_v23 = vmul.f32 %v6456_v59, %v2220_v34  ;;  %v6571_v60 = vmul.f32 0.70710677, %v6553_v25 }
 0x588   : > { %v1779_v3 = vmul.f32 0.3275911, %v6561_v21  ;;  %v6574_v32 = vmul.f32 %v3175_v51, %v6330_v39  ;;  %vm2987_vm9 = vcmp.ge.f32.partialorder %v7975_v18, 0.0  ;;  %v2759_v31 = vmul.f32 1.442695, %v2668_v12 }
 0x589   : > { %v2221_v55 = vadd.f32 1.4214138, %v2157_v8  ;;  %v2159_v48 = vmul.f32 %v6520_v19, %v2095_v63  ;;  %v6578_v58 = vpop.eup %4564  ;;  %v2923_v47 = vsub.f32 1.0, %v2859_v7  ;;  %v2094_v50 = vadd.f32 -1.4531521, %v2030_v20  ;;  %v4381_v8 = vld [vmem:[#allocation8 + $0xb0] sm:$0xff]  }
 0x58a   : > { %7974 = vst [vmem:[#allocation75_spill] sm:$0xff] %v6574_v32  ;;  %v1843_v54 = vadd.f32 1.0, %v1779_v3  ;;  %v6581_v34 = vand.u32 2147483647, %v6571_v60  ;;  %v6584_v42 = vmul.f32 %v3174_v28, %v6362_v22  ;;  %v6587_v39 = vmul.f32 %v3176_v1, %v6365_v16  ;;  %4111 = vmatpush3.bf16.msra.mxu0 %v4381_v8 }
 0x58b   : > { %v2669_v51 = vmul.f32 %v2605_v30, %v6412_v61  ;;  %v2032_v12 = vmul.f32 1.0614054, %v6578_v58  ;;  %v3113_v63 = vsel %vm2985_vm8, %v2921_v14, %v3049_v15  ;;  %v2858_v7 = vmul.f32 %v4563_v10, %v2538_v57  ;;  %v6600_v14 = vpop.f32.mrb[27].mxu1  ;;  %v7979_v57 = vld [vmem:[#allocation56_spill] sm:$0xff] }
 0x58c   : > { %7976 = vst [vmem:[#allocation40_spill] sm:$0xff] %v6584_v42  ;;  %7977 = vst [vmem:[#allocation76_spill] sm:$0xff] %v6587_v39  ;;  %v2348_v20 = vadd.f32 -0.28449672, %v2284_v23  ;;  %v1778_v3 = vmul.f32 0.3275911, %v6581_v34  ;;  %v2285_v22 = vmul.f32 %v6497_v26, %v2221_v55  ;;  %4568 = vrcp.f32 %v1843_v54 }
 0x58d   : > { %v6594_v32 = vpop.eup %4566  ;;  %v2223_v28 = vadd.f32 1.4214138, %v2159_v48  ;;  %v2607_v16 = vsub.f32 0.0, %v6441_v45  ;;  %v3051_v61 = vsub.f32 0.0, %v2923_v47  ;;  %4570 = vpow2.f32 %v2759_v31  ;;  %7978 = vst [vmem:[#allocation77_spill] sm:$0xff] %v6600_v14 }
 0x58e   : > { %v2158_v1 = vmul.f32 %v6555_v37, %v2094_v50  ;;  %v2033_v38 = vmul.f32 1.0614054, %v6594_v32  ;;  %vm2986_vm10 = vcmp.ge.f32.partialorder %v6313_v49, 0.0  ;;  %v2761_v15 = vmul.f32 1.442695, %v2669_v51 }
 0x58f   : > { %v2096_v30 = vadd.f32 -1.4531521, %v2032_v12  ;;  %v1842_v10 = vadd.f32 1.0, %v1778_v3  ;;  %v6605_v23 = vadd.f32 %v7979_v57, %v5647_v52  ;;  %v3177_v55 = vadd.f32 1.0, %v3113_v63  ;;  %v6636_v57 = vpop.f32.mrb[43].mxu0 }
 0x590   : > { %v2922_v48 = vsub.f32 1.0, %v2858_v7  ;;  %v2412_v54 = vmul.f32 %v6456_v59, %v2348_v20  ;;  %v2097_v31 = vadd.f32 -1.4531521, %v2033_v38  ;;  %v2349_v8 = vadd.f32 -0.28449672, %v2285_v22  ;;  %7981 = vst [vmem:[#allocation78_spill] sm:$0xff] %v6636_v57 }
 0x591   : > { %v2287_v50 = vmul.f32 %v6520_v19, %v2223_v28  ;;  %v2671_v39 = vmul.f32 %v2607_v16, %v6441_v45  ;;  %4572 = vrcp.f32 %v1842_v10  ;;  %v3115_v51 = vsel %vm2987_vm9, %v2923_v47, %v3051_v61 }
 0x592   : > { %v6613_v12 = vmul.f32 0.5, %v6408_v36  ;;  %v6616_v3 = vmul.f32 0.5, %v6434_v56  ;;  %v2222_v63 = vadd.f32 1.4214138, %v2158_v1  ;;  %v2606_v7 = vsub.f32 0.0, %v6466_v13 }
 0x593   : > { %v2160_v20 = vmul.f32 %v6578_v58, %v2096_v30  ;;  %v2608_v22 = vsub.f32 0.0, %v6495_v33  ;;  %v6622_v28 = vmul.f32 0.70710677, %v6605_v23  ;;  %v3050_v45 = vsub.f32 0.0, %v2922_v48 }
 0x594   : > { %v2476_v16 = vadd.f32 0.2548296, %v2412_v54  ;;  %4574 = vpow2.f32 %v2761_v15  ;;  %v2161_v47 = vmul.f32 %v6594_v32, %v2097_v31  ;;  %v6626_v36 = vmul.f32 %v3177_v55, %v6392_v6 }
 0x595   : > { %v2413_v56 = vmul.f32 %v6497_v26, %v2349_v8  ;;  %v2351_v18 = vadd.f32 -0.28449672, %v2287_v50  ;;  %v2765_v61 = vmul.f32 1.442695, %v2671_v39  ;;  %v3179_v1 = vadd.f32 1.0, %v3115_v51 }
 0x596   : > { %7980 = vst [vmem:[#allocation56_spill] sm:$0xff] %v6626_v36  ;;  %v2286_v38 = vmul.f32 %v6555_v37, %v2222_v63  ;;  %v6631_v30 = vmul.f32 0.5, %v6460_v11  ;;  %v6634_v10 = vand.u32 2147483647, %v6622_v28  ;;  %v6638_v15 = vpop.eup %4568  ;;  %v2670_v6 = vmul.f32 %v2606_v7, %v6466_v13 }
 0x597   : > { %v2224_v55 = vadd.f32 1.4214138, %v2160_v20  ;;  %v2672_v54 = vmul.f32 %v2608_v22, %v6495_v33  ;;  %v2609_v39 = vsub.f32 0.0, %v6511_v5  ;;  %v4571_v31 = vpop.eup %4570  ;;  %v3114_v8 = vsel %vm2986_vm10, %v2922_v48, %v3050_v45  ;;  %v7982_v22 = vld [vmem:[#allocation57_spill] sm:$0xff]  ;;  %v4382_v48 = vld [vmem:[#allocation8 + $0xf8] sm:$0xff]  }
 0x598   : > { %v2540_v11 = vmul.f32 %v6456_v59, %v2476_v16  ;;  %v2225_v50 = vadd.f32 1.4214138, %v2161_v47  ;;  %v1780_v51 = vmul.f32 0.3275911, %v6634_v10  ;;  %v2477_v63 = vadd.f32 0.2548296, %v2413_v56  ;;  %4112 = vmatprep.subr.bf16.mxu0 %v4382_v48 }
 0x599   : > { %v2415_v36 = vmul.f32 %v6520_v19, %v2351_v18  ;;  %4576 = vpow2.f32 %v2765_v61  ;;  %v6649_v13 = vmul.f32 0.5, %v6483_v40  ;;  %v2350_v7 = vadd.f32 -0.28449672, %v2286_v38  ;;  %v4383_v18 = vld [vmem:[#allocation8 + $0xb8] sm:$0xff]  }
 0x59a   : > { %v2035_v33 = vmul.f32 1.0614054, %v6638_v15  ;;  %v1844_v20 = vadd.f32 1.0, %v1780_v51  ;;  %v6654_v49 = vadd.f32 %v7982_v22, %v5626_v44  ;;  %v3178_v45 = vadd.f32 1.0, %v3114_v8  ;;  %v7983_v8 = vld [vmem:[#allocation61_spill] sm:$0xff]  ;;  %4113 = vmatpush3.bf16.msra.mxu0 %v4383_v18 }
 0x59b   : > { %v6656_v59 = vpop.eup %4572  ;;  %v2763_v16 = vmul.f32 1.442695, %v2670_v6  ;;  %v2288_v47 = vmul.f32 %v6578_v58, %v2224_v55  ;;  %v2767_v56 = vmul.f32 1.442695, %v2672_v54  ;;  %v6659_v61 = vmul.f32 %v4571_v31, %v2540_v11 }
 0x59c   : > { %v2289_v40 = vmul.f32 %v6594_v32, %v2225_v50  ;;  %v2673_v38 = vmul.f32 %v2609_v39, %v6511_v5  ;;  %v2034_v51 = vmul.f32 1.0614054, %v6656_v59  ;;  %v2541_v22 = vmul.f32 %v6497_v26, %v2477_v63  ;;  %v6677_v50 = vpop.f32.mrb[28].mxu1  ;;  %v6679_v63 = vpop.f32.mrb[44].mxu0 }
 0x59d   : > { %v2479_v42 = vadd.f32 0.2548296, %v2415_v36  ;;  %4578 = vrcp.f32 %v1844_v20  ;;  %v6667_v6 = vadd.f32 %v7983_v8, %v5628_v41  ;;  %v2414_v54 = vmul.f32 %v6555_v37, %v2350_v7  ;;  %7985 = vst [vmem:[#allocation61_spill] sm:$0xff] %v6677_v50  ;;  %7986 = vst [vmem:[#allocation79_spill] sm:$0xff] %v6679_v63 }
 0x59e   : > { %v4575_v55 = vpop.eup %4574  ;;  %v2099_v31 = vadd.f32 -1.4531521, %v2035_v33  ;;  %v2611_v11 = vsub.f32 0.0, %v6561_v21  ;;  %v6672_v5 = vmul.f32 0.70710677, %v6654_v49  ;;  %v6675_v39 = vmul.f32 %v3179_v1, %v6421_v46 }
 0x59f   : > { %4580 = vpow2.f32 %v2763_v16  ;;  %v2352_v26 = vadd.f32 -0.28449672, %v2288_v47  ;;  %v2098_v36 = vadd.f32 -1.4531521, %v2034_v51  ;;  %v2924_v20 = vsub.f32 1.0, %v6659_v61 }
 0x5a0   : > { %7984 = vst [vmem:[#allocation57_spill] sm:$0xff] %v6675_v39  ;;  %vm2988_vm11 = vcmp.ge.f32.partialorder %v6370_v53, 0.0  ;;  %4582 = vpow2.f32 %v2767_v56  ;;  %v2353_v7 = vadd.f32 -0.28449672, %v2289_v40  ;;  %v2769_v33 = vmul.f32 1.442695, %v2673_v38 }
 0x5a1   : > { %v2861_v48 = vmul.f32 %v4575_v55, %v2541_v22  ;;  %v2543_v18 = vmul.f32 %v6520_v19, %v2479_v42  ;;  %v6685_v46 = vand.u32 2147483647, %v6672_v5  ;;  %v6688_v1 = vmul.f32 0.70710677, %v6667_v6  ;;  %v7989_v53 = vld [vmem:[#allocation64_spill] sm:$0xff] }
 0x5a2   : > { %v2478_v16 = vadd.f32 0.2548296, %v2414_v54  ;;  %v6691_v47 = vmul.f32 0.5, %v6526_v4  ;;  %v2163_v61 = vmul.f32 %v6638_v15, %v2099_v31  ;;  %v2675_v51 = vmul.f32 %v2611_v11, %v6561_v21 }
 0x5a3   : > { %v4577_v56 = vpop.eup %4576  ;;  %v2416_v40 = vmul.f32 %v6578_v58, %v2352_v26  ;;  %v2162_v38 = vmul.f32 %v6656_v59, %v2098_v36  ;;  %v1781_v19 = vmul.f32 0.3275911, %v6685_v46  ;;  %v6699_v42 = vand.u32 2147483647, %v6688_v1 }
 0x5a4   : > { %v6702_v22 = vmul.f32 %v3178_v45, %v6506_v9  ;;  %v3052_v8 = vsub.f32 0.0, %v2924_v20  ;;  %vm2989_vm12 = vcmp.ge.f32.partialorder %v6399_v29, 0.0  ;;  %v2417_v4 = vmul.f32 %v6594_v32, %v2353_v7 }
 0x5a5   : > { %4584 = vpow2.f32 %v2769_v33  ;;  %v2925_v21 = vsub.f32 1.0, %v2861_v48  ;;  %v2863_v55 = vmul.f32 %v4577_v56, %v2543_v18  ;;  %v1845_v54 = vadd.f32 1.0, %v1781_v19 }
 0x5a6   : > { %7987 = vst [vmem:[#allocation80_spill] sm:$0xff] %v6702_v22  ;;  %v1783_v31 = vmul.f32 0.3275911, %v6699_v42  ;;  %v2542_v11 = vmul.f32 %v6555_v37, %v2478_v16  ;;  %v2227_v26 = vadd.f32 1.4214138, %v2163_v61  ;;  %v6709_v39 = vmul.f32 0.5, %v6553_v25 }
 0x5a7   : > { %v2773_v36 = vmul.f32 1.442695, %v2675_v51  ;;  %v6711_v9 = vpop.eup %4578  ;;  %v2480_v45 = vadd.f32 0.2548296, %v2416_v40  ;;  %v2226_v22 = vadd.f32 1.4214138, %v2162_v38  ;;  %4586 = vrcp.f32 %v1845_v54 }
 0x5a8   : > { %v1847_v63 = vadd.f32 1.0, %v1783_v31  ;;  %vm2991_vm13 = vcmp.ge.f32.partialorder %v6429_v24, 0.0  ;;  %v2481_v7 = vadd.f32 0.2548296, %v2417_v4  ;;  %v2610_v33 = vsub.f32 0.0, %v6581_v34  ;;  %v7988_v51 = vld [vmem:[#allocation62_spill] sm:$0xff] }
 0x5a9   : > { %v6716_v48 = vmul.f32 0.5, %v6605_v23  ;;  %v2036_v37 = vmul.f32 1.0614054, %v6711_v9  ;;  %v4581_v18 = vpop.eup %4580  ;;  %v3116_v25 = vsel %vm2988_vm11, %v2924_v20, %v3052_v8  ;;  %v3053_v16 = vsub.f32 0.0, %v2925_v21 }
 0x5aa   : > { %v2927_v61 = vsub.f32 1.0, %v2863_v55  ;;  %v6723_v56 = vadd.f32 %v7988_v51, %v5630_v43  ;;  %v4583_v40 = vpop.eup %4582  ;;  %v2862_v38 = vmul.f32 %v4581_v18, %v2542_v11  ;;  %v2291_v19 = vmul.f32 %v6638_v15, %v2227_v26  ;;  %v6747_v18 = vpop.f32.mrb[45].mxu0 }
 0x5ab   : > { %v2100_v4 = vadd.f32 -1.4531521, %v2036_v37  ;;  %4588 = vrcp.f32 %v1847_v63  ;;  %v2544_v23 = vmul.f32 %v6578_v58, %v2480_v45  ;;  %v2290_v54 = vmul.f32 %v6656_v59, %v2226_v22  ;;  %v6738_v37 = vpop.f32.mrb[29].mxu1  ;;  %7991 = vst [vmem:[#allocation64_spill] sm:$0xff] %v6747_v18 }
 0x5ac   : > { %v6729_v31 = vmul.f32 0.70710677, %v6723_v56  ;;  %v6733_v20 = vadd.f32 %v7989_v53, %v5647_v52  ;;  %v3180_v8 = vadd.f32 1.0, %v3116_v25  ;;  %v2545_v55 = vmul.f32 %v6594_v32, %v2481_v7  ;;  %7990 = vst [vmem:[#allocation62_spill] sm:$0xff] %v6738_v37  ;;  %v7992_v25 = vld [vmem:[#allocation35_spill] sm:$0xff]  ;;  %v6785_v57 = vpop.f32.mrb[30].mxu1 }
 0x5ad   : > { %v2674_v11 = vmul.f32 %v2610_v33, %v6581_v34  ;;  %v2164_v26 = vmul.f32 %v6711_v9, %v2100_v4  ;;  %v3117_v58 = vsel %vm2989_vm12, %v2925_v21, %v3053_v16  ;;  %v3055_v63 = vsub.f32 0.0, %v2927_v61 }
 0x5ae   : > { %vm2990_vm14 = vcmp.ge.f32.partialorder %v6454_v27, 0.0  ;;  %v2612_v22 = vsub.f32 0.0, %v6634_v10  ;;  %v6745_v45 = vand.u32 2147483647, %v6729_v31  ;;  %v2926_v7 = vsub.f32 1.0, %v2862_v38 }
 0x5af   : > { %v4585_v32 = vpop.eup %4584  ;;  %v2355_v34 = vadd.f32 -0.28449672, %v2291_v19  ;;  %v6750_v33 = vmul.f32 0.70710677, %v6733_v20  ;;  %v6754_v29 = vadd.f32 %v7992_v25, %v5626_v44  ;;  %v2864_v21 = vmul.f32 %v4583_v40, %v2544_v23 }
 0x5b0   : > { %4590 = vpow2.f32 %v2773_v36  ;;  %v2354_v16 = vadd.f32 -0.28449672, %v2290_v54  ;;  %v1782_v51 = vmul.f32 0.3275911, %v6745_v45  ;;  %v2865_v4 = vmul.f32 %v4585_v32, %v2545_v55 }
 0x5b1   : > { %v2771_v53 = vmul.f32 1.442695, %v2674_v11  ;;  %v2228_v37 = vadd.f32 1.4214138, %v2164_v26  ;;  %v6758_v18 = vand.u32 2147483647, %v6750_v33  ;;  %v6760_v38 = vpop.eup %4586  ;;  %v3119_v50 = vsel %vm2991_vm13, %v2927_v61, %v3055_v63 }
 0x5b2   : > { %v6762_v19 = vadd.f32 1.0, %v3117_v58  ;;  %v2676_v25 = vmul.f32 %v2612_v22, %v6634_v10  ;;  %v1846_v40 = vadd.f32 1.0, %v1782_v51  ;;  %v3054_v36 = vsub.f32 0.0, %v2926_v7  ;;  %v7993_v26 = vld [vmem:[#allocation36_spill] sm:$0xff] }
 0x5b3   : > { %vm2992_vm15 = vcmp.ge.f32.partialorder %v6479_v17, 0.0  ;;  %v2419_v23 = vmul.f32 %v6638_v15, %v2355_v34  ;;  %v2037_v54 = vmul.f32 1.0614054, %v6760_v38  ;;  %v6771_v55 = vmul.f32 0.70710677, %v6754_v29  ;;  %7995 = vst [vmem:[#allocation36_spill] sm:$0xff] %v6785_v57 }
 0x5b4   : > { %v2928_v11 = vsub.f32 1.0, %v2864_v21  ;;  %vm2993_vm0 = vcmp.ge.f32.partialorder %v7993_v26, 0.0  ;;  %v2418_v58 = vmul.f32 %v6656_v59, %v2354_v16  ;;  %4592 = vrcp.f32 %v1846_v40 }
 0x5b5   : > { %v1784_v24 = vmul.f32 0.3275911, %v6758_v18  ;;  %v6776_v10 = vpop.eup %4588  ;;  %v6778_v61 = vadd.f32 1.0, %v3119_v50  ;;  %v2929_v63 = vsub.f32 1.0, %v2865_v4  ;;  %4594 = vpow2.f32 %v2771_v53 }
 0x5b6   : > { %v2292_v22 = vmul.f32 %v6711_v9, %v2228_v37  ;;  %v6782_v32 = vmul.f32 %v3180_v8, %v6538_v62  ;;  %v2101_v34 = vadd.f32 -1.4531521, %v2037_v54  ;;  %v2039_v21 = vmul.f32 1.0614054, %v6776_v10 }
 0x5b7   : > { %v1848_v51 = vadd.f32 1.0, %v1784_v24  ;;  %v3118_v16 = vsel %vm2990_vm14, %v2926_v7, %v3054_v36  ;;  %v2483_v40 = vadd.f32 0.2548296, %v2419_v23  ;;  %v2775_v14 = vmul.f32 1.442695, %v2676_v25  ;;  %v7996_v36 = vld [vmem:[#allocation65_spill] sm:$0xff] }
 0x5b8   : > { %7994 = vst [vmem:[#allocation35_spill] sm:$0xff] %v6782_v32  ;;  %v6790_v50 = vand.u32 2147483647, %v6771_v55  ;;  %v3056_v4 = vsub.f32 0.0, %v2928_v11  ;;  %v2482_v53 = vadd.f32 0.2548296, %v2418_v58  ;;  %v2165_v27 = vmul.f32 %v6760_v38, %v2101_v34 }
 0x5b9   : > { %v2103_v37 = vadd.f32 -1.4531521, %v2039_v21  ;;  %4596 = vrcp.f32 %v1848_v51  ;;  %v3057_v62 = vsub.f32 0.0, %v2929_v63  ;;  %v2356_v8 = vadd.f32 -0.28449672, %v2292_v22 }
 0x5ba   : > { %v6793_v54 = vmul.f32 0.5, %v6654_v49  ;;  %v1785_v24 = vmul.f32 0.3275911, %v6790_v50  ;;  %v4591_v32 = vpop.eup %4590  ;;  %v6798_v7 = vmul.f32 0.5, %v6667_v6  ;;  %v6803_v23 = vadd.f32 %v7996_v36, %v5628_v41  ;;  %v7997_v49 = vld [vmem:[#allocation66_spill] sm:$0xff]  ;;  %v6817_v36 = vpop.f32.mrb[46].mxu0 }
 0x5bb   : > { %v2167_v25 = vmul.f32 %v6776_v10, %v2103_v37  ;;  %v3182_v58 = vadd.f32 1.0, %v3118_v16  ;;  %v2547_v22 = vmul.f32 %v6638_v15, %v2483_v40  ;;  %v6808_v51 = vadd.f32 %v7997_v49, %v5630_v43  ;;  %7999 = vst [vmem:[#allocation66_spill] sm:$0xff] %v6817_v36 }
 0x5bc   : > { %v1849_v21 = vadd.f32 1.0, %v1785_v24  ;;  %v3120_v34 = vsel %vm2992_vm15, %v2928_v11, %v3056_v4  ;;  %v2546_v6 = vmul.f32 %v6656_v59, %v2482_v53  ;;  %v2613_v57 = vsub.f32 0.0, %v6685_v46 }
 0x5bd   : > { %v6815_v37 = vmul.f32 0.70710677, %v6803_v23  ;;  %v3121_v15 = vsel %vm2993_vm0, %v2929_v63, %v3057_v62  ;;  %v2420_v16 = vmul.f32 %v6711_v9, %v2356_v8  ;;  %v2615_v40 = vsub.f32 0.0, %v6699_v42 }
 0x5be   : > { %4598 = vrcp.f32 %v1849_v21  ;;  %v6823_v24 = vpop.eup %4592  ;;  %v2229_v17 = vadd.f32 1.4214138, %v2165_v27  ;;  %v2231_v59 = vadd.f32 1.4214138, %v2167_v25  ;;  %v3184_v53 = vadd.f32 1.0, %v3120_v34 }
 0x5bf   : > { %7998 = vst [vmem:[#allocation65_spill] sm:$0xff] %v6815_v37  ;;  %4600 = vpow2.f32 %v2775_v14  ;;  %v6826_v11 = vand.u32 2147483647, %v6815_v37  ;;  %v4595_v4 = vpop.eup %4594  ;;  %v2867_v49 = vmul.f32 %v4591_v32, %v2547_v22  ;;  %v2038_v36 = vmul.f32 1.0614054, %v6823_v24 }
 0x5c0   : > { %v6830_v26 = vmul.f32 0.70710677, %v6808_v51  ;;  %v3185_v63 = vadd.f32 1.0, %v3121_v15  ;;  %v2866_v62 = vmul.f32 %v4595_v4, %v2546_v6  ;;  %v2677_v8 = vmul.f32 %v2613_v57, %v6685_v46 }
 0x5c1   : > { %v1787_v21 = vmul.f32 0.3275911, %v6826_v11  ;;  %v6836_v14 = vmul.f32 %v6762_v19, %v6558_v0  ;;  %v2484_v27 = vadd.f32 0.2548296, %v2420_v16  ;;  %v2102_v25 = vadd.f32 -1.4531521, %v2038_v36 }
 0x5c2   : > { %8000 = vst [vmem:[#allocation81_spill] sm:$0xff] %v6830_v26  ;;  %v6839_v34 = vand.u32 2147483647, %v6830_v26  ;;  %vm2995_vm1 = vcmp.ge.f32.partialorder %v6547_v2, 0.0  ;;  %v2293_v22 = vmul.f32 %v6760_v38, %v2229_v17  ;;  %v2295_v6 = vmul.f32 %v6776_v10, %v2231_v59  ;;  %v6850_v16 = vpop.f32.mrb[31].mxu1 }
 0x5c3   : > { %8001 = vst [vmem:[#allocation82_spill] sm:$0xff] %v6836_v14  ;;  %v6841_v32 = vpop.eup %4596  ;;  %v2679_v57 = vmul.f32 %v2615_v40, %v6699_v42  ;;  %v1851_v46 = vadd.f32 1.0, %v1787_v21  ;;  %v2931_v15 = vsub.f32 1.0, %v2867_v49  ;;  %v2166_v0 = vmul.f32 %v6823_v24, %v2102_v25  ;;  %8002 = vst [vmem:[#allocation83_spill] sm:$0xff] %v6850_v16 }
 0x5c4   : > { %v2040_v19 = vmul.f32 1.0614054, %v6841_v32  ;;  %v1786_v36 = vmul.f32 0.3275911, %v6839_v34  ;;  %v2930_v4 = vsub.f32 1.0, %v2866_v62  ;;  %vm2994_vm2 = vcmp.ge.f32.partialorder %v6571_v60, 0.0 }
 0x5c5   : > { %v2777_v14 = vmul.f32 1.442695, %v2677_v8  ;;  %v2614_v17 = vsub.f32 0.0, %v6745_v45  ;;  %4602 = vrcp.f32 %v1851_v46  ;;  %v2548_v59 = vmul.f32 %v6711_v9, %v2484_v27  ;;  %v8003_v46 = vld [vmem:[#allocation38_spill] sm:$0xff] }
 0x5c6   : > { %v2230_v42 = vadd.f32 1.4214138, %v2166_v0  ;;  %v2104_v40 = vadd.f32 -1.4531521, %v2040_v19  ;;  %v1850_v49 = vadd.f32 1.0, %v1786_v36  ;;  %v6857_v21 = vmul.f32 %v6778_v61, %v6613_v12 }
 0x5c7   : > { %v2357_v25 = vadd.f32 -0.28449672, %v2293_v22  ;;  %v2359_v35 = vadd.f32 -0.28449672, %v2295_v6  ;;  %v2781_v26 = vmul.f32 1.442695, %v2679_v57  ;;  %v6864_v37 = vadd.f32 %v8003_v46, %v5647_v52 }
 0x5c8   : > { %v6859_v16 = vpop.eup %4598  ;;  %v3059_v62 = vsub.f32 0.0, %v2931_v15  ;;  %v2168_v8 = vmul.f32 %v6841_v32, %v2104_v40  ;;  %4604 = vrcp.f32 %v1850_v49  ;;  %v6867_v27 = vmul.f32 %v3182_v58, %v6616_v3  ;;  %v6880_v58 = vpop.f32.mrb[47].mxu0 }
 0x5c9   : > { %v4601_v9 = vpop.eup %4600  ;;  %v6870_v12 = vmul.f32 %v3184_v53, %v6631_v30  ;;  %v2678_v61 = vmul.f32 %v2614_v17, %v6745_v45  ;;  %v2041_v22 = vmul.f32 1.0614054, %v6859_v16  ;;  %v3058_v6 = vsub.f32 0.0, %v2930_v4 }
 0x5ca   : > { %v2868_v57 = vmul.f32 %v4601_v9, %v2548_v59  ;;  %4606 = vpow2.f32 %v2777_v14  ;;  %v2294_v0 = vmul.f32 %v6823_v24, %v2230_v42  ;;  %v6876_v19 = vmul.f32 %v3185_v63, %v6649_v13 }
 0x5cb   : > { %v2421_v36 = vmul.f32 %v6760_v38, %v2357_v25  ;;  %v2423_v3 = vmul.f32 %v6776_v10, %v2359_v35  ;;  %4608 = vpow2.f32 %v2781_v26  ;;  %v3123_v30 = vsel %vm2995_vm1, %v2931_v15, %v3059_v62  ;;  %v8005_v62 = vld [vmem:[#allocation67_spill] sm:$0xff] }
 0x5cc   : > { %8004 = vst [vmem:[#allocation38_spill] sm:$0xff] %v6876_v19  ;;  %v2232_v45 = vadd.f32 1.4214138, %v2168_v8  ;;  %v2105_v53 = vadd.f32 -1.4531521, %v2041_v22  ;;  %v6888_v14 = vmul.f32 0.5, %v6723_v56  ;;  %v3122_v26 = vsel %vm2994_vm2, %v2930_v4, %v3058_v6 }
 0x5cd   : > { %v6885_v17 = vmul.f32 0.70710677, %v6864_v37  ;;  %v2779_v13 = vmul.f32 1.442695, %v2678_v61  ;;  %v6891_v63 = vmul.f32 0.5, %v6733_v20  ;;  %v2616_v35 = vsub.f32 0.0, %v6758_v18 }
 0x5ce   : > { %v2932_v59 = vsub.f32 1.0, %v2868_v57  ;;  %vm2996_vm3 = vcmp.ge.f32.partialorder %v6622_v28, 0.0  ;;  %v2358_v2 = vadd.f32 -0.28449672, %v2294_v0  ;;  %v3187_v56 = vadd.f32 1.0, %v3123_v30 }
 0x5cf   : > { %v6898_v15 = vand.u32 2147483647, %v6885_v17  ;;  %v6900_v42 = vpop.eup %4602  ;;  %v2485_v40 = vadd.f32 0.2548296, %v2421_v36  ;;  %v2487_v49 = vadd.f32 0.2548296, %v2423_v3  ;;  %v2296_v25 = vmul.f32 %v6841_v32, %v2232_v45 }
 0x5d0   : > { %v6903_v20 = vmul.f32 0.5, %v6754_v29  ;;  %v2169_v60 = vmul.f32 %v6859_v16, %v2105_v53  ;;  %v2043_v4 = vmul.f32 1.0614054, %v6900_v42  ;;  %v6910_v8 = vadd.f32 %v8005_v62, %v5626_v44 }
 0x5d1   : > { %v3186_v46 = vadd.f32 1.0, %v3122_v26  ;;  %4610 = vpow2.f32 %v2779_v13  ;;  %v2680_v9 = vmul.f32 %v2616_v35, %v6758_v18  ;;  %v1788_v61 = vmul.f32 0.3275911, %v6898_v15 }
 0x5d2   : > { %v6914_v22 = vpop.eup %4604  ;;  %v3060_v29 = vsub.f32 0.0, %v2932_v59  ;;  %v2422_v6 = vmul.f32 %v6823_v24, %v2358_v2  ;;  %v2617_v57 = vsub.f32 0.0, %v6790_v50  ;;  %v2107_v0 = vadd.f32 -1.4531521, %v2043_v4 }
 0x5d3   : > { %v2549_v36 = vmul.f32 %v6760_v38, %v2485_v40  ;;  %v2551_v3 = vmul.f32 %v6776_v10, %v2487_v49  ;;  %v2619_v30 = vsub.f32 0.0, %v6826_v11  ;;  %v1852_v45 = vadd.f32 1.0, %v1788_v61 }
 0x5d4   : > { %v4607_v53 = vpop.eup %4606  ;;  %v6922_v18 = vmul.f32 %v3187_v56, %v6691_v47  ;;  %v2360_v13 = vadd.f32 -0.28449672, %v2296_v25  ;;  %v2233_v35 = vadd.f32 1.4214138, %v2169_v60  ;;  %v6925_v26 = vmul.f32 0.70710677, %v6910_v8 }
 0x5d5   : > { %v4609_v2 = vpop.eup %4608  ;;  %v2783_v62 = vmul.f32 1.442695, %v2680_v9  ;;  %v2171_v4 = vmul.f32 %v6900_v42, %v2107_v0  ;;  %v2042_v38 = vmul.f32 1.0614054, %v6914_v22  ;;  %4612 = vrcp.f32 %v1852_v45 }
 0x5d6   : > { %8006 = vst [vmem:[#allocation67_spill] sm:$0xff] %v6922_v18  ;;  %v6930_v10 = vmul.f32 %v3186_v46, %v6709_v39  ;;  %v2486_v40 = vadd.f32 0.2548296, %v2422_v6  ;;  %v2681_v49 = vmul.f32 %v2617_v57, %v6790_v50  ;;  %v6934_v47 = vand.u32 2147483647, %v6925_v26  ;;  %v8008_v46 = vld [vmem:[#allocation69_spill] sm:$0xff] }
 0x5d7   : > { %v3124_v56 = vsel %vm2996_vm3, %v2932_v59, %v3060_v29  ;;  %v2869_v25 = vmul.f32 %v4607_v53, %v2549_v36  ;;  %v2871_v60 = vmul.f32 %v4609_v2, %v2551_v3  ;;  %v2683_v9 = vmul.f32 %v2619_v30, %v6826_v11 }
 0x5d8   : > { %8007 = vst [vmem:[#allocation84_spill] sm:$0xff] %v6930_v10  ;;  %v2424_v61 = vmul.f32 %v6841_v32, %v2360_v13  ;;  %v2297_v0 = vmul.f32 %v6859_v16, %v2233_v35  ;;  %v1789_v39 = vmul.f32 0.3275911, %v6934_v47  ;;  %v6944_v6 = vadd.f32 %v8008_v46, %v5628_v41 }
 0x5d9   : > { %4614 = vpow2.f32 %v2783_v62  ;;  %v6947_v50 = vmul.f32 0.5, %v6803_v23  ;;  %v2235_v28 = vadd.f32 1.4214138, %v2171_v4  ;;  %v2106_v59 = vadd.f32 -1.4531521, %v2042_v38  ;;  %v8009_v38 = vld [vmem:[#allocation72_spill] sm:$0xff] }
 0x5da   : > { %v3188_v29 = vadd.f32 1.0, %v3124_v56  ;;  %vm2997_vm4 = vcmp.ge.f32.partialorder %v6672_v5, 0.0  ;;  %vm2999_vm5 = vcmp.ge.f32.partialorder %v6688_v1, 0.0  ;;  %v2550_v11 = vmul.f32 %v6823_v24, %v2486_v40 }
 0x5db   : > { %v2785_v57 = vmul.f32 1.442695, %v2681_v49  ;;  %v1853_v36 = vadd.f32 1.0, %v1789_v39  ;;  %v4611_v3 = vpop.eup %4610  ;;  %v2933_v30 = vsub.f32 1.0, %v2869_v25  ;;  %v2935_v45 = vsub.f32 1.0, %v2871_v60 }
 0x5dc   : > { %v2789_v53 = vmul.f32 1.442695, %v2683_v9  ;;  %v6953_v13 = vmul.f32 0.5, %v6808_v51  ;;  %v2488_v23 = vadd.f32 0.2548296, %v2424_v61  ;;  %v2299_v62 = vmul.f32 %v6900_v42, %v2235_v28 }
 0x5dd   : > { %v2361_v35 = vadd.f32 -0.28449672, %v2297_v0  ;;  %4616 = vrcp.f32 %v1853_v36  ;;  %v6956_v2 = vmul.f32 0.70710677, %v6944_v6  ;;  %v2170_v4 = vmul.f32 %v6914_v22, %v2106_v59 }
 0x5de   : > { %v2618_v24 = vsub.f32 0.0, %v6839_v34  ;;  %v6963_v40 = vadd.f32 %v8009_v38, %v5630_v43  ;;  %v6966_v49 = vmul.f32 %v3188_v29, %v6716_v48  ;;  %v2870_v51 = vmul.f32 %v4611_v3, %v2550_v11 }
 0x5df   : > { %4618 = vpow2.f32 %v2785_v57  ;;  %v6969_v56 = vand.u32 2147483647, %v6956_v2  ;;  %v6971_v25 = vpop.eup %4612  ;;  %v3061_v60 = vsub.f32 0.0, %v2933_v30  ;;  %v3063_v9 = vsub.f32 0.0, %v2935_v45 }
 0x5e0   : > { %8010 = vst [vmem:[#allocation69_spill] sm:$0xff] %v6966_v49  ;;  %4620 = vpow2.f32 %v2789_v53  ;;  %v2620_v61 = vsub.f32 0.0, %v6898_v15  ;;  %v2552_v0 = vmul.f32 %v6841_v32, %v2488_v23  ;;  %v2425_v39 = vmul.f32 %v6859_v16, %v2361_v35  ;;  %v8011_v32 = vld [vmem:[#allocation42_spill] sm:$0xff] }
 0x5e1   : > { %v2044_v46 = vmul.f32 1.0614054, %v6971_v25  ;;  %v1791_v48 = vmul.f32 0.3275911, %v6969_v56  ;;  %vm2998_vm6 = vcmp.ge.f32.partialorder %v6729_v31, 0.0  ;;  %v2682_v29 = vmul.f32 %v2618_v24, %v6839_v34 }
 0x5e2   : > { %v2363_v28 = vadd.f32 -0.28449672, %v2299_v62  ;;  %v2234_v59 = vadd.f32 1.4214138, %v2170_v4  ;;  %v6981_v11 = vmul.f32 0.70710677, %v6963_v40  ;;  %v6985_v53 = vadd.f32 %v8011_v32, %v5647_v52 }
 0x5e3   : > { %v2934_v57 = vsub.f32 1.0, %v2870_v51  ;;  %v2108_v36 = vadd.f32 -1.4531521, %v2044_v46  ;;  %v1855_v3 = vadd.f32 1.0, %v1791_v48  ;;  %v4615_v23 = vpop.eup %4614  ;;  %v3125_v35 = vsel %vm2997_vm4, %v2933_v30, %v3061_v60 }
 0x5e4   : > { %v3127_v62 = vsel %vm2999_vm5, %v2935_v45, %v3063_v9  ;;  %v2684_v4 = vmul.f32 %v2620_v61, %v6898_v15  ;;  %v6993_v34 = vand.u32 2147483647, %v6981_v11  ;;  %v2872_v24 = vmul.f32 %v4615_v23, %v2552_v0 }
 0x5e5   : > { %v2489_v38 = vadd.f32 0.2548296, %v2425_v39  ;;  %v2172_v51 = vmul.f32 %v6971_v25, %v2108_v36  ;;  %4622 = vrcp.f32 %v1855_v3  ;;  %v2427_v46 = vmul.f32 %v6900_v42, %v2363_v28 }
 0x5e6   : > { %v2298_v48 = vmul.f32 %v6914_v22, %v2234_v59  ;;  %v2787_v32 = vmul.f32 1.442695, %v2682_v29  ;;  %v1790_v5 = vmul.f32 0.3275911, %v6993_v34  ;;  %v3062_v1 = vsub.f32 0.0, %v2934_v57 }
 0x5e7   : > { %v6999_v30 = vpop.eup %4616  ;;  %v7002_v15 = vmul.f32 0.5, %v6864_v37  ;;  %v2236_v45 = vadd.f32 1.4214138, %v2172_v51  ;;  %v7005_v60 = vmul.f32 0.70710677, %v6985_v53  ;;  %v3189_v9 = vadd.f32 1.0, %v3125_v35 }
 0x5e8   : > { %v3191_v61 = vadd.f32 1.0, %v3127_v62  ;;  %vm3000_vm7 = vcmp.ge.f32.partialorder %v6750_v33, 0.0  ;;  %v2045_v0 = vmul.f32 1.0614054, %v6999_v30  ;;  %v1854_v39 = vadd.f32 1.0, %v1790_v5  ;;  %v8017_v33 = vld [vmem:[#allocation45_spill] sm:$0xff] }
 0x5e9   : > { %v4619_v28 = vpop.eup %4618  ;;  %v2936_v59 = vsub.f32 1.0, %v2872_v24  ;;  %v2553_v29 = vmul.f32 %v6859_v16, %v2489_v38  ;;  %v2791_v36 = vmul.f32 1.442695, %v2684_v4  ;;  %v7011_v3 = vand.u32 2147483647, %v7005_v60  ;;  %v8012_v24 = vld [vmem:[#allocation43_spill] sm:$0xff] }
 0x5ea   : > { %v4621_v37 = vpop.eup %4620  ;;  %v2491_v23 = vadd.f32 0.2548296, %v2427_v46  ;;  %v2362_v51 = vadd.f32 -0.28449672, %v2298_v48  ;;  %v2109_v18 = vadd.f32 -1.4531521, %v2045_v0  ;;  %4624 = vrcp.f32 %v1854_v39 }
 0x5eb   : > { %v3126_v35 = vsel %vm2998_vm6, %v2934_v57, %v3062_v1  ;;  %v2300_v62 = vmul.f32 %v6971_v25, %v2236_v45  ;;  %v1792_v5 = vmul.f32 0.3275911, %v7011_v3  ;;  %v7019_v19 = vadd.f32 %v8012_v24, %v5626_v44 }
 0x5ec   : > { %v7022_v16 = vmul.f32 %v3189_v9, %v6793_v54  ;;  %4626 = vpow2.f32 %v2787_v32  ;;  %v7025_v4 = vmul.f32 0.5, %v6910_v8  ;;  %v2621_v38 = vsub.f32 0.0, %v6934_v47 }
 0x5ed   : > { %v3064_v46 = vsub.f32 0.0, %v2936_v59  ;;  %v2873_v31 = vmul.f32 %v4619_v28, %v2553_v29  ;;  %v2173_v57 = vmul.f32 %v6999_v30, %v2109_v18  ;;  %v1856_v48 = vadd.f32 1.0, %v1792_v5  ;;  %v8015_v28 = vld [vmem:[#allocation44_spill] sm:$0xff] }
 0x5ee   : > { %8013 = vst [vmem:[#allocation72_spill] sm:$0xff] %v7022_v16  ;;  %v3190_v1 = vadd.f32 1.0, %v3126_v35  ;;  %v2555_v45 = vmul.f32 %v6900_v42, %v2491_v23  ;;  %v2426_v0 = vmul.f32 %v6914_v22, %v2362_v51  ;;  %4628 = vpow2.f32 %v2791_v36 }
 0x5ef   : > { %v7031_v39 = vpop.eup %4622  ;;  %v7034_v54 = vmul.f32 %v3191_v61, %v6798_v7  ;;  %v2364_v8 = vadd.f32 -0.28449672, %v2300_v62  ;;  %4630 = vrcp.f32 %v1856_v48  ;;  %v7037_v32 = vmul.f32 0.70710677, %v7019_v19  ;;  %v8018_v48 = vld [vmem:[#allocation65_spill] sm:$0xff] }
 0x5f0   : > { %vm3001_vm8 = vcmp.ge.f32.partialorder %v6771_v55, 0.0  ;;  %v2685_v18 = vmul.f32 %v2621_v38, %v6934_v47  ;;  %v7042_v9 = vmul.f32 0.5, %v6944_v6  ;;  %v2047_v42 = vmul.f32 1.0614054, %v7031_v39 }
 0x5f1   : > { %8014 = vst [vmem:[#allocation42_spill] sm:$0xff] %v7034_v54  ;;  %v7047_v29 = vadd.f32 %v8015_v28, %v5628_v41  ;;  %v3128_v7 = vsel %vm3000_vm7, %v2936_v59, %v3064_v46  ;;  %v2937_v61 = vsub.f32 1.0, %v2873_v31  ;;  %v2237_v36 = vadd.f32 1.4214138, %v2173_v57 }
 0x5f2   : > { %v7052_v23 = vand.u32 2147483647, %v7037_v32  ;;  %v7055_v51 = vmul.f32 %v3190_v1, %v6888_v14  ;;  %v2875_v47 = vmul.f32 %v4621_v37, %v2555_v45  ;;  %v2490_v6 = vadd.f32 0.2548296, %v2426_v0 }
 0x5f3   : > { %v2111_v35 = vadd.f32 -1.4531521, %v2047_v42  ;;  %v2428_v62 = vmul.f32 %v6971_v25, %v2364_v8  ;;  %v7060_v24 = vmul.f32 0.70710677, %v7047_v29  ;;  %v7064_v59 = vadd.f32 %v8017_v33, %v5630_v43 }
 0x5f4   : > { %8016 = vst [vmem:[#allocation43_spill] sm:$0xff] %v7055_v51  ;;  %v1793_v5 = vmul.f32 0.3275911, %v7052_v23  ;;  %v7066_v38 = vpop.eup %4624  ;;  %v3192_v46 = vadd.f32 1.0, %v3128_v7  ;;  %v2793_v31 = vmul.f32 1.442695, %v2685_v18  ;;  %v2301_v1 = vmul.f32 %v6999_v30, %v2237_v36 }
 0x5f5   : > { %v2175_v14 = vmul.f32 %v7031_v39, %v2111_v35  ;;  %v2623_v37 = vsub.f32 0.0, %v6969_v56  ;;  %v3065_v57 = vsub.f32 0.0, %v2937_v61  ;;  %vm3003_vm9 = vcmp.ge.f32.partialorder %v8018_v48, 0.0 }
 0x5f6   : > { %v2046_v45 = vmul.f32 1.0614054, %v7066_v38  ;;  %v1857_v0 = vadd.f32 1.0, %v1793_v5  ;;  %v4627_v8 = vpop.eup %4626  ;;  %v2939_v42 = vsub.f32 1.0, %v2875_v47  ;;  %v2554_v28 = vmul.f32 %v6914_v22, %v2490_v6 }
 0x5f7   : > { %v2239_v33 = vadd.f32 1.4214138, %v2175_v14  ;;  %v7075_v7 = vand.u32 2147483647, %v7060_v24  ;;  %v2492_v18 = vadd.f32 0.2548296, %v2428_v62  ;;  %v2687_v36 = vmul.f32 %v2623_v37, %v6969_v56 }
 0x5f8   : > { %v2110_v35 = vadd.f32 -1.4531521, %v2046_v45  ;;  %4632 = vrcp.f32 %v1857_v0  ;;  %v7078_v54 = vmul.f32 0.70710677, %v7064_v59  ;;  %v4629_v16 = vpop.eup %4628  ;;  %v7082_v5 = vmul.f32 0.5, %v6963_v40 }
 0x5f9   : > { %4634 = vpow2.f32 %v2793_v31  ;;  %v1795_v47 = vmul.f32 0.3275911, %v7075_v7  ;;  %v7085_v22 = vpop.eup %4630  ;;  %v3129_v6 = vsel %vm3001_vm8, %v2937_v61, %v3065_v57  ;;  %v2365_v62 = vadd.f32 -0.28449672, %v2301_v1 }
 0x5fa   : > { %v2303_v14 = vmul.f32 %v7031_v39, %v2239_v33  ;;  %v2174_v45 = vmul.f32 %v7066_v38, %v2110_v35  ;;  %v3067_v0 = vsub.f32 0.0, %v2939_v42  ;;  %v2874_v49 = vmul.f32 %v4627_v8, %v2554_v28 }
 0x5fb   : > { %v2622_v31 = vsub.f32 0.0, %v6993_v34  ;;  %v2048_v56 = vmul.f32 1.0614054, %v7085_v22  ;;  %v2556_v40 = vmul.f32 %v6971_v25, %v2492_v18  ;;  %v1859_v51 = vadd.f32 1.0, %v1795_v47  ;;  %v8019_v18 = vld [vmem:[#allocation81_spill] sm:$0xff] }
 0x5fc   : > { %v2238_v37 = vadd.f32 1.4214138, %v2174_v45  ;;  %v7095_v10 = vand.u32 2147483647, %v7078_v54  ;;  %v3193_v55 = vadd.f32 1.0, %v3129_v6  ;;  %v2624_v1 = vsub.f32 0.0, %v7011_v3 }
 0x5fd   : > { %v2797_v61 = vmul.f32 1.442695, %v2687_v36  ;;  %v2112_v57 = vadd.f32 -1.4531521, %v2048_v56  ;;  %v2429_v33 = vmul.f32 %v6999_v30, %v2365_v62  ;;  %v2367_v35 = vadd.f32 -0.28449672, %v2303_v14 }
 0x5fe   : > { %4636 = vrcp.f32 %v1859_v51  ;;  %v1794_v8 = vmul.f32 0.3275911, %v7095_v10  ;;  %v3131_v28 = vsel %vm3003_vm9, %v2939_v42, %v3067_v0  ;;  %v2938_v25 = vsub.f32 1.0, %v2874_v49  ;;  %v8020_v62 = vld [vmem:[#allocation48_spill] sm:$0xff] }
 0x5ff   : > { %vm3002_vm10 = vcmp.ge.f32.partialorder %v8019_v18, 0.0  ;;  %v2302_v47 = vmul.f32 %v7066_v38, %v2238_v37  ;;  %v2176_v6 = vmul.f32 %v7085_v22, %v2112_v57  ;;  %v2876_v36 = vmul.f32 %v4629_v16, %v2556_v40 }
 0x600   : > { %v2686_v45 = vmul.f32 %v2622_v31, %v6993_v34  ;;  %v1858_v56 = vadd.f32 1.0, %v1794_v8  ;;  %v7108_v14 = vadd.f32 %v8020_v62, %v5647_v52  ;;  %v7111_v51 = vmul.f32 %v3192_v46, %v6891_v63 }
 0x601   : > { %4638 = vpow2.f32 %v2797_v61  ;;  %v2240_v48 = vadd.f32 1.4214138, %v2176_v6  ;;  %v2688_v49 = vmul.f32 %v2624_v1, %v7011_v3  ;;  %v7117_v0 = vmul.f32 %v3193_v55, %v6903_v20  ;;  %v8022_v20 = vld [vmem:[#allocation51_spill] sm:$0xff] }
 0x602   : > { %v7114_v42 = vpop.eup %4632  ;;  %v2493_v16 = vadd.f32 0.2548296, %v2429_v33  ;;  %v2431_v34 = vmul.f32 %v7031_v39, %v2367_v35  ;;  %4640 = vrcp.f32 %v1858_v56  ;;  %v3195_v40 = vadd.f32 1.0, %v3131_v28 }
 0x603   : > { %8021 = vst [vmem:[#allocation44_spill] sm:$0xff] %v7117_v0  ;;  %v4635_v31 = vpop.eup %4634  ;;  %v3066_v37 = vsub.f32 0.0, %v2938_v25  ;;  %v2366_v57 = vadd.f32 -0.28449672, %v2302_v47  ;;  %v2049_v63 = vmul.f32 1.0614054, %v7114_v42  ;;  %v7127_v55 = vadd.f32 %v8022_v20, %v5626_v44 }
 0x604   : > { %v2940_v46 = vsub.f32 1.0, %v2876_v36  ;;  %vm3004_vm11 = vcmp.ge.f32.partialorder %v6885_v17, 0.0  ;;  %v2795_v61 = vmul.f32 1.442695, %v2686_v45  ;;  %v7123_v3 = vmul.f32 0.70710677, %v7108_v14 }
 0x605   : > { %v7130_v1 = vmul.f32 0.5, %v6985_v53  ;;  %v2304_v33 = vmul.f32 %v7085_v22, %v2240_v48  ;;  %v2799_v35 = vmul.f32 1.442695, %v2688_v49  ;;  %v2113_v8 = vadd.f32 -1.4531521, %v2049_v63  ;;  %v8024_v17 = vld [vmem:[#allocation53_spill] sm:$0xff] }
 0x606   : > { %v2557_v28 = vmul.f32 %v6999_v30, %v2493_v16  ;;  %v2495_v47 = vadd.f32 0.2548296, %v2431_v34  ;;  %v2625_v6 = vsub.f32 0.0, %v7052_v23  ;;  %v7136_v36 = vand.u32 2147483647, %v7123_v3 }
 0x607   : > { %v7139_v45 = vmul.f32 %v3195_v40, %v6947_v50  ;;  %v2430_v56 = vmul.f32 %v7066_v38, %v2366_v57  ;;  %v2177_v53 = vmul.f32 %v7114_v42, %v2113_v8  ;;  %v7144_v62 = vmul.f32 0.70710677, %v7127_v55 }
 0x608   : > { %v7146_v48 = vpop.eup %4636  ;;  %v3130_v30 = vsel %vm3002_vm10, %v2938_v25, %v3066_v37  ;;  %v3068_v49 = vsub.f32 0.0, %v2940_v46  ;;  %4642 = vpow2.f32 %v2795_v61  ;;  %v1796_v16 = vmul.f32 0.3275911, %v7136_v36 }
 0x609   : > { %8023 = vst [vmem:[#allocation45_spill] sm:$0xff] %v7139_v45  ;;  %v2368_v34 = vadd.f32 -0.28449672, %v2304_v33  ;;  %4644 = vpow2.f32 %v2799_v35  ;;  %v2241_v50 = vadd.f32 1.4214138, %v2177_v53  ;;  %v2877_v57 = vmul.f32 %v4635_v31, %v2557_v28 }
 0x60a   : > { %v2051_v40 = vmul.f32 1.0614054, %v7146_v48  ;;  %v2559_v63 = vmul.f32 %v7031_v39, %v2495_v47  ;;  %v2689_v20 = vmul.f32 %v2625_v6, %v7052_v23  ;;  %v1860_v8 = vadd.f32 1.0, %v1796_v16 }
 0x60b   : > { %v4639_v45 = vpop.eup %4638  ;;  %v2494_v0 = vadd.f32 0.2548296, %v2430_v56  ;;  %v2305_v18 = vmul.f32 %v7114_v42, %v2241_v50  ;;  %v7156_v37 = vand.u32 2147483647, %v7144_v62  ;;  %v3194_v33 = vadd.f32 1.0, %v3130_v30 }
 0x60c   : > { %v2115_v25 = vadd.f32 -1.4531521, %v2051_v40  ;;  %v7158_v61 = vpop.eup %4640  ;;  %v7161_v35 = vmul.f32 0.5, %v7019_v19  ;;  %v2627_v31 = vsub.f32 0.0, %v7075_v7  ;;  %4646 = vrcp.f32 %v1860_v8 }
 0x60d   : > { %v3132_v39 = vsel %vm3004_vm11, %v2940_v46, %v3068_v49  ;;  %vm3005_vm12 = vcmp.ge.f32.partialorder %v6925_v26, 0.0  ;;  %v2432_v23 = vmul.f32 %v7085_v22, %v2368_v34  ;;  %v2050_v47 = vmul.f32 1.0614054, %v7158_v61 }
 0x60e   : > { %v2179_v28 = vmul.f32 %v7146_v48, %v2115_v25  ;;  %v2941_v6 = vsub.f32 1.0, %v2877_v57  ;;  %v2879_v56 = vmul.f32 %v4639_v45, %v2559_v63  ;;  %v2369_v53 = vadd.f32 -0.28449672, %v2305_v18 }
 0x60f   : > { %v1797_v19 = vmul.f32 0.3275911, %v7156_v37  ;;  %v2558_v30 = vmul.f32 %v7066_v38, %v2494_v0  ;;  %v2801_v16 = vmul.f32 1.442695, %v2689_v20  ;;  %v7174_v46 = vadd.f32 %v8024_v17, %v5628_v41 }
 0x610   : > { %v2243_v50 = vadd.f32 1.4214138, %v2179_v28  ;;  %v7177_v49 = vmul.f32 %v3194_v33, %v6953_v13  ;;  %v2691_v34 = vmul.f32 %v2627_v31, %v7075_v7  ;;  %v2114_v40 = vadd.f32 -1.4531521, %v2050_v47  ;;  %v8026_v28 = vld [vmem:[#allocation77_spill] sm:$0xff] }
 0x611   : > { %v1861_v8 = vadd.f32 1.0, %v1797_v19  ;;  %v3196_v57 = vadd.f32 1.0, %v3132_v39  ;;  %v2496_v45 = vadd.f32 0.2548296, %v2432_v23  ;;  %v7181_v63 = vmul.f32 0.5, %v7047_v29 }
 0x612   : > { %8025 = vst [vmem:[#allocation65_spill] sm:$0xff] %v7177_v49  ;;  %v2307_v38 = vmul.f32 %v7146_v48, %v2243_v50  ;;  %v4643_v0 = vpop.eup %4642  ;;  %v3069_v20 = vsub.f32 0.0, %v2941_v6  ;;  %v2943_v18 = vsub.f32 1.0, %v2879_v56  ;;  %vm3007_vm13 = vcmp.ge.f32.partialorder %v6956_v2, 0.0 }
 0x613   : > { %v2433_v25 = vmul.f32 %v7114_v42, %v2369_v53  ;;  %4648 = vrcp.f32 %v1861_v8  ;;  %v4645_v13 = vpop.eup %4644  ;;  %v2878_v33 = vmul.f32 %v4643_v0, %v2558_v30  ;;  %v2178_v7 = vmul.f32 %v7158_v61, %v2114_v40 }
 0x614   : > { %4650 = vpow2.f32 %v2801_v16  ;;  %v7188_v31 = vmul.f32 0.70710677, %v7174_v46  ;;  %v2805_v29 = vmul.f32 1.442695, %v2691_v34  ;;  %v7191_v39 = vmul.f32 0.5, %v7064_v59 }
 0x615   : > { %v2626_v23 = vsub.f32 0.0, %v7095_v10  ;;  %v7196_v47 = vadd.f32 %v8026_v28, %v5630_v43  ;;  %v7199_v56 = vmul.f32 %v3196_v57, %v7002_v15  ;;  %v2560_v53 = vmul.f32 %v7085_v22, %v2496_v45 }
 0x616   : > { %v2371_v19 = vadd.f32 -0.28449672, %v2307_v38  ;;  %v7203_v30 = vand.u32 2147483647, %v7188_v31  ;;  %v7205_v16 = vpop.eup %4646  ;;  %v3133_v59 = vsel %vm3005_vm12, %v2941_v6, %v3069_v20  ;;  %v3071_v50 = vsub.f32 0.0, %v2943_v18 }
 0x617   : > { %8027 = vst [vmem:[#allocation81_spill] sm:$0xff] %v7199_v56  ;;  %v2497_v17 = vadd.f32 0.2548296, %v2433_v25  ;;  %v7210_v34 = vmul.f32 0.70710677, %v7196_v47  ;;  %v2942_v40 = vsub.f32 1.0, %v2878_v33  ;;  %4652 = vpow2.f32 %v2805_v29 }
 0x618   : > { %vm3006_vm14 = vcmp.ge.f32.partialorder %v6981_v11, 0.0  ;;  %v2242_v15 = vadd.f32 1.4214138, %v2178_v7  ;;  %v2052_v22 = vmul.f32 1.0614054, %v7205_v16  ;;  %v2628_v8 = vsub.f32 0.0, %v7136_v36 }
 0x619   : > { %v2690_v57 = vmul.f32 %v2626_v23, %v7095_v10  ;;  %v1799_v45 = vmul.f32 0.3275911, %v7203_v30  ;;  %v7218_v26 = vand.u32 2147483647, %v7210_v34  ;;  %v3197_v6 = vadd.f32 1.0, %v3133_v59 }
 0x61a   : > { %v2880_v38 = vmul.f32 %v4645_v13, %v2560_v53  ;;  %v2435_v0 = vmul.f32 %v7146_v48, %v2371_v19  ;;  %v2116_v20 = vadd.f32 -1.4531521, %v2052_v22  ;;  %v2561_v25 = vmul.f32 %v7114_v42, %v2497_v17  ;;  %v8028_v53 = vld [vmem:[#allocation78_spill] sm:$0xff] }
 0x61b   : > { %v7223_v33 = vmul.f32 0.5, %v7108_v14  ;;  %v1863_v7 = vadd.f32 1.0, %v1799_v45  ;;  %v1798_v29 = vmul.f32 0.3275911, %v7218_v26  ;;  %v3135_v10 = vsel %vm3007_vm13, %v2943_v18, %v3071_v50 }
 0x61c   : > { %v3070_v23 = vsub.f32 0.0, %v2942_v40  ;;  %v2306_v28 = vmul.f32 %v7158_v61, %v2242_v15  ;;  %v2692_v59 = vmul.f32 %v2628_v8, %v7136_v36  ;;  %vm3008_vm15 = vcmp.ge.f32.partialorder %v7005_v60, 0.0 }
 0x61d   : > { %v7230_v13 = vpop.eup %4648  ;;  %v2180_v42 = vmul.f32 %v7205_v16, %v2116_v20  ;;  %4654 = vrcp.f32 %v1863_v7  ;;  %v1862_v14 = vadd.f32 1.0, %v1798_v29  ;;  %v7236_v19 = vadd.f32 %v8028_v53, %v5647_v52 }
 0x61e   : > { %v4651_v17 = vpop.eup %4650  ;;  %v2944_v2 = vsub.f32 1.0, %v2880_v38  ;;  %v2499_v18 = vadd.f32 0.2548296, %v2435_v0  ;;  %v2053_v50 = vmul.f32 1.0614054, %v7230_v13  ;;  %v2629_v15 = vsub.f32 0.0, %v7156_v37 }
 0x61f   : > { %v7241_v36 = vmul.f32 %v3197_v6, %v7025_v4  ;;  %v2881_v22 = vmul.f32 %v4651_v17, %v2561_v25  ;;  %v2803_v8 = vmul.f32 1.442695, %v2690_v57  ;;  %4656 = vrcp.f32 %v1862_v14  ;;  %v8029_v57 = vld [vmem:[#allocation61_spill] sm:$0xff] }
 0x620   : > { %v3199_v45 = vadd.f32 1.0, %v3135_v10  ;;  %v2370_v20 = vadd.f32 -0.28449672, %v2306_v28  ;;  %v2117_v7 = vadd.f32 -1.4531521, %v2053_v50  ;;  %v2631_v29 = vsub.f32 0.0, %v7203_v30 }
 0x621   : > { %v3134_v53 = vsel %vm3006_vm14, %v2942_v40, %v3070_v23  ;;  %v2244_v38 = vadd.f32 1.4214138, %v2180_v42  ;;  %v2807_v0 = vmul.f32 1.442695, %v2692_v59  ;;  %v7247_v56 = vmul.f32 0.70710677, %v7236_v19  ;;  %v4653_v10 = vpop.eup %4652 }
 0x622   : > { %v3072_v49 = vsub.f32 0.0, %v2944_v2  ;;  %v2563_v4 = vmul.f32 %v7146_v48, %v2499_v18  ;;  %v2693_v6 = vmul.f32 %v2629_v15, %v7156_v37  ;;  %v7253_v25 = vadd.f32 %v8029_v57, %v5626_v44 }
 0x623   : > { %v2945_v28 = vsub.f32 1.0, %v2881_v22  ;;  %vm3009_vm0 = vcmp.ge.f32.partialorder %v7037_v32, 0.0  ;;  %4658 = vpow2.f32 %v2803_v8  ;;  %v2181_v11 = vmul.f32 %v7230_v13, %v2117_v7 }
 0x624   : > { %v7258_v40 = vand.u32 2147483647, %v7247_v56  ;;  %v3198_v23 = vadd.f32 1.0, %v3134_v53  ;;  %v2434_v59 = vmul.f32 %v7158_v61, %v2370_v20  ;;  %v7262_v48 = vmul.f32 0.5, %v7127_v55  ;;  %v8031_v20 = vld [vmem:[#allocation60_spill] sm:$0xff] }
 0x625   : > { %v2695_v37 = vmul.f32 %v2631_v29, %v7203_v30  ;;  %v7266_v42 = vmul.f32 %v3199_v45, %v7042_v9  ;;  %v2308_v14 = vmul.f32 %v7205_v16, %v2244_v38  ;;  %4660 = vpow2.f32 %v2807_v0  ;;  %v8030_v45 = vld [vmem:[#allocation58_spill] sm:$0xff] }
 0x626   : > { %v1800_v17 = vmul.f32 0.3275911, %v7258_v40  ;;  %v3136_v18 = vsel %vm3008_vm15, %v2944_v2, %v3072_v49  ;;  %v7272_v50 = vmul.f32 %v4653_v10, %v2563_v4  ;;  %v2809_v15 = vmul.f32 1.442695, %v2693_v6  ;;  %v8032_v4 = vld [vmem:[#allocation79_spill] sm:$0xff] }
 0x627   : > { %v7275_v22 = vmul.f32 0.70710677, %v7253_v25  ;;  %v7277_v55 = vpop.eup %4654  ;;  %v3073_v30 = vsub.f32 0.0, %v2945_v28  ;;  %v2245_v8 = vadd.f32 1.4214138, %v2181_v11  ;;  %v3282_v7 = vpack.c.bf16 %v8031_v20, %v8030_v45 }
 0x628   : > { %v1864_v9 = vadd.f32 1.0, %v1800_v17  ;;  %v7282_v29 = vmul.f32 %v3198_v23, %v7082_v5  ;;  %v2498_v53 = vadd.f32 0.2548296, %v2434_v59  ;;  %v2055_v60 = vmul.f32 1.0614054, %v7277_v55  ;;  %v8034_v23 = vld [vmem:[#allocation47_spill] sm:$0xff] }
 0x629   : > { %v2813_v49 = vmul.f32 1.442695, %v2695_v37  ;;  %v7285_v2 = vpop.eup %4656  ;;  %vm3011_vm1 = vcmp.ge.f32.partialorder %v7060_v24, 0.0  ;;  %v2372_v38 = vadd.f32 -0.28449672, %v2308_v14  ;;  %v7293_v6 = vadd.f32 %v8032_v4, %v5628_v41  ;;  %3608 = vmatprep.mubr.bf16.mxu1 %v3282_v7  ;;  %v8035_v59 = vld [vmem:[#allocation46_spill] sm:$0xff] }
 0x62a   : > { %4662 = vrcp.f32 %v1864_v9  ;;  %v7289_v0 = vand.u32 2147483647, %v7275_v22  ;;  %v7295_v5 = vadd.f32 1.0, %v3136_v18  ;;  %v2947_v57 = vsub.f32 1.0, %v7272_v50  ;;  %v4705_v18 = vld [vmem:[#allocation8 + $0x80] sm:$0xff]   ;;  %v4706_v7 = vld [vmem:[#allocation8 + $0xc8] sm:$0xff]  }
 0x62b   : > { %8033 = vst [vmem:[#allocation48_spill] sm:$0xff] %v7293_v6  ;;  %v7299_v10 = vmul.f32 0.5, %v7174_v46  ;;  %v2119_v11 = vadd.f32 -1.4531521, %v2055_v60  ;;  %v8036_v37 = vpack.c.bf16 %v8034_v23, %v8035_v59  ;;  %v2309_v14 = vmul.f32 %v7230_v13, %v2245_v8 }
 0x62c   : > { %v2054_v17 = vmul.f32 1.0614054, %v7285_v2  ;;  %v2630_v9 = vsub.f32 0.0, %v7218_v26  ;;  %v1801_v45 = vmul.f32 0.3275911, %v7289_v0  ;;  %v3137_v50 = vsel %vm3009_vm0, %v2945_v28, %v3073_v30  ;;  %v8038_v28 = vld [vmem:[#allocation59_spill] sm:$0xff] }
 0x62d   : > { %3609 = vmatmul.mubr.bf16.vlgmr.msra.gmra.mrb[32].mxu1 %v8036_v37  ;;  %v2562_v46 = vmul.f32 %v7158_v61, %v2498_v53  ;;  %v2183_v20 = vmul.f32 %v7277_v55, %v2119_v11  ;;  %4664 = vpow2.f32 %v2813_v49  ;;  %v4659_v60 = vpop.eup %4658  ;;  %v2436_v8 = vmul.f32 %v7205_v16, %v2372_v38  ;;  %v8039_v30 = vld [vmem:[#allocation33_spill] sm:$0xff]  ;;  %v4707_v38 = vld [vmem:[#allocation8 + $0x88] sm:$0xff]  }
 0x62e   : > { %4202 = vmatpush3.bf16.msra.mxu1 %v4705_v18  ;;  %v2118_v4 = vadd.f32 -1.4531521, %v2054_v17  ;;  %v1865_v23 = vadd.f32 1.0, %v1801_v45  ;;  %v7314_v59 = vmul.f32 0.70710677, %v7293_v6  ;;  %v3075_v37 = vsub.f32 0.0, %v2947_v57 }
 0x62f   : > { %4195 = vmatprep.subr.bf16.mxu1 %v4706_v7  ;;  %v2247_v18 = vadd.f32 1.4214138, %v2183_v20  ;;  %v2632_v32 = vsub.f32 0.0, %v7258_v40  ;;  %v3284_v61 = vpack.c.bf16 %v8039_v30, %v8038_v28  ;;  %v4661_v53 = vpop.eup %4660  ;;  %v2373_v11 = vadd.f32 -0.28449672, %v2309_v14  ;;  %v4708_v28 = vld [vmem:[#allocation8 + $0xd0] sm:$0xff]  }
 0x630   : > { %8037 = vst [vmem:[#allocation51_spill] sm:$0xff] %v7314_v59  ;;  %v2182_v49 = vmul.f32 %v7285_v2, %v2118_v4  ;;  %4666 = vrcp.f32 %v1865_v23  ;;  %v7321_v7 = vand.u32 2147483647, %v7314_v59  ;;  %v7323_v17 = vadd.f32 1.0, %v3137_v50  ;;  %v8040_v30 = vld [vmem:[#allocation50_spill] sm:$0xff]  ;;  %v8041_v59 = vld [vmem:[#allocation49_spill] sm:$0xff] }
 0x631   : > { %v2311_v45 = vmul.f32 %v7277_v55, %v2247_v18  ;;  %v7327_v20 = vmul.f32 0.5, %v7196_v47  ;;  %v2694_v6 = vmul.f32 %v2630_v9, %v7218_v26  ;;  %3705 = vmatprep.mubr.bf16.mxu0 %v3284_v61  ;;  %v2500_v14 = vadd.f32 0.2548296, %v2436_v8  ;;  %v8043_v26 = vld [vmem:[#allocation62_spill] sm:$0xff] }
 0x632   : > { %4203 = vmatpush3.bf16.msra.mxu1 %v4707_v38  ;;  %4668 = vpow2.f32 %v2809_v15  ;;  %v2246_v4 = vadd.f32 1.4214138, %v2182_v49  ;;  %v1803_v23 = vmul.f32 0.3275911, %v7321_v7  ;;  %v8042_v38 = vpack.c.bf16 %v8040_v30, %v8041_v59 }
 0x633   : > { %4196 = vmatprep.subr.bf16.mxu1 %v4708_v28  ;;  %v3139_v50 = vsel %vm3011_vm1, %v2947_v57, %v3075_v37  ;;  %v7336_v18 = vmul.f32 %v4659_v60, %v2562_v46  ;;  %v2375_v47 = vadd.f32 -0.28449672, %v2311_v45  ;;  %v7340_v9 = vadd.f32 %v8043_v26, %v5630_v43  ;;  %v4709_v28 = vld [vmem:[#allocation8 + $0x90] sm:$0xff]   ;;  %v4710_v37 = vld [vmem:[#allocation8 + $0xd8] sm:$0xff]  }
 0x634   : > { %3706 = vmatmul.mubr.bf16.vlgmr.msra.gmra.mrb[48].mxu0 %v8042_v38  ;;  %v7342_v61 = vpop.eup %4662  ;;  %v2437_v15 = vmul.f32 %v7230_v13, %v2373_v11  ;;  %v2310_v8 = vmul.f32 %v7285_v2, %v2246_v4  ;;  %v2696_v49 = vmul.f32 %v2632_v32, %v7258_v40  ;;  %v1867_v59 = vadd.f32 1.0, %v1803_v23  ;;  %v4711_v26 = vld [vmem:[#allocation8 + $0x98] sm:$0xff]  }
 0x635   : > { %v2439_v24 = vmul.f32 %v7277_v55, %v2375_v47  ;;  %v2811_v57 = vmul.f32 1.442695, %v2694_v6  ;;  %v7349_v46 = vmul.f32 0.5, %v7236_v19  ;;  %v2056_v60 = vmul.f32 1.0614054, %v7342_v61  ;;  %v8044_v6 = vld [vmem:[#allocation64_spill] sm:$0xff] }
 0x636   : > { %4204 = vmatpush3.bf16.msra.mxu1 %v4709_v28  ;;  %v2564_v45 = vmul.f32 %v7205_v16, %v2500_v14  ;;  %v2374_v11 = vadd.f32 -0.28449672, %v2310_v8  ;;  %4670 = vrcp.f32 %v1867_v59  ;;  %v7354_v4 = vmul.f32 0.70710677, %v7340_v9  ;;  %v4712_v28 = vld [vmem:[#allocation8 + $0xe0] sm:$0xff]  }
 0x637   : > { %4197 = vmatprep.subr.bf16.mxu1 %v4710_v37  ;;  %v4665_v40 = vpop.eup %4664  ;;  %v3203_v32 = vadd.f32 1.0, %v3139_v50  ;;  %v2503_v23 = vadd.f32 0.2548296, %v2439_v24  ;;  %v2120_v30 = vadd.f32 -1.4531521, %v2056_v60  ;;  %v7358_v38 = vadd.f32 %v8044_v6, %v5647_v52 }
 0x638   : > { %v7362_v19 = vmul.f32 %v7295_v5, %v7130_v1  ;;  %v2501_v47 = vadd.f32 0.2548296, %v2437_v15  ;;  %vm3015_vm2 = vcmp.ge.f32.partialorder %v7188_v31, 0.0  ;;  %v2815_v16 = vmul.f32 1.442695, %v2696_v49 }
 0x639   : > { %8045 = vst [vmem:[#allocation53_spill] sm:$0xff] %v7358_v38  ;;  %v7366_v14 = vand.u32 2147483647, %v7354_v4  ;;  %v2946_v50 = vsub.f32 1.0, %v7336_v18  ;;  %v2567_v8 = vmul.f32 %v7277_v55, %v2503_v23  ;;  %4672 = vpow2.f32 %v2811_v57 }
 0x63a   : > { %4205 = vmatpush3.bf16.msra.mxu1 %v4711_v26  ;;  %v2184_v59 = vmul.f32 %v7342_v61, %v2120_v30  ;;  %v7371_v1 = vpop.eup %4666  ;;  %v7373_v5 = vmul.f32 %v4661_v53, %v2564_v45  ;;  %v2438_v15 = vmul.f32 %v7285_v2, %v2374_v11  ;;  %v7377_v49 = vmul.f32 0.5, %v7253_v25  ;;  %v4713_v25 = vld [vmem:[#allocation8 + $0xa0] sm:$0xff]   ;;  %v4714_v26 = vld [vmem:[#allocation8 + $0xe8] sm:$0xff]  }
 0x63b   : > { %4198 = vmatprep.subr.bf16.mxu1 %v4712_v28  ;;  %v1802_v24 = vmul.f32 0.3275911, %v7366_v14  ;;  %vm3010_vm3 = vcmp.ge.f32.partialorder %v7078_v54, 0.0  ;;  %v2887_v18 = vmul.f32 %v4665_v40, %v2567_v8  ;;  %v2057_v57 = vmul.f32 1.0614054, %v7371_v1 }
 0x63c   : > { %v2248_v55 = vadd.f32 1.4214138, %v2184_v59  ;;  %v7383_v60 = vmul.f32 0.70710677, %v7358_v38  ;;  %v4669_v37 = vpop.eup %4668  ;;  %v2565_v53 = vmul.f32 %v7230_v13, %v2501_v47  ;;  %4674 = vpow2.f32 %v2815_v16  ;;  %v8047_v13 = vld [vmem:[#allocation36_spill] sm:$0xff] }
 0x63d   : > { %v2633_v45 = vsub.f32 0.0, %v7289_v0  ;;  %v1866_v11 = vadd.f32 1.0, %v1802_v24  ;;  %v2951_v23 = vsub.f32 1.0, %v2887_v18  ;;  %v2121_v6 = vadd.f32 -1.4531521, %v2057_v57 }
 0x63e   : > { %4206 = vmatpush3.bf16.msra.mxu1 %v4713_v25  ;;  %v2312_v30 = vmul.f32 %v7342_v61, %v2248_v55  ;;  %v7389_v40 = vand.u32 2147483647, %v7383_v60  ;;  %v7392_v8 = vmul.f32 %v3203_v32, %v7181_v63  ;;  %v2502_v59 = vadd.f32 0.2548296, %v2438_v15  ;;  %v4715_v32 = vld [vmem:[#allocation8 + $0xa8] sm:$0xff]  }
 0x63f   : > { %4199 = vmatprep.subr.bf16.mxu1 %v4714_v26  ;;  %4676 = vrcp.f32 %v1866_v11  ;;  %v7396_v47 = vadd.f32 %v8047_v13, %v5626_v44  ;;  %v3079_v16 = vsub.f32 0.0, %v2951_v23  ;;  %v2185_v24 = vmul.f32 %v7371_v1, %v2121_v6  ;;  %v4716_v6 = vld [vmem:[#allocation8 + $0xf0] sm:$0xff]  }
 0x640   : > { %8046 = vst [vmem:[#allocation77_spill] sm:$0xff] %v7392_v8  ;;  %v2376_v28 = vadd.f32 -0.28449672, %v2312_v30  ;;  %v1804_v18 = vmul.f32 0.3275911, %v7389_v40  ;;  %v7400_v55 = vpop.eup %4670  ;;  %v3074_v57 = vsub.f32 0.0, %v2946_v50  ;;  %v7403_v26 = vmul.f32 %v4669_v37, %v2565_v53 }
 0x641   : > { %v2697_v63 = vmul.f32 %v2633_v45, %v7289_v0  ;;  %v3143_v44 = vsel %vm3015_vm2, %v2951_v23, %v3079_v16  ;;  %v2249_v11 = vadd.f32 1.4214138, %v2185_v24  ;;  %v2059_v30 = vmul.f32 1.0614054, %v7400_v55 }
 0x642   : > { %4207 = vmatpush3.bf16.msra.mxu1 %v4715_v32  ;;  %v2440_v15 = vmul.f32 %v7342_v61, %v2376_v28  ;;  %v3207_v13 = vadd.f32 1.0, %v3143_v44  ;;  %v2566_v38 = vmul.f32 %v7285_v2, %v2502_v59  ;;  %v2635_v37 = vsub.f32 0.0, %v7321_v7  ;;  %v4717_v2 = vld [vmem:[#allocation8 + $0xb0] sm:$0xff]  }
 0x643   : > { %4200 = vmatprep.subr.bf16.mxu1 %v4716_v6  ;;  %v1868_v53 = vadd.f32 1.0, %v1804_v18  ;;  %v4673_v25 = vpop.eup %4672  ;;  %v2313_v45 = vmul.f32 %v7371_v1, %v2249_v11  ;;  %v2123_v32 = vadd.f32 -1.4531521, %v2059_v30  ;;  %v7414_v31 = vmul.f32 0.70710677, %v7396_v47 }
 0x644   : > { %v2504_v0 = vadd.f32 0.2548296, %v2440_v15  ;;  %v3138_v23 = vsel %vm3010_vm3, %v2946_v50, %v3074_v57  ;;  %v7419_v16 = vmul.f32 %v3207_v13, %v7299_v10  ;;  %v2817_v28 = vmul.f32 1.442695, %v2697_v63  ;;  %v4718_v15 = vld [vmem:[#allocation8 + $0xf8] sm:$0xff]  }
 0x645   : > { %4678 = vrcp.f32 %v1868_v53  ;;  %vm3012_vm4 = vcmp.ge.f32.partialorder %v7123_v3, 0.0  ;;  %v2949_v59 = vsub.f32 1.0, %v7403_v26  ;;  %v2377_v18 = vadd.f32 -0.28449672, %v2313_v45 }
 0x646   : > { %8048 = vst [vmem:[#allocation78_spill] sm:$0xff] %v7419_v16  ;;  %4208 = vmatpush3.bf16.msra.mxu1 %v4717_v2  ;;  %v2568_v24 = vmul.f32 %v7342_v61, %v2504_v0  ;;  %v2187_v44 = vmul.f32 %v7400_v55, %v2123_v32  ;;  %v4675_v54 = vpop.eup %4674  ;;  %v2886_v50 = vmul.f32 %v4673_v25, %v2566_v38  ;;  %v1741_v63 = vand.u32 2147483647, %v7414_v31  ;;  %v8050_v38 = vld [vmem:[#allocation66_spill] sm:$0xff]  ;;  %v4719_v25 = vld [vmem:[#allocation8 + $0xb8] sm:$0xff]   ;;  %v8085_v16 = vld [vmem:[#allocation45_spill] sm:$0xff] }
 0x647   : > { %4201 = vmatprep.subr.bf16.mxu1 %v4718_v15  ;;  %v2699_v57 = vmul.f32 %v2635_v37, %v7321_v7  ;;  %v3202_v11 = vadd.f32 1.0, %v3138_v23  ;;  %v8049_v30 = vsub.f32 1.0, %v7373_v5  ;;  %vm3013_vm5 = vcmp.ge.f32.partialorder %v7144_v62, 0.0 }
 0x648   : > { %v2441_v61 = vmul.f32 %v7371_v1, %v2377_v18  ;;  %v2251_v6 = vadd.f32 1.4214138, %v2187_v44  ;;  %4680 = vpow2.f32 %v2817_v28  ;;  %v2634_v53 = vsub.f32 0.0, %v7366_v14 }
 0x649   : > { %v3076_v26 = vsub.f32 0.0, %v8049_v30  ;;  %v7433_v13 = vpop.eup %4676  ;;  %v1805_v0 = vmul.f32 0.3275911, %v1741_v63  ;;  %v7438_v7 = vadd.f32 %v8050_v38, %v5628_v41  ;;  %v3077_v37 = vsub.f32 0.0, %v2949_v59 }
 0x64a   : > { %4209 = vmatpush3.bf16.msra.mxu1 %v4719_v25  ;;  %v2888_v45 = vmul.f32 %v4675_v54, %v2568_v24  ;;  %v2315_v32 = vmul.f32 %v7400_v55, %v2251_v6  ;;  %v2058_v23 = vmul.f32 1.0614054, %v7433_v13  ;;  %v2950_v2 = vsub.f32 1.0, %v2886_v50 }
 0x64b   : > { %vm3014_vm6 = vcmp.ge.f32.partialorder %v7210_v34, 0.0  ;;  %v2821_v18 = vmul.f32 1.442695, %v2699_v57  ;;  %v1869_v28 = vadd.f32 1.0, %v1805_v0  ;;  %v7444_v44 = vmul.f32 0.70710677, %v7438_v7 }
 0x64c   : > { %v7448_v41 = vmul.f32 %v7323_v17, %v7161_v35  ;;  %v2505_v15 = vadd.f32 0.2548296, %v2441_v61  ;;  %v2379_v30 = vadd.f32 -0.28449672, %v2315_v32  ;;  %v2122_v38 = vadd.f32 -1.4531521, %v2058_v23 }
 0x64d   : > { %vm3016_vm7 = vcmp.ge.f32.partialorder %v7247_v56, 0.0  ;;  %v2698_v24 = vmul.f32 %v2634_v53, %v7366_v14  ;;  %v2636_v54 = vsub.f32 0.0, %v7389_v40  ;;  %4682 = vrcp.f32 %v1869_v28  ;;  %v8051_v35 = vld [vmem:[#allocation83_spill] sm:$0xff] }
 0x64e   : > { %v1743_v50 = vand.u32 2147483647, %v7444_v44  ;;  %v2952_v57 = vsub.f32 1.0, %v2888_v45  ;;  %v2443_v6 = vmul.f32 %v7400_v55, %v2379_v30  ;;  %v2186_v0 = vmul.f32 %v7433_v13, %v2122_v38 }
 0x64f   : > { %v7458_v17 = vadd.f32 %v8051_v35, %v5630_v43  ;;  %v7460_v61 = vpop.eup %4678  ;;  %v7463_v25 = vmul.f32 %v3202_v11, %v7191_v39  ;;  %v8052_v14 = vsub.f32 1.0, %v7373_v5  ;;  %4684 = vpow2.f32 %v2821_v18 }
 0x650   : > { %v1807_v45 = vmul.f32 0.3275911, %v1743_v50  ;;  %v3078_v32 = vsub.f32 0.0, %v2950_v2  ;;  %v2569_v23 = vmul.f32 %v7371_v1, %v2505_v15  ;;  %v2250_v28 = vadd.f32 1.4214138, %v2186_v0 }
 0x651   : > { %v3140_v53 = vsel %vm3012_vm4, %v8052_v14, %v3076_v26  ;;  %v2637_v30 = vsub.f32 0.0, %v1741_v63  ;;  %v3141_v43 = vsel %vm3013_vm5, %v2949_v59, %v3077_v37  ;;  %v2819_v38 = vmul.f32 1.442695, %v2698_v24 }
 0x652   : > { %v2060_v35 = vmul.f32 1.0614054, %v7460_v61  ;;  %v1871_v39 = vadd.f32 1.0, %v1807_v45  ;;  %v3080_v11 = vsub.f32 0.0, %v2952_v57  ;;  %v2507_v10 = vadd.f32 0.2548296, %v2443_v6  ;;  %v4681_v26 = vpop.eup %4680 }
 0x653   : > { %v2700_v5 = vmul.f32 %v2636_v54, %v7389_v40  ;;  %v7475_v3 = vmul.f32 0.70710677, %v7458_v17  ;;  %v2314_v18 = vmul.f32 %v7433_v13, %v2250_v28  ;;  %v7480_v62 = vadd.f32 %v6880_v58, %v5647_v52 }
 0x654   : > { %v2124_v1 = vadd.f32 -1.4531521, %v2060_v35  ;;  %4686 = vrcp.f32 %v1871_v39  ;;  %v3142_v59 = vsel %vm3014_vm6, %v2950_v2, %v3078_v32  ;;  %v2889_v37 = vmul.f32 %v4681_v26, %v2569_v23 }
 0x655   : > { %8053 = vst [vmem:[#allocation61_spill] sm:$0xff] %v7480_v62  ;;  %v2701_v15 = vmul.f32 %v2637_v30, %v1741_v63  ;;  %v7485_v24 = vand.u32 2147483647, %v7475_v3  ;;  %v3204_v40 = vadd.f32 1.0, %v3140_v53  ;;  %v3205_v54 = vadd.f32 1.0, %v3141_v43 }
 0x656   : > { %v2188_v6 = vmul.f32 %v7460_v61, %v2124_v1  ;;  %v2639_v0 = vsub.f32 0.0, %v1743_v50  ;;  %v3144_v14 = vsel %vm3016_vm7, %v2952_v57, %v3080_v11  ;;  %4688 = vpow2.f32 %v2819_v38 }
 0x657   : > { %v2823_v45 = vmul.f32 1.442695, %v2700_v5  ;;  %v1806_v52 = vmul.f32 0.3275911, %v7485_v24  ;;  %v7491_v58 = vpop.eup %4682  ;;  %v3206_v34 = vadd.f32 1.0, %v3142_v59  ;;  %vm3017_vm8 = vcmp.ge.f32.partialorder %v7275_v22, 0.0 }
 0x658   : > { %v2571_v63 = vmul.f32 %v7400_v55, %v2507_v10  ;;  %v2378_v2 = vadd.f32 -0.28449672, %v2314_v18  ;;  %v7496_v53 = vmul.f32 0.70710677, %v7480_v62  ;;  %v2953_v32 = vsub.f32 1.0, %v2889_v37  ;;  %v8055_v59 = vld [vmem:[#allocation70_spill] sm:$0xff] }
 0x659   : > { %v2061_v23 = vmul.f32 1.0614054, %v7491_v58  ;;  %v2825_v56 = vmul.f32 1.442695, %v2701_v15  ;;  %v1870_v57 = vadd.f32 1.0, %v1806_v52  ;;  %v4685_v28 = vpop.eup %4684  ;;  %v3208_v30 = vadd.f32 1.0, %v3144_v14 }
 0x65a   : > { %v2252_v43 = vadd.f32 1.4214138, %v2188_v6  ;;  %v2703_v38 = vmul.f32 %v2639_v0, %v1743_v50  ;;  %v7500_v35 = vand.u32 2147483647, %v7496_v53  ;;  %v7503_v39 = vmul.f32 %v3204_v40, %v7223_v33  ;;  %v8054_v33 = vld [vmem:[#allocation54_spill] sm:$0xff]  ;;  %v8082_v62 = vld [vmem:[#allocation65_spill] sm:$0xff] }
 0x65b   : > { %v7506_v55 = vmul.f32 %v3205_v54, %v7262_v48  ;;  %v2125_v10 = vadd.f32 -1.4531521, %v2061_v23  ;;  %4690 = vrcp.f32 %v1870_v57  ;;  %v7509_v11 = vmul.f32 %v3206_v34, %v7327_v20  ;;  %v8056_v34 = vld [vmem:[#allocation55_spill] sm:$0xff] }
 0x65c   : > { %v7511_v5 = vmul.f32 %v4685_v28, %v2571_v63  ;;  %v2442_v26 = vmul.f32 %v7433_v13, %v2378_v2  ;;  %4692 = vpow2.f32 %v2823_v45  ;;  %v3081_v50 = vsub.f32 0.0, %v2953_v32  ;;  %v8057_v63 = vld [vmem:[#allocation71_spill] sm:$0xff] }
 0x65d   : > { %v2189_v18 = vmul.f32 %v7491_v58, %v2125_v10  ;;  %v1808_v1 = vmul.f32 0.3275911, %v7500_v35  ;;  %v3286_v37 = vpack.c.bf16 %v8055_v59, %v8054_v33  ;;  %v7521_v15 = vmul.f32 %v3208_v30, %v7349_v46  ;;  %v8058_v23 = vld [vmem:[#allocation63_spill] sm:$0xff]  ;;  %v8059_v46 = vld [vmem:[#allocation68_spill] sm:$0xff] }
 0x65e   : > { %v7518_v48 = vpop.eup %4686  ;;  %v2316_v20 = vmul.f32 %v7460_v61, %v2252_v43  ;;  %4694 = vpow2.f32 %v2825_v56  ;;  %v2829_v40 = vmul.f32 1.442695, %v2703_v38  ;;  %v2638_v0 = vsub.f32 0.0, %v7485_v24  ;;  %v8060_v10 = vld [vmem:[#allocation39_spill] sm:$0xff]  ;;  %v8063_v33 = vld [vmem:[#allocation40_spill] sm:$0xff] }
 0x65f   : > { %v2253_v54 = vadd.f32 1.4214138, %v2189_v18  ;;  %v2063_v6 = vmul.f32 1.0614054, %v7518_v48  ;;  %v1872_v14 = vadd.f32 1.0, %v1808_v1  ;;  %3616 = vmatprep.mubr.bf16.mxu1 %v3286_v37  ;;  %v7844_v45 = vsub.f32 1.0, %v7511_v5 }
 0x660   : > { %v2506_v52 = vadd.f32 0.2548296, %v2442_v26  ;;  %v3288_v2 = vpack.c.bf16 %v8057_v63, %v8056_v34  ;;  %v3285_v57 = vpack.c.bf16 %v8059_v46, %v8058_v23  ;;  %v7531_v28 = vpop.eup %4688  ;;  %v7535_v56 = vsel %vm3017_vm8, %v2953_v32, %v3081_v50  ;;  %v8061_v26 = vld [vmem:[#allocation41_spill] sm:$0xff]  ;;  %v8062_v1 = vld [vmem:[#allocation34_spill] sm:$0xff]  ;;  %v8065_v50 = vld [vmem:[#allocation76_spill] sm:$0xff] }
 0x661   : > { %v2317_v30 = vmul.f32 %v7491_v58, %v2253_v54  ;;  %v2127_v43 = vadd.f32 -1.4531521, %v2063_v6  ;;  %4696 = vrcp.f32 %v1872_v14  ;;  %v2380_v38 = vadd.f32 -0.28449672, %v2316_v20  ;;  %v8064_v32 = vld [vmem:[#allocation37_spill] sm:$0xff]  ;;  %v8067_v14 = vld [vmem:[#allocation52_spill] sm:$0xff] }
 0x662   : > { %4698 = vpow2.f32 %v2829_v40  ;;  %3713 = vmatprep.mubr.bf16.mxu0 %v3288_v2  ;;  %3617 = vmatmul.mubr.bf16.gmra.mrb[36].mxu1 %v3285_v57  ;;  %v3287_v18 = vpack.c.bf16 %v8061_v26, %v8060_v10  ;;  %v3290_v59 = vpack.c.bf16 %v8063_v33, %v8062_v1  ;;  %v2702_v22 = vmul.f32 %v2638_v0, %v7485_v24  ;;  %v8066_v6 = vld [vmem:[#allocation73_spill] sm:$0xff]  ;;  %v8068_v2 = vld [vmem:[#allocation74_spill] sm:$0xff]  ;;  %v8069_v23 = vld [vmem:[#allocation75_spill] sm:$0xff] }
 0x663   : > { %v2381_v37 = vadd.f32 -0.28449672, %v2317_v30  ;;  %v2191_v34 = vmul.f32 %v7518_v48, %v2127_v43  ;;  %v3292_v54 = vpack.c.bf16 %v8065_v50, %v8064_v32  ;;  %v7548_v20 = vsub.f32 0.0, %v7844_v45  ;;  %v8070_v30 = vld [vmem:[#allocation80_spill] sm:$0xff]  ;;  %v8071_v10 = vld [vmem:[#allocation35_spill] sm:$0xff]  ;;  %v8074_v50 = vld [vmem:[#allocation57_spill] sm:$0xff] }
 0x664   : > { %v2570_v40 = vmul.f32 %v7433_v13, %v2506_v52  ;;  %3714 = vmatmul.mubr.bf16.gmra.mrb[52].mxu0 %v3287_v18  ;;  %3624 = vmatprep.mubr.bf16.mxu1 %v3290_v59  ;;  %v3289_v63 = vpack.c.bf16 %v8067_v14, %v8066_v6  ;;  %v3291_v46 = vpack.c.bf16 %v8069_v23, %v8068_v2  ;;  %v2640_v1 = vsub.f32 0.0, %v7500_v35  ;;  %v8072_v33 = vld [vmem:[#allocation56_spill] sm:$0xff]  ;;  %v8073_v59 = vld [vmem:[#allocation82_spill] sm:$0xff]  ;;  %v8076_v6 = vld [vmem:[#allocation43_spill] sm:$0xff] }
 0x665   : > { %v7555_v57 = vpop.eup %4690  ;;  %v2445_v24 = vmul.f32 %v7491_v58, %v2381_v37  ;;  %v2255_v0 = vadd.f32 1.4214138, %v2191_v34  ;;  %3721 = vmatprep.mubr.bf16.mxu0 %v3292_v54  ;;  %v3294_v43 = vpack.c.bf16 %v6867_v27, %v8070_v30  ;;  %v3296_v13 = vpack.c.bf16 %v6870_v12, %v8071_v10  ;;  %v8075_v54 = vld [vmem:[#allocation84_spill] sm:$0xff]  ;;  %v8078_v10 = vld [vmem:[#allocation38_spill] sm:$0xff] }
 0x666   : > { %v7562_v52 = vpop.eup %4692  ;;  %v2444_v26 = vmul.f32 %v7460_v61, %v2380_v38  ;;  %v2062_v18 = vmul.f32 1.0614054, %v7555_v57  ;;  %v3293_v32 = vpack.c.bf16 %v8073_v59, %v8072_v33  ;;  %v3295_v27 = vpack.c.bf16 %v6857_v21, %v8074_v50  ;;  %v8077_v38 = vld [vmem:[#allocation69_spill] sm:$0xff]  ;;  %v8079_v45 = vld [vmem:[#allocation72_spill] sm:$0xff]  ;;  %v8080_v59 = vld [vmem:[#allocation67_spill] sm:$0xff] }
 0x667   : > { %v2509_v37 = vadd.f32 0.2548296, %v2445_v24  ;;  %v2319_v34 = vmul.f32 %v7518_v48, %v2255_v0  ;;  %v3298_v12 = vpack.c.bf16 %v8076_v6, %v8075_v54  ;;  %v2827_v23 = vmul.f32 1.442695, %v2702_v22  ;;  %v8081_v0 = vld [vmem:[#allocation42_spill] sm:$0xff]  ;;  %v8083_v22 = vld [vmem:[#allocation81_spill] sm:$0xff] }
 0x668   : > { %v4695_v14 = vpop.eup %4694  ;;  %v2126_v2 = vadd.f32 -1.4531521, %v2062_v18  ;;  %v3300_v30 = vpack.c.bf16 %v7111_v51, %v8077_v38  ;;  %v2704_v18 = vmul.f32 %v2640_v1, %v7500_v35  ;;  %v3304_v51 = vpack.c.bf16 %v7362_v19, %v8083_v22  ;;  %v8084_v54 = vld [vmem:[#allocation44_spill] sm:$0xff] }
 0x669   : > { %v2573_v33 = vmul.f32 %v7491_v58, %v2509_v37  ;;  %v2383_v24 = vadd.f32 -0.28449672, %v2319_v34  ;;  %v2508_v58 = vadd.f32 0.2548296, %v2444_v26  ;;  %4700 = vpow2.f32 %v2827_v23 }
 0x66a   : > { %v2190_v50 = vmul.f32 %v7555_v57, %v2126_v2  ;;  %3625 = vmatmul.mubr.bf16.gmra.mrb[40].mxu1 %v3289_v63  ;;  %v2831_v1 = vmul.f32 1.442695, %v2704_v18  ;;  %vm3021_vm10 = vcmp.ge.f32.partialorder %v7414_v31, 0.0  ;;  %vm3023_vm11 = vcmp.ge.f32.partialorder %v7444_v44, 0.0 }
 0x66b   : > { %v7589_v38 = vpop.eup %4696  ;;  %v2893_v37 = vmul.f32 %v4695_v14, %v2573_v33  ;;  %v2447_v34 = vmul.f32 %v7518_v48, %v2383_v24  ;;  %3632 = vmatprep.mubr.bf16.mxu1 %v3294_v43  ;;  %v3308_v43 = vpack.c.bf16 %v7521_v15, %v7503_v39  ;;  %v8086_v14 = vld [vmem:[#allocation51_spill] sm:$0xff]  ;;  %v2890_v33 = vmul.f32 %v7531_v28, %v2570_v40 }
 0x66c   : > { %v4699_v2 = vpop.eup %4698  ;;  %v2254_v8 = vadd.f32 1.4214138, %v2190_v50  ;;  %v2064_v35 = vmul.f32 1.0614054, %v7589_v38  ;;  %3722 = vmatmul.mubr.bf16.gmra.mrb[56].mxu0 %v3291_v46  ;;  %vm3019_vm9 = vcmp.ge.f32.partialorder %v8086_v14, 0.0  ;;  %v3209_v50 = vadd.f32 1.0, %v7535_v56 }
 0x66d   : > { %v2957_v6 = vsub.f32 1.0, %v2893_v37  ;;  %v2511_v26 = vadd.f32 0.2548296, %v2447_v34  ;;  %3729 = vmatprep.mubr.bf16.mxu0 %v3296_v13  ;;  %v2572_v37 = vmul.f32 %v7460_v61, %v2508_v58  ;;  %v8087_v34 = vsub.f32 1.0, %v7511_v5 }
 0x66e   : > { %v2318_v24 = vmul.f32 %v7555_v57, %v2254_v8  ;;  %v2128_v46 = vadd.f32 -1.4531521, %v2064_v35  ;;  %v1613_v8 = vmul.f32 0.5, %v7396_v47  ;;  %v2954_v56 = vsub.f32 1.0, %v2890_v33 }
 0x66f   : > { %v3085_v21 = vsub.f32 0.0, %v2957_v6  ;;  %v2575_v63 = vmul.f32 %v7518_v48, %v2511_v26  ;;  %v3147_v28 = vsel %vm3019_vm9, %v8087_v34, %v7548_v20  ;;  %v7615_v61 = vmul.f32 %v3209_v50, %v7377_v49 }
 0x670   : > { %v2382_v13 = vadd.f32 -0.28449672, %v2318_v24  ;;  %v2192_v23 = vmul.f32 %v7589_v38, %v2128_v46  ;;  %4702 = vpow2.f32 %v2831_v1  ;;  %v2892_v58 = vmul.f32 %v7562_v52, %v2572_v37  ;;  %v8088_v52 = vld [vmem:[#allocation48_spill] sm:$0xff] }
 0x671   : > { %v3149_v40 = vsel %vm3021_vm10, %v2957_v6, %v3085_v21  ;;  %v2895_v35 = vmul.f32 %v4699_v2, %v2575_v63  ;;  %v3211_v21 = vadd.f32 1.0, %v3147_v28  ;;  %v1611_v1 = vmul.f32 0.5, %v8088_v52 }
 0x672   : > { %v3213_v14 = vadd.f32 1.0, %v3149_v40  ;;  %v2446_v48 = vmul.f32 %v7555_v57, %v2382_v13  ;;  %v2256_v18 = vadd.f32 1.4214138, %v2192_v23  ;;  %3633 = vmatmul.mubr.bf16.gmra.mrb[44].mxu1 %v3293_v32  ;;  %v3082_v32 = vsub.f32 0.0, %v2954_v56 }
 0x673   : > { %v2959_v31 = vsub.f32 1.0, %v2895_v35  ;;  %3640 = vmatprep.mubr.bf16.mxu1 %v3298_v12  ;;  %v4701_v63 = vpop.eup %4700  ;;  %v1615_v26 = vmul.f32 0.5, %v7438_v7  ;;  %v2956_v24 = vsub.f32 1.0, %v2892_v58  ;;  %v3275_v50 = vmul.f32 %v3211_v21, %v1611_v1 }
 0x674   : > { %v7618_v5 = vmul.f32 %v3213_v14, %v1613_v8  ;;  %v2510_v20 = vadd.f32 0.2548296, %v2446_v48  ;;  %v2320_v47 = vmul.f32 %v7589_v38, %v2256_v18  ;;  %3730 = vmatmul.mubr.bf16.gmra.mrb[60].mxu0 %v3295_v27  ;;  %vm3018_vm12 = vcmp.ge.f32.partialorder %v7354_v4, 0.0 }
 0x675   : > { %v3087_v6 = vsub.f32 0.0, %v2959_v31  ;;  %3737 = vmatprep.mubr.bf16.mxu0 %v3300_v30  ;;  %v3146_v30 = vsel %vm3018_vm12, %v2954_v56, %v3082_v32  ;;  %v8089_v23 = vpack.c.bf16 %v8079_v45, %v8078_v10  ;;  %v8090_v7 = vpack.c.bf16 %v7282_v29, %v8082_v62 }
 0x676   : > { %v2574_v49 = vmul.f32 %v7555_v57, %v2510_v20  ;;  %v2384_v2 = vadd.f32 -0.28449672, %v2320_v47  ;;  %v3309_v12 = vpack.c.bf16 %v7618_v5, %v7615_v61  ;;  %v3084_v34 = vsub.f32 0.0, %v2956_v24 }
 0x677   : > { %v3151_v33 = vsel %vm3023_vm11, %v2959_v31, %v3087_v6  ;;  %v8091_v40 = vpack.c.bf16 %v8081_v0, %v8080_v59  ;;  %v3210_v56 = vadd.f32 1.0, %v3146_v30  ;;  %vm3022_vm13 = vcmp.ge.f32.partialorder %v7475_v3, 0.0  ;;  %v8096_v31 = vld [vmem:[#allocation61_spill] sm:$0xff] }
 0x678   : > { %v3215_v27 = vadd.f32 1.0, %v3151_v33  ;;  %v2894_v46 = vmul.f32 %v4701_v63, %v2574_v49  ;;  %v2448_v44 = vmul.f32 %v7589_v38, %v2384_v2  ;;  %v1610_v62 = vmul.f32 0.5, %v7340_v9 }
 0x679   : > { %vm3020_vm14 = vcmp.ge.f32.partialorder %v7383_v60, 0.0  ;;  %v1614_v10 = vmul.f32 0.5, %v7458_v17  ;;  %v8092_v3 = vpack.c.bf16 %v7241_v36, %v8084_v54  ;;  %vm3024_vm15 = vcmp.ge.f32.partialorder %v7496_v53, 0.0 }
 0x67a   : > { %v3279_v57 = vmul.f32 %v3215_v27, %v1615_v26  ;;  %v2958_v37 = vsub.f32 1.0, %v2894_v46  ;;  %v2512_v13 = vadd.f32 0.2548296, %v2448_v44  ;;  %3641 = vmatmul.mubr.bf16.gmra.mrb[48].mxu1 %v8089_v23  ;;  %v4703_v35 = vpop.eup %4702  ;;  %v3148_v59 = vsel %vm3020_vm14, %v2956_v24, %v3084_v34  ;;  %v8102_v26 = vld [vmem:[#allocation17_spill] sm:$0xff]  ;;  %v8103_v27 = vld [vmem:[#allocation18_spill] sm:$0xff] }
 0x67b   : > { %3648 = vmatprep.mubr.bf16.mxu1 %v8090_v7  ;;  %v3274_v14 = vmul.f32 %v3210_v56, %v1610_v62  ;;  %v3212_v19 = vadd.f32 1.0, %v3148_v59  ;;  %v8093_v9 = vpack.c.bf16 %v7509_v11, %v7463_v25  ;;  %v8094_v17 = vpack.c.bf16 %v7266_v42, %v8085_v16  ;;  %v8098_v42 = vld [vmem:[#allocation78_spill] sm:$0xff]  ;;  %v8099_v16 = vld [vmem:[#allocation77_spill] sm:$0xff]  ;;  %v8105_v59 = vld [vmem:[#allocation20_spill] sm:$0xff] }
 0x67c   : > { %v3086_v28 = vsub.f32 0.0, %v2958_v37  ;;  %v2576_v8 = vmul.f32 %v7589_v38, %v2512_v13  ;;  %3738 = vmatmul.mubr.bf16.gmra.mrb[64].mxu0 %v8091_v40  ;;  %v3311_v4 = vpack.c.bf16 %v3279_v57, %v3275_v50  ;;  %v1616_v58 = vmul.f32 0.5, %v8096_v31 }
 0x67d   : > { %3745 = vmatprep.mubr.bf16.mxu0 %v3304_v51  ;;  %v8095_v51 = vld [vmem:[#allocation53_spill] sm:$0xff]  ;;  %v8097_v53 = vpack.c.bf16 %v7506_v55, %v7448_v41  ;;  %v8100_v25 = vpack.c.bf16 %v8098_v42, %v8099_v16  ;;  %v8107_v42 = vld [vmem:[#allocation22_spill] sm:$0xff] }
 0x67e   : > { %v3150_v45 = vsel %vm3022_vm13, %v2958_v37, %v3086_v28  ;;  %v2896_v29 = vmul.f32 %v4703_v35, %v2576_v8  ;;  %v1612_v61 = vmul.f32 0.5, %v8095_v51  ;;  %v7670_v41 = vld [vmem:[%s8101_s25] ss:$0 sm:$0xff] }
 0x67f   : > { %v3214_v38 = vadd.f32 1.0, %v3150_v45  ;;  %v8104_v45 = vld [vmem:[#allocation19_spill] sm:$0xff] }
 0x680   : > { %v2960_v0 = vsub.f32 1.0, %v2896_v29  ;;  %v3276_v36 = vmul.f32 %v3212_v19, %v1612_v61 }
 0x681   : > { %v3278_v48 = vmul.f32 %v3214_v38, %v1614_v10 }
 0x682   : > { %v3088_v18 = vsub.f32 0.0, %v2960_v0  ;;  %3649 = vmatmul.mubr.bf16.gmra.mrb[52].mxu1 %v8092_v3 }
 0x683   : > { %3656 = vmatprep.mubr.bf16.mxu1 %v8093_v9  ;;  %v3310_v60 = vpack.c.bf16 %v3278_v48, %v3274_v14 }
 0x684   : > { %v3152_v22 = vsel %vm3024_vm15, %v2960_v0, %v3088_v18  ;;  %3746 = vmatmul.mubr.bf16.gmra.mrb[68].mxu0 %v8094_v17 }
 0x685   : > { %v3216_v5 = vadd.f32 1.0, %v3152_v22 }
 0x687   : > { %v3280_v54 = vmul.f32 %v3216_v5, %v1616_v58  ;;  %v8106_v5 = vld [vmem:[#allocation21_spill] sm:$0xff] }
 0x689   : > { %v3312_v20 = vpack.c.bf16 %v3280_v54, %v3276_v36 }
 0x68a   : > { %3657 = vmatmul.mubr.bf16.gmra.mrb[56].mxu1 %v8097_v53 }
 0x68b   : > { %3664 = vmatprep.mubr.bf16.mxu1 %v3310_v60 }
 0x692   : > { %3665 = vmatmul.mubr.bf16.gmra.mrb[60].mxu1 %v3309_v12 }
 0x693   : > { %3753 = vmatprep.mubr.bf16.mxu1 %v3308_v43 }
 0x69a   : > { %3754 = vmatmul.mubr.bf16.vlgmr.msra.gmra.mrb[64].mxu1 %v8100_v25 }
 0x69b   : > { %3761 = vmatprep.mubr.bf16.mxu1 %v3312_v20 }
 0x6a2   : > { %3762 = vmatmul.mubr.bf16.gmra.mrb[68].mxu1 %v3311_v4 }
 0x700   : > { %v4050_v11 = vpop.f32.mrb[32].mxu1 }
 0x701   : > { %v4051_v47 = vpop.f32.mrb[33].mxu1 }
 0x702   : > { %v4052_v21 = vadd.f32 %v4051_v47, %v4050_v11  ;;  %v4053_v6 = vpop.f32.mrb[34].mxu1 }
 0x703   : > { %v4054_v32 = vpop.f32.mrb[35].mxu1 }
 0x704   : > { %v4055_v55 = vadd.f32 %v4054_v32, %v4053_v6  ;;  %v3611_v15 = vadd.f32 %v4052_v21, %v7670_v41 }
 0x706   : > { %v3614_v12 = vadd.f32 %v4055_v55, %v7670_v41 }
 0x707   : > { %v4114_v39 = vpop.f32.mrb[48].mxu0 }
 0x708   : > { %v4115_v43 = vpop.f32.mrb[49].mxu0 }
 0x709   : > { %v4116_v49 = vadd.f32 %v4115_v43, %v4114_v39  ;;  %v4117_v2 = vpop.f32.mrb[50].mxu0 }
 0x70a   : > { %v4118_v63 = vpop.f32.mrb[51].mxu0 }
 0x70b   : > { %v3708_v52 = vadd.f32 %v4116_v49, %v3611_v15  ;;  %v4119_v1 = vadd.f32 %v4118_v63, %v4117_v2  ;;  %v8108_v63 = vld [vmem:[#allocation23_spill] sm:$0xff] }
 0x70d   : > { %v3770_v33 = vadd.f32 %v3708_v52, %v8102_v26  ;;  %v3711_v24 = vadd.f32 %v4119_v1, %v3614_v12 }
 0x70f   : > { %3786 = vst [vmem:[%s7677_s16] sm:$0xff] %v3770_v33  ;;  %v3771_v46 = vadd.f32 %v3711_v24, %v8103_v27  ;;  %v8109_v24 = vld [vmem:[#allocation24_spill] sm:$0xff] }
 0x711   : > { %3787 = vst [vmem:[%s7677_s16 + $0x8] sm:$0xff] %v3771_v46 }
 0x735   : > { %v4056_v44 = vpop.f32.mrb[36].mxu1 }
 0x736   : > { %v4057_v50 = vpop.f32.mrb[37].mxu1 }
 0x737   : > { %v4120_v30 = vpop.f32.mrb[52].mxu0  ;;  %v4058_v57 = vadd.f32 %v4057_v50, %v4056_v44  ;;  %v4059_v37 = vpop.f32.mrb[38].mxu1 }
 0x738   : > { %v4121_v13 = vpop.f32.mrb[53].mxu0  ;;  %v4060_v23 = vpop.f32.mrb[39].mxu1 }
 0x739   : > { %v3619_v7 = vadd.f32 %v4058_v57, %v7670_v41  ;;  %v4122_v34 = vadd.f32 %v4121_v13, %v4120_v30  ;;  %v4123_v28 = vpop.f32.mrb[54].mxu0  ;;  %v4061_v8 = vadd.f32 %v4060_v23, %v4059_v37 }
 0x73a   : > { %v4124_v40 = vpop.f32.mrb[55].mxu0 }
 0x73b   : > { %v3716_v4 = vadd.f32 %v4122_v34, %v3619_v7  ;;  %v3622_v35 = vadd.f32 %v4061_v8, %v7670_v41  ;;  %v4125_v56 = vadd.f32 %v4124_v40, %v4123_v28 }
 0x73d   : > { %v3772_v29 = vadd.f32 %v3716_v4, %v8104_v45  ;;  %v3719_v62 = vadd.f32 %v4125_v56, %v3622_v35  ;;  %v4062_v10 = vpop.f32.mrb[40].mxu1  ;;  %v8110_v4 = vld [vmem:[#allocation25_spill] sm:$0xff] }
 0x73e   : > { %v4063_v38 = vpop.f32.mrb[41].mxu1 }
 0x73f   : > { %3788 = vst [vmem:[%s7677_s16 + $0x10] sm:$0xff] %v3772_v29  ;;  %v3773_v0 = vadd.f32 %v3719_v62, %v8105_v59  ;;  %v4126_v14 = vpop.f32.mrb[56].mxu0  ;;  %v4064_v48 = vadd.f32 %v4063_v38, %v4062_v10  ;;  %v4065_v18 = vpop.f32.mrb[42].mxu1  ;;  %v8111_v62 = vld [vmem:[#allocation26_spill] sm:$0xff] }
 0x740   : > { %v4127_v3 = vpop.f32.mrb[57].mxu0  ;;  %v4066_v19 = vpop.f32.mrb[43].mxu1 }
 0x741   : > { %3789 = vst [vmem:[%s7677_s16 + $0x18] sm:$0xff] %v3773_v0  ;;  %v3627_v9 = vadd.f32 %v4064_v48, %v7670_v41  ;;  %v4128_v60 = vadd.f32 %v4127_v3, %v4126_v14  ;;  %v4129_v22 = vpop.f32.mrb[58].mxu0  ;;  %v4067_v17 = vadd.f32 %v4066_v19, %v4065_v18 }
 0x742   : > { %v4130_v51 = vpop.f32.mrb[59].mxu0 }
 0x743   : > { %v3724_v61 = vadd.f32 %v4128_v60, %v3627_v9  ;;  %v3630_v31 = vadd.f32 %v4067_v17, %v7670_v41  ;;  %v4131_v58 = vadd.f32 %v4130_v51, %v4129_v22 }
 0x745   : > { %v3774_v36 = vadd.f32 %v3724_v61, %v8106_v5  ;;  %v3727_v54 = vadd.f32 %v4131_v58, %v3630_v31  ;;  %v4068_v20 = vpop.f32.mrb[44].mxu1  ;;  %v8112_v61 = vld [vmem:[#allocation27_spill] sm:$0xff] }
 0x746   : > { %v4069_v53 = vpop.f32.mrb[45].mxu1 }
 0x747   : > { %3790 = vst [vmem:[%s7677_s16 + $0x20] sm:$0xff] %v3774_v36  ;;  %v3775_v16 = vadd.f32 %v3727_v54, %v8107_v42  ;;  %v4132_v25 = vpop.f32.mrb[60].mxu0  ;;  %v4070_v11 = vadd.f32 %v4069_v53, %v4068_v20  ;;  %v4071_v47 = vpop.f32.mrb[46].mxu1  ;;  %v8113_v54 = vld [vmem:[#allocation28_spill] sm:$0xff] }
 0x748   : > { %v4133_v21 = vpop.f32.mrb[61].mxu0  ;;  %v4072_v6 = vpop.f32.mrb[47].mxu1 }
 0x749   : > { %3791 = vst [vmem:[%s7677_s16 + $0x28] sm:$0xff] %v3775_v16  ;;  %v3635_v32 = vadd.f32 %v4070_v11, %v7670_v41  ;;  %v4134_v55 = vadd.f32 %v4133_v21, %v4132_v25  ;;  %v4135_v39 = vpop.f32.mrb[62].mxu0  ;;  %v4073_v15 = vadd.f32 %v4072_v6, %v4071_v47 }
 0x74a   : > { %v4136_v43 = vpop.f32.mrb[63].mxu0 }
 0x74b   : > { %v3732_v49 = vadd.f32 %v4134_v55, %v3635_v32  ;;  %v3638_v2 = vadd.f32 %v4073_v15, %v7670_v41  ;;  %v4137_v12 = vadd.f32 %v4136_v43, %v4135_v39 }
 0x74d   : > { %v3776_v52 = vadd.f32 %v3732_v49, %v8108_v63  ;;  %v3735_v1 = vadd.f32 %v4137_v12, %v3638_v2  ;;  %v4074_v26 = vpop.f32.mrb[48].mxu1 }
 0x74e   : > { %v4075_v33 = vpop.f32.mrb[49].mxu1 }
 0x74f   : > { %3792 = vst [vmem:[%s7677_s16 + $0x30] sm:$0xff] %v3776_v52  ;;  %v3777_v27 = vadd.f32 %v3735_v1, %v8109_v24  ;;  %v4138_v46 = vpop.f32.mrb[64].mxu0  ;;  %v4076_v44 = vadd.f32 %v4075_v33, %v4074_v26  ;;  %v4077_v50 = vpop.f32.mrb[50].mxu1  ;;  %v8114_v26 = vld [vmem:[#allocation29_spill] sm:$0xff] }
 0x750   : > { %v4139_v30 = vpop.f32.mrb[65].mxu0  ;;  %v4078_v57 = vpop.f32.mrb[51].mxu1 }
 0x751   : > { %3793 = vst [vmem:[%s7677_s16 + $0x38] sm:$0xff] %v3777_v27  ;;  %v3643_v37 = vadd.f32 %v4076_v44, %v7670_v41  ;;  %v4140_v13 = vadd.f32 %v4139_v30, %v4138_v46  ;;  %v4141_v23 = vpop.f32.mrb[66].mxu0  ;;  %v4079_v7 = vadd.f32 %v4078_v57, %v4077_v50  ;;  %v8115_v27 = vld [vmem:[#allocation30_spill] sm:$0xff] }
 0x752   : > { %v4142_v34 = vpop.f32.mrb[67].mxu0 }
 0x753   : > { %v3740_v28 = vadd.f32 %v4140_v13, %v3643_v37  ;;  %v3646_v8 = vadd.f32 %v4079_v7, %v7670_v41  ;;  %v4143_v40 = vadd.f32 %v4142_v34, %v4141_v23 }
 0x755   : > { %v3778_v35 = vadd.f32 %v3740_v28, %v8110_v4  ;;  %v3743_v56 = vadd.f32 %v4143_v40, %v3646_v8  ;;  %v4080_v45 = vpop.f32.mrb[52].mxu1  ;;  %v8116_v28 = vld [vmem:[#allocation31_spill] sm:$0xff]  ;;  %v8118_v4 = vld [vmem:[#allocation32_spill] sm:$0xff] }
 0x756   : > { %v4081_v29 = vpop.f32.mrb[53].mxu1 }
 0x757   : > { %3794 = vst [vmem:[%s7677_s16 + $0x40] sm:$0xff] %v3778_v35  ;;  %v3779_v10 = vadd.f32 %v3743_v56, %v8111_v62  ;;  %v4144_v38 = vpop.f32.mrb[68].mxu0  ;;  %v4082_v59 = vadd.f32 %v4081_v29, %v4080_v45  ;;  %v4083_v0 = vpop.f32.mrb[54].mxu1 }
 0x758   : > { %v4145_v14 = vpop.f32.mrb[69].mxu0  ;;  %v4084_v48 = vpop.f32.mrb[55].mxu1 }
 0x759   : > { %3795 = vst [vmem:[%s7677_s16 + $0x48] sm:$0xff] %v3779_v10  ;;  %v3651_v18 = vadd.f32 %v4082_v59, %v7670_v41  ;;  %v4146_v3 = vadd.f32 %v4145_v14, %v4144_v38  ;;  %v4147_v19 = vpop.f32.mrb[70].mxu0  ;;  %v4085_v9 = vadd.f32 %v4084_v48, %v4083_v0 }
 0x75a   : > { %v4148_v60 = vpop.f32.mrb[71].mxu0 }
 0x75b   : > { %v3748_v22 = vadd.f32 %v4146_v3, %v3651_v18  ;;  %v3654_v17 = vadd.f32 %v4085_v9, %v7670_v41  ;;  %v4149_v51 = vadd.f32 %v4148_v60, %v4147_v19 }
 0x75d   : > { %v3780_v31 = vadd.f32 %v3748_v22, %v8112_v61  ;;  %v3751_v58 = vadd.f32 %v4149_v51, %v3654_v17  ;;  %v4086_v5 = vpop.f32.mrb[56].mxu1 }
 0x75e   : > { %v4087_v36 = vpop.f32.mrb[57].mxu1 }
 0x75f   : > { %3796 = vst [vmem:[%s7677_s16 + $0x50] sm:$0xff] %v3780_v31  ;;  %v3781_v20 = vadd.f32 %v3751_v58, %v8113_v54  ;;  %v4088_v53 = vadd.f32 %v4087_v36, %v4086_v5  ;;  %v4089_v42 = vpop.f32.mrb[58].mxu1 }
 0x760   : > { %v4090_v16 = vpop.f32.mrb[59].mxu1 }
 0x761   : > { %3797 = vst [vmem:[%s7677_s16 + $0x58] sm:$0xff] %v3781_v20  ;;  %v4091_v25 = vadd.f32 %v4090_v16, %v4089_v42  ;;  %v3659_v43 = vadd.f32 %v4088_v53, %v7670_v41 }
 0x763   : > { %v3662_v63 = vadd.f32 %v4091_v25, %v7670_v41 }
 0x765   : > { %v4092_v11 = vpop.f32.mrb[60].mxu1 }
 0x766   : > { %v4093_v47 = vpop.f32.mrb[61].mxu1 }
 0x767   : > { %v4094_v21 = vadd.f32 %v4093_v47, %v4092_v11  ;;  %v4095_v6 = vpop.f32.mrb[62].mxu1 }
 0x768   : > { %v4096_v32 = vpop.f32.mrb[63].mxu1 }
 0x769   : > { %v4097_v55 = vadd.f32 %v4096_v32, %v4095_v6  ;;  %v3667_v30 = vadd.f32 %v4094_v21, %v7670_v41 }
 0x76b   : > { %v3670_v23 = vadd.f32 %v4097_v55, %v7670_v41 }
 0x76d   : > { %v4150_v39 = vpop.f32.mrb[64].mxu1 }
 0x76e   : > { %v4151_v15 = vpop.f32.mrb[65].mxu1 }
 0x76f   : > { %v4152_v49 = vadd.f32 %v4151_v15, %v4150_v39  ;;  %v4153_v2 = vpop.f32.mrb[66].mxu1 }
 0x770   : > { %v4154_v12 = vpop.f32.mrb[67].mxu1 }
 0x771   : > { %v3756_v52 = vadd.f32 %v4152_v49, %v3659_v43  ;;  %v4155_v1 = vadd.f32 %v4154_v12, %v4153_v2 }
 0x773   : > { %v3782_v33 = vadd.f32 %v3756_v52, %v8114_v26  ;;  %v3759_v24 = vadd.f32 %v4155_v1, %v3662_v63 }
 0x775   : > { %3798 = vst [vmem:[%s7677_s16 + $0x60] sm:$0xff] %v3782_v33  ;;  %v3783_v46 = vadd.f32 %v3759_v24, %v8115_v27  ;;  %v4156_v44 = vpop.f32.mrb[68].mxu1 }
 0x776   : > { %v4157_v50 = vpop.f32.mrb[69].mxu1 }
 0x777   : > { %3799 = vst [vmem:[%s7677_s16 + $0x68] sm:$0xff] %v3783_v46  ;;  %v4158_v57 = vadd.f32 %v4157_v50, %v4156_v44  ;;  %v4159_v37 = vpop.f32.mrb[70].mxu1 }
 0x778   : > { %v4160_v13 = vpop.f32.mrb[71].mxu1 }
 0x779   : > { %v3764_v7 = vadd.f32 %v4158_v57, %v3667_v30  ;;  %v4161_v34 = vadd.f32 %v4160_v13, %v4159_v37 }
 0x77b   : > { %v3784_v8 = vadd.f32 %v3764_v7, %v8116_v28  ;;  %v3767_v40 = vadd.f32 %v4161_v34, %v3670_v23 }
 0x77d   : > { %3800 = vst [vmem:[%s7677_s16 + $0x70] sm:$0xff] %v3784_v8  ;;  %v3785_v41 = vadd.f32 %v3767_v40, %v8118_v4 }
 0x77f   : > { %3801 = vst [vmem:[%s7677_s16 + $0x78] sm:$0xff] %v3785_v41 }
 0x780   : > { %4847 = shalt.err (!%p4844_p4)
}
 0x781   : > { %s4848_s24 = scalar_lea.hbm %s7726_s29, 2048  ;;  %s4852_s25 = scalar_lea.hbm %s8117_s11, 4096 }
 0x782   : > { %p4849_p9 = scmp.ne.s32.totalorder %s7726_s29, %s4848_s24  ;;  %p4853_p8 = scmp.lt.u32.totalorder %s7726_s29, %s8117_s11 }
 0x783   : > { %p4854_p13 = scmp.lt.u32.totalorder %s4852_s25, %s4848_s24  ;;  %p4856_p10 = scmp.lt.u32.totalorder %s4848_s24, %s7726_s29 }
 0x784   : > { %p4850_p0 = pnand %p4849_p9, %p5132_p5 }
 0x785   : > { %p4855_p6 = por %p4854_p13, %p4853_p8 }
 0x786   : > { %p4851_p11 = pneg %p4850_p0 }
 0x787   : > { %p4857_p3 = por %p4856_p10, %p4855_p6 }
 0x789   : > { %p4858_p7 = pnand %p4857_p3, %p4851_p11 }
 0x78b   : > { %4861 = shalt.err (!%p4858_p7)
}
 0x78c   : > { %s4922_s13 = smov 128   ;;  %s4923_s14 = smov 8  }
 0x78d   : > { %4224 = dma.vmem_to_hbm [thread:$0]  (%p5132_p5), %s7728_s30, 2048, %s7726_s29, %s3803_s12, %s4922_s13, %s4922_s13, %s4923_s14  }
 0x78e PF: > { %s8119_s21 = sld [smem:[#allocation15_spill]]  ;;  %s8120_s27 = sld [smem:[#allocation16_spill]] }
 0x78f   : > { %p8122_p1 = scmp.ge.s32.totalorder %s4908_s20, 2 }
 0x794   : > { %s3831_s3 = sand.u32 1, %s8119_s21   ;;  %p8121_p12 = scmp.ne.s32.totalorder %s8120_s27, 0 }
 0x795   : > { %s3832_s8 = scalar_lea.sflag [#allocation4], %s3831_s3 }
 0x796   : > { %p4241_p2 = pnand %p8122_p1, %p8121_p12 }
 0x798   : > { %4891 = dma.done.wait (!%p4241_p2), %s3832_s8, 2048  }
 0x799   : > { %4893 = vsyncadd (!%p4241_p2), %s3832_s8, 4294965248  ;;  %s8123_s24 = smov %s5128_s17  ;;  %p26_p4 = scmp.ge.s32.totalorder %s5097_s26, 4  }
 0x79a   : > { %s8124_s17 = smov %s4900_s18  ;;  %s8125_s18 = smov %s4904_s19 }
 0x79b   : > { %s8126_s19 = smov %s8123_s24  ;;  %s8127_s20 = smov %s5097_s26 }
 0x79c   :  { %28 = sbr.rel (!%p26_p4) target bundleno = 12 (0xc), region = 121 }
 0x7a3   :  { %3837 = vsyncpa [#allocation3], 1 }
 0x7a4   :  { %3839 = vsyncpa [#allocation3 + $0x1], 1 }
 0x7a5   :  { %3840 = vsyncpa [#allocation6], 1 }
 0x7a6   :  { %3841 = vsyncpa [#allocation9], 1 }
 0x7a7   :  { %3842 = vsyncpa [#allocation4], 1 }
 0x7a8   :  { %3844 = vsyncpa [#allocation4 + $0x1], 1 }

</bundles_post_ra>
